<compile_context>
chip_gen: v7x
topology: tpu7x:2x2x1
jax: 0.10.0
libtpu: 0.0.40
codegen_flags: <defaults>
</compile_context>

<pallas_src>
import functools
import jax
import jax.numpy as jnp
from jax.experimental import pallas as pl
from jax.experimental.pallas import tpu as pltpu

FDIM = 8          # feature_dim (64 in the original module; kept small for the demo)
IN_CH = 3
OUT_CH = 3
EPS = 1e-5


def _round_up(x, m):
    return ((x + m - 1) // m) * m


def _pick_tile(p, target=512):
    """Largest tile <= target that divides p (multiple of 8), else p itself."""
    if p <= target:
        return p
    for t in range(target, 7, -8):
        if p % t == 0:
            return t
    return p


# ------------------------------------------------------------------ Pallas kernels

def matmul_bias_act(a, w, bias, act="none", out_dtype=jnp.bfloat16, compute_stats=False):
    """(M,K) @ (K,Cout) + bias, optional relu/sigmoid epilogue.

    Output columns are zero-padded to a multiple of 128 inside the kernel so stores are
    lane-dense; the result is sliced back to Cout. With compute_stats=True the kernel also
    emits per-column sum and sum-of-squares of the (pre-activation) output, accumulated
    across M tiles (reduction axis marked 'arbitrary').
    """
    M, K = a.shape
    cout = w.shape[1]
    npad = _round_up(cout, 128)

    a = a.astype(jnp.bfloat16)
    w_p = jnp.pad(w, ((0, 0), (0, npad - cout))).astype(jnp.bfloat16)
    b_p = jnp.pad(bias.astype(jnp.float32), (0, npad - cout)).reshape(1, npad)

    # M tiling: large tiles amortize per-grid-step overhead; at the demo sizes M is
    # already a multiple of 8 and <= 512 so no padding actually happens.
    if M > 512:
        TM = 512
        M_pad = _round_up(M, TM)
    else:
        M_pad = _round_up(M, 8)
        TM = M_pad
    if M_pad > M:
        a = jnp.pad(a, ((0, M_pad - M), (0, 0)))
    ntiles = M_pad // TM

    in_specs = [
        pl.BlockSpec((TM, K), lambda i: (i, 0)),
        pl.BlockSpec((K, npad), lambda i: (0, 0)),
        pl.BlockSpec((1, npad), lambda i: (0, 0)),
    ]

    if compute_stats:
        assert act == "none"

        def kernel(a_ref, w_ref, b_ref, o_ref, s_ref, q_ref):
            acc = jnp.dot(a_ref[...], w_ref[...], preferred_element_type=jnp.float32)
            acc = acc + b_ref[...]
            o_ref[...] = acc.astype(o_ref.dtype)

            @pl.when(pl.program_id(0) == 0)
            def _():
                s_ref[...] = jnp.zeros_like(s_ref)
                q_ref[...] = jnp.zeros_like(q_ref)

            s_ref[...] += jnp.sum(acc, axis=0, keepdims=True)
            q_ref[...] += jnp.sum(acc * acc, axis=0, keepdims=True)

        y, s, q = pl.pallas_call(
            kernel,
            out_shape=(
                jax.ShapeDtypeStruct((M_pad, npad), out_dtype),
                jax.ShapeDtypeStruct((1, npad), jnp.float32),
                jax.ShapeDtypeStruct((1, npad), jnp.float32),
            ),
            grid=(ntiles,),
            in_specs=in_specs,
            out_specs=(
                pl.BlockSpec((TM, npad), lambda i: (i, 0)),
                pl.BlockSpec((1, npad), lambda i: (0, 0)),   # accumulator, resident
                pl.BlockSpec((1, npad), lambda i: (0, 0)),   # accumulator, resident
            ),
            compiler_params=pltpu.CompilerParams(dimension_semantics=("arbitrary",)),
        )(a, w_p, b_p)

        ssum = s[0]
        ssq = q[0]
        pad_rows = M_pad - M
        if pad_rows:
            # Padded A rows are zero => their outputs equal the bias exactly; remove them.
            bp = b_p[0]
            ssum = ssum - pad_rows * bp
            ssq = ssq - pad_rows * bp * bp
        return y[:M, :cout], ssum[:cout], ssq[:cout]

    def kernel(a_ref, w_ref, b_ref, o_ref):
        acc = jnp.dot(a_ref[...], w_ref[...], preferred_element_type=jnp.float32)
        acc = acc + b_ref[...]
        if act == "relu":
            acc = jnp.maximum(acc, 0.0)
        elif act == "sigmoid":
            acc = jax.nn.sigmoid(acc)
        o_ref[...] = acc.astype(o_ref.dtype)

    y = pl.pallas_call(
        kernel,
        out_shape=jax.ShapeDtypeStruct((M_pad, npad), out_dtype),
        grid=(ntiles,),
        in_specs=in_specs,
        out_specs=pl.BlockSpec((TM, npad), lambda i: (i, 0)),
        compiler_params=pltpu.CompilerParams(dimension_semantics=("parallel",)),
    )(a, w_p, b_p)
    return y[:M, :cout]


def moments(x3):
    """x3: (N, P, C) -> (sum, sumsq), each (N, 1, C) f32. Single-pass, P tiled ('arbitrary')."""
    n, p, c = x3.shape
    tp = _pick_tile(p)

    def kernel(x_ref, s_ref, q_ref):
        @pl.when(pl.program_id(1) == 0)
        def _():
            s_ref[...] = jnp.zeros_like(s_ref)
            q_ref[...] = jnp.zeros_like(q_ref)
        x = x_ref[...].astype(jnp.float32)
        s_ref[...] += jnp.sum(x, axis=1, keepdims=True)
        q_ref[...] += jnp.sum(x * x, axis=1, keepdims=True)

    s, q = pl.pallas_call(
        kernel,
        out_shape=(
            jax.ShapeDtypeStruct((n, 1, c), jnp.float32),
            jax.ShapeDtypeStruct((n, 1, c), jnp.float32),
        ),
        grid=(n, p // tp),
        in_specs=[pl.BlockSpec((1, tp, c), lambda i, j: (i, j, 0))],
        out_specs=(
            pl.BlockSpec((1, 1, c), lambda i, j: (i, 0, 0)),
            pl.BlockSpec((1, 1, c), lambda i, j: (i, 0, 0)),
        ),
        compiler_params=pltpu.CompilerParams(dimension_semantics=("parallel", "arbitrary")),
    )(x3)
    return s, q


def affine_act(x3, scale, shift, act="none", out_dtype=jnp.bfloat16):
    """out = act(x * scale + shift). x3: (N, P, C); scale/shift: (N, 1, C) f32."""
    n, p, c = x3.shape
    tp = _pick_tile(p)

    def kernel(x_ref, sc_ref, sh_ref, o_ref):
        y = x_ref[...].astype(jnp.float32) * sc_ref[...] + sh_ref[...]
        if act == "relu":
            y = jnp.maximum(y, 0.0)
        o_ref[...] = y.astype(o_ref.dtype)

    out = pl.pallas_call(
        kernel,
        out_shape=jax.ShapeDtypeStruct((n, p, c), out_dtype),
        grid=(n, p // tp),
        in_specs=[
            pl.BlockSpec((1, tp, c), lambda i, j: (i, j, 0)),
            pl.BlockSpec((1, 1, c), lambda i, j: (i, 0, 0)),
            pl.BlockSpec((1, 1, c), lambda i, j: (i, 0, 0)),
        ],
        out_specs=pl.BlockSpec((1, tp, c), lambda i, j: (i, j, 0)),
        compiler_params=pltpu.CompilerParams(dimension_semantics=("parallel", "parallel")),
    )(x3, scale.astype(jnp.float32), shift.astype(jnp.float32))
    return out


# ------------------------------------------------------------------ layers built on the kernels

def im2col3x3(x):
    """x: (N,H,W,C) bf16 -> (N*H*W, 9*C) bf16, patch order (kh, kw, c). XLA glue.
    TODO(synk): fuse patch extraction into the GEMM kernel (shifted-tap accumulation)."""
    n, h, w, c = x.shape
    xp = jnp.pad(x, ((0, 0), (1, 1), (1, 1), (0, 0)))
    patches = [xp[:, dh:dh + h, dw:dw + w, :] for dh in range(3) for dw in range(3)]
    p = jnp.stack(patches, axis=3)                        # (N,H,W,9,C)
    return p.reshape(n * h * w, 9 * c)


def conv_bn_relu(x, w_hwio, b, gamma, beta):
    """3x3 same conv + training-mode BatchNorm (batch stats, biased var) + ReLU.
    BN statistics are fused into the conv GEMM epilogue."""
    n, h, wd, cin = x.shape
    cout = w_hwio.shape[-1]
    m = n * h * wd
    a = im2col3x3(x)
    y, ssum, ssq = matmul_bias_act(a, w_hwio.reshape(9 * cin, cout), b,
                                   act="none", out_dtype=jnp.bfloat16, compute_stats=True)
    mean = ssum / m
    var = jnp.maximum(ssq / m - mean * mean, 0.0)         # biased var (BN training mode)
    scale = gamma / jnp.sqrt(var + EPS)
    shift = beta - mean * scale
    y = affine_act(y.reshape(1, m, cout), scale.reshape(1, 1, cout), shift.reshape(1, 1, cout),
                   act="relu", out_dtype=jnp.bfloat16)
    return y.reshape(n, h, wd, cout)


def conv_block(x, p):
    x = conv_bn_relu(x, p["w1"], p["b1"], p["g1"], p["be1"])
    x = conv_bn_relu(x, p["w2"], p["b2"], p["g2"], p["be2"])
    return x


def maxpool2x2(x):
    n, h, w, c = x.shape
    return x.reshape(n, h // 2, 2, w // 2, 2, c).max(axis=(2, 4))


def conv_transpose2x2(x, w, b):
    """ConvTranspose2d(k=2, s=2) as Pallas GEMM + depth-to-space.
    Weight layout (Cin, 2, 2, Cout) (PyTorch stores (Cin, Cout, kH, kW) - permute on import)."""
    n, h, wd, cin = x.shape
    cout = w.shape[-1]
    wm = w.reshape(cin, 4 * cout)
    bm = jnp.tile(b, 4)                                   # matches (dh, dw, cout) column order
    y = matmul_bias_act(x.reshape(n * h * wd, cin), wm, bm, act="none", out_dtype=jnp.bfloat16)
    y = y.reshape(n, h, wd, 2, 2, cout)
    # TODO(synk): fuse the depth-to-space interleave into the GEMM output index_map.
    y = jnp.transpose(y, (0, 1, 3, 2, 4, 5))
    return y.reshape(n, 2 * h, 2 * wd, cout)


def style_stats(x):
    """Per-(n,c) mean / unbiased std over H,W (torch.std semantics). Returns (N,1,C) each."""
    n, h, w, c = x.shape
    p = h * w
    s, q = moments(x.reshape(n, p, c))
    mean = s / p
    var = jnp.maximum((q - s * s / p) / max(p - 1, 1), 0.0)
    return mean, jnp.sqrt(var)


def adain_nhwc(content, style_mean, style_std):
    """AdaIN matching the PyTorch module: (x - mean) / (unbiased_std + eps) * ss + sm."""
    n, h, w, c = content.shape
    p = h * w
    x3 = content.reshape(n, p, c)
    s, q = moments(x3)
    c_mean = s / p
    c_var = jnp.maximum((q - s * s / p) / max(p - 1, 1), 0.0)
    c_std = jnp.sqrt(c_var)
    scale = style_std / (c_std + EPS)
    shift = style_mean - c_mean * scale
    y = affine_act(x3, scale, shift, act="none", out_dtype=jnp.bfloat16)
    return y.reshape(n, h, w, c)


# ------------------------------------------------------------------ parameters

def _conv_block_params(key, cin, cout):
    ks = jax.random.split(key, 8)
    return dict(
        w1=0.1 * jax.random.normal(ks[0], (3, 3, cin, cout), jnp.float32),
        b1=0.01 * jax.random.normal(ks[1], (cout,), jnp.float32),
        g1=1.0 + 0.1 * jax.random.normal(ks[2], (cout,), jnp.float32),
        be1=0.1 * jax.random.normal(ks[3], (cout,), jnp.float32),
        w2=0.1 * jax.random.normal(ks[4], (3, 3, cout, cout), jnp.float32),
        b2=0.01 * jax.random.normal(ks[5], (cout,), jnp.float32),
        g2=1.0 + 0.1 * jax.random.normal(ks[6], (cout,), jnp.float32),
        be2=0.1 * jax.random.normal(ks[7], (cout,), jnp.float32),
    )


def init_params(key, in_ch=IN_CH, out_ch=OUT_CH, fdim=FDIM):
    keys = jax.random.split(key, 20)
    p = {}
    # style encoder
    p["s_enc1"] = _conv_block_params(keys[0], in_ch, fdim)
    p["s_enc2"] = _conv_block_params(keys[1], fdim, fdim * 2)
    p["s_enc3"] = _conv_block_params(keys[2], fdim * 2, fdim * 4)
    # content encoder
    p["c_enc1"] = _conv_block_params(keys[3], in_ch, fdim)
    p["c_enc2"] = _conv_block_params(keys[4], fdim, fdim * 2)
    p["c_enc3"] = _conv_block_params(keys[5], fdim * 2, fdim * 4)
    p["c_enc4"] = _conv_block_params(keys[6], fdim * 4, fdim * 8)
    # decoder
    p["up4_w"] = 0.1 * jax.random.normal(keys[7], (fdim * 8, 2, 2, fdim * 4), jnp.float32)
    p["up4_b"] = 0.01 * jax.random.normal(keys[8], (fdim * 4,), jnp.float32)
    p["dec4"] = _conv_block_params(keys[9], fdim * 8, fdim * 4)
    p["up3_w"] = 0.1 * jax.random.normal(keys[10], (fdim * 4, 2, 2, fdim * 2), jnp.float32)
    p["up3_b"] = 0.01 * jax.random.normal(keys[11], (fdim * 2,), jnp.float32)
    p["dec3"] = _conv_block_params(keys[12], fdim * 4, fdim * 2)
    p["up2_w"] = 0.1 * jax.random.normal(keys[13], (fdim * 2, 2, 2, fdim), jnp.float32)
    p["up2_b"] = 0.01 * jax.random.normal(keys[14], (fdim,), jnp.float32)
    p["dec2"] = _conv_block_params(keys[15], fdim * 2, fdim)
    p["final_w"] = 0.1 * jax.random.normal(keys[16], (fdim, out_ch), jnp.float32)
    p["final_b"] = 0.01 * jax.random.normal(keys[17], (out_ch,), jnp.float32)
    return p


# ------------------------------------------------------------------ full forward

def blur_generator_forward(params, clear_img, blur_img):
    """clear_img, blur_img: NCHW. Returns NCHW sigmoid output (float32)."""
    clear = jnp.transpose(clear_img, (0, 2, 3, 1)).astype(jnp.bfloat16)
    blur = jnp.transpose(blur_img, (0, 2, 3, 1)).astype(jnp.bfloat16)

    # style encoder
    s1 = conv_block(blur, params["s_enc1"])
    s2 = conv_block(maxpool2x2(s1), params["s_enc2"])
    s3 = conv_block(maxpool2x2(s2), params["s_enc3"])
    sm1, ss1 = style_stats(s1)
    sm2, ss2 = style_stats(s2)
    sm3, ss3 = style_stats(s3)

    # content encoder
    e1 = conv_block(clear, params["c_enc1"])
    e2 = conv_block(maxpool2x2(e1), params["c_enc2"])
    e3 = conv_block(maxpool2x2(e2), params["c_enc3"])
    e4 = conv_block(maxpool2x2(e3), params["c_enc4"])

    # decoder with AdaIN style injection + skip concat
    d4_up = conv_transpose2x2(e4, params["up4_w"], params["up4_b"])
    d4 = jnp.concatenate([adain_nhwc(d4_up, sm3, ss3), e3], axis=-1)
    d4 = conv_block(d4, params["dec4"])

    d3_up = conv_transpose2x2(d4, params["up3_w"], params["up3_b"])
    d3 = jnp.concatenate([adain_nhwc(d3_up, sm2, ss2), e2], axis=-1)
    d3 = conv_block(d3, params["dec3"])

    d2_up = conv_transpose2x2(d3, params["up2_w"], params["up2_b"])
    d2 = jnp.concatenate([adain_nhwc(d2_up, sm1, ss1), e1], axis=-1)
    d2 = conv_block(d2, params["dec2"])

    # final 1x1 conv + sigmoid (fused into the GEMM kernel), f32 output
    n, h, w, c = d2.shape
    out = matmul_bias_act(d2.reshape(n * h * w, c),
                          params["final_w"], params["final_b"],
                          act="sigmoid", out_dtype=jnp.float32)
    out = out.reshape(n, h, w, -1)
    return jnp.transpose(out, (0, 3, 1, 2))


if __name__ == "__main__":
    key = jax.random.PRNGKey(0)
    kp, kc, kb = jax.random.split(key, 3)
    params = init_params(kp)

    B, H, W = 2, 16, 16
    clear_img = jax.random.normal(kc, (B, IN_CH, H, W), jnp.float32)
    blur_img = jax.random.normal(kb, (B, IN_CH, H, W), jnp.float32)

    fwd = jax.jit(blur_generator_forward)
    out = fwd(params, clear_img, blur_img)
    out = jax.block_until_ready(out)

    assert out.shape == (B, OUT_CH, H, W), out.shape
    assert bool(jnp.all(jnp.isfinite(out)))
    assert bool(jnp.all((out >= 0.0) & (out <= 1.0)))  # sigmoid range
    print("KERNEL_OK")
</pallas_src>

<mosaic_0001>
module attributes {stable_mosaic.version = 11 : i64} {
  func.func @kernel(%arg0: i32, %arg1: memref<512x27xbf16, #tpu.memory_space<vmem>>, %arg2: memref<27x128xbf16, #tpu.memory_space<vmem>>, %arg3: memref<1x128xf32, #tpu.memory_space<vmem>>, %arg4: memref<512x128xbf16, #tpu.memory_space<vmem>>, %arg5: memref<1x128xf32, #tpu.memory_space<vmem>>, %arg6: memref<1x128xf32, #tpu.memory_space<vmem>>) attributes {dimension_semantics = [#tpu.dimension_semantics<arbitrary>], iteration_bounds = array<i64: 1>, scalar_prefetch = 0 : i64, scratch_operands = 0 : i64, tpu.core_type = #tpu.core_type<tc>, window_params = [{transform_indices = @transform_0, window_bounds = array<i64: 512, 27>}, {pipeline_mode = #tpu.pipeline_mode<synchronous>, transform_indices = @transform_1, window_bounds = array<i64: 27, 128>}, {pipeline_mode = #tpu.pipeline_mode<synchronous>, transform_indices = @transform_2, window_bounds = array<i64: 1, 128>}, {transform_indices = @transform_3, window_bounds = array<i64: 512, 128>}, {pipeline_mode = #tpu.pipeline_mode<synchronous>, transform_indices = @transform_4, window_bounds = array<i64: 1, 128>}, {pipeline_mode = #tpu.pipeline_mode<synchronous>, transform_indices = @transform_5, window_bounds = array<i64: 1, 128>}]} {
    %c0 = arith.constant 0 : index
    %c0_0 = arith.constant 0 : index
    %0 = vector.load %arg1[%c0, %c0_0] : memref<512x27xbf16, #tpu.memory_space<vmem>>, vector<512x27xbf16>
    %c0_1 = arith.constant 0 : index
    %c0_2 = arith.constant 0 : index
    %1 = vector.load %arg2[%c0_1, %c0_2] : memref<27x128xbf16, #tpu.memory_space<vmem>>, vector<27x128xbf16>
    %cst = arith.constant dense<0.000000e+00> : vector<512x128xf32>
    %2 = tpu.matmul %0, %1, %cst {dimension_numbers = #tpu.dot_dimension_numbers<[1], [0], [0], [1], [0, 0, 1, 1], [], []>} : vector<512x27xbf16>, vector<27x128xbf16>, vector<512x128xf32> -> vector<512x128xf32>
    %c0_3 = arith.constant 0 : index
    %c0_4 = arith.constant 0 : index
    %3 = vector.load %arg3[%c0_3, %c0_4] : memref<1x128xf32, #tpu.memory_space<vmem>>, vector<1x128xf32>
    %4 = vector.broadcast %3 : vector<1x128xf32> to vector<512x128xf32>
    %5 = arith.addf %2, %4 : vector<512x128xf32>
    %6 = arith.truncf %5 : vector<512x128xf32> to vector<512x128xbf16>
    %c0_5 = arith.constant 0 : index
    %c0_6 = arith.constant 0 : index
    %7 = vector.load %arg4[%c0_5, %c0_6] : memref<512x128xbf16, #tpu.memory_space<vmem>>, vector<512x128xbf16>
    tpu.vector_store %arg4[%c0_5, %c0_6], %6 {strides = array<i32>} : memref<512x128xbf16, #tpu.memory_space<vmem>>, vector<512x128xbf16>,
    %c0_i32 = arith.constant 0 : i32
    %8 = arith.cmpi eq, %arg0, %c0_i32 : i32
    %9 = arith.extui %8 : i1 to i32
    %c0_i32_7 = arith.constant 0 : i32
    %10 = arith.cmpi ne, %9, %c0_i32_7 : i32
    scf.if %10 {
      %cst_18 = arith.constant 0.000000e+00 : f32
      %22 = vector.broadcast %cst_18 : f32 to vector<1x128xf32>
      %c0_19 = arith.constant 0 : index
      %c0_20 = arith.constant 0 : index
      %23 = vector.load %arg5[%c0_19, %c0_20] : memref<1x128xf32, #tpu.memory_space<vmem>>, vector<1x128xf32>
      tpu.vector_store %arg5[%c0_19, %c0_20], %22 {strides = array<i32>} : memref<1x128xf32, #tpu.memory_space<vmem>>, vector<1x128xf32>,
      %cst_21 = arith.constant 0.000000e+00 : f32
      %24 = vector.broadcast %cst_21 : f32 to vector<1x128xf32>
      %c0_22 = arith.constant 0 : index
      %c0_23 = arith.constant 0 : index
      %25 = vector.load %arg6[%c0_22, %c0_23] : memref<1x128xf32, #tpu.memory_space<vmem>>, vector<1x128xf32>
      tpu.vector_store %arg6[%c0_22, %c0_23], %24 {strides = array<i32>} : memref<1x128xf32, #tpu.memory_space<vmem>>, vector<1x128xf32>,
    } else {
    }
    %c0_8 = arith.constant 0 : index
    %c0_9 = arith.constant 0 : index
    %11 = vector.load %arg5[%c0_8, %c0_9] : memref<1x128xf32, #tpu.memory_space<vmem>>, vector<1x128xf32>
    %cst_10 = arith.constant dense<0.000000e+00> : vector<128xf32>
    %12 = vector.multi_reduction <add>, %5, %cst_10 [0] : vector<512x128xf32> to vector<128xf32>
    %13 = vector.shape_cast %12 : vector<128xf32> to vector<1x128xf32>
    %14 = arith.addf %11, %13 : vector<1x128xf32>
    %c0_11 = arith.constant 0 : index
    %c0_12 = arith.constant 0 : index
    %15 = vector.load %arg5[%c0_11, %c0_12] : memref<1x128xf32, #tpu.memory_space<vmem>>, vector<1x128xf32>
    tpu.vector_store %arg5[%c0_11, %c0_12], %14 {strides = array<i32>} : memref<1x128xf32, #tpu.memory_space<vmem>>, vector<1x128xf32>,
    %c0_13 = arith.constant 0 : index
    %c0_14 = arith.constant 0 : index
    %16 = vector.load %arg6[%c0_13, %c0_14] : memref<1x128xf32, #tpu.memory_space<vmem>>, vector<1x128xf32>
    %17 = arith.mulf %5, %5 : vector<512x128xf32>
    %cst_15 = arith.constant dense<0.000000e+00> : vector<128xf32>
    %18 = vector.multi_reduction <add>, %17, %cst_15 [0] : vector<512x128xf32> to vector<128xf32>
    %19 = vector.shape_cast %18 : vector<128xf32> to vector<1x128xf32>
    %20 = arith.addf %16, %19 : vector<1x128xf32>
    %c0_16 = arith.constant 0 : index
    %c0_17 = arith.constant 0 : index
    %21 = vector.load %arg6[%c0_16, %c0_17] : memref<1x128xf32, #tpu.memory_space<vmem>>, vector<1x128xf32>
    tpu.vector_store %arg6[%c0_16, %c0_17], %20 {strides = array<i32>} : memref<1x128xf32, #tpu.memory_space<vmem>>, vector<1x128xf32>,
    return
  }
  func.func @transform_0(%arg0: i32) -> (i32, i32) {
    %c0_i32 = arith.constant 0 : i32
    %c0_i32_0 = arith.constant 0 : i32
    return %arg0, %c0_i32 : i32, i32
  }
  func.func @transform_1(%arg0: i32) -> (i32, i32) {
    %c0_i32 = arith.constant 0 : i32
    %c0_i32_0 = arith.constant 0 : i32
    %c0_i32_1 = arith.constant 0 : i32
    return %c0_i32, %c0_i32_0 : i32, i32
  }
  func.func @transform_2(%arg0: i32) -> (i32, i32) {
    %c0_i32 = arith.constant 0 : i32
    %c0_i32_0 = arith.constant 0 : i32
    %c0_i32_1 = arith.constant 0 : i32
    return %c0_i32, %c0_i32_0 : i32, i32
  }
  func.func @transform_3(%arg0: i32) -> (i32, i32) {
    %c0_i32 = arith.constant 0 : i32
    %c0_i32_0 = arith.constant 0 : i32
    return %arg0, %c0_i32 : i32, i32
  }
  func.func @transform_4(%arg0: i32) -> (i32, i32) {
    %c0_i32 = arith.constant 0 : i32
    %c0_i32_0 = arith.constant 0 : i32
    %c0_i32_1 = arith.constant 0 : i32
    return %c0_i32, %c0_i32_0 : i32, i32
  }
  func.func @transform_5(%arg0: i32) -> (i32, i32) {
    %c0_i32 = arith.constant 0 : i32
    %c0_i32_0 = arith.constant 0 : i32
    %c0_i32_1 = arith.constant 0 : i32
    return %c0_i32, %c0_i32_0 : i32, i32
  }
}

module attributes {stable_mosaic.version = 11 : i64} {
  func.func @kernel(%arg0: i32, %arg1: i32, %arg2: memref<1x512x8xbf16, #tpu.memory_space<vmem>>, %arg3: memref<1x1x8xf32, #tpu.memory_space<vmem>>, %arg4: memref<1x1x8xf32, #tpu.memory_space<vmem>>, %arg5: memref<1x512x8xbf16, #tpu.memory_space<vmem>>) attributes {dimension_semantics = [#tpu.dimension_semantics<parallel>, #tpu.dimension_semantics<parallel>], iteration_bounds = array<i64: 1, 1>, scalar_prefetch = 0 : i64, scratch_operands = 0 : i64, tpu.core_type = #tpu.core_type<tc>, window_params = [{transform_indices = @transform_0, window_bounds = array<i64: 1, 512, 8>}, {transform_indices = @transform_1, window_bounds = array<i64: 1, 1, 8>}, {transform_indices = @transform_2, window_bounds = array<i64: 1, 1, 8>}, {transform_indices = @transform_3, window_bounds = array<i64: 1, 512, 8>}]} {
    %c0 = arith.constant 0 : index
    %c0_0 = arith.constant 0 : index
    %c0_1 = arith.constant 0 : index
    %0 = vector.load %arg2[%c0, %c0_0, %c0_1] : memref<1x512x8xbf16, #tpu.memory_space<vmem>>, vector<1x512x8xbf16>
    %1 = arith.extf %0 : vector<1x512x8xbf16> to vector<1x512x8xf32>
    %c0_2 = arith.constant 0 : index
    %c0_3 = arith.constant 0 : index
    %c0_4 = arith.constant 0 : index
    %2 = vector.load %arg3[%c0_2, %c0_3, %c0_4] : memref<1x1x8xf32, #tpu.memory_space<vmem>>, vector<1x1x8xf32>
    %3 = vector.broadcast %2 : vector<1x1x8xf32> to vector<1x512x8xf32>
    %4 = arith.mulf %1, %3 : vector<1x512x8xf32>
    %c0_5 = arith.constant 0 : index
    %c0_6 = arith.constant 0 : index
    %c0_7 = arith.constant 0 : index
    %5 = vector.load %arg4[%c0_5, %c0_6, %c0_7] : memref<1x1x8xf32, #tpu.memory_space<vmem>>, vector<1x1x8xf32>
    %6 = vector.broadcast %5 : vector<1x1x8xf32> to vector<1x512x8xf32>
    %7 = arith.addf %4, %6 : vector<1x512x8xf32>
    %cst = arith.constant 0.000000e+00 : f32
    %8 = vector.broadcast %cst : f32 to vector<1x512x8xf32>
    %9 = arith.maximumf %7, %8 : vector<1x512x8xf32>
    %10 = arith.truncf %9 : vector<1x512x8xf32> to vector<1x512x8xbf16>
    %c0_8 = arith.constant 0 : index
    %c0_9 = arith.constant 0 : index
    %c0_10 = arith.constant 0 : index
    %11 = vector.load %arg5[%c0_8, %c0_9, %c0_10] : memref<1x512x8xbf16, #tpu.memory_space<vmem>>, vector<1x512x8xbf16>
    tpu.vector_store %arg5[%c0_8, %c0_9, %c0_10], %10 {strides = array<i32>} : memref<1x512x8xbf16, #tpu.memory_space<vmem>>, vector<1x512x8xbf16>,
    return
  }
  func.func @transform_0(%arg0: i32, %arg1: i32) -> (i32, i32, i32) {
    %c0_i32 = arith.constant 0 : i32
    %c0_i32_0 = arith.constant 0 : i32
    return %arg0, %arg1, %c0_i32 : i32, i32, i32
  }
  func.func @transform_1(%arg0: i32, %arg1: i32) -> (i32, i32, i32) {
    %c0_i32 = arith.constant 0 : i32
    %c0_i32_0 = arith.constant 0 : i32
    %c0_i32_1 = arith.constant 0 : i32
    return %arg0, %c0_i32, %c0_i32_0 : i32, i32, i32
  }
  func.func @transform_2(%arg0: i32, %arg1: i32) -> (i32, i32, i32) {
    %c0_i32 = arith.constant 0 : i32
    %c0_i32_0 = arith.constant 0 : i32
    %c0_i32_1 = arith.constant 0 : i32
    return %arg0, %c0_i32, %c0_i32_0 : i32, i32, i32
  }
  func.func @transform_3(%arg0: i32, %arg1: i32) -> (i32, i32, i32) {
    %c0_i32 = arith.constant 0 : i32
    %c0_i32_0 = arith.constant 0 : i32
    return %arg0, %arg1, %c0_i32 : i32, i32, i32
  }
}

module attributes {stable_mosaic.version = 11 : i64} {
  func.func @kernel(%arg0: i32, %arg1: memref<512x72xbf16, #tpu.memory_space<vmem>>, %arg2: memref<72x128xbf16, #tpu.memory_space<vmem>>, %arg3: memref<1x128xf32, #tpu.memory_space<vmem>>, %arg4: memref<512x128xbf16, #tpu.memory_space<vmem>>, %arg5: memref<1x128xf32, #tpu.memory_space<vmem>>, %arg6: memref<1x128xf32, #tpu.memory_space<vmem>>) attributes {dimension_semantics = [#tpu.dimension_semantics<arbitrary>], iteration_bounds = array<i64: 1>, scalar_prefetch = 0 : i64, scratch_operands = 0 : i64, tpu.core_type = #tpu.core_type<tc>, window_params = [{transform_indices = @transform_0, window_bounds = array<i64: 512, 72>}, {pipeline_mode = #tpu.pipeline_mode<synchronous>, transform_indices = @transform_1, window_bounds = array<i64: 72, 128>}, {pipeline_mode = #tpu.pipeline_mode<synchronous>, transform_indices = @transform_2, window_bounds = array<i64: 1, 128>}, {transform_indices = @transform_3, window_bounds = array<i64: 512, 128>}, {pipeline_mode = #tpu.pipeline_mode<synchronous>, transform_indices = @transform_4, window_bounds = array<i64: 1, 128>}, {pipeline_mode = #tpu.pipeline_mode<synchronous>, transform_indices = @transform_5, window_bounds = array<i64: 1, 128>}]} {
    %c0 = arith.constant 0 : index
    %c0_0 = arith.constant 0 : index
    %0 = vector.load %arg1[%c0, %c0_0] : memref<512x72xbf16, #tpu.memory_space<vmem>>, vector<512x72xbf16>
    %c0_1 = arith.constant 0 : index
    %c0_2 = arith.constant 0 : index
    %1 = vector.load %arg2[%c0_1, %c0_2] : memref<72x128xbf16, #tpu.memory_space<vmem>>, vector<72x128xbf16>
    %cst = arith.constant dense<0.000000e+00> : vector<512x128xf32>
    %2 = tpu.matmul %0, %1, %cst {dimension_numbers = #tpu.dot_dimension_numbers<[1], [0], [0], [1], [0, 0, 1, 1], [], []>} : vector<512x72xbf16>, vector<72x128xbf16>, vector<512x128xf32> -> vector<512x128xf32>
    %c0_3 = arith.constant 0 : index
    %c0_4 = arith.constant 0 : index
    %3 = vector.load %arg3[%c0_3, %c0_4] : memref<1x128xf32, #tpu.memory_space<vmem>>, vector<1x128xf32>
    %4 = vector.broadcast %3 : vector<1x128xf32> to vector<512x128xf32>
    %5 = arith.addf %2, %4 : vector<512x128xf32>
    %6 = arith.truncf %5 : vector<512x128xf32> to vector<512x128xbf16>
    %c0_5 = arith.constant 0 : index
    %c0_6 = arith.constant 0 : index
    %7 = vector.load %arg4[%c0_5, %c0_6] : memref<512x128xbf16, #tpu.memory_space<vmem>>, vector<512x128xbf16>
    tpu.vector_store %arg4[%c0_5, %c0_6], %6 {strides = array<i32>} : memref<512x128xbf16, #tpu.memory_space<vmem>>, vector<512x128xbf16>,
    %c0_i32 = arith.constant 0 : i32
    %8 = arith.cmpi eq, %arg0, %c0_i32 : i32
    %9 = arith.extui %8 : i1 to i32
    %c0_i32_7 = arith.constant 0 : i32
    %10 = arith.cmpi ne, %9, %c0_i32_7 : i32
    scf.if %10 {
      %cst_18 = arith.constant 0.000000e+00 : f32
      %22 = vector.broadcast %cst_18 : f32 to vector<1x128xf32>
      %c0_19 = arith.constant 0 : index
      %c0_20 = arith.constant 0 : index
      %23 = vector.load %arg5[%c0_19, %c0_20] : memref<1x128xf32, #tpu.memory_space<vmem>>, vector<1x128xf32>
      tpu.vector_store %arg5[%c0_19, %c0_20], %22 {strides = array<i32>} : memref<1x128xf32, #tpu.memory_space<vmem>>, vector<1x128xf32>,
      %cst_21 = arith.constant 0.000000e+00 : f32
      %24 = vector.broadcast %cst_21 : f32 to vector<1x128xf32>
      %c0_22 = arith.constant 0 : index
      %c0_23 = arith.constant 0 : index
      %25 = vector.load %arg6[%c0_22, %c0_23] : memref<1x128xf32, #tpu.memory_space<vmem>>, vector<1x128xf32>
      tpu.vector_store %arg6[%c0_22, %c0_23], %24 {strides = array<i32>} : memref<1x128xf32, #tpu.memory_space<vmem>>, vector<1x128xf32>,
    } else {
    }
    %c0_8 = arith.constant 0 : index
    %c0_9 = arith.constant 0 : index
    %11 = vector.load %arg5[%c0_8, %c0_9] : memref<1x128xf32, #tpu.memory_space<vmem>>, vector<1x128xf32>
    %cst_10 = arith.constant dense<0.000000e+00> : vector<128xf32>
    %12 = vector.multi_reduction <add>, %5, %cst_10 [0] : vector<512x128xf32> to vector<128xf32>
    %13 = vector.shape_cast %12 : vector<128xf32> to vector<1x128xf32>
    %14 = arith.addf %11, %13 : vector<1x128xf32>
    %c0_11 = arith.constant 0 : index
    %c0_12 = arith.constant 0 : index
    %15 = vector.load %arg5[%c0_11, %c0_12] : memref<1x128xf32, #tpu.memory_space<vmem>>, vector<1x128xf32>
    tpu.vector_store %arg5[%c0_11, %c0_12], %14 {strides = array<i32>} : memref<1x128xf32, #tpu.memory_space<vmem>>, vector<1x128xf32>,
    %c0_13 = arith.constant 0 : index
    %c0_14 = arith.constant 0 : index
    %16 = vector.load %arg6[%c0_13, %c0_14] : memref<1x128xf32, #tpu.memory_space<vmem>>, vector<1x128xf32>
    %17 = arith.mulf %5, %5 : vector<512x128xf32>
    %cst_15 = arith.constant dense<0.000000e+00> : vector<128xf32>
    %18 = vector.multi_reduction <add>, %17, %cst_15 [0] : vector<512x128xf32> to vector<128xf32>
    %19 = vector.shape_cast %18 : vector<128xf32> to vector<1x128xf32>
    %20 = arith.addf %16, %19 : vector<1x128xf32>
    %c0_16 = arith.constant 0 : index
    %c0_17 = arith.constant 0 : index
    %21 = vector.load %arg6[%c0_16, %c0_17] : memref<1x128xf32, #tpu.memory_space<vmem>>, vector<1x128xf32>
    tpu.vector_store %arg6[%c0_16, %c0_17], %20 {strides = array<i32>} : memref<1x128xf32, #tpu.memory_space<vmem>>, vector<1x128xf32>,
    return
  }
  func.func @transform_0(%arg0: i32) -> (i32, i32) {
    %c0_i32 = arith.constant 0 : i32
    %c0_i32_0 = arith.constant 0 : i32
    return %arg0, %c0_i32 : i32, i32
  }
  func.func @transform_1(%arg0: i32) -> (i32, i32) {
    %c0_i32 = arith.constant 0 : i32
    %c0_i32_0 = arith.constant 0 : i32
    %c0_i32_1 = arith.constant 0 : i32
    return %c0_i32, %c0_i32_0 : i32, i32
  }
  func.func @transform_2(%arg0: i32) -> (i32, i32) {
    %c0_i32 = arith.constant 0 : i32
    %c0_i32_0 = arith.constant 0 : i32
    %c0_i32_1 = arith.constant 0 : i32
    return %c0_i32, %c0_i32_0 : i32, i32
  }
  func.func @transform_3(%arg0: i32) -> (i32, i32) {
    %c0_i32 = arith.constant 0 : i32
    %c0_i32_0 = arith.constant 0 : i32
    return %arg0, %c0_i32 : i32, i32
  }
  func.func @transform_4(%arg0: i32) -> (i32, i32) {
    %c0_i32 = arith.constant 0 : i32
    %c0_i32_0 = arith.constant 0 : i32
    %c0_i32_1 = arith.constant 0 : i32
    return %c0_i32, %c0_i32_0 : i32, i32
  }
  func.func @transform_5(%arg0: i32) -> (i32, i32) {
    %c0_i32 = arith.constant 0 : i32
    %c0_i32_0 = arith.constant 0 : i32
    %c0_i32_1 = arith.constant 0 : i32
    return %c0_i32, %c0_i32_0 : i32, i32
  }
}

module attributes {stable_mosaic.version = 11 : i64} {
  func.func @kernel(%arg0: i32, %arg1: memref<128x72xbf16, #tpu.memory_space<vmem>>, %arg2: memref<72x128xbf16, #tpu.memory_space<vmem>>, %arg3: memref<1x128xf32, #tpu.memory_space<vmem>>, %arg4: memref<128x128xbf16, #tpu.memory_space<vmem>>, %arg5: memref<1x128xf32, #tpu.memory_space<vmem>>, %arg6: memref<1x128xf32, #tpu.memory_space<vmem>>) attributes {dimension_semantics = [#tpu.dimension_semantics<arbitrary>], iteration_bounds = array<i64: 1>, scalar_prefetch = 0 : i64, scratch_operands = 0 : i64, tpu.core_type = #tpu.core_type<tc>, window_params = [{transform_indices = @transform_0, window_bounds = array<i64: 128, 72>}, {pipeline_mode = #tpu.pipeline_mode<synchronous>, transform_indices = @transform_1, window_bounds = array<i64: 72, 128>}, {pipeline_mode = #tpu.pipeline_mode<synchronous>, transform_indices = @transform_2, window_bounds = array<i64: 1, 128>}, {transform_indices = @transform_3, window_bounds = array<i64: 128, 128>}, {pipeline_mode = #tpu.pipeline_mode<synchronous>, transform_indices = @transform_4, window_bounds = array<i64: 1, 128>}, {pipeline_mode = #tpu.pipeline_mode<synchronous>, transform_indices = @transform_5, window_bounds = array<i64: 1, 128>}]} {
    %c0 = arith.constant 0 : index
    %c0_0 = arith.constant 0 : index
    %0 = vector.load %arg1[%c0, %c0_0] : memref<128x72xbf16, #tpu.memory_space<vmem>>, vector<128x72xbf16>
    %c0_1 = arith.constant 0 : index
    %c0_2 = arith.constant 0 : index
    %1 = vector.load %arg2[%c0_1, %c0_2] : memref<72x128xbf16, #tpu.memory_space<vmem>>, vector<72x128xbf16>
    %cst = arith.constant dense<0.000000e+00> : vector<128x128xf32>
    %2 = tpu.matmul %0, %1, %cst {dimension_numbers = #tpu.dot_dimension_numbers<[1], [0], [0], [1], [0, 0, 1, 1], [], []>} : vector<128x72xbf16>, vector<72x128xbf16>, vector<128x128xf32> -> vector<128x128xf32>
    %c0_3 = arith.constant 0 : index
    %c0_4 = arith.constant 0 : index
    %3 = vector.load %arg3[%c0_3, %c0_4] : memref<1x128xf32, #tpu.memory_space<vmem>>, vector<1x128xf32>
    %4 = vector.broadcast %3 : vector<1x128xf32> to vector<128x128xf32>
    %5 = arith.addf %2, %4 : vector<128x128xf32>
    %6 = arith.truncf %5 : vector<128x128xf32> to vector<128x128xbf16>
    %c0_5 = arith.constant 0 : index
    %c0_6 = arith.constant 0 : index
    %7 = vector.load %arg4[%c0_5, %c0_6] : memref<128x128xbf16, #tpu.memory_space<vmem>>, vector<128x128xbf16>
    tpu.vector_store %arg4[%c0_5, %c0_6], %6 {strides = array<i32>} : memref<128x128xbf16, #tpu.memory_space<vmem>>, vector<128x128xbf16>,
    %c0_i32 = arith.constant 0 : i32
    %8 = arith.cmpi eq, %arg0, %c0_i32 : i32
    %9 = arith.extui %8 : i1 to i32
    %c0_i32_7 = arith.constant 0 : i32
    %10 = arith.cmpi ne, %9, %c0_i32_7 : i32
    scf.if %10 {
      %cst_18 = arith.constant 0.000000e+00 : f32
      %22 = vector.broadcast %cst_18 : f32 to vector<1x128xf32>
      %c0_19 = arith.constant 0 : index
      %c0_20 = arith.constant 0 : index
      %23 = vector.load %arg5[%c0_19, %c0_20] : memref<1x128xf32, #tpu.memory_space<vmem>>, vector<1x128xf32>
      tpu.vector_store %arg5[%c0_19, %c0_20], %22 {strides = array<i32>} : memref<1x128xf32, #tpu.memory_space<vmem>>, vector<1x128xf32>,
      %cst_21 = arith.constant 0.000000e+00 : f32
      %24 = vector.broadcast %cst_21 : f32 to vector<1x128xf32>
      %c0_22 = arith.constant 0 : index
      %c0_23 = arith.constant 0 : index
      %25 = vector.load %arg6[%c0_22, %c0_23] : memref<1x128xf32, #tpu.memory_space<vmem>>, vector<1x128xf32>
      tpu.vector_store %arg6[%c0_22, %c0_23], %24 {strides = array<i32>} : memref<1x128xf32, #tpu.memory_space<vmem>>, vector<1x128xf32>,
    } else {
    }
    %c0_8 = arith.constant 0 : index
    %c0_9 = arith.constant 0 : index
    %11 = vector.load %arg5[%c0_8, %c0_9] : memref<1x128xf32, #tpu.memory_space<vmem>>, vector<1x128xf32>
    %cst_10 = arith.constant dense<0.000000e+00> : vector<128xf32>
    %12 = vector.multi_reduction <add>, %5, %cst_10 [0] : vector<128x128xf32> to vector<128xf32>
    %13 = vector.shape_cast %12 : vector<128xf32> to vector<1x128xf32>
    %14 = arith.addf %11, %13 : vector<1x128xf32>
    %c0_11 = arith.constant 0 : index
    %c0_12 = arith.constant 0 : index
    %15 = vector.load %arg5[%c0_11, %c0_12] : memref<1x128xf32, #tpu.memory_space<vmem>>, vector<1x128xf32>
    tpu.vector_store %arg5[%c0_11, %c0_12], %14 {strides = array<i32>} : memref<1x128xf32, #tpu.memory_space<vmem>>, vector<1x128xf32>,
    %c0_13 = arith.constant 0 : index
    %c0_14 = arith.constant 0 : index
    %16 = vector.load %arg6[%c0_13, %c0_14] : memref<1x128xf32, #tpu.memory_space<vmem>>, vector<1x128xf32>
    %17 = arith.mulf %5, %5 : vector<128x128xf32>
    %cst_15 = arith.constant dense<0.000000e+00> : vector<128xf32>
    %18 = vector.multi_reduction <add>, %17, %cst_15 [0] : vector<128x128xf32> to vector<128xf32>
    %19 = vector.shape_cast %18 : vector<128xf32> to vector<1x128xf32>
    %20 = arith.addf %16, %19 : vector<1x128xf32>
    %c0_16 = arith.constant 0 : index
    %c0_17 = arith.constant 0 : index
    %21 = vector.load %arg6[%c0_16, %c0_17] : memref<1x128xf32, #tpu.memory_space<vmem>>, vector<1x128xf32>
    tpu.vector_store %arg6[%c0_16, %c0_17], %20 {strides = array<i32>} : memref<1x128xf32, #tpu.memory_space<vmem>>, vector<1x128xf32>,
    return
  }
  func.func @transform_0(%arg0: i32) -> (i32, i32) {
    %c0_i32 = arith.constant 0 : i32
    %c0_i32_0 = arith.constant 0 : i32
    return %arg0, %c0_i32 : i32, i32
  }
  func.func @transform_1(%arg0: i32) -> (i32, i32) {
    %c0_i32 = arith.constant 0 : i32
    %c0_i32_0 = arith.constant 0 : i32
    %c0_i32_1 = arith.constant 0 : i32
    return %c0_i32, %c0_i32_0 : i32, i32
  }
  func.func @transform_2(%arg0: i32) -> (i32, i32) {
    %c0_i32 = arith.constant 0 : i32
    %c0_i32_0 = arith.constant 0 : i32
    %c0_i32_1 = arith.constant 0 : i32
    return %c0_i32, %c0_i32_0 : i32, i32
  }
  func.func @transform_3(%arg0: i32) -> (i32, i32) {
    %c0_i32 = arith.constant 0 : i32
    %c0_i32_0 = arith.constant 0 : i32
    return %arg0, %c0_i32 : i32, i32
  }
  func.func @transform_4(%arg0: i32) -> (i32, i32) {
    %c0_i32 = arith.constant 0 : i32
    %c0_i32_0 = arith.constant 0 : i32
    %c0_i32_1 = arith.constant 0 : i32
    return %c0_i32, %c0_i32_0 : i32, i32
  }
  func.func @transform_5(%arg0: i32) -> (i32, i32) {
    %c0_i32 = arith.constant 0 : i32
    %c0_i32_0 = arith.constant 0 : i32
    %c0_i32_1 = arith.constant 0 : i32
    return %c0_i32, %c0_i32_0 : i32, i32
  }
}

module attributes {stable_mosaic.version = 11 : i64} {
  func.func @kernel(%arg0: i32, %arg1: i32, %arg2: memref<1x128x16xbf16, #tpu.memory_space<vmem>>, %arg3: memref<1x1x16xf32, #tpu.memory_space<vmem>>, %arg4: memref<1x1x16xf32, #tpu.memory_space<vmem>>, %arg5: memref<1x128x16xbf16, #tpu.memory_space<vmem>>) attributes {dimension_semantics = [#tpu.dimension_semantics<parallel>, #tpu.dimension_semantics<parallel>], iteration_bounds = array<i64: 1, 1>, scalar_prefetch = 0 : i64, scratch_operands = 0 : i64, tpu.core_type = #tpu.core_type<tc>, window_params = [{transform_indices = @transform_0, window_bounds = array<i64: 1, 128, 16>}, {transform_indices = @transform_1, window_bounds = array<i64: 1, 1, 16>}, {transform_indices = @transform_2, window_bounds = array<i64: 1, 1, 16>}, {transform_indices = @transform_3, window_bounds = array<i64: 1, 128, 16>}]} {
    %c0 = arith.constant 0 : index
    %c0_0 = arith.constant 0 : index
    %c0_1 = arith.constant 0 : index
    %0 = vector.load %arg2[%c0, %c0_0, %c0_1] : memref<1x128x16xbf16, #tpu.memory_space<vmem>>, vector<1x128x16xbf16>
    %1 = arith.extf %0 : vector<1x128x16xbf16> to vector<1x128x16xf32>
    %c0_2 = arith.constant 0 : index
    %c0_3 = arith.constant 0 : index
    %c0_4 = arith.constant 0 : index
    %2 = vector.load %arg3[%c0_2, %c0_3, %c0_4] : memref<1x1x16xf32, #tpu.memory_space<vmem>>, vector<1x1x16xf32>
    %3 = vector.broadcast %2 : vector<1x1x16xf32> to vector<1x128x16xf32>
    %4 = arith.mulf %1, %3 : vector<1x128x16xf32>
    %c0_5 = arith.constant 0 : index
    %c0_6 = arith.constant 0 : index
    %c0_7 = arith.constant 0 : index
    %5 = vector.load %arg4[%c0_5, %c0_6, %c0_7] : memref<1x1x16xf32, #tpu.memory_space<vmem>>, vector<1x1x16xf32>
    %6 = vector.broadcast %5 : vector<1x1x16xf32> to vector<1x128x16xf32>
    %7 = arith.addf %4, %6 : vector<1x128x16xf32>
    %cst = arith.constant 0.000000e+00 : f32
    %8 = vector.broadcast %cst : f32 to vector<1x128x16xf32>
    %9 = arith.maximumf %7, %8 : vector<1x128x16xf32>
    %10 = arith.truncf %9 : vector<1x128x16xf32> to vector<1x128x16xbf16>
    %c0_8 = arith.constant 0 : index
    %c0_9 = arith.constant 0 : index
    %c0_10 = arith.constant 0 : index
    %11 = vector.load %arg5[%c0_8, %c0_9, %c0_10] : memref<1x128x16xbf16, #tpu.memory_space<vmem>>, vector<1x128x16xbf16>
    tpu.vector_store %arg5[%c0_8, %c0_9, %c0_10], %10 {strides = array<i32>} : memref<1x128x16xbf16, #tpu.memory_space<vmem>>, vector<1x128x16xbf16>,
    return
  }
  func.func @transform_0(%arg0: i32, %arg1: i32) -> (i32, i32, i32) {
    %c0_i32 = arith.constant 0 : i32
    %c0_i32_0 = arith.constant 0 : i32
    return %arg0, %arg1, %c0_i32 : i32, i32, i32
  }
  func.func @transform_1(%arg0: i32, %arg1: i32) -> (i32, i32, i32) {
    %c0_i32 = arith.constant 0 : i32
    %c0_i32_0 = arith.constant 0 : i32
    %c0_i32_1 = arith.constant 0 : i32
    return %arg0, %c0_i32, %c0_i32_0 : i32, i32, i32
  }
  func.func @transform_2(%arg0: i32, %arg1: i32) -> (i32, i32, i32) {
    %c0_i32 = arith.constant 0 : i32
    %c0_i32_0 = arith.constant 0 : i32
    %c0_i32_1 = arith.constant 0 : i32
    return %arg0, %c0_i32, %c0_i32_0 : i32, i32, i32
  }
  func.func @transform_3(%arg0: i32, %arg1: i32) -> (i32, i32, i32) {
    %c0_i32 = arith.constant 0 : i32
    %c0_i32_0 = arith.constant 0 : i32
    return %arg0, %arg1, %c0_i32 : i32, i32, i32
  }
}

module attributes {stable_mosaic.version = 11 : i64} {
  func.func @kernel(%arg0: i32, %arg1: memref<128x144xbf16, #tpu.memory_space<vmem>>, %arg2: memref<144x128xbf16, #tpu.memory_space<vmem>>, %arg3: memref<1x128xf32, #tpu.memory_space<vmem>>, %arg4: memref<128x128xbf16, #tpu.memory_space<vmem>>, %arg5: memref<1x128xf32, #tpu.memory_space<vmem>>, %arg6: memref<1x128xf32, #tpu.memory_space<vmem>>) attributes {dimension_semantics = [#tpu.dimension_semantics<arbitrary>], iteration_bounds = array<i64: 1>, scalar_prefetch = 0 : i64, scratch_operands = 0 : i64, tpu.core_type = #tpu.core_type<tc>, window_params = [{transform_indices = @transform_0, window_bounds = array<i64: 128, 144>}, {pipeline_mode = #tpu.pipeline_mode<synchronous>, transform_indices = @transform_1, window_bounds = array<i64: 144, 128>}, {pipeline_mode = #tpu.pipeline_mode<synchronous>, transform_indices = @transform_2, window_bounds = array<i64: 1, 128>}, {transform_indices = @transform_3, window_bounds = array<i64: 128, 128>}, {pipeline_mode = #tpu.pipeline_mode<synchronous>, transform_indices = @transform_4, window_bounds = array<i64: 1, 128>}, {pipeline_mode = #tpu.pipeline_mode<synchronous>, transform_indices = @transform_5, window_bounds = array<i64: 1, 128>}]} {
    %c0 = arith.constant 0 : index
    %c0_0 = arith.constant 0 : index
    %0 = vector.load %arg1[%c0, %c0_0] : memref<128x144xbf16, #tpu.memory_space<vmem>>, vector<128x144xbf16>
    %c0_1 = arith.constant 0 : index
    %c0_2 = arith.constant 0 : index
    %1 = vector.load %arg2[%c0_1, %c0_2] : memref<144x128xbf16, #tpu.memory_space<vmem>>, vector<144x128xbf16>
    %cst = arith.constant dense<0.000000e+00> : vector<128x128xf32>
    %2 = tpu.matmul %0, %1, %cst {dimension_numbers = #tpu.dot_dimension_numbers<[1], [0], [0], [1], [0, 0, 1, 1], [], []>} : vector<128x144xbf16>, vector<144x128xbf16>, vector<128x128xf32> -> vector<128x128xf32>
    %c0_3 = arith.constant 0 : index
    %c0_4 = arith.constant 0 : index
    %3 = vector.load %arg3[%c0_3, %c0_4] : memref<1x128xf32, #tpu.memory_space<vmem>>, vector<1x128xf32>
    %4 = vector.broadcast %3 : vector<1x128xf32> to vector<128x128xf32>
    %5 = arith.addf %2, %4 : vector<128x128xf32>
    %6 = arith.truncf %5 : vector<128x128xf32> to vector<128x128xbf16>
    %c0_5 = arith.constant 0 : index
    %c0_6 = arith.constant 0 : index
    %7 = vector.load %arg4[%c0_5, %c0_6] : memref<128x128xbf16, #tpu.memory_space<vmem>>, vector<128x128xbf16>
    tpu.vector_store %arg4[%c0_5, %c0_6], %6 {strides = array<i32>} : memref<128x128xbf16, #tpu.memory_space<vmem>>, vector<128x128xbf16>,
    %c0_i32 = arith.constant 0 : i32
    %8 = arith.cmpi eq, %arg0, %c0_i32 : i32
    %9 = arith.extui %8 : i1 to i32
    %c0_i32_7 = arith.constant 0 : i32
    %10 = arith.cmpi ne, %9, %c0_i32_7 : i32
    scf.if %10 {
      %cst_18 = arith.constant 0.000000e+00 : f32
      %22 = vector.broadcast %cst_18 : f32 to vector<1x128xf32>
      %c0_19 = arith.constant 0 : index
      %c0_20 = arith.constant 0 : index
      %23 = vector.load %arg5[%c0_19, %c0_20] : memref<1x128xf32, #tpu.memory_space<vmem>>, vector<1x128xf32>
      tpu.vector_store %arg5[%c0_19, %c0_20], %22 {strides = array<i32>} : memref<1x128xf32, #tpu.memory_space<vmem>>, vector<1x128xf32>,
      %cst_21 = arith.constant 0.000000e+00 : f32
      %24 = vector.broadcast %cst_21 : f32 to vector<1x128xf32>
      %c0_22 = arith.constant 0 : index
      %c0_23 = arith.constant 0 : index
      %25 = vector.load %arg6[%c0_22, %c0_23] : memref<1x128xf32, #tpu.memory_space<vmem>>, vector<1x128xf32>
      tpu.vector_store %arg6[%c0_22, %c0_23], %24 {strides = array<i32>} : memref<1x128xf32, #tpu.memory_space<vmem>>, vector<1x128xf32>,
    } else {
    }
    %c0_8 = arith.constant 0 : index
    %c0_9 = arith.constant 0 : index
    %11 = vector.load %arg5[%c0_8, %c0_9] : memref<1x128xf32, #tpu.memory_space<vmem>>, vector<1x128xf32>
    %cst_10 = arith.constant dense<0.000000e+00> : vector<128xf32>
    %12 = vector.multi_reduction <add>, %5, %cst_10 [0] : vector<128x128xf32> to vector<128xf32>
    %13 = vector.shape_cast %12 : vector<128xf32> to vector<1x128xf32>
    %14 = arith.addf %11, %13 : vector<1x128xf32>
    %c0_11 = arith.constant 0 : index
    %c0_12 = arith.constant 0 : index
    %15 = vector.load %arg5[%c0_11, %c0_12] : memref<1x128xf32, #tpu.memory_space<vmem>>, vector<1x128xf32>
    tpu.vector_store %arg5[%c0_11, %c0_12], %14 {strides = array<i32>} : memref<1x128xf32, #tpu.memory_space<vmem>>, vector<1x128xf32>,
    %c0_13 = arith.constant 0 : index
    %c0_14 = arith.constant 0 : index
    %16 = vector.load %arg6[%c0_13, %c0_14] : memref<1x128xf32, #tpu.memory_space<vmem>>, vector<1x128xf32>
    %17 = arith.mulf %5, %5 : vector<128x128xf32>
    %cst_15 = arith.constant dense<0.000000e+00> : vector<128xf32>
    %18 = vector.multi_reduction <add>, %17, %cst_15 [0] : vector<128x128xf32> to vector<128xf32>
    %19 = vector.shape_cast %18 : vector<128xf32> to vector<1x128xf32>
    %20 = arith.addf %16, %19 : vector<1x128xf32>
    %c0_16 = arith.constant 0 : index
    %c0_17 = arith.constant 0 : index
    %21 = vector.load %arg6[%c0_16, %c0_17] : memref<1x128xf32, #tpu.memory_space<vmem>>, vector<1x128xf32>
    tpu.vector_store %arg6[%c0_16, %c0_17], %20 {strides = array<i32>} : memref<1x128xf32, #tpu.memory_space<vmem>>, vector<1x128xf32>,
    return
  }
  func.func @transform_0(%arg0: i32) -> (i32, i32) {
    %c0_i32 = arith.constant 0 : i32
    %c0_i32_0 = arith.constant 0 : i32
    return %arg0, %c0_i32 : i32, i32
  }
  func.func @transform_1(%arg0: i32) -> (i32, i32) {
    %c0_i32 = arith.constant 0 : i32
    %c0_i32_0 = arith.constant 0 : i32
    %c0_i32_1 = arith.constant 0 : i32
    return %c0_i32, %c0_i32_0 : i32, i32
  }
  func.func @transform_2(%arg0: i32) -> (i32, i32) {
    %c0_i32 = arith.constant 0 : i32
    %c0_i32_0 = arith.constant 0 : i32
    %c0_i32_1 = arith.constant 0 : i32
    return %c0_i32, %c0_i32_0 : i32, i32
  }
  func.func @transform_3(%arg0: i32) -> (i32, i32) {
    %c0_i32 = arith.constant 0 : i32
    %c0_i32_0 = arith.constant 0 : i32
    return %arg0, %c0_i32 : i32, i32
  }
  func.func @transform_4(%arg0: i32) -> (i32, i32) {
    %c0_i32 = arith.constant 0 : i32
    %c0_i32_0 = arith.constant 0 : i32
    %c0_i32_1 = arith.constant 0 : i32
    return %c0_i32, %c0_i32_0 : i32, i32
  }
  func.func @transform_5(%arg0: i32) -> (i32, i32) {
    %c0_i32 = arith.constant 0 : i32
    %c0_i32_0 = arith.constant 0 : i32
    %c0_i32_1 = arith.constant 0 : i32
    return %c0_i32, %c0_i32_0 : i32, i32
  }
}

module attributes {stable_mosaic.version = 11 : i64} {
  func.func @kernel(%arg0: i32, %arg1: memref<32x144xbf16, #tpu.memory_space<vmem>>, %arg2: memref<144x128xbf16, #tpu.memory_space<vmem>>, %arg3: memref<1x128xf32, #tpu.memory_space<vmem>>, %arg4: memref<32x128xbf16, #tpu.memory_space<vmem>>, %arg5: memref<1x128xf32, #tpu.memory_space<vmem>>, %arg6: memref<1x128xf32, #tpu.memory_space<vmem>>) attributes {dimension_semantics = [#tpu.dimension_semantics<arbitrary>], iteration_bounds = array<i64: 1>, scalar_prefetch = 0 : i64, scratch_operands = 0 : i64, tpu.core_type = #tpu.core_type<tc>, window_params = [{transform_indices = @transform_0, window_bounds = array<i64: 32, 144>}, {pipeline_mode = #tpu.pipeline_mode<synchronous>, transform_indices = @transform_1, window_bounds = array<i64: 144, 128>}, {pipeline_mode = #tpu.pipeline_mode<synchronous>, transform_indices = @transform_2, window_bounds = array<i64: 1, 128>}, {transform_indices = @transform_3, window_bounds = array<i64: 32, 128>}, {pipeline_mode = #tpu.pipeline_mode<synchronous>, transform_indices = @transform_4, window_bounds = array<i64: 1, 128>}, {pipeline_mode = #tpu.pipeline_mode<synchronous>, transform_indices = @transform_5, window_bounds = array<i64: 1, 128>}]} {
    %c0 = arith.constant 0 : index
    %c0_0 = arith.constant 0 : index
    %0 = vector.load %arg1[%c0, %c0_0] : memref<32x144xbf16, #tpu.memory_space<vmem>>, vector<32x144xbf16>
    %c0_1 = arith.constant 0 : index
    %c0_2 = arith.constant 0 : index
    %1 = vector.load %arg2[%c0_1, %c0_2] : memref<144x128xbf16, #tpu.memory_space<vmem>>, vector<144x128xbf16>
    %cst = arith.constant dense<0.000000e+00> : vector<32x128xf32>
    %2 = tpu.matmul %0, %1, %cst {dimension_numbers = #tpu.dot_dimension_numbers<[1], [0], [0], [1], [0, 0, 1, 1], [], []>} : vector<32x144xbf16>, vector<144x128xbf16>, vector<32x128xf32> -> vector<32x128xf32>
    %c0_3 = arith.constant 0 : index
    %c0_4 = arith.constant 0 : index
    %3 = vector.load %arg3[%c0_3, %c0_4] : memref<1x128xf32, #tpu.memory_space<vmem>>, vector<1x128xf32>
    %4 = vector.broadcast %3 : vector<1x128xf32> to vector<32x128xf32>
    %5 = arith.addf %2, %4 : vector<32x128xf32>
    %6 = arith.truncf %5 : vector<32x128xf32> to vector<32x128xbf16>
    %c0_5 = arith.constant 0 : index
    %c0_6 = arith.constant 0 : index
    %7 = vector.load %arg4[%c0_5, %c0_6] : memref<32x128xbf16, #tpu.memory_space<vmem>>, vector<32x128xbf16>
    tpu.vector_store %arg4[%c0_5, %c0_6], %6 {strides = array<i32>} : memref<32x128xbf16, #tpu.memory_space<vmem>>, vector<32x128xbf16>,
    %c0_i32 = arith.constant 0 : i32
    %8 = arith.cmpi eq, %arg0, %c0_i32 : i32
    %9 = arith.extui %8 : i1 to i32
    %c0_i32_7 = arith.constant 0 : i32
    %10 = arith.cmpi ne, %9, %c0_i32_7 : i32
    scf.if %10 {
      %cst_18 = arith.constant 0.000000e+00 : f32
      %22 = vector.broadcast %cst_18 : f32 to vector<1x128xf32>
      %c0_19 = arith.constant 0 : index
      %c0_20 = arith.constant 0 : index
      %23 = vector.load %arg5[%c0_19, %c0_20] : memref<1x128xf32, #tpu.memory_space<vmem>>, vector<1x128xf32>
      tpu.vector_store %arg5[%c0_19, %c0_20], %22 {strides = array<i32>} : memref<1x128xf32, #tpu.memory_space<vmem>>, vector<1x128xf32>,
      %cst_21 = arith.constant 0.000000e+00 : f32
      %24 = vector.broadcast %cst_21 : f32 to vector<1x128xf32>
      %c0_22 = arith.constant 0 : index
      %c0_23 = arith.constant 0 : index
      %25 = vector.load %arg6[%c0_22, %c0_23] : memref<1x128xf32, #tpu.memory_space<vmem>>, vector<1x128xf32>
      tpu.vector_store %arg6[%c0_22, %c0_23], %24 {strides = array<i32>} : memref<1x128xf32, #tpu.memory_space<vmem>>, vector<1x128xf32>,
    } else {
    }
    %c0_8 = arith.constant 0 : index
    %c0_9 = arith.constant 0 : index
    %11 = vector.load %arg5[%c0_8, %c0_9] : memref<1x128xf32, #tpu.memory_space<vmem>>, vector<1x128xf32>
    %cst_10 = arith.constant dense<0.000000e+00> : vector<128xf32>
    %12 = vector.multi_reduction <add>, %5, %cst_10 [0] : vector<32x128xf32> to vector<128xf32>
    %13 = vector.shape_cast %12 : vector<128xf32> to vector<1x128xf32>
    %14 = arith.addf %11, %13 : vector<1x128xf32>
    %c0_11 = arith.constant 0 : index
    %c0_12 = arith.constant 0 : index
    %15 = vector.load %arg5[%c0_11, %c0_12] : memref<1x128xf32, #tpu.memory_space<vmem>>, vector<1x128xf32>
    tpu.vector_store %arg5[%c0_11, %c0_12], %14 {strides = array<i32>} : memref<1x128xf32, #tpu.memory_space<vmem>>, vector<1x128xf32>,
    %c0_13 = arith.constant 0 : index
    %c0_14 = arith.constant 0 : index
    %16 = vector.load %arg6[%c0_13, %c0_14] : memref<1x128xf32, #tpu.memory_space<vmem>>, vector<1x128xf32>
    %17 = arith.mulf %5, %5 : vector<32x128xf32>
    %cst_15 = arith.constant dense<0.000000e+00> : vector<128xf32>
    %18 = vector.multi_reduction <add>, %17, %cst_15 [0] : vector<32x128xf32> to vector<128xf32>
    %19 = vector.shape_cast %18 : vector<128xf32> to vector<1x128xf32>
    %20 = arith.addf %16, %19 : vector<1x128xf32>
    %c0_16 = arith.constant 0 : index
    %c0_17 = arith.constant 0 : index
    %21 = vector.load %arg6[%c0_16, %c0_17] : memref<1x128xf32, #tpu.memory_space<vmem>>, vector<1x128xf32>
    tpu.vector_store %arg6[%c0_16, %c0_17], %20 {strides = array<i32>} : memref<1x128xf32, #tpu.memory_space<vmem>>, vector<1x128xf32>,
    return
  }
  func.func @transform_0(%arg0: i32) -> (i32, i32) {
    %c0_i32 = arith.constant 0 : i32
    %c0_i32_0 = arith.constant 0 : i32
    return %arg0, %c0_i32 : i32, i32
  }
  func.func @transform_1(%arg0: i32) -> (i32, i32) {
    %c0_i32 = arith.constant 0 : i32
    %c0_i32_0 = arith.constant 0 : i32
    %c0_i32_1 = arith.constant 0 : i32
    return %c0_i32, %c0_i32_0 : i32, i32
  }
  func.func @transform_2(%arg0: i32) -> (i32, i32) {
    %c0_i32 = arith.constant 0 : i32
    %c0_i32_0 = arith.constant 0 : i32
    %c0_i32_1 = arith.constant 0 : i32
    return %c0_i32, %c0_i32_0 : i32, i32
  }
  func.func @transform_3(%arg0: i32) -> (i32, i32) {
    %c0_i32 = arith.constant 0 : i32
    %c0_i32_0 = arith.constant 0 : i32
    return %arg0, %c0_i32 : i32, i32
  }
  func.func @transform_4(%arg0: i32) -> (i32, i32) {
    %c0_i32 = arith.constant 0 : i32
    %c0_i32_0 = arith.constant 0 : i32
    %c0_i32_1 = arith.constant 0 : i32
    return %c0_i32, %c0_i32_0 : i32, i32
  }
  func.func @transform_5(%arg0: i32) -> (i32, i32) {
    %c0_i32 = arith.constant 0 : i32
    %c0_i32_0 = arith.constant 0 : i32
    %c0_i32_1 = arith.constant 0 : i32
    return %c0_i32, %c0_i32_0 : i32, i32
  }
}

module attributes {stable_mosaic.version = 11 : i64} {
  func.func @kernel(%arg0: i32, %arg1: i32, %arg2: memref<1x32x32xbf16, #tpu.memory_space<vmem>>, %arg3: memref<1x1x32xf32, #tpu.memory_space<vmem>>, %arg4: memref<1x1x32xf32, #tpu.memory_space<vmem>>, %arg5: memref<1x32x32xbf16, #tpu.memory_space<vmem>>) attributes {dimension_semantics = [#tpu.dimension_semantics<parallel>, #tpu.dimension_semantics<parallel>], iteration_bounds = array<i64: 1, 1>, scalar_prefetch = 0 : i64, scratch_operands = 0 : i64, tpu.core_type = #tpu.core_type<tc>, window_params = [{transform_indices = @transform_0, window_bounds = array<i64: 1, 32, 32>}, {transform_indices = @transform_1, window_bounds = array<i64: 1, 1, 32>}, {transform_indices = @transform_2, window_bounds = array<i64: 1, 1, 32>}, {transform_indices = @transform_3, window_bounds = array<i64: 1, 32, 32>}]} {
    %c0 = arith.constant 0 : index
    %c0_0 = arith.constant 0 : index
    %c0_1 = arith.constant 0 : index
    %0 = vector.load %arg2[%c0, %c0_0, %c0_1] : memref<1x32x32xbf16, #tpu.memory_space<vmem>>, vector<1x32x32xbf16>
    %1 = arith.extf %0 : vector<1x32x32xbf16> to vector<1x32x32xf32>
    %c0_2 = arith.constant 0 : index
    %c0_3 = arith.constant 0 : index
    %c0_4 = arith.constant 0 : index
    %2 = vector.load %arg3[%c0_2, %c0_3, %c0_4] : memref<1x1x32xf32, #tpu.memory_space<vmem>>, vector<1x1x32xf32>
    %3 = vector.broadcast %2 : vector<1x1x32xf32> to vector<1x32x32xf32>
    %4 = arith.mulf %1, %3 : vector<1x32x32xf32>
    %c0_5 = arith.constant 0 : index
    %c0_6 = arith.constant 0 : index
    %c0_7 = arith.constant 0 : index
    %5 = vector.load %arg4[%c0_5, %c0_6, %c0_7] : memref<1x1x32xf32, #tpu.memory_space<vmem>>, vector<1x1x32xf32>
    %6 = vector.broadcast %5 : vector<1x1x32xf32> to vector<1x32x32xf32>
    %7 = arith.addf %4, %6 : vector<1x32x32xf32>
    %cst = arith.constant 0.000000e+00 : f32
    %8 = vector.broadcast %cst : f32 to vector<1x32x32xf32>
    %9 = arith.maximumf %7, %8 : vector<1x32x32xf32>
    %10 = arith.truncf %9 : vector<1x32x32xf32> to vector<1x32x32xbf16>
    %c0_8 = arith.constant 0 : index
    %c0_9 = arith.constant 0 : index
    %c0_10 = arith.constant 0 : index
    %11 = vector.load %arg5[%c0_8, %c0_9, %c0_10] : memref<1x32x32xbf16, #tpu.memory_space<vmem>>, vector<1x32x32xbf16>
    tpu.vector_store %arg5[%c0_8, %c0_9, %c0_10], %10 {strides = array<i32>} : memref<1x32x32xbf16, #tpu.memory_space<vmem>>, vector<1x32x32xbf16>,
    return
  }
  func.func @transform_0(%arg0: i32, %arg1: i32) -> (i32, i32, i32) {
    %c0_i32 = arith.constant 0 : i32
    %c0_i32_0 = arith.constant 0 : i32
    return %arg0, %arg1, %c0_i32 : i32, i32, i32
  }
  func.func @transform_1(%arg0: i32, %arg1: i32) -> (i32, i32, i32) {
    %c0_i32 = arith.constant 0 : i32
    %c0_i32_0 = arith.constant 0 : i32
    %c0_i32_1 = arith.constant 0 : i32
    return %arg0, %c0_i32, %c0_i32_0 : i32, i32, i32
  }
  func.func @transform_2(%arg0: i32, %arg1: i32) -> (i32, i32, i32) {
    %c0_i32 = arith.constant 0 : i32
    %c0_i32_0 = arith.constant 0 : i32
    %c0_i32_1 = arith.constant 0 : i32
    return %arg0, %c0_i32, %c0_i32_0 : i32, i32, i32
  }
  func.func @transform_3(%arg0: i32, %arg1: i32) -> (i32, i32, i32) {
    %c0_i32 = arith.constant 0 : i32
    %c0_i32_0 = arith.constant 0 : i32
    return %arg0, %arg1, %c0_i32 : i32, i32, i32
  }
}

module attributes {stable_mosaic.version = 11 : i64} {
  func.func @kernel(%arg0: i32, %arg1: memref<32x288xbf16, #tpu.memory_space<vmem>>, %arg2: memref<288x128xbf16, #tpu.memory_space<vmem>>, %arg3: memref<1x128xf32, #tpu.memory_space<vmem>>, %arg4: memref<32x128xbf16, #tpu.memory_space<vmem>>, %arg5: memref<1x128xf32, #tpu.memory_space<vmem>>, %arg6: memref<1x128xf32, #tpu.memory_space<vmem>>) attributes {dimension_semantics = [#tpu.dimension_semantics<arbitrary>], iteration_bounds = array<i64: 1>, scalar_prefetch = 0 : i64, scratch_operands = 0 : i64, tpu.core_type = #tpu.core_type<tc>, window_params = [{transform_indices = @transform_0, window_bounds = array<i64: 32, 288>}, {pipeline_mode = #tpu.pipeline_mode<synchronous>, transform_indices = @transform_1, window_bounds = array<i64: 288, 128>}, {pipeline_mode = #tpu.pipeline_mode<synchronous>, transform_indices = @transform_2, window_bounds = array<i64: 1, 128>}, {transform_indices = @transform_3, window_bounds = array<i64: 32, 128>}, {pipeline_mode = #tpu.pipeline_mode<synchronous>, transform_indices = @transform_4, window_bounds = array<i64: 1, 128>}, {pipeline_mode = #tpu.pipeline_mode<synchronous>, transform_indices = @transform_5, window_bounds = array<i64: 1, 128>}]} {
    %c0 = arith.constant 0 : index
    %c0_0 = arith.constant 0 : index
    %0 = vector.load %arg1[%c0, %c0_0] : memref<32x288xbf16, #tpu.memory_space<vmem>>, vector<32x288xbf16>
    %c0_1 = arith.constant 0 : index
    %c0_2 = arith.constant 0 : index
    %1 = vector.load %arg2[%c0_1, %c0_2] : memref<288x128xbf16, #tpu.memory_space<vmem>>, vector<288x128xbf16>
    %cst = arith.constant dense<0.000000e+00> : vector<32x128xf32>
    %2 = tpu.matmul %0, %1, %cst {dimension_numbers = #tpu.dot_dimension_numbers<[1], [0], [0], [1], [0, 0, 1, 1], [], []>} : vector<32x288xbf16>, vector<288x128xbf16>, vector<32x128xf32> -> vector<32x128xf32>
    %c0_3 = arith.constant 0 : index
    %c0_4 = arith.constant 0 : index
    %3 = vector.load %arg3[%c0_3, %c0_4] : memref<1x128xf32, #tpu.memory_space<vmem>>, vector<1x128xf32>
    %4 = vector.broadcast %3 : vector<1x128xf32> to vector<32x128xf32>
    %5 = arith.addf %2, %4 : vector<32x128xf32>
    %6 = arith.truncf %5 : vector<32x128xf32> to vector<32x128xbf16>
    %c0_5 = arith.constant 0 : index
    %c0_6 = arith.constant 0 : index
    %7 = vector.load %arg4[%c0_5, %c0_6] : memref<32x128xbf16, #tpu.memory_space<vmem>>, vector<32x128xbf16>
    tpu.vector_store %arg4[%c0_5, %c0_6], %6 {strides = array<i32>} : memref<32x128xbf16, #tpu.memory_space<vmem>>, vector<32x128xbf16>,
    %c0_i32 = arith.constant 0 : i32
    %8 = arith.cmpi eq, %arg0, %c0_i32 : i32
    %9 = arith.extui %8 : i1 to i32
    %c0_i32_7 = arith.constant 0 : i32
    %10 = arith.cmpi ne, %9, %c0_i32_7 : i32
    scf.if %10 {
      %cst_18 = arith.constant 0.000000e+00 : f32
      %22 = vector.broadcast %cst_18 : f32 to vector<1x128xf32>
      %c0_19 = arith.constant 0 : index
      %c0_20 = arith.constant 0 : index
      %23 = vector.load %arg5[%c0_19, %c0_20] : memref<1x128xf32, #tpu.memory_space<vmem>>, vector<1x128xf32>
      tpu.vector_store %arg5[%c0_19, %c0_20], %22 {strides = array<i32>} : memref<1x128xf32, #tpu.memory_space<vmem>>, vector<1x128xf32>,
      %cst_21 = arith.constant 0.000000e+00 : f32
      %24 = vector.broadcast %cst_21 : f32 to vector<1x128xf32>
      %c0_22 = arith.constant 0 : index
      %c0_23 = arith.constant 0 : index
      %25 = vector.load %arg6[%c0_22, %c0_23] : memref<1x128xf32, #tpu.memory_space<vmem>>, vector<1x128xf32>
      tpu.vector_store %arg6[%c0_22, %c0_23], %24 {strides = array<i32>} : memref<1x128xf32, #tpu.memory_space<vmem>>, vector<1x128xf32>,
    } else {
    }
    %c0_8 = arith.constant 0 : index
    %c0_9 = arith.constant 0 : index
    %11 = vector.load %arg5[%c0_8, %c0_9] : memref<1x128xf32, #tpu.memory_space<vmem>>, vector<1x128xf32>
    %cst_10 = arith.constant dense<0.000000e+00> : vector<128xf32>
    %12 = vector.multi_reduction <add>, %5, %cst_10 [0] : vector<32x128xf32> to vector<128xf32>
    %13 = vector.shape_cast %12 : vector<128xf32> to vector<1x128xf32>
    %14 = arith.addf %11, %13 : vector<1x128xf32>
    %c0_11 = arith.constant 0 : index
    %c0_12 = arith.constant 0 : index
    %15 = vector.load %arg5[%c0_11, %c0_12] : memref<1x128xf32, #tpu.memory_space<vmem>>, vector<1x128xf32>
    tpu.vector_store %arg5[%c0_11, %c0_12], %14 {strides = array<i32>} : memref<1x128xf32, #tpu.memory_space<vmem>>, vector<1x128xf32>,
    %c0_13 = arith.constant 0 : index
    %c0_14 = arith.constant 0 : index
    %16 = vector.load %arg6[%c0_13, %c0_14] : memref<1x128xf32, #tpu.memory_space<vmem>>, vector<1x128xf32>
    %17 = arith.mulf %5, %5 : vector<32x128xf32>
    %cst_15 = arith.constant dense<0.000000e+00> : vector<128xf32>
    %18 = vector.multi_reduction <add>, %17, %cst_15 [0] : vector<32x128xf32> to vector<128xf32>
    %19 = vector.shape_cast %18 : vector<128xf32> to vector<1x128xf32>
    %20 = arith.addf %16, %19 : vector<1x128xf32>
    %c0_16 = arith.constant 0 : index
    %c0_17 = arith.constant 0 : index
    %21 = vector.load %arg6[%c0_16, %c0_17] : memref<1x128xf32, #tpu.memory_space<vmem>>, vector<1x128xf32>
    tpu.vector_store %arg6[%c0_16, %c0_17], %20 {strides = array<i32>} : memref<1x128xf32, #tpu.memory_space<vmem>>, vector<1x128xf32>,
    return
  }
  func.func @transform_0(%arg0: i32) -> (i32, i32) {
    %c0_i32 = arith.constant 0 : i32
    %c0_i32_0 = arith.constant 0 : i32
    return %arg0, %c0_i32 : i32, i32
  }
  func.func @transform_1(%arg0: i32) -> (i32, i32) {
    %c0_i32 = arith.constant 0 : i32
    %c0_i32_0 = arith.constant 0 : i32
    %c0_i32_1 = arith.constant 0 : i32
    return %c0_i32, %c0_i32_0 : i32, i32
  }
  func.func @transform_2(%arg0: i32) -> (i32, i32) {
    %c0_i32 = arith.constant 0 : i32
    %c0_i32_0 = arith.constant 0 : i32
    %c0_i32_1 = arith.constant 0 : i32
    return %c0_i32, %c0_i32_0 : i32, i32
  }
  func.func @transform_3(%arg0: i32) -> (i32, i32) {
    %c0_i32 = arith.constant 0 : i32
    %c0_i32_0 = arith.constant 0 : i32
    return %arg0, %c0_i32 : i32, i32
  }
  func.func @transform_4(%arg0: i32) -> (i32, i32) {
    %c0_i32 = arith.constant 0 : i32
    %c0_i32_0 = arith.constant 0 : i32
    %c0_i32_1 = arith.constant 0 : i32
    return %c0_i32, %c0_i32_0 : i32, i32
  }
  func.func @transform_5(%arg0: i32) -> (i32, i32) {
    %c0_i32 = arith.constant 0 : i32
    %c0_i32_0 = arith.constant 0 : i32
    %c0_i32_1 = arith.constant 0 : i32
    return %c0_i32, %c0_i32_0 : i32, i32
  }
}

module attributes {stable_mosaic.version = 11 : i64} {
  func.func @kernel(%arg0: i32, %arg1: i32, %arg2: memref<1x16x32xbf16, #tpu.memory_space<vmem>>, %arg3: memref<1x1x32xf32, #tpu.memory_space<vmem>>, %arg4: memref<1x1x32xf32, #tpu.memory_space<vmem>>) attributes {dimension_semantics = [#tpu.dimension_semantics<parallel>, #tpu.dimension_semantics<arbitrary>], iteration_bounds = array<i64: 2, 1>, scalar_prefetch = 0 : i64, scratch_operands = 0 : i64, tpu.core_type = #tpu.core_type<tc>, window_params = [{transform_indices = @transform_0, window_bounds = array<i64: 1, 16, 32>}, {transform_indices = @transform_1, window_bounds = array<i64: 1, 1, 32>}, {transform_indices = @transform_2, window_bounds = array<i64: 1, 1, 32>}]} {
    %c0_i32 = arith.constant 0 : i32
    %0 = arith.cmpi eq, %arg1, %c0_i32 : i32
    %1 = arith.extui %0 : i1 to i32
    %c0_i32_0 = arith.constant 0 : i32
    %2 = arith.cmpi ne, %1, %c0_i32_0 : i32
    scf.if %2 {
      %cst_16 = arith.constant 0.000000e+00 : f32
      %16 = vector.broadcast %cst_16 : f32 to vector<1x1x32xf32>
      %c0_17 = arith.constant 0 : index
      %c0_18 = arith.constant 0 : index
      %c0_19 = arith.constant 0 : index
      %17 = vector.load %arg3[%c0_17, %c0_18, %c0_19] : memref<1x1x32xf32, #tpu.memory_space<vmem>>, vector<1x1x32xf32>
      tpu.vector_store %arg3[%c0_17, %c0_18, %c0_19], %16 {strides = array<i32>} : memref<1x1x32xf32, #tpu.memory_space<vmem>>, vector<1x1x32xf32>,
      %cst_20 = arith.constant 0.000000e+00 : f32
      %18 = vector.broadcast %cst_20 : f32 to vector<1x1x32xf32>
      %c0_21 = arith.constant 0 : index
      %c0_22 = arith.constant 0 : index
      %c0_23 = arith.constant 0 : index
      %19 = vector.load %arg4[%c0_21, %c0_22, %c0_23] : memref<1x1x32xf32, #tpu.memory_space<vmem>>, vector<1x1x32xf32>
      tpu.vector_store %arg4[%c0_21, %c0_22, %c0_23], %18 {strides = array<i32>} : memref<1x1x32xf32, #tpu.memory_space<vmem>>, vector<1x1x32xf32>,
    } else {
    }
    %c0 = arith.constant 0 : index
    %c0_1 = arith.constant 0 : index
    %c0_2 = arith.constant 0 : index
    %3 = vector.load %arg2[%c0, %c0_1, %c0_2] : memref<1x16x32xbf16, #tpu.memory_space<vmem>>, vector<1x16x32xbf16>
    %4 = arith.extf %3 : vector<1x16x32xbf16> to vector<1x16x32xf32>
    %c0_3 = arith.constant 0 : index
    %c0_4 = arith.constant 0 : index
    %c0_5 = arith.constant 0 : index
    %5 = vector.load %arg3[%c0_3, %c0_4, %c0_5] : memref<1x1x32xf32, #tpu.memory_space<vmem>>, vector<1x1x32xf32>
    %cst = arith.constant dense<0.000000e+00> : vector<1x32xf32>
    %6 = vector.multi_reduction <add>, %4, %cst [1] : vector<1x16x32xf32> to vector<1x32xf32>
    %7 = vector.shape_cast %6 : vector<1x32xf32> to vector<1x1x32xf32>
    %8 = arith.addf %5, %7 : vector<1x1x32xf32>
    %c0_6 = arith.constant 0 : index
    %c0_7 = arith.constant 0 : index
    %c0_8 = arith.constant 0 : index
    %9 = vector.load %arg3[%c0_6, %c0_7, %c0_8] : memref<1x1x32xf32, #tpu.memory_space<vmem>>, vector<1x1x32xf32>
    tpu.vector_store %arg3[%c0_6, %c0_7, %c0_8], %8 {strides = array<i32>} : memref<1x1x32xf32, #tpu.memory_space<vmem>>, vector<1x1x32xf32>,
    %c0_9 = arith.constant 0 : index
    %c0_10 = arith.constant 0 : index
    %c0_11 = arith.constant 0 : index
    %10 = vector.load %arg4[%c0_9, %c0_10, %c0_11] : memref<1x1x32xf32, #tpu.memory_space<vmem>>, vector<1x1x32xf32>
    %11 = arith.mulf %4, %4 : vector<1x16x32xf32>
    %cst_12 = arith.constant dense<0.000000e+00> : vector<1x32xf32>
    %12 = vector.multi_reduction <add>, %11, %cst_12 [1] : vector<1x16x32xf32> to vector<1x32xf32>
    %13 = vector.shape_cast %12 : vector<1x32xf32> to vector<1x1x32xf32>
    %14 = arith.addf %10, %13 : vector<1x1x32xf32>
    %c0_13 = arith.constant 0 : index
    %c0_14 = arith.constant 0 : index
    %c0_15 = arith.constant 0 : index
    %15 = vector.load %arg4[%c0_13, %c0_14, %c0_15] : memref<1x1x32xf32, #tpu.memory_space<vmem>>, vector<1x1x32xf32>
    tpu.vector_store %arg4[%c0_13, %c0_14, %c0_15], %14 {strides = array<i32>} : memref<1x1x32xf32, #tpu.memory_space<vmem>>, vector<1x1x32xf32>,
    return
  }
  func.func @transform_0(%arg0: i32, %arg1: i32) -> (i32, i32, i32) {
    %c0_i32 = arith.constant 0 : i32
    %c0_i32_0 = arith.constant 0 : i32
    return %arg0, %arg1, %c0_i32 : i32, i32, i32
  }
  func.func @transform_1(%arg0: i32, %arg1: i32) -> (i32, i32, i32) {
    %c0_i32 = arith.constant 0 : i32
    %c0_i32_0 = arith.constant 0 : i32
    %c0_i32_1 = arith.constant 0 : i32
    return %arg0, %c0_i32, %c0_i32_0 : i32, i32, i32
  }
  func.func @transform_2(%arg0: i32, %arg1: i32) -> (i32, i32, i32) {
    %c0_i32 = arith.constant 0 : i32
    %c0_i32_0 = arith.constant 0 : i32
    %c0_i32_1 = arith.constant 0 : i32
    return %arg0, %c0_i32, %c0_i32_0 : i32, i32, i32
  }
}

module attributes {stable_mosaic.version = 11 : i64} {
  func.func @kernel(%arg0: i32, %arg1: i32, %arg2: memref<1x8x64xbf16, #tpu.memory_space<vmem>>, %arg3: memref<1x1x64xf32, #tpu.memory_space<vmem>>, %arg4: memref<1x1x64xf32, #tpu.memory_space<vmem>>, %arg5: memref<1x8x64xbf16, #tpu.memory_space<vmem>>) attributes {dimension_semantics = [#tpu.dimension_semantics<parallel>, #tpu.dimension_semantics<parallel>], iteration_bounds = array<i64: 1, 1>, scalar_prefetch = 0 : i64, scratch_operands = 0 : i64, tpu.core_type = #tpu.core_type<tc>, window_params = [{transform_indices = @transform_0, window_bounds = array<i64: 1, 8, 64>}, {transform_indices = @transform_1, window_bounds = array<i64: 1, 1, 64>}, {transform_indices = @transform_2, window_bounds = array<i64: 1, 1, 64>}, {transform_indices = @transform_3, window_bounds = array<i64: 1, 8, 64>}]} {
    %c0 = arith.constant 0 : index
    %c0_0 = arith.constant 0 : index
    %c0_1 = arith.constant 0 : index
    %0 = vector.load %arg2[%c0, %c0_0, %c0_1] : memref<1x8x64xbf16, #tpu.memory_space<vmem>>, vector<1x8x64xbf16>
    %1 = arith.extf %0 : vector<1x8x64xbf16> to vector<1x8x64xf32>
    %c0_2 = arith.constant 0 : index
    %c0_3 = arith.constant 0 : index
    %c0_4 = arith.constant 0 : index
    %2 = vector.load %arg3[%c0_2, %c0_3, %c0_4] : memref<1x1x64xf32, #tpu.memory_space<vmem>>, vector<1x1x64xf32>
    %3 = vector.broadcast %2 : vector<1x1x64xf32> to vector<1x8x64xf32>
    %4 = arith.mulf %1, %3 : vector<1x8x64xf32>
    %c0_5 = arith.constant 0 : index
    %c0_6 = arith.constant 0 : index
    %c0_7 = arith.constant 0 : index
    %5 = vector.load %arg4[%c0_5, %c0_6, %c0_7] : memref<1x1x64xf32, #tpu.memory_space<vmem>>, vector<1x1x64xf32>
    %6 = vector.broadcast %5 : vector<1x1x64xf32> to vector<1x8x64xf32>
    %7 = arith.addf %4, %6 : vector<1x8x64xf32>
    %cst = arith.constant 0.000000e+00 : f32
    %8 = vector.broadcast %cst : f32 to vector<1x8x64xf32>
    %9 = arith.maximumf %7, %8 : vector<1x8x64xf32>
    %10 = arith.truncf %9 : vector<1x8x64xf32> to vector<1x8x64xbf16>
    %c0_8 = arith.constant 0 : index
    %c0_9 = arith.constant 0 : index
    %c0_10 = arith.constant 0 : index
    %11 = vector.load %arg5[%c0_8, %c0_9, %c0_10] : memref<1x8x64xbf16, #tpu.memory_space<vmem>>, vector<1x8x64xbf16>
    tpu.vector_store %arg5[%c0_8, %c0_9, %c0_10], %10 {strides = array<i32>} : memref<1x8x64xbf16, #tpu.memory_space<vmem>>, vector<1x8x64xbf16>,
    return
  }
  func.func @transform_0(%arg0: i32, %arg1: i32) -> (i32, i32, i32) {
    %c0_i32 = arith.constant 0 : i32
    %c0_i32_0 = arith.constant 0 : i32
    return %arg0, %arg1, %c0_i32 : i32, i32, i32
  }
  func.func @transform_1(%arg0: i32, %arg1: i32) -> (i32, i32, i32) {
    %c0_i32 = arith.constant 0 : i32
    %c0_i32_0 = arith.constant 0 : i32
    %c0_i32_1 = arith.constant 0 : i32
    return %arg0, %c0_i32, %c0_i32_0 : i32, i32, i32
  }
  func.func @transform_2(%arg0: i32, %arg1: i32) -> (i32, i32, i32) {
    %c0_i32 = arith.constant 0 : i32
    %c0_i32_0 = arith.constant 0 : i32
    %c0_i32_1 = arith.constant 0 : i32
    return %arg0, %c0_i32, %c0_i32_0 : i32, i32, i32
  }
  func.func @transform_3(%arg0: i32, %arg1: i32) -> (i32, i32, i32) {
    %c0_i32 = arith.constant 0 : i32
    %c0_i32_0 = arith.constant 0 : i32
    return %arg0, %arg1, %c0_i32 : i32, i32, i32
  }
}

module attributes {stable_mosaic.version = 11 : i64} {
  func.func @kernel(%arg0: i32, %arg1: memref<8x288xbf16, #tpu.memory_space<vmem>>, %arg2: memref<288x128xbf16, #tpu.memory_space<vmem>>, %arg3: memref<1x128xf32, #tpu.memory_space<vmem>>, %arg4: memref<8x128xbf16, #tpu.memory_space<vmem>>, %arg5: memref<1x128xf32, #tpu.memory_space<vmem>>, %arg6: memref<1x128xf32, #tpu.memory_space<vmem>>) attributes {dimension_semantics = [#tpu.dimension_semantics<arbitrary>], iteration_bounds = array<i64: 1>, scalar_prefetch = 0 : i64, scratch_operands = 0 : i64, tpu.core_type = #tpu.core_type<tc>, window_params = [{transform_indices = @transform_0, window_bounds = array<i64: 8, 288>}, {pipeline_mode = #tpu.pipeline_mode<synchronous>, transform_indices = @transform_1, window_bounds = array<i64: 288, 128>}, {pipeline_mode = #tpu.pipeline_mode<synchronous>, transform_indices = @transform_2, window_bounds = array<i64: 1, 128>}, {transform_indices = @transform_3, window_bounds = array<i64: 8, 128>}, {pipeline_mode = #tpu.pipeline_mode<synchronous>, transform_indices = @transform_4, window_bounds = array<i64: 1, 128>}, {pipeline_mode = #tpu.pipeline_mode<synchronous>, transform_indices = @transform_5, window_bounds = array<i64: 1, 128>}]} {
    %c0 = arith.constant 0 : index
    %c0_0 = arith.constant 0 : index
    %0 = vector.load %arg1[%c0, %c0_0] : memref<8x288xbf16, #tpu.memory_space<vmem>>, vector<8x288xbf16>
    %c0_1 = arith.constant 0 : index
    %c0_2 = arith.constant 0 : index
    %1 = vector.load %arg2[%c0_1, %c0_2] : memref<288x128xbf16, #tpu.memory_space<vmem>>, vector<288x128xbf16>
    %cst = arith.constant dense<0.000000e+00> : vector<8x128xf32>
    %2 = tpu.matmul %0, %1, %cst {dimension_numbers = #tpu.dot_dimension_numbers<[1], [0], [0], [1], [0, 0, 1, 1], [], []>} : vector<8x288xbf16>, vector<288x128xbf16>, vector<8x128xf32> -> vector<8x128xf32>
    %c0_3 = arith.constant 0 : index
    %c0_4 = arith.constant 0 : index
    %3 = vector.load %arg3[%c0_3, %c0_4] : memref<1x128xf32, #tpu.memory_space<vmem>>, vector<1x128xf32>
    %4 = vector.broadcast %3 : vector<1x128xf32> to vector<8x128xf32>
    %5 = arith.addf %2, %4 : vector<8x128xf32>
    %6 = arith.truncf %5 : vector<8x128xf32> to vector<8x128xbf16>
    %c0_5 = arith.constant 0 : index
    %c0_6 = arith.constant 0 : index
    %7 = vector.load %arg4[%c0_5, %c0_6] : memref<8x128xbf16, #tpu.memory_space<vmem>>, vector<8x128xbf16>
    tpu.vector_store %arg4[%c0_5, %c0_6], %6 {strides = array<i32>} : memref<8x128xbf16, #tpu.memory_space<vmem>>, vector<8x128xbf16>,
    %c0_i32 = arith.constant 0 : i32
    %8 = arith.cmpi eq, %arg0, %c0_i32 : i32
    %9 = arith.extui %8 : i1 to i32
    %c0_i32_7 = arith.constant 0 : i32
    %10 = arith.cmpi ne, %9, %c0_i32_7 : i32
    scf.if %10 {
      %cst_18 = arith.constant 0.000000e+00 : f32
      %22 = vector.broadcast %cst_18 : f32 to vector<1x128xf32>
      %c0_19 = arith.constant 0 : index
      %c0_20 = arith.constant 0 : index
      %23 = vector.load %arg5[%c0_19, %c0_20] : memref<1x128xf32, #tpu.memory_space<vmem>>, vector<1x128xf32>
      tpu.vector_store %arg5[%c0_19, %c0_20], %22 {strides = array<i32>} : memref<1x128xf32, #tpu.memory_space<vmem>>, vector<1x128xf32>,
      %cst_21 = arith.constant 0.000000e+00 : f32
      %24 = vector.broadcast %cst_21 : f32 to vector<1x128xf32>
      %c0_22 = arith.constant 0 : index
      %c0_23 = arith.constant 0 : index
      %25 = vector.load %arg6[%c0_22, %c0_23] : memref<1x128xf32, #tpu.memory_space<vmem>>, vector<1x128xf32>
      tpu.vector_store %arg6[%c0_22, %c0_23], %24 {strides = array<i32>} : memref<1x128xf32, #tpu.memory_space<vmem>>, vector<1x128xf32>,
    } else {
    }
    %c0_8 = arith.constant 0 : index
    %c0_9 = arith.constant 0 : index
    %11 = vector.load %arg5[%c0_8, %c0_9] : memref<1x128xf32, #tpu.memory_space<vmem>>, vector<1x128xf32>
    %cst_10 = arith.constant dense<0.000000e+00> : vector<128xf32>
    %12 = vector.multi_reduction <add>, %5, %cst_10 [0] : vector<8x128xf32> to vector<128xf32>
    %13 = vector.shape_cast %12 : vector<128xf32> to vector<1x128xf32>
    %14 = arith.addf %11, %13 : vector<1x128xf32>
    %c0_11 = arith.constant 0 : index
    %c0_12 = arith.constant 0 : index
    %15 = vector.load %arg5[%c0_11, %c0_12] : memref<1x128xf32, #tpu.memory_space<vmem>>, vector<1x128xf32>
    tpu.vector_store %arg5[%c0_11, %c0_12], %14 {strides = array<i32>} : memref<1x128xf32, #tpu.memory_space<vmem>>, vector<1x128xf32>,
    %c0_13 = arith.constant 0 : index
    %c0_14 = arith.constant 0 : index
    %16 = vector.load %arg6[%c0_13, %c0_14] : memref<1x128xf32, #tpu.memory_space<vmem>>, vector<1x128xf32>
    %17 = arith.mulf %5, %5 : vector<8x128xf32>
    %cst_15 = arith.constant dense<0.000000e+00> : vector<128xf32>
    %18 = vector.multi_reduction <add>, %17, %cst_15 [0] : vector<8x128xf32> to vector<128xf32>
    %19 = vector.shape_cast %18 : vector<128xf32> to vector<1x128xf32>
    %20 = arith.addf %16, %19 : vector<1x128xf32>
    %c0_16 = arith.constant 0 : index
    %c0_17 = arith.constant 0 : index
    %21 = vector.load %arg6[%c0_16, %c0_17] : memref<1x128xf32, #tpu.memory_space<vmem>>, vector<1x128xf32>
    tpu.vector_store %arg6[%c0_16, %c0_17], %20 {strides = array<i32>} : memref<1x128xf32, #tpu.memory_space<vmem>>, vector<1x128xf32>,
    return
  }
  func.func @transform_0(%arg0: i32) -> (i32, i32) {
    %c0_i32 = arith.constant 0 : i32
    %c0_i32_0 = arith.constant 0 : i32
    return %arg0, %c0_i32 : i32, i32
  }
  func.func @transform_1(%arg0: i32) -> (i32, i32) {
    %c0_i32 = arith.constant 0 : i32
    %c0_i32_0 = arith.constant 0 : i32
    %c0_i32_1 = arith.constant 0 : i32
    return %c0_i32, %c0_i32_0 : i32, i32
  }
  func.func @transform_2(%arg0: i32) -> (i32, i32) {
    %c0_i32 = arith.constant 0 : i32
    %c0_i32_0 = arith.constant 0 : i32
    %c0_i32_1 = arith.constant 0 : i32
    return %c0_i32, %c0_i32_0 : i32, i32
  }
  func.func @transform_3(%arg0: i32) -> (i32, i32) {
    %c0_i32 = arith.constant 0 : i32
    %c0_i32_0 = arith.constant 0 : i32
    return %arg0, %c0_i32 : i32, i32
  }
  func.func @transform_4(%arg0: i32) -> (i32, i32) {
    %c0_i32 = arith.constant 0 : i32
    %c0_i32_0 = arith.constant 0 : i32
    %c0_i32_1 = arith.constant 0 : i32
    return %c0_i32, %c0_i32_0 : i32, i32
  }
  func.func @transform_5(%arg0: i32) -> (i32, i32) {
    %c0_i32 = arith.constant 0 : i32
    %c0_i32_0 = arith.constant 0 : i32
    %c0_i32_1 = arith.constant 0 : i32
    return %c0_i32, %c0_i32_0 : i32, i32
  }
}

module attributes {stable_mosaic.version = 11 : i64} {
  func.func @kernel(%arg0: i32, %arg1: memref<8x576xbf16, #tpu.memory_space<vmem>>, %arg2: memref<576x128xbf16, #tpu.memory_space<vmem>>, %arg3: memref<1x128xf32, #tpu.memory_space<vmem>>, %arg4: memref<8x128xbf16, #tpu.memory_space<vmem>>, %arg5: memref<1x128xf32, #tpu.memory_space<vmem>>, %arg6: memref<1x128xf32, #tpu.memory_space<vmem>>) attributes {dimension_semantics = [#tpu.dimension_semantics<arbitrary>], iteration_bounds = array<i64: 1>, scalar_prefetch = 0 : i64, scratch_operands = 0 : i64, tpu.core_type = #tpu.core_type<tc>, window_params = [{transform_indices = @transform_0, window_bounds = array<i64: 8, 576>}, {pipeline_mode = #tpu.pipeline_mode<synchronous>, transform_indices = @transform_1, window_bounds = array<i64: 576, 128>}, {pipeline_mode = #tpu.pipeline_mode<synchronous>, transform_indices = @transform_2, window_bounds = array<i64: 1, 128>}, {transform_indices = @transform_3, window_bounds = array<i64: 8, 128>}, {pipeline_mode = #tpu.pipeline_mode<synchronous>, transform_indices = @transform_4, window_bounds = array<i64: 1, 128>}, {pipeline_mode = #tpu.pipeline_mode<synchronous>, transform_indices = @transform_5, window_bounds = array<i64: 1, 128>}]} {
    %c0 = arith.constant 0 : index
    %c0_0 = arith.constant 0 : index
    %0 = vector.load %arg1[%c0, %c0_0] : memref<8x576xbf16, #tpu.memory_space<vmem>>, vector<8x576xbf16>
    %c0_1 = arith.constant 0 : index
    %c0_2 = arith.constant 0 : index
    %1 = vector.load %arg2[%c0_1, %c0_2] : memref<576x128xbf16, #tpu.memory_space<vmem>>, vector<576x128xbf16>
    %cst = arith.constant dense<0.000000e+00> : vector<8x128xf32>
    %2 = tpu.matmul %0, %1, %cst {dimension_numbers = #tpu.dot_dimension_numbers<[1], [0], [0], [1], [0, 0, 1, 1], [], []>} : vector<8x576xbf16>, vector<576x128xbf16>, vector<8x128xf32> -> vector<8x128xf32>
    %c0_3 = arith.constant 0 : index
    %c0_4 = arith.constant 0 : index
    %3 = vector.load %arg3[%c0_3, %c0_4] : memref<1x128xf32, #tpu.memory_space<vmem>>, vector<1x128xf32>
    %4 = vector.broadcast %3 : vector<1x128xf32> to vector<8x128xf32>
    %5 = arith.addf %2, %4 : vector<8x128xf32>
    %6 = arith.truncf %5 : vector<8x128xf32> to vector<8x128xbf16>
    %c0_5 = arith.constant 0 : index
    %c0_6 = arith.constant 0 : index
    %7 = vector.load %arg4[%c0_5, %c0_6] : memref<8x128xbf16, #tpu.memory_space<vmem>>, vector<8x128xbf16>
    tpu.vector_store %arg4[%c0_5, %c0_6], %6 {strides = array<i32>} : memref<8x128xbf16, #tpu.memory_space<vmem>>, vector<8x128xbf16>,
    %c0_i32 = arith.constant 0 : i32
    %8 = arith.cmpi eq, %arg0, %c0_i32 : i32
    %9 = arith.extui %8 : i1 to i32
    %c0_i32_7 = arith.constant 0 : i32
    %10 = arith.cmpi ne, %9, %c0_i32_7 : i32
    scf.if %10 {
      %cst_18 = arith.constant 0.000000e+00 : f32
      %22 = vector.broadcast %cst_18 : f32 to vector<1x128xf32>
      %c0_19 = arith.constant 0 : index
      %c0_20 = arith.constant 0 : index
      %23 = vector.load %arg5[%c0_19, %c0_20] : memref<1x128xf32, #tpu.memory_space<vmem>>, vector<1x128xf32>
      tpu.vector_store %arg5[%c0_19, %c0_20], %22 {strides = array<i32>} : memref<1x128xf32, #tpu.memory_space<vmem>>, vector<1x128xf32>,
      %cst_21 = arith.constant 0.000000e+00 : f32
      %24 = vector.broadcast %cst_21 : f32 to vector<1x128xf32>
      %c0_22 = arith.constant 0 : index
      %c0_23 = arith.constant 0 : index
      %25 = vector.load %arg6[%c0_22, %c0_23] : memref<1x128xf32, #tpu.memory_space<vmem>>, vector<1x128xf32>
      tpu.vector_store %arg6[%c0_22, %c0_23], %24 {strides = array<i32>} : memref<1x128xf32, #tpu.memory_space<vmem>>, vector<1x128xf32>,
    } else {
    }
    %c0_8 = arith.constant 0 : index
    %c0_9 = arith.constant 0 : index
    %11 = vector.load %arg5[%c0_8, %c0_9] : memref<1x128xf32, #tpu.memory_space<vmem>>, vector<1x128xf32>
    %cst_10 = arith.constant dense<0.000000e+00> : vector<128xf32>
    %12 = vector.multi_reduction <add>, %5, %cst_10 [0] : vector<8x128xf32> to vector<128xf32>
    %13 = vector.shape_cast %12 : vector<128xf32> to vector<1x128xf32>
    %14 = arith.addf %11, %13 : vector<1x128xf32>
    %c0_11 = arith.constant 0 : index
    %c0_12 = arith.constant 0 : index
    %15 = vector.load %arg5[%c0_11, %c0_12] : memref<1x128xf32, #tpu.memory_space<vmem>>, vector<1x128xf32>
    tpu.vector_store %arg5[%c0_11, %c0_12], %14 {strides = array<i32>} : memref<1x128xf32, #tpu.memory_space<vmem>>, vector<1x128xf32>,
    %c0_13 = arith.constant 0 : index
    %c0_14 = arith.constant 0 : index
    %16 = vector.load %arg6[%c0_13, %c0_14] : memref<1x128xf32, #tpu.memory_space<vmem>>, vector<1x128xf32>
    %17 = arith.mulf %5, %5 : vector<8x128xf32>
    %cst_15 = arith.constant dense<0.000000e+00> : vector<128xf32>
    %18 = vector.multi_reduction <add>, %17, %cst_15 [0] : vector<8x128xf32> to vector<128xf32>
    %19 = vector.shape_cast %18 : vector<128xf32> to vector<1x128xf32>
    %20 = arith.addf %16, %19 : vector<1x128xf32>
    %c0_16 = arith.constant 0 : index
    %c0_17 = arith.constant 0 : index
    %21 = vector.load %arg6[%c0_16, %c0_17] : memref<1x128xf32, #tpu.memory_space<vmem>>, vector<1x128xf32>
    tpu.vector_store %arg6[%c0_16, %c0_17], %20 {strides = array<i32>} : memref<1x128xf32, #tpu.memory_space<vmem>>, vector<1x128xf32>,
    return
  }
  func.func @transform_0(%arg0: i32) -> (i32, i32) {
    %c0_i32 = arith.constant 0 : i32
    %c0_i32_0 = arith.constant 0 : i32
    return %arg0, %c0_i32 : i32, i32
  }
  func.func @transform_1(%arg0: i32) -> (i32, i32) {
    %c0_i32 = arith.constant 0 : i32
    %c0_i32_0 = arith.constant 0 : i32
    %c0_i32_1 = arith.constant 0 : i32
    return %c0_i32, %c0_i32_0 : i32, i32
  }
  func.func @transform_2(%arg0: i32) -> (i32, i32) {
    %c0_i32 = arith.constant 0 : i32
    %c0_i32_0 = arith.constant 0 : i32
    %c0_i32_1 = arith.constant 0 : i32
    return %c0_i32, %c0_i32_0 : i32, i32
  }
  func.func @transform_3(%arg0: i32) -> (i32, i32) {
    %c0_i32 = arith.constant 0 : i32
    %c0_i32_0 = arith.constant 0 : i32
    return %arg0, %c0_i32 : i32, i32
  }
  func.func @transform_4(%arg0: i32) -> (i32, i32) {
    %c0_i32 = arith.constant 0 : i32
    %c0_i32_0 = arith.constant 0 : i32
    %c0_i32_1 = arith.constant 0 : i32
    return %c0_i32, %c0_i32_0 : i32, i32
  }
  func.func @transform_5(%arg0: i32) -> (i32, i32) {
    %c0_i32 = arith.constant 0 : i32
    %c0_i32_0 = arith.constant 0 : i32
    %c0_i32_1 = arith.constant 0 : i32
    return %c0_i32, %c0_i32_0 : i32, i32
  }
}

module attributes {stable_mosaic.version = 11 : i64} {
  func.func @kernel(%arg0: i32, %arg1: memref<8x64xbf16, #tpu.memory_space<vmem>>, %arg2: memref<64x128xbf16, #tpu.memory_space<vmem>>, %arg3: memref<1x128xf32, #tpu.memory_space<vmem>>, %arg4: memref<8x128xbf16, #tpu.memory_space<vmem>>) attributes {dimension_semantics = [#tpu.dimension_semantics<parallel>], iteration_bounds = array<i64: 1>, scalar_prefetch = 0 : i64, scratch_operands = 0 : i64, tpu.core_type = #tpu.core_type<tc>, window_params = [{transform_indices = @transform_0, window_bounds = array<i64: 8, 64>}, {pipeline_mode = #tpu.pipeline_mode<synchronous>, transform_indices = @transform_1, window_bounds = array<i64: 64, 128>}, {pipeline_mode = #tpu.pipeline_mode<synchronous>, transform_indices = @transform_2, window_bounds = array<i64: 1, 128>}, {transform_indices = @transform_3, window_bounds = array<i64: 8, 128>}]} {
    %c0 = arith.constant 0 : index
    %c0_0 = arith.constant 0 : index
    %0 = vector.load %arg1[%c0, %c0_0] : memref<8x64xbf16, #tpu.memory_space<vmem>>, vector<8x64xbf16>
    %c0_1 = arith.constant 0 : index
    %c0_2 = arith.constant 0 : index
    %1 = vector.load %arg2[%c0_1, %c0_2] : memref<64x128xbf16, #tpu.memory_space<vmem>>, vector<64x128xbf16>
    %cst = arith.constant dense<0.000000e+00> : vector<8x128xf32>
    %2 = tpu.matmul %0, %1, %cst {dimension_numbers = #tpu.dot_dimension_numbers<[1], [0], [0], [1], [0, 0, 1, 1], [], []>} : vector<8x64xbf16>, vector<64x128xbf16>, vector<8x128xf32> -> vector<8x128xf32>
    %c0_3 = arith.constant 0 : index
    %c0_4 = arith.constant 0 : index
    %3 = vector.load %arg3[%c0_3, %c0_4] : memref<1x128xf32, #tpu.memory_space<vmem>>, vector<1x128xf32>
    %4 = vector.broadcast %3 : vector<1x128xf32> to vector<8x128xf32>
    %5 = arith.addf %2, %4 : vector<8x128xf32>
    %6 = arith.truncf %5 : vector<8x128xf32> to vector<8x128xbf16>
    %c0_5 = arith.constant 0 : index
    %c0_6 = arith.constant 0 : index
    %7 = vector.load %arg4[%c0_5, %c0_6] : memref<8x128xbf16, #tpu.memory_space<vmem>>, vector<8x128xbf16>
    tpu.vector_store %arg4[%c0_5, %c0_6], %6 {strides = array<i32>} : memref<8x128xbf16, #tpu.memory_space<vmem>>, vector<8x128xbf16>,
    return
  }
  func.func @transform_0(%arg0: i32) -> (i32, i32) {
    %c0_i32 = arith.constant 0 : i32
    %c0_i32_0 = arith.constant 0 : i32
    return %arg0, %c0_i32 : i32, i32
  }
  func.func @transform_1(%arg0: i32) -> (i32, i32) {
    %c0_i32 = arith.constant 0 : i32
    %c0_i32_0 = arith.constant 0 : i32
    %c0_i32_1 = arith.constant 0 : i32
    return %c0_i32, %c0_i32_0 : i32, i32
  }
  func.func @transform_2(%arg0: i32) -> (i32, i32) {
    %c0_i32 = arith.constant 0 : i32
    %c0_i32_0 = arith.constant 0 : i32
    %c0_i32_1 = arith.constant 0 : i32
    return %c0_i32, %c0_i32_0 : i32, i32
  }
  func.func @transform_3(%arg0: i32) -> (i32, i32) {
    %c0_i32 = arith.constant 0 : i32
    %c0_i32_0 = arith.constant 0 : i32
    return %arg0, %c0_i32 : i32, i32
  }
}

module attributes {stable_mosaic.version = 11 : i64} {
  func.func @kernel(%arg0: i32, %arg1: i32, %arg2: memref<1x16x32xbf16, #tpu.memory_space<vmem>>, %arg3: memref<1x1x32xf32, #tpu.memory_space<vmem>>, %arg4: memref<1x1x32xf32, #tpu.memory_space<vmem>>, %arg5: memref<1x16x32xbf16, #tpu.memory_space<vmem>>) attributes {dimension_semantics = [#tpu.dimension_semantics<parallel>, #tpu.dimension_semantics<parallel>], iteration_bounds = array<i64: 2, 1>, scalar_prefetch = 0 : i64, scratch_operands = 0 : i64, tpu.core_type = #tpu.core_type<tc>, window_params = [{transform_indices = @transform_0, window_bounds = array<i64: 1, 16, 32>}, {transform_indices = @transform_1, window_bounds = array<i64: 1, 1, 32>}, {transform_indices = @transform_2, window_bounds = array<i64: 1, 1, 32>}, {transform_indices = @transform_3, window_bounds = array<i64: 1, 16, 32>}]} {
    %c0 = arith.constant 0 : index
    %c0_0 = arith.constant 0 : index
    %c0_1 = arith.constant 0 : index
    %0 = vector.load %arg2[%c0, %c0_0, %c0_1] : memref<1x16x32xbf16, #tpu.memory_space<vmem>>, vector<1x16x32xbf16>
    %1 = arith.extf %0 : vector<1x16x32xbf16> to vector<1x16x32xf32>
    %c0_2 = arith.constant 0 : index
    %c0_3 = arith.constant 0 : index
    %c0_4 = arith.constant 0 : index
    %2 = vector.load %arg3[%c0_2, %c0_3, %c0_4] : memref<1x1x32xf32, #tpu.memory_space<vmem>>, vector<1x1x32xf32>
    %3 = vector.broadcast %2 : vector<1x1x32xf32> to vector<1x16x32xf32>
    %4 = arith.mulf %1, %3 : vector<1x16x32xf32>
    %c0_5 = arith.constant 0 : index
    %c0_6 = arith.constant 0 : index
    %c0_7 = arith.constant 0 : index
    %5 = vector.load %arg4[%c0_5, %c0_6, %c0_7] : memref<1x1x32xf32, #tpu.memory_space<vmem>>, vector<1x1x32xf32>
    %6 = vector.broadcast %5 : vector<1x1x32xf32> to vector<1x16x32xf32>
    %7 = arith.addf %4, %6 : vector<1x16x32xf32>
    %8 = arith.truncf %7 : vector<1x16x32xf32> to vector<1x16x32xbf16>
    %c0_8 = arith.constant 0 : index
    %c0_9 = arith.constant 0 : index
    %c0_10 = arith.constant 0 : index
    %9 = vector.load %arg5[%c0_8, %c0_9, %c0_10] : memref<1x16x32xbf16, #tpu.memory_space<vmem>>, vector<1x16x32xbf16>
    tpu.vector_store %arg5[%c0_8, %c0_9, %c0_10], %8 {strides = array<i32>} : memref<1x16x32xbf16, #tpu.memory_space<vmem>>, vector<1x16x32xbf16>,
    return
  }
  func.func @transform_0(%arg0: i32, %arg1: i32) -> (i32, i32, i32) {
    %c0_i32 = arith.constant 0 : i32
    %c0_i32_0 = arith.constant 0 : i32
    return %arg0, %arg1, %c0_i32 : i32, i32, i32
  }
  func.func @transform_1(%arg0: i32, %arg1: i32) -> (i32, i32, i32) {
    %c0_i32 = arith.constant 0 : i32
    %c0_i32_0 = arith.constant 0 : i32
    %c0_i32_1 = arith.constant 0 : i32
    return %arg0, %c0_i32, %c0_i32_0 : i32, i32, i32
  }
  func.func @transform_2(%arg0: i32, %arg1: i32) -> (i32, i32, i32) {
    %c0_i32 = arith.constant 0 : i32
    %c0_i32_0 = arith.constant 0 : i32
    %c0_i32_1 = arith.constant 0 : i32
    return %arg0, %c0_i32, %c0_i32_0 : i32, i32, i32
  }
  func.func @transform_3(%arg0: i32, %arg1: i32) -> (i32, i32, i32) {
    %c0_i32 = arith.constant 0 : i32
    %c0_i32_0 = arith.constant 0 : i32
    return %arg0, %arg1, %c0_i32 : i32, i32, i32
  }
}

module attributes {stable_mosaic.version = 11 : i64} {
  func.func @kernel(%arg0: i32, %arg1: memref<32x576xbf16, #tpu.memory_space<vmem>>, %arg2: memref<576x128xbf16, #tpu.memory_space<vmem>>, %arg3: memref<1x128xf32, #tpu.memory_space<vmem>>, %arg4: memref<32x128xbf16, #tpu.memory_space<vmem>>, %arg5: memref<1x128xf32, #tpu.memory_space<vmem>>, %arg6: memref<1x128xf32, #tpu.memory_space<vmem>>) attributes {dimension_semantics = [#tpu.dimension_semantics<arbitrary>], iteration_bounds = array<i64: 1>, scalar_prefetch = 0 : i64, scratch_operands = 0 : i64, tpu.core_type = #tpu.core_type<tc>, window_params = [{transform_indices = @transform_0, window_bounds = array<i64: 32, 576>}, {pipeline_mode = #tpu.pipeline_mode<synchronous>, transform_indices = @transform_1, window_bounds = array<i64: 576, 128>}, {pipeline_mode = #tpu.pipeline_mode<synchronous>, transform_indices = @transform_2, window_bounds = array<i64: 1, 128>}, {transform_indices = @transform_3, window_bounds = array<i64: 32, 128>}, {pipeline_mode = #tpu.pipeline_mode<synchronous>, transform_indices = @transform_4, window_bounds = array<i64: 1, 128>}, {pipeline_mode = #tpu.pipeline_mode<synchronous>, transform_indices = @transform_5, window_bounds = array<i64: 1, 128>}]} {
    %c0 = arith.constant 0 : index
    %c0_0 = arith.constant 0 : index
    %0 = vector.load %arg1[%c0, %c0_0] : memref<32x576xbf16, #tpu.memory_space<vmem>>, vector<32x576xbf16>
    %c0_1 = arith.constant 0 : index
    %c0_2 = arith.constant 0 : index
    %1 = vector.load %arg2[%c0_1, %c0_2] : memref<576x128xbf16, #tpu.memory_space<vmem>>, vector<576x128xbf16>
    %cst = arith.constant dense<0.000000e+00> : vector<32x128xf32>
    %2 = tpu.matmul %0, %1, %cst {dimension_numbers = #tpu.dot_dimension_numbers<[1], [0], [0], [1], [0, 0, 1, 1], [], []>} : vector<32x576xbf16>, vector<576x128xbf16>, vector<32x128xf32> -> vector<32x128xf32>
    %c0_3 = arith.constant 0 : index
    %c0_4 = arith.constant 0 : index
    %3 = vector.load %arg3[%c0_3, %c0_4] : memref<1x128xf32, #tpu.memory_space<vmem>>, vector<1x128xf32>
    %4 = vector.broadcast %3 : vector<1x128xf32> to vector<32x128xf32>
    %5 = arith.addf %2, %4 : vector<32x128xf32>
    %6 = arith.truncf %5 : vector<32x128xf32> to vector<32x128xbf16>
    %c0_5 = arith.constant 0 : index
    %c0_6 = arith.constant 0 : index
    %7 = vector.load %arg4[%c0_5, %c0_6] : memref<32x128xbf16, #tpu.memory_space<vmem>>, vector<32x128xbf16>
    tpu.vector_store %arg4[%c0_5, %c0_6], %6 {strides = array<i32>} : memref<32x128xbf16, #tpu.memory_space<vmem>>, vector<32x128xbf16>,
    %c0_i32 = arith.constant 0 : i32
    %8 = arith.cmpi eq, %arg0, %c0_i32 : i32
    %9 = arith.extui %8 : i1 to i32
    %c0_i32_7 = arith.constant 0 : i32
    %10 = arith.cmpi ne, %9, %c0_i32_7 : i32
    scf.if %10 {
      %cst_18 = arith.constant 0.000000e+00 : f32
      %22 = vector.broadcast %cst_18 : f32 to vector<1x128xf32>
      %c0_19 = arith.constant 0 : index
      %c0_20 = arith.constant 0 : index
      %23 = vector.load %arg5[%c0_19, %c0_20] : memref<1x128xf32, #tpu.memory_space<vmem>>, vector<1x128xf32>
      tpu.vector_store %arg5[%c0_19, %c0_20], %22 {strides = array<i32>} : memref<1x128xf32, #tpu.memory_space<vmem>>, vector<1x128xf32>,
      %cst_21 = arith.constant 0.000000e+00 : f32
      %24 = vector.broadcast %cst_21 : f32 to vector<1x128xf32>
      %c0_22 = arith.constant 0 : index
      %c0_23 = arith.constant 0 : index
      %25 = vector.load %arg6[%c0_22, %c0_23] : memref<1x128xf32, #tpu.memory_space<vmem>>, vector<1x128xf32>
      tpu.vector_store %arg6[%c0_22, %c0_23], %24 {strides = array<i32>} : memref<1x128xf32, #tpu.memory_space<vmem>>, vector<1x128xf32>,
    } else {
    }
    %c0_8 = arith.constant 0 : index
    %c0_9 = arith.constant 0 : index
    %11 = vector.load %arg5[%c0_8, %c0_9] : memref<1x128xf32, #tpu.memory_space<vmem>>, vector<1x128xf32>
    %cst_10 = arith.constant dense<0.000000e+00> : vector<128xf32>
    %12 = vector.multi_reduction <add>, %5, %cst_10 [0] : vector<32x128xf32> to vector<128xf32>
    %13 = vector.shape_cast %12 : vector<128xf32> to vector<1x128xf32>
    %14 = arith.addf %11, %13 : vector<1x128xf32>
    %c0_11 = arith.constant 0 : index
    %c0_12 = arith.constant 0 : index
    %15 = vector.load %arg5[%c0_11, %c0_12] : memref<1x128xf32, #tpu.memory_space<vmem>>, vector<1x128xf32>
    tpu.vector_store %arg5[%c0_11, %c0_12], %14 {strides = array<i32>} : memref<1x128xf32, #tpu.memory_space<vmem>>, vector<1x128xf32>,
    %c0_13 = arith.constant 0 : index
    %c0_14 = arith.constant 0 : index
    %16 = vector.load %arg6[%c0_13, %c0_14] : memref<1x128xf32, #tpu.memory_space<vmem>>, vector<1x128xf32>
    %17 = arith.mulf %5, %5 : vector<32x128xf32>
    %cst_15 = arith.constant dense<0.000000e+00> : vector<128xf32>
    %18 = vector.multi_reduction <add>, %17, %cst_15 [0] : vector<32x128xf32> to vector<128xf32>
    %19 = vector.shape_cast %18 : vector<128xf32> to vector<1x128xf32>
    %20 = arith.addf %16, %19 : vector<1x128xf32>
    %c0_16 = arith.constant 0 : index
    %c0_17 = arith.constant 0 : index
    %21 = vector.load %arg6[%c0_16, %c0_17] : memref<1x128xf32, #tpu.memory_space<vmem>>, vector<1x128xf32>
    tpu.vector_store %arg6[%c0_16, %c0_17], %20 {strides = array<i32>} : memref<1x128xf32, #tpu.memory_space<vmem>>, vector<1x128xf32>,
    return
  }
  func.func @transform_0(%arg0: i32) -> (i32, i32) {
    %c0_i32 = arith.constant 0 : i32
    %c0_i32_0 = arith.constant 0 : i32
    return %arg0, %c0_i32 : i32, i32
  }
  func.func @transform_1(%arg0: i32) -> (i32, i32) {
    %c0_i32 = arith.constant 0 : i32
    %c0_i32_0 = arith.constant 0 : i32
    %c0_i32_1 = arith.constant 0 : i32
    return %c0_i32, %c0_i32_0 : i32, i32
  }
  func.func @transform_2(%arg0: i32) -> (i32, i32) {
    %c0_i32 = arith.constant 0 : i32
    %c0_i32_0 = arith.constant 0 : i32
    %c0_i32_1 = arith.constant 0 : i32
    return %c0_i32, %c0_i32_0 : i32, i32
  }
  func.func @transform_3(%arg0: i32) -> (i32, i32) {
    %c0_i32 = arith.constant 0 : i32
    %c0_i32_0 = arith.constant 0 : i32
    return %arg0, %c0_i32 : i32, i32
  }
  func.func @transform_4(%arg0: i32) -> (i32, i32) {
    %c0_i32 = arith.constant 0 : i32
    %c0_i32_0 = arith.constant 0 : i32
    %c0_i32_1 = arith.constant 0 : i32
    return %c0_i32, %c0_i32_0 : i32, i32
  }
  func.func @transform_5(%arg0: i32) -> (i32, i32) {
    %c0_i32 = arith.constant 0 : i32
    %c0_i32_0 = arith.constant 0 : i32
    %c0_i32_1 = arith.constant 0 : i32
    return %c0_i32, %c0_i32_0 : i32, i32
  }
}

module attributes {stable_mosaic.version = 11 : i64} {
  func.func @kernel(%arg0: i32, %arg1: i32, %arg2: memref<1x64x16xbf16, #tpu.memory_space<vmem>>, %arg3: memref<1x1x16xf32, #tpu.memory_space<vmem>>, %arg4: memref<1x1x16xf32, #tpu.memory_space<vmem>>) attributes {dimension_semantics = [#tpu.dimension_semantics<parallel>, #tpu.dimension_semantics<arbitrary>], iteration_bounds = array<i64: 2, 1>, scalar_prefetch = 0 : i64, scratch_operands = 0 : i64, tpu.core_type = #tpu.core_type<tc>, window_params = [{transform_indices = @transform_0, window_bounds = array<i64: 1, 64, 16>}, {transform_indices = @transform_1, window_bounds = array<i64: 1, 1, 16>}, {transform_indices = @transform_2, window_bounds = array<i64: 1, 1, 16>}]} {
    %c0_i32 = arith.constant 0 : i32
    %0 = arith.cmpi eq, %arg1, %c0_i32 : i32
    %1 = arith.extui %0 : i1 to i32
    %c0_i32_0 = arith.constant 0 : i32
    %2 = arith.cmpi ne, %1, %c0_i32_0 : i32
    scf.if %2 {
      %cst_16 = arith.constant 0.000000e+00 : f32
      %16 = vector.broadcast %cst_16 : f32 to vector<1x1x16xf32>
      %c0_17 = arith.constant 0 : index
      %c0_18 = arith.constant 0 : index
      %c0_19 = arith.constant 0 : index
      %17 = vector.load %arg3[%c0_17, %c0_18, %c0_19] : memref<1x1x16xf32, #tpu.memory_space<vmem>>, vector<1x1x16xf32>
      tpu.vector_store %arg3[%c0_17, %c0_18, %c0_19], %16 {strides = array<i32>} : memref<1x1x16xf32, #tpu.memory_space<vmem>>, vector<1x1x16xf32>,
      %cst_20 = arith.constant 0.000000e+00 : f32
      %18 = vector.broadcast %cst_20 : f32 to vector<1x1x16xf32>
      %c0_21 = arith.constant 0 : index
      %c0_22 = arith.constant 0 : index
      %c0_23 = arith.constant 0 : index
      %19 = vector.load %arg4[%c0_21, %c0_22, %c0_23] : memref<1x1x16xf32, #tpu.memory_space<vmem>>, vector<1x1x16xf32>
      tpu.vector_store %arg4[%c0_21, %c0_22, %c0_23], %18 {strides = array<i32>} : memref<1x1x16xf32, #tpu.memory_space<vmem>>, vector<1x1x16xf32>,
    } else {
    }
    %c0 = arith.constant 0 : index
    %c0_1 = arith.constant 0 : index
    %c0_2 = arith.constant 0 : index
    %3 = vector.load %arg2[%c0, %c0_1, %c0_2] : memref<1x64x16xbf16, #tpu.memory_space<vmem>>, vector<1x64x16xbf16>
    %4 = arith.extf %3 : vector<1x64x16xbf16> to vector<1x64x16xf32>
    %c0_3 = arith.constant 0 : index
    %c0_4 = arith.constant 0 : index
    %c0_5 = arith.constant 0 : index
    %5 = vector.load %arg3[%c0_3, %c0_4, %c0_5] : memref<1x1x16xf32, #tpu.memory_space<vmem>>, vector<1x1x16xf32>
    %cst = arith.constant dense<0.000000e+00> : vector<1x16xf32>
    %6 = vector.multi_reduction <add>, %4, %cst [1] : vector<1x64x16xf32> to vector<1x16xf32>
    %7 = vector.shape_cast %6 : vector<1x16xf32> to vector<1x1x16xf32>
    %8 = arith.addf %5, %7 : vector<1x1x16xf32>
    %c0_6 = arith.constant 0 : index
    %c0_7 = arith.constant 0 : index
    %c0_8 = arith.constant 0 : index
    %9 = vector.load %arg3[%c0_6, %c0_7, %c0_8] : memref<1x1x16xf32, #tpu.memory_space<vmem>>, vector<1x1x16xf32>
    tpu.vector_store %arg3[%c0_6, %c0_7, %c0_8], %8 {strides = array<i32>} : memref<1x1x16xf32, #tpu.memory_space<vmem>>, vector<1x1x16xf32>,
    %c0_9 = arith.constant 0 : index
    %c0_10 = arith.constant 0 : index
    %c0_11 = arith.constant 0 : index
    %10 = vector.load %arg4[%c0_9, %c0_10, %c0_11] : memref<1x1x16xf32, #tpu.memory_space<vmem>>, vector<1x1x16xf32>
    %11 = arith.mulf %4, %4 : vector<1x64x16xf32>
    %cst_12 = arith.constant dense<0.000000e+00> : vector<1x16xf32>
    %12 = vector.multi_reduction <add>, %11, %cst_12 [1] : vector<1x64x16xf32> to vector<1x16xf32>
    %13 = vector.shape_cast %12 : vector<1x16xf32> to vector<1x1x16xf32>
    %14 = arith.addf %10, %13 : vector<1x1x16xf32>
    %c0_13 = arith.constant 0 : index
    %c0_14 = arith.constant 0 : index
    %c0_15 = arith.constant 0 : index
    %15 = vector.load %arg4[%c0_13, %c0_14, %c0_15] : memref<1x1x16xf32, #tpu.memory_space<vmem>>, vector<1x1x16xf32>
    tpu.vector_store %arg4[%c0_13, %c0_14, %c0_15], %14 {strides = array<i32>} : memref<1x1x16xf32, #tpu.memory_space<vmem>>, vector<1x1x16xf32>,
    return
  }
  func.func @transform_0(%arg0: i32, %arg1: i32) -> (i32, i32, i32) {
    %c0_i32 = arith.constant 0 : i32
    %c0_i32_0 = arith.constant 0 : i32
    return %arg0, %arg1, %c0_i32 : i32, i32, i32
  }
  func.func @transform_1(%arg0: i32, %arg1: i32) -> (i32, i32, i32) {
    %c0_i32 = arith.constant 0 : i32
    %c0_i32_0 = arith.constant 0 : i32
    %c0_i32_1 = arith.constant 0 : i32
    return %arg0, %c0_i32, %c0_i32_0 : i32, i32, i32
  }
  func.func @transform_2(%arg0: i32, %arg1: i32) -> (i32, i32, i32) {
    %c0_i32 = arith.constant 0 : i32
    %c0_i32_0 = arith.constant 0 : i32
    %c0_i32_1 = arith.constant 0 : i32
    return %arg0, %c0_i32, %c0_i32_0 : i32, i32, i32
  }
}

module attributes {stable_mosaic.version = 11 : i64} {
  func.func @kernel(%arg0: i32, %arg1: memref<32x32xbf16, #tpu.memory_space<vmem>>, %arg2: memref<32x128xbf16, #tpu.memory_space<vmem>>, %arg3: memref<1x128xf32, #tpu.memory_space<vmem>>, %arg4: memref<32x128xbf16, #tpu.memory_space<vmem>>) attributes {dimension_semantics = [#tpu.dimension_semantics<parallel>], iteration_bounds = array<i64: 1>, scalar_prefetch = 0 : i64, scratch_operands = 0 : i64, tpu.core_type = #tpu.core_type<tc>, window_params = [{transform_indices = @transform_0, window_bounds = array<i64: 32, 32>}, {pipeline_mode = #tpu.pipeline_mode<synchronous>, transform_indices = @transform_1, window_bounds = array<i64: 32, 128>}, {pipeline_mode = #tpu.pipeline_mode<synchronous>, transform_indices = @transform_2, window_bounds = array<i64: 1, 128>}, {transform_indices = @transform_3, window_bounds = array<i64: 32, 128>}]} {
    %c0 = arith.constant 0 : index
    %c0_0 = arith.constant 0 : index
    %0 = vector.load %arg1[%c0, %c0_0] : memref<32x32xbf16, #tpu.memory_space<vmem>>, vector<32x32xbf16>
    %c0_1 = arith.constant 0 : index
    %c0_2 = arith.constant 0 : index
    %1 = vector.load %arg2[%c0_1, %c0_2] : memref<32x128xbf16, #tpu.memory_space<vmem>>, vector<32x128xbf16>
    %cst = arith.constant dense<0.000000e+00> : vector<32x128xf32>
    %2 = tpu.matmul %0, %1, %cst {dimension_numbers = #tpu.dot_dimension_numbers<[1], [0], [0], [1], [0, 0, 1, 1], [], []>} : vector<32x32xbf16>, vector<32x128xbf16>, vector<32x128xf32> -> vector<32x128xf32>
    %c0_3 = arith.constant 0 : index
    %c0_4 = arith.constant 0 : index
    %3 = vector.load %arg3[%c0_3, %c0_4] : memref<1x128xf32, #tpu.memory_space<vmem>>, vector<1x128xf32>
    %4 = vector.broadcast %3 : vector<1x128xf32> to vector<32x128xf32>
    %5 = arith.addf %2, %4 : vector<32x128xf32>
    %6 = arith.truncf %5 : vector<32x128xf32> to vector<32x128xbf16>
    %c0_5 = arith.constant 0 : index
    %c0_6 = arith.constant 0 : index
    %7 = vector.load %arg4[%c0_5, %c0_6] : memref<32x128xbf16, #tpu.memory_space<vmem>>, vector<32x128xbf16>
    tpu.vector_store %arg4[%c0_5, %c0_6], %6 {strides = array<i32>} : memref<32x128xbf16, #tpu.memory_space<vmem>>, vector<32x128xbf16>,
    return
  }
  func.func @transform_0(%arg0: i32) -> (i32, i32) {
    %c0_i32 = arith.constant 0 : i32
    %c0_i32_0 = arith.constant 0 : i32
    return %arg0, %c0_i32 : i32, i32
  }
  func.func @transform_1(%arg0: i32) -> (i32, i32) {
    %c0_i32 = arith.constant 0 : i32
    %c0_i32_0 = arith.constant 0 : i32
    %c0_i32_1 = arith.constant 0 : i32
    return %c0_i32, %c0_i32_0 : i32, i32
  }
  func.func @transform_2(%arg0: i32) -> (i32, i32) {
    %c0_i32 = arith.constant 0 : i32
    %c0_i32_0 = arith.constant 0 : i32
    %c0_i32_1 = arith.constant 0 : i32
    return %c0_i32, %c0_i32_0 : i32, i32
  }
  func.func @transform_3(%arg0: i32) -> (i32, i32) {
    %c0_i32 = arith.constant 0 : i32
    %c0_i32_0 = arith.constant 0 : i32
    return %arg0, %c0_i32 : i32, i32
  }
}

module attributes {stable_mosaic.version = 11 : i64} {
  func.func @kernel(%arg0: i32, %arg1: i32, %arg2: memref<1x64x16xbf16, #tpu.memory_space<vmem>>, %arg3: memref<1x1x16xf32, #tpu.memory_space<vmem>>, %arg4: memref<1x1x16xf32, #tpu.memory_space<vmem>>, %arg5: memref<1x64x16xbf16, #tpu.memory_space<vmem>>) attributes {dimension_semantics = [#tpu.dimension_semantics<parallel>, #tpu.dimension_semantics<parallel>], iteration_bounds = array<i64: 2, 1>, scalar_prefetch = 0 : i64, scratch_operands = 0 : i64, tpu.core_type = #tpu.core_type<tc>, window_params = [{transform_indices = @transform_0, window_bounds = array<i64: 1, 64, 16>}, {transform_indices = @transform_1, window_bounds = array<i64: 1, 1, 16>}, {transform_indices = @transform_2, window_bounds = array<i64: 1, 1, 16>}, {transform_indices = @transform_3, window_bounds = array<i64: 1, 64, 16>}]} {
    %c0 = arith.constant 0 : index
    %c0_0 = arith.constant 0 : index
    %c0_1 = arith.constant 0 : index
    %0 = vector.load %arg2[%c0, %c0_0, %c0_1] : memref<1x64x16xbf16, #tpu.memory_space<vmem>>, vector<1x64x16xbf16>
    %1 = arith.extf %0 : vector<1x64x16xbf16> to vector<1x64x16xf32>
    %c0_2 = arith.constant 0 : index
    %c0_3 = arith.constant 0 : index
    %c0_4 = arith.constant 0 : index
    %2 = vector.load %arg3[%c0_2, %c0_3, %c0_4] : memref<1x1x16xf32, #tpu.memory_space<vmem>>, vector<1x1x16xf32>
    %3 = vector.broadcast %2 : vector<1x1x16xf32> to vector<1x64x16xf32>
    %4 = arith.mulf %1, %3 : vector<1x64x16xf32>
    %c0_5 = arith.constant 0 : index
    %c0_6 = arith.constant 0 : index
    %c0_7 = arith.constant 0 : index
    %5 = vector.load %arg4[%c0_5, %c0_6, %c0_7] : memref<1x1x16xf32, #tpu.memory_space<vmem>>, vector<1x1x16xf32>
    %6 = vector.broadcast %5 : vector<1x1x16xf32> to vector<1x64x16xf32>
    %7 = arith.addf %4, %6 : vector<1x64x16xf32>
    %8 = arith.truncf %7 : vector<1x64x16xf32> to vector<1x64x16xbf16>
    %c0_8 = arith.constant 0 : index
    %c0_9 = arith.constant 0 : index
    %c0_10 = arith.constant 0 : index
    %9 = vector.load %arg5[%c0_8, %c0_9, %c0_10] : memref<1x64x16xbf16, #tpu.memory_space<vmem>>, vector<1x64x16xbf16>
    tpu.vector_store %arg5[%c0_8, %c0_9, %c0_10], %8 {strides = array<i32>} : memref<1x64x16xbf16, #tpu.memory_space<vmem>>, vector<1x64x16xbf16>,
    return
  }
  func.func @transform_0(%arg0: i32, %arg1: i32) -> (i32, i32, i32) {
    %c0_i32 = arith.constant 0 : i32
    %c0_i32_0 = arith.constant 0 : i32
    return %arg0, %arg1, %c0_i32 : i32, i32, i32
  }
  func.func @transform_1(%arg0: i32, %arg1: i32) -> (i32, i32, i32) {
    %c0_i32 = arith.constant 0 : i32
    %c0_i32_0 = arith.constant 0 : i32
    %c0_i32_1 = arith.constant 0 : i32
    return %arg0, %c0_i32, %c0_i32_0 : i32, i32, i32
  }
  func.func @transform_2(%arg0: i32, %arg1: i32) -> (i32, i32, i32) {
    %c0_i32 = arith.constant 0 : i32
    %c0_i32_0 = arith.constant 0 : i32
    %c0_i32_1 = arith.constant 0 : i32
    return %arg0, %c0_i32, %c0_i32_0 : i32, i32, i32
  }
  func.func @transform_3(%arg0: i32, %arg1: i32) -> (i32, i32, i32) {
    %c0_i32 = arith.constant 0 : i32
    %c0_i32_0 = arith.constant 0 : i32
    return %arg0, %arg1, %c0_i32 : i32, i32, i32
  }
}

module attributes {stable_mosaic.version = 11 : i64} {
  func.func @kernel(%arg0: i32, %arg1: memref<128x288xbf16, #tpu.memory_space<vmem>>, %arg2: memref<288x128xbf16, #tpu.memory_space<vmem>>, %arg3: memref<1x128xf32, #tpu.memory_space<vmem>>, %arg4: memref<128x128xbf16, #tpu.memory_space<vmem>>, %arg5: memref<1x128xf32, #tpu.memory_space<vmem>>, %arg6: memref<1x128xf32, #tpu.memory_space<vmem>>) attributes {dimension_semantics = [#tpu.dimension_semantics<arbitrary>], iteration_bounds = array<i64: 1>, scalar_prefetch = 0 : i64, scratch_operands = 0 : i64, tpu.core_type = #tpu.core_type<tc>, window_params = [{transform_indices = @transform_0, window_bounds = array<i64: 128, 288>}, {pipeline_mode = #tpu.pipeline_mode<synchronous>, transform_indices = @transform_1, window_bounds = array<i64: 288, 128>}, {pipeline_mode = #tpu.pipeline_mode<synchronous>, transform_indices = @transform_2, window_bounds = array<i64: 1, 128>}, {transform_indices = @transform_3, window_bounds = array<i64: 128, 128>}, {pipeline_mode = #tpu.pipeline_mode<synchronous>, transform_indices = @transform_4, window_bounds = array<i64: 1, 128>}, {pipeline_mode = #tpu.pipeline_mode<synchronous>, transform_indices = @transform_5, window_bounds = array<i64: 1, 128>}]} {
    %c0 = arith.constant 0 : index
    %c0_0 = arith.constant 0 : index
    %0 = vector.load %arg1[%c0, %c0_0] : memref<128x288xbf16, #tpu.memory_space<vmem>>, vector<128x288xbf16>
    %c0_1 = arith.constant 0 : index
    %c0_2 = arith.constant 0 : index
    %1 = vector.load %arg2[%c0_1, %c0_2] : memref<288x128xbf16, #tpu.memory_space<vmem>>, vector<288x128xbf16>
    %cst = arith.constant dense<0.000000e+00> : vector<128x128xf32>
    %2 = tpu.matmul %0, %1, %cst {dimension_numbers = #tpu.dot_dimension_numbers<[1], [0], [0], [1], [0, 0, 1, 1], [], []>} : vector<128x288xbf16>, vector<288x128xbf16>, vector<128x128xf32> -> vector<128x128xf32>
    %c0_3 = arith.constant 0 : index
    %c0_4 = arith.constant 0 : index
    %3 = vector.load %arg3[%c0_3, %c0_4] : memref<1x128xf32, #tpu.memory_space<vmem>>, vector<1x128xf32>
    %4 = vector.broadcast %3 : vector<1x128xf32> to vector<128x128xf32>
    %5 = arith.addf %2, %4 : vector<128x128xf32>
    %6 = arith.truncf %5 : vector<128x128xf32> to vector<128x128xbf16>
    %c0_5 = arith.constant 0 : index
    %c0_6 = arith.constant 0 : index
    %7 = vector.load %arg4[%c0_5, %c0_6] : memref<128x128xbf16, #tpu.memory_space<vmem>>, vector<128x128xbf16>
    tpu.vector_store %arg4[%c0_5, %c0_6], %6 {strides = array<i32>} : memref<128x128xbf16, #tpu.memory_space<vmem>>, vector<128x128xbf16>,
    %c0_i32 = arith.constant 0 : i32
    %8 = arith.cmpi eq, %arg0, %c0_i32 : i32
    %9 = arith.extui %8 : i1 to i32
    %c0_i32_7 = arith.constant 0 : i32
    %10 = arith.cmpi ne, %9, %c0_i32_7 : i32
    scf.if %10 {
      %cst_18 = arith.constant 0.000000e+00 : f32
      %22 = vector.broadcast %cst_18 : f32 to vector<1x128xf32>
      %c0_19 = arith.constant 0 : index
      %c0_20 = arith.constant 0 : index
      %23 = vector.load %arg5[%c0_19, %c0_20] : memref<1x128xf32, #tpu.memory_space<vmem>>, vector<1x128xf32>
      tpu.vector_store %arg5[%c0_19, %c0_20], %22 {strides = array<i32>} : memref<1x128xf32, #tpu.memory_space<vmem>>, vector<1x128xf32>,
      %cst_21 = arith.constant 0.000000e+00 : f32
      %24 = vector.broadcast %cst_21 : f32 to vector<1x128xf32>
      %c0_22 = arith.constant 0 : index
      %c0_23 = arith.constant 0 : index
      %25 = vector.load %arg6[%c0_22, %c0_23] : memref<1x128xf32, #tpu.memory_space<vmem>>, vector<1x128xf32>
      tpu.vector_store %arg6[%c0_22, %c0_23], %24 {strides = array<i32>} : memref<1x128xf32, #tpu.memory_space<vmem>>, vector<1x128xf32>,
    } else {
    }
    %c0_8 = arith.constant 0 : index
    %c0_9 = arith.constant 0 : index
    %11 = vector.load %arg5[%c0_8, %c0_9] : memref<1x128xf32, #tpu.memory_space<vmem>>, vector<1x128xf32>
    %cst_10 = arith.constant dense<0.000000e+00> : vector<128xf32>
    %12 = vector.multi_reduction <add>, %5, %cst_10 [0] : vector<128x128xf32> to vector<128xf32>
    %13 = vector.shape_cast %12 : vector<128xf32> to vector<1x128xf32>
    %14 = arith.addf %11, %13 : vector<1x128xf32>
    %c0_11 = arith.constant 0 : index
    %c0_12 = arith.constant 0 : index
    %15 = vector.load %arg5[%c0_11, %c0_12] : memref<1x128xf32, #tpu.memory_space<vmem>>, vector<1x128xf32>
    tpu.vector_store %arg5[%c0_11, %c0_12], %14 {strides = array<i32>} : memref<1x128xf32, #tpu.memory_space<vmem>>, vector<1x128xf32>,
    %c0_13 = arith.constant 0 : index
    %c0_14 = arith.constant 0 : index
    %16 = vector.load %arg6[%c0_13, %c0_14] : memref<1x128xf32, #tpu.memory_space<vmem>>, vector<1x128xf32>
    %17 = arith.mulf %5, %5 : vector<128x128xf32>
    %cst_15 = arith.constant dense<0.000000e+00> : vector<128xf32>
    %18 = vector.multi_reduction <add>, %17, %cst_15 [0] : vector<128x128xf32> to vector<128xf32>
    %19 = vector.shape_cast %18 : vector<128xf32> to vector<1x128xf32>
    %20 = arith.addf %16, %19 : vector<1x128xf32>
    %c0_16 = arith.constant 0 : index
    %c0_17 = arith.constant 0 : index
    %21 = vector.load %arg6[%c0_16, %c0_17] : memref<1x128xf32, #tpu.memory_space<vmem>>, vector<1x128xf32>
    tpu.vector_store %arg6[%c0_16, %c0_17], %20 {strides = array<i32>} : memref<1x128xf32, #tpu.memory_space<vmem>>, vector<1x128xf32>,
    return
  }
  func.func @transform_0(%arg0: i32) -> (i32, i32) {
    %c0_i32 = arith.constant 0 : i32
    %c0_i32_0 = arith.constant 0 : i32
    return %arg0, %c0_i32 : i32, i32
  }
  func.func @transform_1(%arg0: i32) -> (i32, i32) {
    %c0_i32 = arith.constant 0 : i32
    %c0_i32_0 = arith.constant 0 : i32
    %c0_i32_1 = arith.constant 0 : i32
    return %c0_i32, %c0_i32_0 : i32, i32
  }
  func.func @transform_2(%arg0: i32) -> (i32, i32) {
    %c0_i32 = arith.constant 0 : i32
    %c0_i32_0 = arith.constant 0 : i32
    %c0_i32_1 = arith.constant 0 : i32
    return %c0_i32, %c0_i32_0 : i32, i32
  }
  func.func @transform_3(%arg0: i32) -> (i32, i32) {
    %c0_i32 = arith.constant 0 : i32
    %c0_i32_0 = arith.constant 0 : i32
    return %arg0, %c0_i32 : i32, i32
  }
  func.func @transform_4(%arg0: i32) -> (i32, i32) {
    %c0_i32 = arith.constant 0 : i32
    %c0_i32_0 = arith.constant 0 : i32
    %c0_i32_1 = arith.constant 0 : i32
    return %c0_i32, %c0_i32_0 : i32, i32
  }
  func.func @transform_5(%arg0: i32) -> (i32, i32) {
    %c0_i32 = arith.constant 0 : i32
    %c0_i32_0 = arith.constant 0 : i32
    %c0_i32_1 = arith.constant 0 : i32
    return %c0_i32, %c0_i32_0 : i32, i32
  }
}

module attributes {stable_mosaic.version = 11 : i64} {
  func.func @kernel(%arg0: i32, %arg1: memref<128x16xbf16, #tpu.memory_space<vmem>>, %arg2: memref<16x128xbf16, #tpu.memory_space<vmem>>, %arg3: memref<1x128xf32, #tpu.memory_space<vmem>>, %arg4: memref<128x128xbf16, #tpu.memory_space<vmem>>) attributes {dimension_semantics = [#tpu.dimension_semantics<parallel>], iteration_bounds = array<i64: 1>, scalar_prefetch = 0 : i64, scratch_operands = 0 : i64, tpu.core_type = #tpu.core_type<tc>, window_params = [{transform_indices = @transform_0, window_bounds = array<i64: 128, 16>}, {pipeline_mode = #tpu.pipeline_mode<synchronous>, transform_indices = @transform_1, window_bounds = array<i64: 16, 128>}, {pipeline_mode = #tpu.pipeline_mode<synchronous>, transform_indices = @transform_2, window_bounds = array<i64: 1, 128>}, {transform_indices = @transform_3, window_bounds = array<i64: 128, 128>}]} {
    %c0 = arith.constant 0 : index
    %c0_0 = arith.constant 0 : index
    %0 = vector.load %arg1[%c0, %c0_0] : memref<128x16xbf16, #tpu.memory_space<vmem>>, vector<128x16xbf16>
    %c0_1 = arith.constant 0 : index
    %c0_2 = arith.constant 0 : index
    %1 = vector.load %arg2[%c0_1, %c0_2] : memref<16x128xbf16, #tpu.memory_space<vmem>>, vector<16x128xbf16>
    %cst = arith.constant dense<0.000000e+00> : vector<128x128xf32>
    %2 = tpu.matmul %0, %1, %cst {dimension_numbers = #tpu.dot_dimension_numbers<[1], [0], [0], [1], [0, 0, 1, 1], [], []>} : vector<128x16xbf16>, vector<16x128xbf16>, vector<128x128xf32> -> vector<128x128xf32>
    %c0_3 = arith.constant 0 : index
    %c0_4 = arith.constant 0 : index
    %3 = vector.load %arg3[%c0_3, %c0_4] : memref<1x128xf32, #tpu.memory_space<vmem>>, vector<1x128xf32>
    %4 = vector.broadcast %3 : vector<1x128xf32> to vector<128x128xf32>
    %5 = arith.addf %2, %4 : vector<128x128xf32>
    %6 = arith.truncf %5 : vector<128x128xf32> to vector<128x128xbf16>
    %c0_5 = arith.constant 0 : index
    %c0_6 = arith.constant 0 : index
    %7 = vector.load %arg4[%c0_5, %c0_6] : memref<128x128xbf16, #tpu.memory_space<vmem>>, vector<128x128xbf16>
    tpu.vector_store %arg4[%c0_5, %c0_6], %6 {strides = array<i32>} : memref<128x128xbf16, #tpu.memory_space<vmem>>, vector<128x128xbf16>,
    return
  }
  func.func @transform_0(%arg0: i32) -> (i32, i32) {
    %c0_i32 = arith.constant 0 : i32
    %c0_i32_0 = arith.constant 0 : i32
    return %arg0, %c0_i32 : i32, i32
  }
  func.func @transform_1(%arg0: i32) -> (i32, i32) {
    %c0_i32 = arith.constant 0 : i32
    %c0_i32_0 = arith.constant 0 : i32
    %c0_i32_1 = arith.constant 0 : i32
    return %c0_i32, %c0_i32_0 : i32, i32
  }
  func.func @transform_2(%arg0: i32) -> (i32, i32) {
    %c0_i32 = arith.constant 0 : i32
    %c0_i32_0 = arith.constant 0 : i32
    %c0_i32_1 = arith.constant 0 : i32
    return %c0_i32, %c0_i32_0 : i32, i32
  }
  func.func @transform_3(%arg0: i32) -> (i32, i32) {
    %c0_i32 = arith.constant 0 : i32
    %c0_i32_0 = arith.constant 0 : i32
    return %arg0, %c0_i32 : i32, i32
  }
}

module attributes {stable_mosaic.version = 11 : i64} {
  func.func @kernel(%arg0: i32, %arg1: i32, %arg2: memref<1x256x8xbf16, #tpu.memory_space<vmem>>, %arg3: memref<1x1x8xf32, #tpu.memory_space<vmem>>, %arg4: memref<1x1x8xf32, #tpu.memory_space<vmem>>) attributes {dimension_semantics = [#tpu.dimension_semantics<parallel>, #tpu.dimension_semantics<arbitrary>], iteration_bounds = array<i64: 2, 1>, scalar_prefetch = 0 : i64, scratch_operands = 0 : i64, tpu.core_type = #tpu.core_type<tc>, window_params = [{transform_indices = @transform_0, window_bounds = array<i64: 1, 256, 8>}, {transform_indices = @transform_1, window_bounds = array<i64: 1, 1, 8>}, {transform_indices = @transform_2, window_bounds = array<i64: 1, 1, 8>}]} {
    %c0_i32 = arith.constant 0 : i32
    %0 = arith.cmpi eq, %arg1, %c0_i32 : i32
    %1 = arith.extui %0 : i1 to i32
    %c0_i32_0 = arith.constant 0 : i32
    %2 = arith.cmpi ne, %1, %c0_i32_0 : i32
    scf.if %2 {
      %cst_16 = arith.constant 0.000000e+00 : f32
      %16 = vector.broadcast %cst_16 : f32 to vector<1x1x8xf32>
      %c0_17 = arith.constant 0 : index
      %c0_18 = arith.constant 0 : index
      %c0_19 = arith.constant 0 : index
      %17 = vector.load %arg3[%c0_17, %c0_18, %c0_19] : memref<1x1x8xf32, #tpu.memory_space<vmem>>, vector<1x1x8xf32>
      tpu.vector_store %arg3[%c0_17, %c0_18, %c0_19], %16 {strides = array<i32>} : memref<1x1x8xf32, #tpu.memory_space<vmem>>, vector<1x1x8xf32>,
      %cst_20 = arith.constant 0.000000e+00 : f32
      %18 = vector.broadcast %cst_20 : f32 to vector<1x1x8xf32>
      %c0_21 = arith.constant 0 : index
      %c0_22 = arith.constant 0 : index
      %c0_23 = arith.constant 0 : index
      %19 = vector.load %arg4[%c0_21, %c0_22, %c0_23] : memref<1x1x8xf32, #tpu.memory_space<vmem>>, vector<1x1x8xf32>
      tpu.vector_store %arg4[%c0_21, %c0_22, %c0_23], %18 {strides = array<i32>} : memref<1x1x8xf32, #tpu.memory_space<vmem>>, vector<1x1x8xf32>,
    } else {
    }
    %c0 = arith.constant 0 : index
    %c0_1 = arith.constant 0 : index
    %c0_2 = arith.constant 0 : index
    %3 = vector.load %arg2[%c0, %c0_1, %c0_2] : memref<1x256x8xbf16, #tpu.memory_space<vmem>>, vector<1x256x8xbf16>
    %4 = arith.extf %3 : vector<1x256x8xbf16> to vector<1x256x8xf32>
    %c0_3 = arith.constant 0 : index
    %c0_4 = arith.constant 0 : index
    %c0_5 = arith.constant 0 : index
    %5 = vector.load %arg3[%c0_3, %c0_4, %c0_5] : memref<1x1x8xf32, #tpu.memory_space<vmem>>, vector<1x1x8xf32>
    %cst = arith.constant dense<0.000000e+00> : vector<1x8xf32>
    %6 = vector.multi_reduction <add>, %4, %cst [1] : vector<1x256x8xf32> to vector<1x8xf32>
    %7 = vector.shape_cast %6 : vector<1x8xf32> to vector<1x1x8xf32>
    %8 = arith.addf %5, %7 : vector<1x1x8xf32>
    %c0_6 = arith.constant 0 : index
    %c0_7 = arith.constant 0 : index
    %c0_8 = arith.constant 0 : index
    %9 = vector.load %arg3[%c0_6, %c0_7, %c0_8] : memref<1x1x8xf32, #tpu.memory_space<vmem>>, vector<1x1x8xf32>
    tpu.vector_store %arg3[%c0_6, %c0_7, %c0_8], %8 {strides = array<i32>} : memref<1x1x8xf32, #tpu.memory_space<vmem>>, vector<1x1x8xf32>,
    %c0_9 = arith.constant 0 : index
    %c0_10 = arith.constant 0 : index
    %c0_11 = arith.constant 0 : index
    %10 = vector.load %arg4[%c0_9, %c0_10, %c0_11] : memref<1x1x8xf32, #tpu.memory_space<vmem>>, vector<1x1x8xf32>
    %11 = arith.mulf %4, %4 : vector<1x256x8xf32>
    %cst_12 = arith.constant dense<0.000000e+00> : vector<1x8xf32>
    %12 = vector.multi_reduction <add>, %11, %cst_12 [1] : vector<1x256x8xf32> to vector<1x8xf32>
    %13 = vector.shape_cast %12 : vector<1x8xf32> to vector<1x1x8xf32>
    %14 = arith.addf %10, %13 : vector<1x1x8xf32>
    %c0_13 = arith.constant 0 : index
    %c0_14 = arith.constant 0 : index
    %c0_15 = arith.constant 0 : index
    %15 = vector.load %arg4[%c0_13, %c0_14, %c0_15] : memref<1x1x8xf32, #tpu.memory_space<vmem>>, vector<1x1x8xf32>
    tpu.vector_store %arg4[%c0_13, %c0_14, %c0_15], %14 {strides = array<i32>} : memref<1x1x8xf32, #tpu.memory_space<vmem>>, vector<1x1x8xf32>,
    return
  }
  func.func @transform_0(%arg0: i32, %arg1: i32) -> (i32, i32, i32) {
    %c0_i32 = arith.constant 0 : i32
    %c0_i32_0 = arith.constant 0 : i32
    return %arg0, %arg1, %c0_i32 : i32, i32, i32
  }
  func.func @transform_1(%arg0: i32, %arg1: i32) -> (i32, i32, i32) {
    %c0_i32 = arith.constant 0 : i32
    %c0_i32_0 = arith.constant 0 : i32
    %c0_i32_1 = arith.constant 0 : i32
    return %arg0, %c0_i32, %c0_i32_0 : i32, i32, i32
  }
  func.func @transform_2(%arg0: i32, %arg1: i32) -> (i32, i32, i32) {
    %c0_i32 = arith.constant 0 : i32
    %c0_i32_0 = arith.constant 0 : i32
    %c0_i32_1 = arith.constant 0 : i32
    return %arg0, %c0_i32, %c0_i32_0 : i32, i32, i32
  }
}

module attributes {stable_mosaic.version = 11 : i64} {
  func.func @kernel(%arg0: i32, %arg1: i32, %arg2: memref<1x256x8xbf16, #tpu.memory_space<vmem>>, %arg3: memref<1x1x8xf32, #tpu.memory_space<vmem>>, %arg4: memref<1x1x8xf32, #tpu.memory_space<vmem>>, %arg5: memref<1x256x8xbf16, #tpu.memory_space<vmem>>) attributes {dimension_semantics = [#tpu.dimension_semantics<parallel>, #tpu.dimension_semantics<parallel>], iteration_bounds = array<i64: 2, 1>, scalar_prefetch = 0 : i64, scratch_operands = 0 : i64, tpu.core_type = #tpu.core_type<tc>, window_params = [{transform_indices = @transform_0, window_bounds = array<i64: 1, 256, 8>}, {transform_indices = @transform_1, window_bounds = array<i64: 1, 1, 8>}, {transform_indices = @transform_2, window_bounds = array<i64: 1, 1, 8>}, {transform_indices = @transform_3, window_bounds = array<i64: 1, 256, 8>}]} {
    %c0 = arith.constant 0 : index
    %c0_0 = arith.constant 0 : index
    %c0_1 = arith.constant 0 : index
    %0 = vector.load %arg2[%c0, %c0_0, %c0_1] : memref<1x256x8xbf16, #tpu.memory_space<vmem>>, vector<1x256x8xbf16>
    %1 = arith.extf %0 : vector<1x256x8xbf16> to vector<1x256x8xf32>
    %c0_2 = arith.constant 0 : index
    %c0_3 = arith.constant 0 : index
    %c0_4 = arith.constant 0 : index
    %2 = vector.load %arg3[%c0_2, %c0_3, %c0_4] : memref<1x1x8xf32, #tpu.memory_space<vmem>>, vector<1x1x8xf32>
    %3 = vector.broadcast %2 : vector<1x1x8xf32> to vector<1x256x8xf32>
    %4 = arith.mulf %1, %3 : vector<1x256x8xf32>
    %c0_5 = arith.constant 0 : index
    %c0_6 = arith.constant 0 : index
    %c0_7 = arith.constant 0 : index
    %5 = vector.load %arg4[%c0_5, %c0_6, %c0_7] : memref<1x1x8xf32, #tpu.memory_space<vmem>>, vector<1x1x8xf32>
    %6 = vector.broadcast %5 : vector<1x1x8xf32> to vector<1x256x8xf32>
    %7 = arith.addf %4, %6 : vector<1x256x8xf32>
    %8 = arith.truncf %7 : vector<1x256x8xf32> to vector<1x256x8xbf16>
    %c0_8 = arith.constant 0 : index
    %c0_9 = arith.constant 0 : index
    %c0_10 = arith.constant 0 : index
    %9 = vector.load %arg5[%c0_8, %c0_9, %c0_10] : memref<1x256x8xbf16, #tpu.memory_space<vmem>>, vector<1x256x8xbf16>
    tpu.vector_store %arg5[%c0_8, %c0_9, %c0_10], %8 {strides = array<i32>} : memref<1x256x8xbf16, #tpu.memory_space<vmem>>, vector<1x256x8xbf16>,
    return
  }
  func.func @transform_0(%arg0: i32, %arg1: i32) -> (i32, i32, i32) {
    %c0_i32 = arith.constant 0 : i32
    %c0_i32_0 = arith.constant 0 : i32
    return %arg0, %arg1, %c0_i32 : i32, i32, i32
  }
  func.func @transform_1(%arg0: i32, %arg1: i32) -> (i32, i32, i32) {
    %c0_i32 = arith.constant 0 : i32
    %c0_i32_0 = arith.constant 0 : i32
    %c0_i32_1 = arith.constant 0 : i32
    return %arg0, %c0_i32, %c0_i32_0 : i32, i32, i32
  }
  func.func @transform_2(%arg0: i32, %arg1: i32) -> (i32, i32, i32) {
    %c0_i32 = arith.constant 0 : i32
    %c0_i32_0 = arith.constant 0 : i32
    %c0_i32_1 = arith.constant 0 : i32
    return %arg0, %c0_i32, %c0_i32_0 : i32, i32, i32
  }
  func.func @transform_3(%arg0: i32, %arg1: i32) -> (i32, i32, i32) {
    %c0_i32 = arith.constant 0 : i32
    %c0_i32_0 = arith.constant 0 : i32
    return %arg0, %arg1, %c0_i32 : i32, i32, i32
  }
}

module attributes {stable_mosaic.version = 11 : i64} {
  func.func @kernel(%arg0: i32, %arg1: memref<512x144xbf16, #tpu.memory_space<vmem>>, %arg2: memref<144x128xbf16, #tpu.memory_space<vmem>>, %arg3: memref<1x128xf32, #tpu.memory_space<vmem>>, %arg4: memref<512x128xbf16, #tpu.memory_space<vmem>>, %arg5: memref<1x128xf32, #tpu.memory_space<vmem>>, %arg6: memref<1x128xf32, #tpu.memory_space<vmem>>) attributes {dimension_semantics = [#tpu.dimension_semantics<arbitrary>], iteration_bounds = array<i64: 1>, scalar_prefetch = 0 : i64, scratch_operands = 0 : i64, tpu.core_type = #tpu.core_type<tc>, window_params = [{transform_indices = @transform_0, window_bounds = array<i64: 512, 144>}, {pipeline_mode = #tpu.pipeline_mode<synchronous>, transform_indices = @transform_1, window_bounds = array<i64: 144, 128>}, {pipeline_mode = #tpu.pipeline_mode<synchronous>, transform_indices = @transform_2, window_bounds = array<i64: 1, 128>}, {transform_indices = @transform_3, window_bounds = array<i64: 512, 128>}, {pipeline_mode = #tpu.pipeline_mode<synchronous>, transform_indices = @transform_4, window_bounds = array<i64: 1, 128>}, {pipeline_mode = #tpu.pipeline_mode<synchronous>, transform_indices = @transform_5, window_bounds = array<i64: 1, 128>}]} {
    %c0 = arith.constant 0 : index
    %c0_0 = arith.constant 0 : index
    %0 = vector.load %arg1[%c0, %c0_0] : memref<512x144xbf16, #tpu.memory_space<vmem>>, vector<512x144xbf16>
    %c0_1 = arith.constant 0 : index
    %c0_2 = arith.constant 0 : index
    %1 = vector.load %arg2[%c0_1, %c0_2] : memref<144x128xbf16, #tpu.memory_space<vmem>>, vector<144x128xbf16>
    %cst = arith.constant dense<0.000000e+00> : vector<512x128xf32>
    %2 = tpu.matmul %0, %1, %cst {dimension_numbers = #tpu.dot_dimension_numbers<[1], [0], [0], [1], [0, 0, 1, 1], [], []>} : vector<512x144xbf16>, vector<144x128xbf16>, vector<512x128xf32> -> vector<512x128xf32>
    %c0_3 = arith.constant 0 : index
    %c0_4 = arith.constant 0 : index
    %3 = vector.load %arg3[%c0_3, %c0_4] : memref<1x128xf32, #tpu.memory_space<vmem>>, vector<1x128xf32>
    %4 = vector.broadcast %3 : vector<1x128xf32> to vector<512x128xf32>
    %5 = arith.addf %2, %4 : vector<512x128xf32>
    %6 = arith.truncf %5 : vector<512x128xf32> to vector<512x128xbf16>
    %c0_5 = arith.constant 0 : index
    %c0_6 = arith.constant 0 : index
    %7 = vector.load %arg4[%c0_5, %c0_6] : memref<512x128xbf16, #tpu.memory_space<vmem>>, vector<512x128xbf16>
    tpu.vector_store %arg4[%c0_5, %c0_6], %6 {strides = array<i32>} : memref<512x128xbf16, #tpu.memory_space<vmem>>, vector<512x128xbf16>,
    %c0_i32 = arith.constant 0 : i32
    %8 = arith.cmpi eq, %arg0, %c0_i32 : i32
    %9 = arith.extui %8 : i1 to i32
    %c0_i32_7 = arith.constant 0 : i32
    %10 = arith.cmpi ne, %9, %c0_i32_7 : i32
    scf.if %10 {
      %cst_18 = arith.constant 0.000000e+00 : f32
      %22 = vector.broadcast %cst_18 : f32 to vector<1x128xf32>
      %c0_19 = arith.constant 0 : index
      %c0_20 = arith.constant 0 : index
      %23 = vector.load %arg5[%c0_19, %c0_20] : memref<1x128xf32, #tpu.memory_space<vmem>>, vector<1x128xf32>
      tpu.vector_store %arg5[%c0_19, %c0_20], %22 {strides = array<i32>} : memref<1x128xf32, #tpu.memory_space<vmem>>, vector<1x128xf32>,
      %cst_21 = arith.constant 0.000000e+00 : f32
      %24 = vector.broadcast %cst_21 : f32 to vector<1x128xf32>
      %c0_22 = arith.constant 0 : index
      %c0_23 = arith.constant 0 : index
      %25 = vector.load %arg6[%c0_22, %c0_23] : memref<1x128xf32, #tpu.memory_space<vmem>>, vector<1x128xf32>
      tpu.vector_store %arg6[%c0_22, %c0_23], %24 {strides = array<i32>} : memref<1x128xf32, #tpu.memory_space<vmem>>, vector<1x128xf32>,
    } else {
    }
    %c0_8 = arith.constant 0 : index
    %c0_9 = arith.constant 0 : index
    %11 = vector.load %arg5[%c0_8, %c0_9] : memref<1x128xf32, #tpu.memory_space<vmem>>, vector<1x128xf32>
    %cst_10 = arith.constant dense<0.000000e+00> : vector<128xf32>
    %12 = vector.multi_reduction <add>, %5, %cst_10 [0] : vector<512x128xf32> to vector<128xf32>
    %13 = vector.shape_cast %12 : vector<128xf32> to vector<1x128xf32>
    %14 = arith.addf %11, %13 : vector<1x128xf32>
    %c0_11 = arith.constant 0 : index
    %c0_12 = arith.constant 0 : index
    %15 = vector.load %arg5[%c0_11, %c0_12] : memref<1x128xf32, #tpu.memory_space<vmem>>, vector<1x128xf32>
    tpu.vector_store %arg5[%c0_11, %c0_12], %14 {strides = array<i32>} : memref<1x128xf32, #tpu.memory_space<vmem>>, vector<1x128xf32>,
    %c0_13 = arith.constant 0 : index
    %c0_14 = arith.constant 0 : index
    %16 = vector.load %arg6[%c0_13, %c0_14] : memref<1x128xf32, #tpu.memory_space<vmem>>, vector<1x128xf32>
    %17 = arith.mulf %5, %5 : vector<512x128xf32>
    %cst_15 = arith.constant dense<0.000000e+00> : vector<128xf32>
    %18 = vector.multi_reduction <add>, %17, %cst_15 [0] : vector<512x128xf32> to vector<128xf32>
    %19 = vector.shape_cast %18 : vector<128xf32> to vector<1x128xf32>
    %20 = arith.addf %16, %19 : vector<1x128xf32>
    %c0_16 = arith.constant 0 : index
    %c0_17 = arith.constant 0 : index
    %21 = vector.load %arg6[%c0_16, %c0_17] : memref<1x128xf32, #tpu.memory_space<vmem>>, vector<1x128xf32>
    tpu.vector_store %arg6[%c0_16, %c0_17], %20 {strides = array<i32>} : memref<1x128xf32, #tpu.memory_space<vmem>>, vector<1x128xf32>,
    return
  }
  func.func @transform_0(%arg0: i32) -> (i32, i32) {
    %c0_i32 = arith.constant 0 : i32
    %c0_i32_0 = arith.constant 0 : i32
    return %arg0, %c0_i32 : i32, i32
  }
  func.func @transform_1(%arg0: i32) -> (i32, i32) {
    %c0_i32 = arith.constant 0 : i32
    %c0_i32_0 = arith.constant 0 : i32
    %c0_i32_1 = arith.constant 0 : i32
    return %c0_i32, %c0_i32_0 : i32, i32
  }
  func.func @transform_2(%arg0: i32) -> (i32, i32) {
    %c0_i32 = arith.constant 0 : i32
    %c0_i32_0 = arith.constant 0 : i32
    %c0_i32_1 = arith.constant 0 : i32
    return %c0_i32, %c0_i32_0 : i32, i32
  }
  func.func @transform_3(%arg0: i32) -> (i32, i32) {
    %c0_i32 = arith.constant 0 : i32
    %c0_i32_0 = arith.constant 0 : i32
    return %arg0, %c0_i32 : i32, i32
  }
  func.func @transform_4(%arg0: i32) -> (i32, i32) {
    %c0_i32 = arith.constant 0 : i32
    %c0_i32_0 = arith.constant 0 : i32
    %c0_i32_1 = arith.constant 0 : i32
    return %c0_i32, %c0_i32_0 : i32, i32
  }
  func.func @transform_5(%arg0: i32) -> (i32, i32) {
    %c0_i32 = arith.constant 0 : i32
    %c0_i32_0 = arith.constant 0 : i32
    %c0_i32_1 = arith.constant 0 : i32
    return %c0_i32, %c0_i32_0 : i32, i32
  }
}

module attributes {stable_mosaic.version = 11 : i64} {
  func.func @kernel(%arg0: i32, %arg1: memref<512x8xbf16, #tpu.memory_space<vmem>>, %arg2: memref<8x128xbf16, #tpu.memory_space<vmem>>, %arg3: memref<1x128xf32, #tpu.memory_space<vmem>>, %arg4: memref<512x128xf32, #tpu.memory_space<vmem>>) attributes {dimension_semantics = [#tpu.dimension_semantics<parallel>], iteration_bounds = array<i64: 1>, scalar_prefetch = 0 : i64, scratch_operands = 0 : i64, tpu.core_type = #tpu.core_type<tc>, window_params = [{transform_indices = @transform_0, window_bounds = array<i64: 512, 8>}, {pipeline_mode = #tpu.pipeline_mode<synchronous>, transform_indices = @transform_1, window_bounds = array<i64: 8, 128>}, {pipeline_mode = #tpu.pipeline_mode<synchronous>, transform_indices = @transform_2, window_bounds = array<i64: 1, 128>}, {transform_indices = @transform_3, window_bounds = array<i64: 512, 128>}]} {
    %c0 = arith.constant 0 : index
    %c0_0 = arith.constant 0 : index
    %0 = vector.load %arg1[%c0, %c0_0] : memref<512x8xbf16, #tpu.memory_space<vmem>>, vector<512x8xbf16>
    %c0_1 = arith.constant 0 : index
    %c0_2 = arith.constant 0 : index
    %1 = vector.load %arg2[%c0_1, %c0_2] : memref<8x128xbf16, #tpu.memory_space<vmem>>, vector<8x128xbf16>
    %cst = arith.constant dense<0.000000e+00> : vector<512x128xf32>
    %2 = tpu.matmul %0, %1, %cst {dimension_numbers = #tpu.dot_dimension_numbers<[1], [0], [0], [1], [0, 0, 1, 1], [], []>} : vector<512x8xbf16>, vector<8x128xbf16>, vector<512x128xf32> -> vector<512x128xf32>
    %c0_3 = arith.constant 0 : index
    %c0_4 = arith.constant 0 : index
    %3 = vector.load %arg3[%c0_3, %c0_4] : memref<1x128xf32, #tpu.memory_space<vmem>>, vector<1x128xf32>
    %4 = vector.broadcast %3 : vector<1x128xf32> to vector<512x128xf32>
    %5 = arith.addf %2, %4 : vector<512x128xf32>
    %6 = arith.negf %5 : vector<512x128xf32>
    %7 = math.exp %6 : vector<512x128xf32>
    %cst_5 = arith.constant 1.000000e+00 : f32
    %8 = vector.broadcast %cst_5 : f32 to vector<512x128xf32>
    %9 = arith.addf %8, %7 : vector<512x128xf32>
    %10 = arith.divf %8, %9 : vector<512x128xf32>
    %c0_6 = arith.constant 0 : index
    %c0_7 = arith.constant 0 : index
    %11 = vector.load %arg4[%c0_6, %c0_7] : memref<512x128xf32, #tpu.memory_space<vmem>>, vector<512x128xf32>
    tpu.vector_store %arg4[%c0_6, %c0_7], %10 {strides = array<i32>} : memref<512x128xf32, #tpu.memory_space<vmem>>, vector<512x128xf32>,
    return
  }
  func.func @transform_0(%arg0: i32) -> (i32, i32) {
    %c0_i32 = arith.constant 0 : i32
    %c0_i32_0 = arith.constant 0 : i32
    return %arg0, %c0_i32 : i32, i32
  }
  func.func @transform_1(%arg0: i32) -> (i32, i32) {
    %c0_i32 = arith.constant 0 : i32
    %c0_i32_0 = arith.constant 0 : i32
    %c0_i32_1 = arith.constant 0 : i32
    return %c0_i32, %c0_i32_0 : i32, i32
  }
  func.func @transform_2(%arg0: i32) -> (i32, i32) {
    %c0_i32 = arith.constant 0 : i32
    %c0_i32_0 = arith.constant 0 : i32
    %c0_i32_1 = arith.constant 0 : i32
    return %c0_i32, %c0_i32_0 : i32, i32
  }
  func.func @transform_3(%arg0: i32) -> (i32, i32) {
    %c0_i32 = arith.constant 0 : i32
    %c0_i32_0 = arith.constant 0 : i32
    return %arg0, %c0_i32 : i32, i32
  }
}

</mosaic_0001>

<bundles_post_ra>
// kernel: blur_generator_forward.54
= control target key start
LH: loop header
LB: loop body
LE: loop exit
PB: predicated region body
PF: predicated region fallthrough
CT: control target
= control target key end

     0   :  { %vm604_vm0 = vcmask 60416   ;;  %s1472_s0 = inlined_call_operand.vmem [shape: bf16[1,512,8], index: 0, kind: input, shape index: {}]   ;;  %s1473_s1 = inlined_call_operand.vmem [shape: f32[1,1,8], index: 1, kind: input, shape index: {}]   ;;  %s1474_s2 = inlined_call_operand.vmem [shape: f32[1,1,8], index: 2, kind: input, shape index: {}]   ;;  %s1475_s3 = inlined_call_operand.vmem [shape: bf16[1,512,8], index: 3, kind: output, shape index: {}]  }
   0x1   :  { %v804_v0 = vld [vmem:[%s1472_s0] sm:$0xff]   ;;  %v931_v4 = vld [vmem:[%s1472_s0 + $0x8] sm:$0xff]   ;;  %v932_v5 = vld [vmem:[%s1472_s0 + $0x10] sm:$0xff]  }
   0x2   :  { %v988_v1 = vld [vmem:[%s1473_s1] ss:$0 sm:$0xff]  ;;  %v805_v2 = vunpack.c.l.bf16 %v804_v0  ;;  %v806_v3 = vunpack.c.h.bf16 %v804_v0  ;;  %v933_v6 = vld [vmem:[%s1472_s0 + $0x18] sm:$0xff]   ;;  %v809_v8 = vunpack.c.l.bf16 %v931_v4  ;;  %v810_v9 = vunpack.c.h.bf16 %v931_v4  ;;  %v935_v41 = vld [vmem:[%s1472_s0 + $0x28] sm:$0xff]  }
   0x3   :  { %v1002_v7 = vld [vmem:[%s1474_s2] ss:$0 sm:$0xff]  ;;  %v813_v10 = vunpack.c.l.bf16 %v932_v5  ;;  %v814_v11 = vunpack.c.h.bf16 %v932_v5  ;;  %v817_v14 = vunpack.c.l.bf16 %v933_v6  ;;  %v818_v15 = vunpack.c.h.bf16 %v933_v6  ;;  %v936_v42 = vld [vmem:[%s1472_s0 + $0x30] sm:$0xff]   ;;  %v937_v47 = vld [vmem:[%s1472_s0 + $0x38] sm:$0xff]  }
   0x4   :  { %v149_v12 = vmul.f32 %v805_v2, %v988_v1  ;;  %v150_v13 = vmul.f32 %v806_v3, %v988_v1  ;;  %v151_v16 = vmul.f32 %v809_v8, %v988_v1  ;;  %v152_v17 = vmul.f32 %v810_v9, %v988_v1  ;;  %v934_v36 = vld [vmem:[%s1472_s0 + $0x20] sm:$0xff]  }
   0x5   :  { %v153_v18 = vmul.f32 %v813_v10, %v988_v1  ;;  %v154_v19 = vmul.f32 %v814_v11, %v988_v1  ;;  %v155_v22 = vmul.f32 %v817_v14, %v988_v1  ;;  %v156_v23 = vmul.f32 %v818_v15, %v988_v1 }
   0x6   :  { %v220_v20 = vadd.f32 %v1002_v7, %v149_v12  ;;  %v221_v21 = vadd.f32 %v1002_v7, %v150_v13  ;;  %v222_v24 = vadd.f32 %v1002_v7, %v151_v16  ;;  %v223_v25 = vadd.f32 %v1002_v7, %v152_v17 }
   0x7   :  { %v224_v26 = vadd.f32 %v1002_v7, %v153_v18  ;;  %v225_v27 = vadd.f32 %v1002_v7, %v154_v19  ;;  %v226_v30 = vadd.f32 %v1002_v7, %v155_v22  ;;  %v227_v31 = vadd.f32 %v1002_v7, %v156_v23  ;;  %v938_v18 = vld [vmem:[%s1472_s0 + $0x40] sm:$0xff]   ;;  %v939_v23 = vld [vmem:[%s1472_s0 + $0x48] sm:$0xff]  }
   0x8   :  { %v284_v28 = vmax.f32 %v220_v20, 0.0  ;;  %v285_v29 = vmax.f32 %v221_v21, 0.0  ;;  %v286_v32 = vmax.f32 %v222_v24, 0.0  ;;  %v287_v33 = vmax.f32 %v223_v25, 0.0  ;;  %v940_v24 = vld [vmem:[%s1472_s0 + $0x50] sm:$0xff]  }
   0x9   :  { %v288_v34 = vmax.f32 %v224_v26, 0.0  ;;  %v289_v35 = vmax.f32 %v225_v27, 0.0  ;;  %v290_v39 = vmax.f32 %v226_v30, 0.0  ;;  %v291_v40 = vmax.f32 %v227_v31, 0.0 }
   0xa   :  { %v739_v37 = vpack.c.bf16 %v284_v28, %v284_v28  ;;  %v740_v38 = vpack.c.bf16 %v285_v29, %v285_v29  ;;  %v741_v43 = vpack.c.bf16 %v286_v32, %v286_v32  ;;  %v742_v44 = vpack.c.bf16 %v287_v33, %v287_v33  ;;  %v941_v29 = vld [vmem:[%s1472_s0 + $0x58] sm:$0xff]  }
   0xb   :  { %v743_v45 = vpack.c.bf16 %v288_v34, %v288_v34  ;;  %v744_v46 = vpack.c.bf16 %v289_v35, %v289_v35  ;;  %v745_v48 = vpack.c.bf16 %v290_v39, %v290_v39  ;;  %v746_v49 = vpack.c.bf16 %v291_v40, %v291_v40 }
   0xc   :  { %605 = vst.msk [vmem:[%s1475_s3] sm:$0xf] %vm604_vm0, %v739_v37  ;;  %606 = vst.msk [vmem:[%s1475_s3 + $0x4] sm:$0xf] %vm604_vm0, %v740_v38  ;;  %v821_v50 = vunpack.c.l.bf16 %v934_v36  ;;  %v822_v51 = vunpack.c.h.bf16 %v934_v36  ;;  %v825_v52 = vunpack.c.l.bf16 %v935_v41  ;;  %v826_v53 = vunpack.c.h.bf16 %v935_v41 }
   0xd   :  { %607 = vst.msk [vmem:[%s1475_s3 + $0x8] sm:$0xf] %vm604_vm0, %v741_v43  ;;  %608 = vst.msk [vmem:[%s1475_s3 + $0xc] sm:$0xf] %vm604_vm0, %v742_v44  ;;  %v829_v54 = vunpack.c.l.bf16 %v936_v42  ;;  %v830_v55 = vunpack.c.h.bf16 %v936_v42  ;;  %v833_v58 = vunpack.c.l.bf16 %v937_v47  ;;  %v834_v59 = vunpack.c.h.bf16 %v937_v47 }
   0xe   :  { %609 = vst.msk [vmem:[%s1475_s3 + $0x10] sm:$0xf] %vm604_vm0, %v743_v45  ;;  %610 = vst.msk [vmem:[%s1475_s3 + $0x14] sm:$0xf] %vm604_vm0, %v744_v46  ;;  %v157_v56 = vmul.f32 %v821_v50, %v988_v1  ;;  %v158_v57 = vmul.f32 %v822_v51, %v988_v1  ;;  %v159_v60 = vmul.f32 %v825_v52, %v988_v1  ;;  %v837_v32 = vunpack.c.l.bf16 %v938_v18 }
   0xf   :  { %611 = vst.msk [vmem:[%s1475_s3 + $0x18] sm:$0xf] %vm604_vm0, %v745_v48  ;;  %612 = vst.msk [vmem:[%s1475_s3 + $0x1c] sm:$0xf] %vm604_vm0, %v746_v49  ;;  %v160_v61 = vmul.f32 %v826_v53, %v988_v1  ;;  %v161_v62 = vmul.f32 %v829_v54, %v988_v1  ;;  %v162_v63 = vmul.f32 %v830_v55, %v988_v1  ;;  %v838_v33 = vunpack.c.h.bf16 %v938_v18 }
  0x10   :  { %v228_v0 = vadd.f32 %v1002_v7, %v157_v56  ;;  %v229_v2 = vadd.f32 %v1002_v7, %v158_v57  ;;  %v163_v3 = vmul.f32 %v833_v58, %v988_v1  ;;  %v164_v4 = vmul.f32 %v834_v59, %v988_v1 }
  0x11   :  { %v230_v5 = vadd.f32 %v1002_v7, %v159_v60  ;;  %v231_v6 = vadd.f32 %v1002_v7, %v160_v61  ;;  %v232_v8 = vadd.f32 %v1002_v7, %v161_v62  ;;  %v233_v9 = vadd.f32 %v1002_v7, %v162_v63  ;;  %v942_v62 = vld [vmem:[%s1472_s0 + $0x60] sm:$0xff]  }
  0x12   :  { %v292_v10 = vmax.f32 %v228_v0, 0.0  ;;  %v293_v11 = vmax.f32 %v229_v2, 0.0  ;;  %v234_v12 = vadd.f32 %v1002_v7, %v163_v3  ;;  %v235_v13 = vadd.f32 %v1002_v7, %v164_v4  ;;  %v943_v4 = vld [vmem:[%s1472_s0 + $0x68] sm:$0xff]  }
  0x13   :  { %v294_v14 = vmax.f32 %v230_v5, 0.0  ;;  %v295_v15 = vmax.f32 %v231_v6, 0.0  ;;  %v296_v16 = vmax.f32 %v232_v8, 0.0  ;;  %v297_v17 = vmax.f32 %v233_v9, 0.0  ;;  %v944_v5 = vld [vmem:[%s1472_s0 + $0x70] sm:$0xff]  }
  0x14   :  { %v747_v19 = vpack.c.bf16 %v292_v10, %v292_v10  ;;  %v748_v20 = vpack.c.bf16 %v293_v11, %v293_v11  ;;  %v298_v21 = vmax.f32 %v234_v12, 0.0  ;;  %v299_v22 = vmax.f32 %v235_v13, 0.0  ;;  %v945_v11 = vld [vmem:[%s1472_s0 + $0x78] sm:$0xff]  }
  0x15   :  { %v749_v25 = vpack.c.bf16 %v294_v14, %v294_v14  ;;  %v750_v26 = vpack.c.bf16 %v295_v15, %v295_v15  ;;  %v751_v27 = vpack.c.bf16 %v296_v16, %v296_v16  ;;  %v752_v28 = vpack.c.bf16 %v297_v17, %v297_v17 }
  0x16   :  { %613 = vst.msk [vmem:[%s1475_s3 + $0x20] sm:$0xf] %vm604_vm0, %v747_v19  ;;  %614 = vst.msk [vmem:[%s1475_s3 + $0x24] sm:$0xf] %vm604_vm0, %v748_v20  ;;  %v753_v30 = vpack.c.bf16 %v298_v21, %v298_v21  ;;  %v754_v31 = vpack.c.bf16 %v299_v22, %v299_v22  ;;  %v841_v34 = vunpack.c.l.bf16 %v939_v23  ;;  %v842_v35 = vunpack.c.h.bf16 %v939_v23 }
  0x17   :  { %615 = vst.msk [vmem:[%s1475_s3 + $0x28] sm:$0xf] %vm604_vm0, %v749_v25  ;;  %616 = vst.msk [vmem:[%s1475_s3 + $0x2c] sm:$0xf] %vm604_vm0, %v750_v26  ;;  %v845_v36 = vunpack.c.l.bf16 %v940_v24  ;;  %v846_v37 = vunpack.c.h.bf16 %v940_v24  ;;  %v165_v38 = vmul.f32 %v837_v32, %v988_v1  ;;  %v166_v39 = vmul.f32 %v838_v33, %v988_v1 }
  0x18   :  { %617 = vst.msk [vmem:[%s1475_s3 + $0x30] sm:$0xf] %vm604_vm0, %v751_v27  ;;  %618 = vst.msk [vmem:[%s1475_s3 + $0x34] sm:$0xf] %vm604_vm0, %v752_v28  ;;  %v849_v40 = vunpack.c.l.bf16 %v941_v29  ;;  %v850_v41 = vunpack.c.h.bf16 %v941_v29  ;;  %v167_v42 = vmul.f32 %v841_v34, %v988_v1  ;;  %v168_v43 = vmul.f32 %v842_v35, %v988_v1 }
  0x19   :  { %619 = vst.msk [vmem:[%s1475_s3 + $0x38] sm:$0xf] %vm604_vm0, %v753_v30  ;;  %620 = vst.msk [vmem:[%s1475_s3 + $0x3c] sm:$0xf] %vm604_vm0, %v754_v31  ;;  %v169_v44 = vmul.f32 %v845_v36, %v988_v1  ;;  %v170_v45 = vmul.f32 %v846_v37, %v988_v1  ;;  %v236_v46 = vadd.f32 %v1002_v7, %v165_v38  ;;  %v853_v14 = vunpack.c.l.bf16 %v942_v62 }
  0x1a   :  { %v237_v47 = vadd.f32 %v1002_v7, %v166_v39  ;;  %v171_v48 = vmul.f32 %v849_v40, %v988_v1  ;;  %v172_v49 = vmul.f32 %v850_v41, %v988_v1  ;;  %v238_v50 = vadd.f32 %v1002_v7, %v167_v42 }
  0x1b   :  { %v239_v51 = vadd.f32 %v1002_v7, %v168_v43  ;;  %v240_v52 = vadd.f32 %v1002_v7, %v169_v44  ;;  %v241_v53 = vadd.f32 %v1002_v7, %v170_v45  ;;  %v300_v54 = vmax.f32 %v236_v46, 0.0  ;;  %v946_v44 = vld [vmem:[%s1472_s0 + $0x80] sm:$0xff]  }
  0x1c   :  { %v301_v55 = vmax.f32 %v237_v47, 0.0  ;;  %v242_v56 = vadd.f32 %v1002_v7, %v171_v48  ;;  %v243_v57 = vadd.f32 %v1002_v7, %v172_v49  ;;  %v302_v58 = vmax.f32 %v238_v50, 0.0  ;;  %v947_v49 = vld [vmem:[%s1472_s0 + $0x88] sm:$0xff]   ;;  %v948_v50 = vld [vmem:[%s1472_s0 + $0x90] sm:$0xff]  }
  0x1d   :  { %v303_v59 = vmax.f32 %v239_v51, 0.0  ;;  %v304_v60 = vmax.f32 %v240_v52, 0.0  ;;  %v305_v61 = vmax.f32 %v241_v53, 0.0  ;;  %v755_v63 = vpack.c.bf16 %v300_v54, %v300_v54 }
  0x1e   :  { %v756_v0 = vpack.c.bf16 %v301_v55, %v301_v55  ;;  %v306_v2 = vmax.f32 %v242_v56, 0.0  ;;  %v307_v3 = vmax.f32 %v243_v57, 0.0  ;;  %v757_v6 = vpack.c.bf16 %v302_v58, %v302_v58  ;;  %v949_v55 = vld [vmem:[%s1472_s0 + $0x98] sm:$0xff]  }
  0x1f   :  { %v758_v8 = vpack.c.bf16 %v303_v59, %v303_v59  ;;  %v759_v9 = vpack.c.bf16 %v304_v60, %v304_v60  ;;  %v760_v10 = vpack.c.bf16 %v305_v61, %v305_v61  ;;  %621 = vst.msk [vmem:[%s1475_s3 + $0x40] sm:$0xf] %vm604_vm0, %v755_v63  ;;  %v854_v15 = vunpack.c.h.bf16 %v942_v62 }
  0x20   :  { %622 = vst.msk [vmem:[%s1475_s3 + $0x44] sm:$0xf] %vm604_vm0, %v756_v0  ;;  %v761_v12 = vpack.c.bf16 %v306_v2, %v306_v2  ;;  %v762_v13 = vpack.c.bf16 %v307_v3, %v307_v3  ;;  %623 = vst.msk [vmem:[%s1475_s3 + $0x48] sm:$0xf] %vm604_vm0, %v757_v6  ;;  %v857_v16 = vunpack.c.l.bf16 %v943_v4  ;;  %v858_v17 = vunpack.c.h.bf16 %v943_v4 }
  0x21   :  { %624 = vst.msk [vmem:[%s1475_s3 + $0x4c] sm:$0xf] %vm604_vm0, %v758_v8  ;;  %625 = vst.msk [vmem:[%s1475_s3 + $0x50] sm:$0xf] %vm604_vm0, %v759_v9  ;;  %v861_v18 = vunpack.c.l.bf16 %v944_v5  ;;  %v862_v19 = vunpack.c.h.bf16 %v944_v5  ;;  %v173_v20 = vmul.f32 %v853_v14, %v988_v1  ;;  %v174_v21 = vmul.f32 %v854_v15, %v988_v1 }
  0x22   :  { %626 = vst.msk [vmem:[%s1475_s3 + $0x54] sm:$0xf] %vm604_vm0, %v760_v10  ;;  %627 = vst.msk [vmem:[%s1475_s3 + $0x58] sm:$0xf] %vm604_vm0, %v761_v12  ;;  %v865_v22 = vunpack.c.l.bf16 %v945_v11  ;;  %v866_v23 = vunpack.c.h.bf16 %v945_v11  ;;  %v175_v24 = vmul.f32 %v857_v16, %v988_v1  ;;  %v176_v25 = vmul.f32 %v858_v17, %v988_v1 }
  0x23   :  { %628 = vst.msk [vmem:[%s1475_s3 + $0x5c] sm:$0xf] %vm604_vm0, %v762_v13  ;;  %v177_v26 = vmul.f32 %v861_v18, %v988_v1  ;;  %v178_v27 = vmul.f32 %v862_v19, %v988_v1  ;;  %v244_v28 = vadd.f32 %v1002_v7, %v173_v20  ;;  %v245_v29 = vadd.f32 %v1002_v7, %v174_v21 }
  0x24   :  { %v179_v30 = vmul.f32 %v865_v22, %v988_v1  ;;  %v180_v31 = vmul.f32 %v866_v23, %v988_v1  ;;  %v246_v32 = vadd.f32 %v1002_v7, %v175_v24  ;;  %v247_v33 = vadd.f32 %v1002_v7, %v176_v25 }
  0x25   :  { %v248_v34 = vadd.f32 %v1002_v7, %v177_v26  ;;  %v249_v35 = vadd.f32 %v1002_v7, %v178_v27  ;;  %v308_v36 = vmax.f32 %v244_v28, 0.0  ;;  %v309_v37 = vmax.f32 %v245_v29, 0.0  ;;  %v950_v26 = vld [vmem:[%s1472_s0 + $0xa0] sm:$0xff]  }
  0x26   :  { %v250_v38 = vadd.f32 %v1002_v7, %v179_v30  ;;  %v251_v39 = vadd.f32 %v1002_v7, %v180_v31  ;;  %v310_v40 = vmax.f32 %v246_v32, 0.0  ;;  %v311_v41 = vmax.f32 %v247_v33, 0.0  ;;  %v951_v31 = vld [vmem:[%s1472_s0 + $0xa8] sm:$0xff]   ;;  %v952_v32 = vld [vmem:[%s1472_s0 + $0xb0] sm:$0xff]  }
  0x27   :  { %v312_v42 = vmax.f32 %v248_v34, 0.0  ;;  %v313_v43 = vmax.f32 %v249_v35, 0.0  ;;  %v763_v45 = vpack.c.bf16 %v308_v36, %v308_v36  ;;  %v764_v46 = vpack.c.bf16 %v309_v37, %v309_v37  ;;  %v953_v37 = vld [vmem:[%s1472_s0 + $0xb8] sm:$0xff]  }
  0x28   :  { %v314_v47 = vmax.f32 %v250_v38, 0.0  ;;  %v315_v48 = vmax.f32 %v251_v39, 0.0  ;;  %v765_v51 = vpack.c.bf16 %v310_v40, %v310_v40  ;;  %v766_v52 = vpack.c.bf16 %v311_v41, %v311_v41 }
  0x29   :  { %v767_v53 = vpack.c.bf16 %v312_v42, %v312_v42  ;;  %v768_v54 = vpack.c.bf16 %v313_v43, %v313_v43  ;;  %629 = vst.msk [vmem:[%s1475_s3 + $0x60] sm:$0xf] %vm604_vm0, %v763_v45  ;;  %630 = vst.msk [vmem:[%s1475_s3 + $0x64] sm:$0xf] %vm604_vm0, %v764_v46  ;;  %v869_v58 = vunpack.c.l.bf16 %v946_v44  ;;  %v870_v59 = vunpack.c.h.bf16 %v946_v44 }
  0x2a   :  { %v769_v56 = vpack.c.bf16 %v314_v47, %v314_v47  ;;  %v770_v57 = vpack.c.bf16 %v315_v48, %v315_v48  ;;  %631 = vst.msk [vmem:[%s1475_s3 + $0x68] sm:$0xf] %vm604_vm0, %v765_v51  ;;  %632 = vst.msk [vmem:[%s1475_s3 + $0x6c] sm:$0xf] %vm604_vm0, %v766_v52  ;;  %v873_v60 = vunpack.c.l.bf16 %v947_v49  ;;  %v874_v61 = vunpack.c.h.bf16 %v947_v49 }
  0x2b   :  { %633 = vst.msk [vmem:[%s1475_s3 + $0x70] sm:$0xf] %vm604_vm0, %v767_v53  ;;  %634 = vst.msk [vmem:[%s1475_s3 + $0x74] sm:$0xf] %vm604_vm0, %v768_v54  ;;  %v877_v62 = vunpack.c.l.bf16 %v948_v50  ;;  %v878_v63 = vunpack.c.h.bf16 %v948_v50  ;;  %v181_v0 = vmul.f32 %v869_v58, %v988_v1  ;;  %v182_v2 = vmul.f32 %v870_v59, %v988_v1 }
  0x2c   :  { %635 = vst.msk [vmem:[%s1475_s3 + $0x78] sm:$0xf] %vm604_vm0, %v769_v56  ;;  %636 = vst.msk [vmem:[%s1475_s3 + $0x7c] sm:$0xf] %vm604_vm0, %v770_v57  ;;  %v881_v3 = vunpack.c.l.bf16 %v949_v55  ;;  %v882_v4 = vunpack.c.h.bf16 %v949_v55  ;;  %v183_v5 = vmul.f32 %v873_v60, %v988_v1  ;;  %v184_v6 = vmul.f32 %v874_v61, %v988_v1 }
  0x2d   :  { %v185_v8 = vmul.f32 %v877_v62, %v988_v1  ;;  %v186_v9 = vmul.f32 %v878_v63, %v988_v1  ;;  %v252_v10 = vadd.f32 %v1002_v7, %v181_v0  ;;  %v253_v11 = vadd.f32 %v1002_v7, %v182_v2 }
  0x2e   :  { %v187_v12 = vmul.f32 %v881_v3, %v988_v1  ;;  %v188_v13 = vmul.f32 %v882_v4, %v988_v1  ;;  %v254_v14 = vadd.f32 %v1002_v7, %v183_v5  ;;  %v255_v15 = vadd.f32 %v1002_v7, %v184_v6 }
  0x2f   :  { %v256_v16 = vadd.f32 %v1002_v7, %v185_v8  ;;  %v257_v17 = vadd.f32 %v1002_v7, %v186_v9  ;;  %v316_v18 = vmax.f32 %v252_v10, 0.0  ;;  %v317_v19 = vmax.f32 %v253_v11, 0.0  ;;  %v954_v8 = vld [vmem:[%s1472_s0 + $0xc0] sm:$0xff]  }
  0x30   :  { %v258_v20 = vadd.f32 %v1002_v7, %v187_v12  ;;  %v259_v21 = vadd.f32 %v1002_v7, %v188_v13  ;;  %v318_v22 = vmax.f32 %v254_v14, 0.0  ;;  %v319_v23 = vmax.f32 %v255_v15, 0.0  ;;  %v955_v13 = vld [vmem:[%s1472_s0 + $0xc8] sm:$0xff]   ;;  %v956_v14 = vld [vmem:[%s1472_s0 + $0xd0] sm:$0xff]  }
  0x31   :  { %v320_v24 = vmax.f32 %v256_v16, 0.0  ;;  %v321_v25 = vmax.f32 %v257_v17, 0.0  ;;  %v771_v27 = vpack.c.bf16 %v316_v18, %v316_v18  ;;  %v772_v28 = vpack.c.bf16 %v317_v19, %v317_v19  ;;  %v957_v19 = vld [vmem:[%s1472_s0 + $0xd8] sm:$0xff]  }
  0x32   :  { %v322_v29 = vmax.f32 %v258_v20, 0.0  ;;  %v323_v30 = vmax.f32 %v259_v21, 0.0  ;;  %v773_v33 = vpack.c.bf16 %v318_v22, %v318_v22  ;;  %v774_v34 = vpack.c.bf16 %v319_v23, %v319_v23 }
  0x33   :  { %v775_v35 = vpack.c.bf16 %v320_v24, %v320_v24  ;;  %v776_v36 = vpack.c.bf16 %v321_v25, %v321_v25  ;;  %637 = vst.msk [vmem:[%s1475_s3 + $0x80] sm:$0xf] %vm604_vm0, %v771_v27  ;;  %638 = vst.msk [vmem:[%s1475_s3 + $0x84] sm:$0xf] %vm604_vm0, %v772_v28  ;;  %v885_v40 = vunpack.c.l.bf16 %v950_v26  ;;  %v886_v41 = vunpack.c.h.bf16 %v950_v26 }
  0x34   :  { %v777_v38 = vpack.c.bf16 %v322_v29, %v322_v29  ;;  %v778_v39 = vpack.c.bf16 %v323_v30, %v323_v30  ;;  %639 = vst.msk [vmem:[%s1475_s3 + $0x88] sm:$0xf] %vm604_vm0, %v773_v33  ;;  %640 = vst.msk [vmem:[%s1475_s3 + $0x8c] sm:$0xf] %vm604_vm0, %v774_v34  ;;  %v889_v42 = vunpack.c.l.bf16 %v951_v31  ;;  %v890_v43 = vunpack.c.h.bf16 %v951_v31 }
  0x35   :  { %641 = vst.msk [vmem:[%s1475_s3 + $0x90] sm:$0xf] %vm604_vm0, %v775_v35  ;;  %642 = vst.msk [vmem:[%s1475_s3 + $0x94] sm:$0xf] %vm604_vm0, %v776_v36  ;;  %v893_v44 = vunpack.c.l.bf16 %v952_v32  ;;  %v894_v45 = vunpack.c.h.bf16 %v952_v32  ;;  %v189_v46 = vmul.f32 %v885_v40, %v988_v1  ;;  %v190_v47 = vmul.f32 %v886_v41, %v988_v1 }
  0x36   :  { %643 = vst.msk [vmem:[%s1475_s3 + $0x98] sm:$0xf] %vm604_vm0, %v777_v38  ;;  %644 = vst.msk [vmem:[%s1475_s3 + $0x9c] sm:$0xf] %vm604_vm0, %v778_v39  ;;  %v897_v48 = vunpack.c.l.bf16 %v953_v37  ;;  %v898_v49 = vunpack.c.h.bf16 %v953_v37  ;;  %v191_v50 = vmul.f32 %v889_v42, %v988_v1  ;;  %v192_v51 = vmul.f32 %v890_v43, %v988_v1 }
  0x37   :  { %v193_v52 = vmul.f32 %v893_v44, %v988_v1  ;;  %v194_v53 = vmul.f32 %v894_v45, %v988_v1  ;;  %v260_v54 = vadd.f32 %v1002_v7, %v189_v46  ;;  %v261_v55 = vadd.f32 %v1002_v7, %v190_v47 }
  0x38   :  { %v195_v56 = vmul.f32 %v897_v48, %v988_v1  ;;  %v196_v57 = vmul.f32 %v898_v49, %v988_v1  ;;  %v262_v58 = vadd.f32 %v1002_v7, %v191_v50  ;;  %v263_v59 = vadd.f32 %v1002_v7, %v192_v51 }
  0x39   :  { %v264_v60 = vadd.f32 %v1002_v7, %v193_v52  ;;  %v265_v61 = vadd.f32 %v1002_v7, %v194_v53  ;;  %v324_v62 = vmax.f32 %v260_v54, 0.0  ;;  %v325_v63 = vmax.f32 %v261_v55, 0.0  ;;  %v958_v52 = vld [vmem:[%s1472_s0 + $0xe0] sm:$0xff]  }
  0x3a   :  { %v266_v0 = vadd.f32 %v1002_v7, %v195_v56  ;;  %v267_v2 = vadd.f32 %v1002_v7, %v196_v57  ;;  %v326_v3 = vmax.f32 %v262_v58, 0.0  ;;  %v327_v4 = vmax.f32 %v263_v59, 0.0  ;;  %v959_v57 = vld [vmem:[%s1472_s0 + $0xe8] sm:$0xff]   ;;  %v960_v58 = vld [vmem:[%s1472_s0 + $0xf0] sm:$0xff]  }
  0x3b   :  { %v328_v5 = vmax.f32 %v264_v60, 0.0  ;;  %v329_v6 = vmax.f32 %v265_v61, 0.0  ;;  %v779_v9 = vpack.c.bf16 %v324_v62, %v324_v62  ;;  %v780_v10 = vpack.c.bf16 %v325_v63, %v325_v63  ;;  %v961_v63 = vld [vmem:[%s1472_s0 + $0xf8] sm:$0xff]  }
  0x3c   :  { %v330_v11 = vmax.f32 %v266_v0, 0.0  ;;  %v331_v12 = vmax.f32 %v267_v2, 0.0  ;;  %v781_v15 = vpack.c.bf16 %v326_v3, %v326_v3  ;;  %v782_v16 = vpack.c.bf16 %v327_v4, %v327_v4 }
  0x3d   :  { %v783_v17 = vpack.c.bf16 %v328_v5, %v328_v5  ;;  %v784_v18 = vpack.c.bf16 %v329_v6, %v329_v6  ;;  %645 = vst.msk [vmem:[%s1475_s3 + $0xa0] sm:$0xf] %vm604_vm0, %v779_v9  ;;  %646 = vst.msk [vmem:[%s1475_s3 + $0xa4] sm:$0xf] %vm604_vm0, %v780_v10  ;;  %v901_v22 = vunpack.c.l.bf16 %v954_v8  ;;  %v902_v23 = vunpack.c.h.bf16 %v954_v8 }
  0x3e   :  { %v785_v20 = vpack.c.bf16 %v330_v11, %v330_v11  ;;  %v786_v21 = vpack.c.bf16 %v331_v12, %v331_v12  ;;  %647 = vst.msk [vmem:[%s1475_s3 + $0xa8] sm:$0xf] %vm604_vm0, %v781_v15  ;;  %648 = vst.msk [vmem:[%s1475_s3 + $0xac] sm:$0xf] %vm604_vm0, %v782_v16  ;;  %v905_v24 = vunpack.c.l.bf16 %v955_v13  ;;  %v906_v25 = vunpack.c.h.bf16 %v955_v13 }
  0x3f   :  { %649 = vst.msk [vmem:[%s1475_s3 + $0xb0] sm:$0xf] %vm604_vm0, %v783_v17  ;;  %650 = vst.msk [vmem:[%s1475_s3 + $0xb4] sm:$0xf] %vm604_vm0, %v784_v18  ;;  %v909_v26 = vunpack.c.l.bf16 %v956_v14  ;;  %v910_v27 = vunpack.c.h.bf16 %v956_v14  ;;  %v197_v28 = vmul.f32 %v901_v22, %v988_v1  ;;  %v198_v29 = vmul.f32 %v902_v23, %v988_v1 }
  0x40   :  { %651 = vst.msk [vmem:[%s1475_s3 + $0xb8] sm:$0xf] %vm604_vm0, %v785_v20  ;;  %652 = vst.msk [vmem:[%s1475_s3 + $0xbc] sm:$0xf] %vm604_vm0, %v786_v21  ;;  %v913_v30 = vunpack.c.l.bf16 %v957_v19  ;;  %v914_v31 = vunpack.c.h.bf16 %v957_v19  ;;  %v199_v32 = vmul.f32 %v905_v24, %v988_v1  ;;  %v200_v33 = vmul.f32 %v906_v25, %v988_v1 }
  0x41   :  { %v201_v34 = vmul.f32 %v909_v26, %v988_v1  ;;  %v202_v35 = vmul.f32 %v910_v27, %v988_v1  ;;  %v268_v36 = vadd.f32 %v1002_v7, %v197_v28  ;;  %v269_v37 = vadd.f32 %v1002_v7, %v198_v29 }
  0x42   :  { %v203_v38 = vmul.f32 %v913_v30, %v988_v1  ;;  %v204_v39 = vmul.f32 %v914_v31, %v988_v1  ;;  %v270_v40 = vadd.f32 %v1002_v7, %v199_v32  ;;  %v271_v41 = vadd.f32 %v1002_v7, %v200_v33 }
  0x43   :  { %v272_v42 = vadd.f32 %v1002_v7, %v201_v34  ;;  %v273_v43 = vadd.f32 %v1002_v7, %v202_v35  ;;  %v332_v44 = vmax.f32 %v268_v36, 0.0  ;;  %v333_v45 = vmax.f32 %v269_v37, 0.0 }
  0x44   :  { %v274_v46 = vadd.f32 %v1002_v7, %v203_v38  ;;  %v275_v47 = vadd.f32 %v1002_v7, %v204_v39  ;;  %v334_v48 = vmax.f32 %v270_v40, 0.0  ;;  %v335_v49 = vmax.f32 %v271_v41, 0.0 }
  0x45   :  { %v336_v50 = vmax.f32 %v272_v42, 0.0  ;;  %v337_v51 = vmax.f32 %v273_v43, 0.0  ;;  %v787_v53 = vpack.c.bf16 %v332_v44, %v332_v44  ;;  %v788_v54 = vpack.c.bf16 %v333_v45, %v333_v45 }
  0x46   :  { %v338_v55 = vmax.f32 %v274_v46, 0.0  ;;  %v339_v56 = vmax.f32 %v275_v47, 0.0  ;;  %v789_v59 = vpack.c.bf16 %v334_v48, %v334_v48  ;;  %v790_v60 = vpack.c.bf16 %v335_v49, %v335_v49 }
  0x47   :  { %v791_v61 = vpack.c.bf16 %v336_v50, %v336_v50  ;;  %v792_v62 = vpack.c.bf16 %v337_v51, %v337_v51  ;;  %653 = vst.msk [vmem:[%s1475_s3 + $0xc0] sm:$0xf] %vm604_vm0, %v787_v53  ;;  %654 = vst.msk [vmem:[%s1475_s3 + $0xc4] sm:$0xf] %vm604_vm0, %v788_v54  ;;  %v917_v3 = vunpack.c.l.bf16 %v958_v52  ;;  %v918_v4 = vunpack.c.h.bf16 %v958_v52 }
  0x48   :  { %v793_v0 = vpack.c.bf16 %v338_v55, %v338_v55  ;;  %v794_v2 = vpack.c.bf16 %v339_v56, %v339_v56  ;;  %655 = vst.msk [vmem:[%s1475_s3 + $0xc8] sm:$0xf] %vm604_vm0, %v789_v59  ;;  %656 = vst.msk [vmem:[%s1475_s3 + $0xcc] sm:$0xf] %vm604_vm0, %v790_v60  ;;  %v921_v5 = vunpack.c.l.bf16 %v959_v57  ;;  %v922_v6 = vunpack.c.h.bf16 %v959_v57 }
  0x49   :  { %657 = vst.msk [vmem:[%s1475_s3 + $0xd0] sm:$0xf] %vm604_vm0, %v791_v61  ;;  %658 = vst.msk [vmem:[%s1475_s3 + $0xd4] sm:$0xf] %vm604_vm0, %v792_v62  ;;  %v925_v8 = vunpack.c.l.bf16 %v960_v58  ;;  %v926_v9 = vunpack.c.h.bf16 %v960_v58  ;;  %v205_v10 = vmul.f32 %v917_v3, %v988_v1  ;;  %v206_v11 = vmul.f32 %v918_v4, %v988_v1 }
  0x4a   :  { %659 = vst.msk [vmem:[%s1475_s3 + $0xd8] sm:$0xf] %vm604_vm0, %v793_v0  ;;  %660 = vst.msk [vmem:[%s1475_s3 + $0xdc] sm:$0xf] %vm604_vm0, %v794_v2  ;;  %v929_v12 = vunpack.c.l.bf16 %v961_v63  ;;  %v930_v13 = vunpack.c.h.bf16 %v961_v63  ;;  %v207_v14 = vmul.f32 %v921_v5, %v988_v1  ;;  %v208_v15 = vmul.f32 %v922_v6, %v988_v1 }
  0x4b   :  { %v209_v16 = vmul.f32 %v925_v8, %v988_v1  ;;  %v210_v17 = vmul.f32 %v926_v9, %v988_v1  ;;  %v276_v18 = vadd.f32 %v1002_v7, %v205_v10  ;;  %v277_v19 = vadd.f32 %v1002_v7, %v206_v11 }
  0x4c   :  { %v211_v20 = vmul.f32 %v929_v12, %v988_v1  ;;  %v212_v21 = vmul.f32 %v930_v13, %v988_v1  ;;  %v278_v22 = vadd.f32 %v1002_v7, %v207_v14  ;;  %v279_v23 = vadd.f32 %v1002_v7, %v208_v15 }
  0x4d   :  { %v280_v24 = vadd.f32 %v1002_v7, %v209_v16  ;;  %v281_v25 = vadd.f32 %v1002_v7, %v210_v17  ;;  %v340_v26 = vmax.f32 %v276_v18, 0.0  ;;  %v341_v27 = vmax.f32 %v277_v19, 0.0 }
  0x4e   :  { %v282_v28 = vadd.f32 %v1002_v7, %v211_v20  ;;  %v283_v29 = vadd.f32 %v1002_v7, %v212_v21  ;;  %v342_v30 = vmax.f32 %v278_v22, 0.0  ;;  %v343_v31 = vmax.f32 %v279_v23, 0.0 }
  0x4f   :  { %v344_v32 = vmax.f32 %v280_v24, 0.0  ;;  %v345_v33 = vmax.f32 %v281_v25, 0.0  ;;  %v795_v34 = vpack.c.bf16 %v340_v26, %v340_v26  ;;  %v796_v1 = vpack.c.bf16 %v341_v27, %v341_v27 }
  0x50   :  { %v346_v35 = vmax.f32 %v282_v28, 0.0  ;;  %v347_v36 = vmax.f32 %v283_v29, 0.0  ;;  %v797_v37 = vpack.c.bf16 %v342_v30, %v342_v30  ;;  %v798_v38 = vpack.c.bf16 %v343_v31, %v343_v31 }
  0x51   :  { %v799_v39 = vpack.c.bf16 %v344_v32, %v344_v32  ;;  %v800_v40 = vpack.c.bf16 %v345_v33, %v345_v33  ;;  %661 = vst.msk [vmem:[%s1475_s3 + $0xe0] sm:$0xf] %vm604_vm0, %v795_v34  ;;  %662 = vst.msk [vmem:[%s1475_s3 + $0xe4] sm:$0xf] %vm604_vm0, %v796_v1 }
  0x52   :  { %v801_v7 = vpack.c.bf16 %v346_v35, %v346_v35  ;;  %v802_v41 = vpack.c.bf16 %v347_v36, %v347_v36  ;;  %663 = vst.msk [vmem:[%s1475_s3 + $0xe8] sm:$0xf] %vm604_vm0, %v797_v37  ;;  %664 = vst.msk [vmem:[%s1475_s3 + $0xec] sm:$0xf] %vm604_vm0, %v798_v38 }
  0x53   :  { %665 = vst.msk [vmem:[%s1475_s3 + $0xf0] sm:$0xf] %vm604_vm0, %v799_v39  ;;  %666 = vst.msk [vmem:[%s1475_s3 + $0xf4] sm:$0xf] %vm604_vm0, %v800_v40 }
  0x54   :  { %667 = vst.msk [vmem:[%s1475_s3 + $0xf8] sm:$0xf] %vm604_vm0, %v801_v7  ;;  %668 = vst.msk [vmem:[%s1475_s3 + $0xfc] sm:$0xf] %vm604_vm0, %v802_v41 }

// kernel: blur_generator_forward.53
= control target key start
LH: loop header
LB: loop body
LE: loop exit
PB: predicated region body
PF: predicated region fallthrough
CT: control target
= control target key end

     0   :  { %vm361_vm0 = vcmask 1044480   ;;  %vm362_vm1 = vcmask 1045504   ;;  %vm264_vm2 = vcmask 220160   ;;  %v1731_v1 = vmov 65535   ;;  %s2272_s1 = inlined_call_operand.vmem [shape: bf16[27,128], index: 1, kind: input, shape index: {}]   ;;  %s2273_s0 = inlined_call_operand.vmem [shape: bf16[512,27], index: 0, kind: input, shape index: {}]   ;;  %s2274_s2 = inlined_call_operand.vmem [shape: f32[1,128], index: 2, kind: input, shape index: {}]   ;;  %s2275_s4 = inlined_call_operand.vmem [shape: f32[1,128], index: 4, kind: output, shape index: {1}]   ;;  %s2276_s5 = inlined_call_operand.vmem [shape: f32[1,128], index: 5, kind: output, shape index: {2}]   ;;  %s2277_s3 = inlined_call_operand.vmem [shape: bf16[512,128], index: 3, kind: output, shape index: {0}]  }
   0x1   :  { %v1697_v0 = vld [vmem:[%s2272_s1] sm:$0xff]   ;;  %v363_v2 = vsel %vm361_vm0, 4294967295, %v1731_v1  ;;  %v1698_v3 = vld [vmem:[%s2272_s1 + $0x8] sm:$0x3f]   ;;  %v1701_v8 = vld [vmem:[%s2273_s0 + $0x10] sm:$0xff]   ;;  %v1732_v39 = vmov 0.0  }
   0x2   :  { %1623 = vmatprep.subr.bf16.mxu0 %v1697_v0  ;;  %v364_v4 = vsel %vm362_vm1, %v363_v2, 0  ;;  %v1699_v5 = vld [vmem:[%s2273_s0] sm:$0xff]   ;;  %1691 = vmatprep.subr.bf16.mxu1 %v1697_v0  ;;  %v1700_v7 = vld [vmem:[%s2273_s0 + $0x8] sm:$0xff]   ;;  %v1702_v9 = vld [vmem:[%s2273_s0 + $0x18] sm:$0xff]   ;;  %981 = vst [vmem:[%s2275_s4] sm:$0x1] %v1732_v39 }
   0x3   :  { %1624 = vmatpush3.bf16.msra.mxu0 %v1697_v0  ;;  %v366_v6 = vand.u32 %v1698_v3, %v364_v4  ;;  %1693 = vmatpush3.bf16.msra.mxu1 %v1697_v0  ;;  %v1703_v10 = vld [vmem:[%s2273_s0 + $0x20] sm:$0xff]   ;;  %v1716_v12 = vld [vmem:[%s2273_s0 + $0x88] sm:$0xff]   ;;  %v1717_v13 = vld [vmem:[%s2273_s0 + $0x90] sm:$0xff]   ;;  %982 = vst [vmem:[%s2276_s5] sm:$0x1] %v1732_v39 }
   0x4   :  { %1627 = vmatprep.mubr.msk.bf16.mxu0 %vm264_vm2, %v1699_v5  ;;  %v1715_v11 = vld [vmem:[%s2273_s0 + $0x80] sm:$0xff]   ;;  %v1704_v14 = vld [vmem:[%s2273_s0 + $0x28] sm:$0xff]   ;;  %v1705_v15 = vld [vmem:[%s2273_s0 + $0x30] sm:$0xff]  }
   0x5   :  { %1625 = vmatprep.subr.bf16.mxu0 %v366_v6  ;;  %1692 = vmatprep.subr.bf16.mxu1 %v366_v6  ;;  %v1718_v16 = vld [vmem:[%s2273_s0 + $0x98] sm:$0xff]   ;;  %v1719_v17 = vld [vmem:[%s2273_s0 + $0xa0] sm:$0xff]   ;;  %v1720_v20 = vld [vmem:[%s2273_s0 + $0xa8] sm:$0xff]  }
   0x6   :  { %1659 = vmatprep.mubr.msk.bf16.mxu1 %vm264_vm2, %v1715_v11  ;;  %v1706_v18 = vld [vmem:[%s2273_s0 + $0x38] sm:$0xff]   ;;  %v1707_v19 = vld [vmem:[%s2273_s0 + $0x40] sm:$0xff]   ;;  %v1721_v21 = vld [vmem:[%s2273_s0 + $0xb0] sm:$0xff]  }
   0x7   :  { %1626 = vmatpush3.bf16.msra.mxu0 %v366_v6  ;;  %1694 = vmatpush3.bf16.msra.mxu1 %v366_v6  ;;  %v1708_v22 = vld [vmem:[%s2273_s0 + $0x48] sm:$0xff]   ;;  %v1709_v23 = vld [vmem:[%s2273_s0 + $0x50] sm:$0xff]   ;;  %v1722_v24 = vld [vmem:[%s2273_s0 + $0xb8] sm:$0xff]  }
   0x8   :  { %v1723_v25 = vld [vmem:[%s2273_s0 + $0xc0] sm:$0xff]   ;;  %v1710_v26 = vld [vmem:[%s2273_s0 + $0x58] sm:$0xff]   ;;  %v1724_v28 = vld [vmem:[%s2273_s0 + $0xc8] sm:$0xff]  }
   0x9   :  { %v1711_v27 = vld [vmem:[%s2273_s0 + $0x60] sm:$0xff]   ;;  %v1725_v29 = vld [vmem:[%s2273_s0 + $0xd0] sm:$0xff]   ;;  %v1712_v30 = vld [vmem:[%s2273_s0 + $0x68] sm:$0xff]  }
   0xa   :  { %1628 = vmatmul.mubr.msk.bf16.vlgmr.msra.gmra.mrb[0].mxu0 %vm264_vm2, %v1700_v7  ;;  %1660 = vmatmul.mubr.msk.bf16.vlgmr.msra.gmra.mrb[0].mxu1 %vm264_vm2, %v1716_v12  ;;  %v1713_v31 = vld [vmem:[%s2273_s0 + $0x70] sm:$0xff]   ;;  %v1726_v32 = vld [vmem:[%s2273_s0 + $0xd8] sm:$0xff]   ;;  %v1727_v33 = vld [vmem:[%s2273_s0 + $0xe0] sm:$0xff]  }
   0xb   :  { %1631 = vmatprep.mubr.msk.bf16.mxu0 %vm264_vm2, %v1701_v8  ;;  %1663 = vmatprep.mubr.msk.bf16.mxu1 %vm264_vm2, %v1717_v13  ;;  %v1714_v34 = vld [vmem:[%s2273_s0 + $0x78] sm:$0xff]   ;;  %v1728_v35 = vld [vmem:[%s2273_s0 + $0xe8] sm:$0xff]   ;;  %v1729_v36 = vld [vmem:[%s2273_s0 + $0xf0] sm:$0xff]  }
   0xc   :  { %v1730_v37 = vld [vmem:[%s2273_s0 + $0xf8] sm:$0xff]   ;;  %v1900_v38 = vld [vmem:[%s2274_s2] ss:$0 sm:$0xff] }
  0x12   :  { %1632 = vmatmul.mubr.msk.bf16.gmra.mrb[4].mxu0 %vm264_vm2, %v1702_v9  ;;  %1664 = vmatmul.mubr.msk.bf16.gmra.mrb[4].mxu1 %vm264_vm2, %v1718_v16 }
  0x13   :  { %1635 = vmatprep.mubr.msk.bf16.mxu0 %vm264_vm2, %v1703_v10  ;;  %1667 = vmatprep.mubr.msk.bf16.mxu1 %vm264_vm2, %v1719_v17 }
  0x1a   :  { %1636 = vmatmul.mubr.msk.bf16.gmra.mrb[8].mxu0 %vm264_vm2, %v1704_v14  ;;  %1668 = vmatmul.mubr.msk.bf16.gmra.mrb[8].mxu1 %vm264_vm2, %v1720_v20 }
  0x1b   :  { %1639 = vmatprep.mubr.msk.bf16.mxu0 %vm264_vm2, %v1705_v15  ;;  %1671 = vmatprep.mubr.msk.bf16.mxu1 %vm264_vm2, %v1721_v21 }
  0x22   :  { %1640 = vmatmul.mubr.msk.bf16.gmra.mrb[12].mxu0 %vm264_vm2, %v1706_v18  ;;  %1672 = vmatmul.mubr.msk.bf16.gmra.mrb[12].mxu1 %vm264_vm2, %v1722_v24 }
  0x23   :  { %1643 = vmatprep.mubr.msk.bf16.mxu0 %vm264_vm2, %v1707_v19  ;;  %1675 = vmatprep.mubr.msk.bf16.mxu1 %vm264_vm2, %v1723_v25 }
  0x2a   :  { %1644 = vmatmul.mubr.msk.bf16.gmra.mrb[16].mxu0 %vm264_vm2, %v1708_v22  ;;  %1676 = vmatmul.mubr.msk.bf16.gmra.mrb[16].mxu1 %vm264_vm2, %v1724_v28 }
  0x2b   :  { %1647 = vmatprep.mubr.msk.bf16.mxu0 %vm264_vm2, %v1709_v23  ;;  %1679 = vmatprep.mubr.msk.bf16.mxu1 %vm264_vm2, %v1725_v29 }
  0x32   :  { %1648 = vmatmul.mubr.msk.bf16.gmra.mrb[20].mxu0 %vm264_vm2, %v1710_v26  ;;  %1680 = vmatmul.mubr.msk.bf16.gmra.mrb[20].mxu1 %vm264_vm2, %v1726_v32 }
  0x33   :  { %1651 = vmatprep.mubr.msk.bf16.mxu0 %vm264_vm2, %v1711_v27  ;;  %1683 = vmatprep.mubr.msk.bf16.mxu1 %vm264_vm2, %v1727_v33 }
  0x3a   :  { %1652 = vmatmul.mubr.msk.bf16.gmra.mrb[24].mxu0 %vm264_vm2, %v1712_v30  ;;  %1684 = vmatmul.mubr.msk.bf16.gmra.mrb[24].mxu1 %vm264_vm2, %v1728_v35 }
  0x3b   :  { %1655 = vmatprep.mubr.msk.bf16.mxu0 %vm264_vm2, %v1713_v31  ;;  %1687 = vmatprep.mubr.msk.bf16.mxu1 %vm264_vm2, %v1729_v36 }
  0x42   :  { %1656 = vmatmul.mubr.msk.bf16.gmra.mrb[28].mxu0 %vm264_vm2, %v1714_v34  ;;  %1688 = vmatmul.mubr.msk.bf16.gmra.mrb[28].mxu1 %vm264_vm2, %v1730_v37 }
  0xdd   :  { %v1629_v40 = vpop.f32.mrb[0].mxu0  ;;  %v1661_v2 = vpop.f32.mrb[0].mxu1 }
  0xde   :  { %v402_v41 = vpop.f32.mrb[1].mxu0  ;;  %v411_v44 = vadd.f32 %v1629_v40, %v1900_v38  ;;  %v530_v7 = vpop.f32.mrb[1].mxu1  ;;  %v1923_v9 = vadd.f32 %v1661_v2, %v1900_v38 }
  0xdf   :  { %v403_v42 = vadd.f32 %v1900_v38, %v402_v41  ;;  %v1630_v43 = vpop.f32.mrb[2].mxu0  ;;  %v1926_v10 = vadd.f32 %v1900_v38, %v530_v7  ;;  %v1662_v11 = vpop.f32.mrb[2].mxu1 }
  0xe0   :  { %v414_v45 = vadd.f32 %v1630_v43, %v1900_v38  ;;  %v405_v46 = vpop.f32.mrb[3].mxu0  ;;  %v1058_v53 = vmul.f32 %v411_v44, %v411_v44  ;;  %v533_v16 = vpop.f32.mrb[3].mxu1  ;;  %v1932_v17 = vadd.f32 %v1662_v11, %v1900_v38 }
  0xe1   :  { %v406_v47 = vadd.f32 %v1900_v38, %v405_v46  ;;  %v1056_v49 = vmul.f32 %v403_v42, %v403_v42  ;;  %v1935_v18 = vadd.f32 %v1900_v38, %v533_v16 }
  0xe2   :  { %v1406_v48 = vpack.c.bf16 %v414_v45, %v411_v44  ;;  %v1059_v58 = vmul.f32 %v414_v45, %v414_v45  ;;  %v1486_v24 = vpack.c.bf16 %v1932_v17, %v1923_v9 }
  0xe3   :  { %v1401_v50 = vpack.c.bf16 %v406_v47, %v403_v42  ;;  %v984_v51 = vadd.f32 %v406_v47, %v403_v42  ;;  %v1057_v52 = vmul.f32 %v406_v47, %v406_v47  ;;  %v1481_v25 = vpack.c.bf16 %v1935_v18, %v1926_v10 }
  0xe4   :  { %1558 = vst [vmem:[%s2277_s3 + $0x8] sm:$0xff] %v1406_v48   ;;  %1574 = vst [vmem:[%s2277_s3 + $0x88] sm:$0xff] %v1486_v24  }
  0xe5   :  { %1402 = vst [vmem:[%s2277_s3] sm:$0xff] %v1401_v50   ;;  %v985_v54 = vadd.f32 %v984_v51, %v411_v44  ;;  %v1120_v55 = vadd.f32 %v1057_v52, %v1056_v49  ;;  %v1633_v56 = vpop.f32.mrb[4].mxu0  ;;  %1573 = vst [vmem:[%s2277_s3 + $0x80] sm:$0xff] %v1481_v25   ;;  %v1665_v34 = vpop.f32.mrb[4].mxu1 }
  0xe6   :  { %v418_v57 = vpop.f32.mrb[5].mxu0  ;;  %v427_v63 = vadd.f32 %v1633_v56, %v1900_v38  ;;  %v546_v40 = vpop.f32.mrb[5].mxu1  ;;  %v1955_v42 = vadd.f32 %v1665_v34, %v1900_v38 }
  0xe7   :  { %v1121_v59 = vadd.f32 %v1120_v55, %v1058_v53  ;;  %v419_v60 = vadd.f32 %v1900_v38, %v418_v57  ;;  %v986_v61 = vadd.f32 %v985_v54, %v414_v45  ;;  %v1634_v62 = vpop.f32.mrb[6].mxu0  ;;  %v1958_v43 = vadd.f32 %v1900_v38, %v546_v40  ;;  %v1666_v44 = vpop.f32.mrb[6].mxu1 }
  0xe8   :  { %v430_v0 = vadd.f32 %v1634_v62, %v1900_v38  ;;  %v421_v1 = vpop.f32.mrb[7].mxu0  ;;  %v1062_v19 = vmul.f32 %v427_v63, %v427_v63  ;;  %v549_v49 = vpop.f32.mrb[7].mxu1  ;;  %v1964_v50 = vadd.f32 %v1666_v44, %v1900_v38 }
  0xe9   :  { %v987_v3 = vadd.f32 %v986_v61, %v419_v60  ;;  %v1060_v4 = vmul.f32 %v419_v60, %v419_v60  ;;  %v1122_v5 = vadd.f32 %v1121_v59, %v1059_v58  ;;  %v422_v6 = vadd.f32 %v1900_v38, %v421_v1 }
  0xea   :  { %v1416_v8 = vpack.c.bf16 %v430_v0, %v427_v63  ;;  %v1063_v26 = vmul.f32 %v430_v0, %v430_v0  ;;  %v1967_v51 = vadd.f32 %v1900_v38, %v549_v49  ;;  %v1496_v57 = vpack.c.bf16 %v1964_v50, %v1955_v42 }
  0xeb   :  { %v1123_v12 = vadd.f32 %v1122_v5, %v1060_v4  ;;  %v1411_v13 = vpack.c.bf16 %v422_v6, %v419_v60  ;;  %v988_v14 = vadd.f32 %v987_v3, %v422_v6  ;;  %v1061_v15 = vmul.f32 %v422_v6, %v422_v6 }
  0xec   :  { %1560 = vst [vmem:[%s2277_s3 + $0x18] sm:$0xff] %v1416_v8   ;;  %v1491_v58 = vpack.c.bf16 %v1967_v51, %v1958_v43  ;;  %1576 = vst [vmem:[%s2277_s3 + $0x98] sm:$0xff] %v1496_v57  }
  0xed   :  { %1559 = vst [vmem:[%s2277_s3 + $0x10] sm:$0xff] %v1411_v13   ;;  %v989_v20 = vadd.f32 %v988_v14, %v427_v63  ;;  %v1124_v21 = vadd.f32 %v1123_v12, %v1061_v15  ;;  %v1637_v22 = vpop.f32.mrb[8].mxu0  ;;  %v1669_v3 = vpop.f32.mrb[8].mxu1 }
  0xee   :  { %v434_v23 = vpop.f32.mrb[9].mxu0  ;;  %v443_v31 = vadd.f32 %v1637_v22, %v1900_v38  ;;  %1575 = vst [vmem:[%s2277_s3 + $0x90] sm:$0xff] %v1491_v58   ;;  %v562_v8 = vpop.f32.mrb[9].mxu1  ;;  %v1987_v12 = vadd.f32 %v1669_v3, %v1900_v38 }
  0xef   :  { %v1125_v27 = vadd.f32 %v1124_v21, %v1062_v19  ;;  %v435_v28 = vadd.f32 %v1900_v38, %v434_v23  ;;  %v990_v29 = vadd.f32 %v989_v20, %v430_v0  ;;  %v1638_v30 = vpop.f32.mrb[10].mxu0  ;;  %v1990_v13 = vadd.f32 %v1900_v38, %v562_v8  ;;  %v1670_v14 = vpop.f32.mrb[10].mxu1 }
  0xf0   :  { %v446_v32 = vadd.f32 %v1638_v30, %v1900_v38  ;;  %v437_v33 = vpop.f32.mrb[11].mxu0  ;;  %v1066_v52 = vmul.f32 %v443_v31, %v443_v31  ;;  %v565_v21 = vpop.f32.mrb[11].mxu1  ;;  %v1996_v22 = vadd.f32 %v1670_v14, %v1900_v38 }
  0xf1   :  { %v991_v35 = vadd.f32 %v990_v29, %v435_v28  ;;  %v1064_v36 = vmul.f32 %v435_v28, %v435_v28  ;;  %v1126_v37 = vadd.f32 %v1125_v27, %v1063_v26  ;;  %v438_v39 = vadd.f32 %v1900_v38, %v437_v33 }
  0xf2   :  { %v1426_v41 = vpack.c.bf16 %v446_v32, %v443_v31  ;;  %v1067_v59 = vmul.f32 %v446_v32, %v446_v32  ;;  %v1999_v23 = vadd.f32 %v1900_v38, %v565_v21  ;;  %v1506_v29 = vpack.c.bf16 %v1996_v22, %v1987_v12 }
  0xf3   :  { %v1127_v45 = vadd.f32 %v1126_v37, %v1064_v36  ;;  %v1421_v46 = vpack.c.bf16 %v438_v39, %v435_v28  ;;  %v992_v47 = vadd.f32 %v991_v35, %v438_v39  ;;  %v1065_v48 = vmul.f32 %v438_v39, %v438_v39 }
  0xf4   :  { %1562 = vst [vmem:[%s2277_s3 + $0x28] sm:$0xff] %v1426_v41   ;;  %v1501_v30 = vpack.c.bf16 %v1999_v23, %v1990_v13  ;;  %1578 = vst [vmem:[%s2277_s3 + $0xa8] sm:$0xff] %v1506_v29  }
  0xf5   :  { %1561 = vst [vmem:[%s2277_s3 + $0x20] sm:$0xff] %v1421_v46   ;;  %v993_v53 = vadd.f32 %v992_v47, %v443_v31  ;;  %v1128_v54 = vadd.f32 %v1127_v45, %v1065_v48  ;;  %v1641_v55 = vpop.f32.mrb[12].mxu0  ;;  %v1673_v40 = vpop.f32.mrb[12].mxu1 }
  0xf6   :  { %v450_v56 = vpop.f32.mrb[13].mxu0  ;;  %v459_v0 = vadd.f32 %v1641_v55, %v1900_v38  ;;  %1577 = vst [vmem:[%s2277_s3 + $0xa0] sm:$0xff] %v1501_v30   ;;  %v578_v47 = vpop.f32.mrb[13].mxu1  ;;  %v2019_v49 = vadd.f32 %v1673_v40, %v1900_v38 }
  0xf7   :  { %v1129_v60 = vadd.f32 %v1128_v54, %v1066_v52  ;;  %v451_v61 = vadd.f32 %v1900_v38, %v450_v56  ;;  %v994_v62 = vadd.f32 %v993_v53, %v446_v32  ;;  %v1642_v63 = vpop.f32.mrb[14].mxu0  ;;  %v2022_v52 = vadd.f32 %v1900_v38, %v578_v47  ;;  %v1674_v53 = vpop.f32.mrb[14].mxu1 }
  0xf8   :  { %v462_v1 = vadd.f32 %v1642_v63, %v1900_v38  ;;  %v453_v2 = vpop.f32.mrb[15].mxu0  ;;  %v1070_v24 = vmul.f32 %v459_v0, %v459_v0  ;;  %v581_v58 = vpop.f32.mrb[15].mxu1 }
  0xf9   :  { %v995_v4 = vadd.f32 %v994_v62, %v451_v61  ;;  %v1068_v5 = vmul.f32 %v451_v61, %v451_v61  ;;  %v1130_v6 = vadd.f32 %v1129_v60, %v1067_v59  ;;  %v454_v7 = vadd.f32 %v1900_v38, %v453_v2 }
  0xfa   :  { %v1436_v11 = vpack.c.bf16 %v462_v1, %v459_v0  ;;  %v1071_v31 = vmul.f32 %v462_v1, %v462_v1  ;;  %v2028_v59 = vadd.f32 %v1674_v53, %v1900_v38  ;;  %v2031_v60 = vadd.f32 %v1900_v38, %v581_v58 }
  0xfb   :  { %v1131_v15 = vadd.f32 %v1130_v6, %v1068_v5  ;;  %v1431_v16 = vpack.c.bf16 %v454_v7, %v451_v61  ;;  %v996_v19 = vadd.f32 %v995_v4, %v454_v7  ;;  %v1069_v20 = vmul.f32 %v454_v7, %v454_v7 }
  0xfc   :  { %1564 = vst [vmem:[%s2277_s3 + $0x38] sm:$0xff] %v1436_v11   ;;  %v1516_v2 = vpack.c.bf16 %v2028_v59, %v2019_v49  ;;  %v1511_v3 = vpack.c.bf16 %v2031_v60, %v2022_v52 }
  0xfd   :  { %1563 = vst [vmem:[%s2277_s3 + $0x30] sm:$0xff] %v1431_v16   ;;  %v997_v25 = vadd.f32 %v996_v19, %v459_v0  ;;  %v1132_v26 = vadd.f32 %v1131_v15, %v1069_v20  ;;  %v1645_v27 = vpop.f32.mrb[16].mxu0  ;;  %v1677_v16 = vpop.f32.mrb[16].mxu1 }
  0xfe   :  { %v466_v28 = vpop.f32.mrb[17].mxu0  ;;  %v475_v36 = vadd.f32 %v1645_v27, %v1900_v38  ;;  %1580 = vst [vmem:[%s2277_s3 + $0xb8] sm:$0xff] %v1516_v2   ;;  %1579 = vst [vmem:[%s2277_s3 + $0xb0] sm:$0xff] %v1511_v3   ;;  %v2051_v27 = vadd.f32 %v1677_v16, %v1900_v38 }
  0xff   :  { %v1133_v32 = vadd.f32 %v1132_v26, %v1070_v24  ;;  %v467_v33 = vadd.f32 %v1900_v38, %v466_v28  ;;  %v998_v34 = vadd.f32 %v997_v25, %v462_v1  ;;  %v1646_v35 = vpop.f32.mrb[18].mxu0  ;;  %v594_v25 = vpop.f32.mrb[17].mxu1 }
 0x100   :  { %v478_v37 = vadd.f32 %v1646_v35, %v1900_v38  ;;  %v469_v39 = vpop.f32.mrb[19].mxu0  ;;  %v1074_v61 = vmul.f32 %v475_v36, %v475_v36  ;;  %v2054_v28 = vadd.f32 %v1900_v38, %v594_v25  ;;  %v1678_v29 = vpop.f32.mrb[18].mxu1 }
 0x101   :  { %v999_v41 = vadd.f32 %v998_v34, %v467_v33  ;;  %v1072_v44 = vmul.f32 %v467_v33, %v467_v33  ;;  %v1134_v45 = vadd.f32 %v1133_v32, %v1071_v31  ;;  %v470_v46 = vadd.f32 %v1900_v38, %v469_v39  ;;  %v597_v34 = vpop.f32.mrb[19].mxu1 }
 0x102   :  { %v1446_v48 = vpack.c.bf16 %v478_v37, %v475_v36  ;;  %v1075_v4 = vmul.f32 %v478_v37, %v478_v37  ;;  %v2060_v35 = vadd.f32 %v1678_v29, %v1900_v38 }
 0x103   :  { %v1135_v54 = vadd.f32 %v1134_v45, %v1072_v44  ;;  %v1441_v55 = vpack.c.bf16 %v470_v46, %v467_v33  ;;  %v1000_v56 = vadd.f32 %v999_v41, %v470_v46  ;;  %v1073_v57 = vmul.f32 %v470_v46, %v470_v46 }
 0x104   :  { %1566 = vst [vmem:[%s2277_s3 + $0x48] sm:$0xff] %v1446_v48   ;;  %v1526_v45 = vpack.c.bf16 %v2060_v35, %v2051_v27 }
 0x105   :  { %1565 = vst [vmem:[%s2277_s3 + $0x40] sm:$0xff] %v1441_v55   ;;  %v1001_v62 = vadd.f32 %v1000_v56, %v475_v36  ;;  %v1136_v63 = vadd.f32 %v1135_v54, %v1073_v57  ;;  %v1649_v0 = vpop.f32.mrb[20].mxu0  ;;  %v2063_v36 = vadd.f32 %v1900_v38, %v597_v34 }
 0x106   :  { %v482_v1 = vpop.f32.mrb[21].mxu0  ;;  %v491_v11 = vadd.f32 %v1649_v0, %v1900_v38  ;;  %1582 = vst [vmem:[%s2277_s3 + $0xc8] sm:$0xff] %v1526_v45  }
 0x107   :  { %v1137_v5 = vadd.f32 %v1136_v63, %v1074_v61  ;;  %v483_v6 = vadd.f32 %v1900_v38, %v482_v1  ;;  %v1002_v7 = vadd.f32 %v1001_v62, %v478_v37  ;;  %v1650_v8 = vpop.f32.mrb[22].mxu0  ;;  %v1521_v46 = vpack.c.bf16 %v2063_v36, %v2054_v28  ;;  %v1681_v61 = vpop.f32.mrb[20].mxu1 }
 0x108   :  { %v494_v14 = vadd.f32 %v1650_v8, %v1900_v38  ;;  %v485_v15 = vpop.f32.mrb[23].mxu0  ;;  %v1078_v37 = vmul.f32 %v491_v11, %v491_v11  ;;  %v610_v2 = vpop.f32.mrb[21].mxu1 }
 0x109   :  { %v1003_v19 = vadd.f32 %v1002_v7, %v483_v6  ;;  %v1076_v20 = vmul.f32 %v483_v6, %v483_v6  ;;  %v1138_v21 = vadd.f32 %v1137_v5, %v1075_v4  ;;  %v486_v24 = vadd.f32 %v1900_v38, %v485_v15  ;;  %1581 = vst [vmem:[%s2277_s3 + $0xc0] sm:$0xff] %v1521_v46  }
 0x10a   :  { %v1456_v26 = vpack.c.bf16 %v494_v14, %v491_v11  ;;  %v1079_v47 = vmul.f32 %v494_v14, %v494_v14  ;;  %v2083_v4 = vadd.f32 %v1681_v61, %v1900_v38  ;;  %v2086_v5 = vadd.f32 %v1900_v38, %v610_v2 }
 0x10b   :  { %v1139_v30 = vadd.f32 %v1138_v21, %v1076_v20  ;;  %v1451_v31 = vpack.c.bf16 %v486_v24, %v483_v6  ;;  %v1004_v32 = vadd.f32 %v1003_v19, %v486_v24  ;;  %v1077_v33 = vmul.f32 %v486_v24, %v486_v24  ;;  %v1682_v6 = vpop.f32.mrb[22].mxu1 }
 0x10c   :  { %1568 = vst [vmem:[%s2277_s3 + $0x58] sm:$0xff] %v1456_v26   ;;  %v613_v15 = vpop.f32.mrb[23].mxu1  ;;  %v2092_v16 = vadd.f32 %v1682_v6, %v1900_v38 }
 0x10d   :  { %1567 = vst [vmem:[%s2277_s3 + $0x50] sm:$0xff] %v1451_v31   ;;  %v1005_v39 = vadd.f32 %v1004_v32, %v491_v11  ;;  %v1140_v40 = vadd.f32 %v1139_v30, %v1077_v33  ;;  %v1653_v41 = vpop.f32.mrb[24].mxu0  ;;  %v2095_v19 = vadd.f32 %v1900_v38, %v613_v15 }
 0x10e   :  { %v498_v44 = vpop.f32.mrb[25].mxu0  ;;  %v507_v56 = vadd.f32 %v1653_v41, %v1900_v38  ;;  %v1536_v29 = vpack.c.bf16 %v2092_v16, %v2083_v4 }
 0x10f   :  { %v1141_v48 = vadd.f32 %v1140_v40, %v1078_v37  ;;  %v499_v53 = vadd.f32 %v1900_v38, %v498_v44  ;;  %v1006_v54 = vadd.f32 %v1005_v39, %v494_v14  ;;  %v1654_v55 = vpop.f32.mrb[26].mxu0  ;;  %v1531_v30 = vpack.c.bf16 %v2095_v19, %v2086_v5  ;;  %v1685_v44 = vpop.f32.mrb[24].mxu1 }
 0x110   :  { %v510_v57 = vadd.f32 %v1654_v55, %v1900_v38  ;;  %v501_v58 = vpop.f32.mrb[27].mxu0  ;;  %v1082_v20 = vmul.f32 %v507_v56, %v507_v56  ;;  %1584 = vst [vmem:[%s2277_s3 + $0xd8] sm:$0xff] %v1536_v29   ;;  %v2115_v55 = vadd.f32 %v1685_v44, %v1900_v38 }
 0x111   :  { %v1007_v62 = vadd.f32 %v1006_v54, %v499_v53  ;;  %v1080_v63 = vmul.f32 %v499_v53, %v499_v53  ;;  %v1142_v0 = vadd.f32 %v1141_v48, %v1079_v47  ;;  %v502_v1 = vadd.f32 %v1900_v38, %v501_v58  ;;  %1583 = vst [vmem:[%s2277_s3 + $0xd0] sm:$0xff] %v1531_v30  }
 0x112   :  { %v1466_v3 = vpack.c.bf16 %v510_v57, %v507_v56  ;;  %v1083_v31 = vmul.f32 %v510_v57, %v510_v57 }
 0x113   :  { %v1143_v7 = vadd.f32 %v1142_v0, %v1080_v63  ;;  %v1461_v8 = vpack.c.bf16 %v502_v1, %v499_v53  ;;  %v1008_v11 = vadd.f32 %v1007_v62, %v502_v1  ;;  %v1081_v14 = vmul.f32 %v502_v1, %v502_v1  ;;  %v626_v53 = vpop.f32.mrb[25].mxu1 }
 0x114   :  { %1570 = vst [vmem:[%s2277_s3 + $0x68] sm:$0xff] %v1466_v3  }
 0x115   :  { %1569 = vst [vmem:[%s2277_s3 + $0x60] sm:$0xff] %v1461_v8   ;;  %v1009_v21 = vadd.f32 %v1008_v11, %v507_v56  ;;  %v1144_v24 = vadd.f32 %v1143_v7, %v1081_v14  ;;  %v1657_v25 = vpop.f32.mrb[28].mxu0  ;;  %v2118_v56 = vadd.f32 %v1900_v38, %v626_v53 }
 0x116   :  { %v514_v26 = vpop.f32.mrb[29].mxu0  ;;  %v523_v39 = vadd.f32 %v1657_v25, %v1900_v38 }
 0x117   :  { %v1145_v32 = vadd.f32 %v1144_v24, %v1082_v20  ;;  %v515_v33 = vadd.f32 %v1900_v38, %v514_v26  ;;  %v1010_v34 = vadd.f32 %v1009_v21, %v510_v57  ;;  %v1658_v37 = vpop.f32.mrb[30].mxu0  ;;  %v1686_v57 = vpop.f32.mrb[26].mxu1  ;;  %v1088_v21 = vmul.f32 %v1926_v10, %v1926_v10 }
 0x118   :  { %v526_v40 = vadd.f32 %v1658_v37, %v1900_v38  ;;  %v517_v41 = vpop.f32.mrb[31].mxu0  ;;  %v629_v0 = vpop.f32.mrb[27].mxu1  ;;  %v2124_v1 = vadd.f32 %v1686_v57, %v1900_v38  ;;  %v1086_v3 = vmul.f32 %v523_v39, %v523_v39  ;;  %v1089_v37 = vmul.f32 %v1935_v18, %v1935_v18 }
 0x119   :  { %v1011_v45 = vadd.f32 %v1010_v34, %v515_v33  ;;  %v1084_v46 = vmul.f32 %v515_v33, %v515_v33  ;;  %v1146_v47 = vadd.f32 %v1145_v32, %v1083_v31  ;;  %v518_v48 = vadd.f32 %v1900_v38, %v517_v41  ;;  %v1689_v24 = vpop.f32.mrb[28].mxu1 }
 0x11a   :  { %v1476_v54 = vpack.c.bf16 %v526_v40, %v523_v39  ;;  %v2127_v2 = vadd.f32 %v1900_v38, %v629_v0  ;;  %v1546_v8 = vpack.c.bf16 %v2124_v1, %v2115_v55  ;;  %v1087_v14 = vmul.f32 %v526_v40, %v526_v40  ;;  %v642_v30 = vpop.f32.mrb[29].mxu1 }
 0x11b   :  { %v1147_v58 = vadd.f32 %v1146_v47, %v1084_v46  ;;  %v1471_v61 = vpack.c.bf16 %v518_v48, %v515_v33  ;;  %v1012_v62 = vadd.f32 %v1011_v45, %v518_v48  ;;  %v1085_v63 = vmul.f32 %v518_v48, %v518_v48  ;;  %v1690_v32 = vpop.f32.mrb[30].mxu1 }
 0x11c   :  { %1572 = vst [vmem:[%s2277_s3 + $0x78] sm:$0xff] %v1476_v54   ;;  %v1541_v11 = vpack.c.bf16 %v2127_v2, %v2118_v56  ;;  %1586 = vst [vmem:[%s2277_s3 + $0xe8] sm:$0xff] %v1546_v8   ;;  %v2146_v29 = vadd.f32 %v1689_v24, %v1900_v38  ;;  %v2149_v31 = vadd.f32 %v1900_v38, %v642_v30 }
 0x11d   :  { %1571 = vst [vmem:[%s2277_s3 + $0x70] sm:$0xff] %v1471_v61   ;;  %v1013_v6 = vadd.f32 %v1012_v62, %v523_v39  ;;  %v1148_v7 = vadd.f32 %v1147_v58, %v1085_v63  ;;  %v2155_v39 = vadd.f32 %v1690_v32, %v1900_v38  ;;  %v1090_v41 = vmul.f32 %v1923_v9, %v1923_v9 }
 0x11e   :  { %1585 = vst [vmem:[%s2277_s3 + $0xe0] sm:$0xff] %v1541_v11   ;;  %v1094_v61 = vmul.f32 %v1955_v42, %v1955_v42  ;;  %v1095_v0 = vmul.f32 %v1964_v50, %v1964_v50  ;;  %v1101_v32 = vmul.f32 %v2031_v60, %v2031_v60 }
 0x11f   :  { %v1149_v15 = vadd.f32 %v1148_v7, %v1086_v3  ;;  %v1014_v20 = vadd.f32 %v1013_v6, %v526_v40  ;;  %v645_v40 = vpop.f32.mrb[31].mxu1  ;;  %v1556_v46 = vpack.c.bf16 %v2155_v39, %v2146_v29 }
 0x121   :  { %v1015_v25 = vadd.f32 %v1014_v20, %v1926_v10  ;;  %v1150_v26 = vadd.f32 %v1149_v15, %v1087_v14  ;;  %v2158_v10 = vadd.f32 %v1900_v38, %v645_v40  ;;  %v1092_v38 = vmul.f32 %v1958_v43, %v1958_v43  ;;  %1588 = vst [vmem:[%s2277_s3 + $0xf8] sm:$0xff] %v1556_v46  }
 0x122   :  { %v1097_v14 = vmul.f32 %v1999_v23, %v1999_v23  ;;  %v1105_v46 = vmul.f32 %v2063_v36, %v2063_v36 }
 0x123   :  { %v1151_v33 = vadd.f32 %v1150_v26, %v1088_v21  ;;  %v1016_v34 = vadd.f32 %v1015_v25, %v1935_v18  ;;  %v1551_v47 = vpack.c.bf16 %v2158_v10, %v2149_v31  ;;  %v1091_v18 = vmul.f32 %v1932_v17, %v1932_v17 }
 0x125   :  { %v1017_v44 = vadd.f32 %v1016_v34, %v1923_v9  ;;  %v1152_v45 = vadd.f32 %v1151_v33, %v1089_v37  ;;  %1587 = vst [vmem:[%s2277_s3 + $0xf0] sm:$0xff] %v1551_v47  }
 0x127   :  { %v1153_v48 = vadd.f32 %v1152_v45, %v1090_v41  ;;  %v1018_v53 = vadd.f32 %v1017_v44, %v1932_v17  ;;  %v1093_v17 = vmul.f32 %v1967_v51, %v1967_v51 }
 0x129   :  { %v1019_v9 = vadd.f32 %v1018_v53, %v1958_v43  ;;  %v1154_v54 = vadd.f32 %v1153_v48, %v1091_v18  ;;  %v1096_v43 = vmul.f32 %v1990_v13, %v1990_v13 }
 0x12b   :  { %v1155_v57 = vadd.f32 %v1154_v54, %v1092_v38  ;;  %v1020_v58 = vadd.f32 %v1019_v9, %v1967_v51 }
 0x12d   :  { %v1021_v62 = vadd.f32 %v1020_v58, %v1955_v42  ;;  %v1156_v63 = vadd.f32 %v1155_v57, %v1093_v17  ;;  %v1098_v42 = vmul.f32 %v1987_v12, %v1987_v12  ;;  %v1109_v57 = vmul.f32 %v2095_v19, %v2095_v19 }
 0x12f   :  { %v1157_v3 = vadd.f32 %v1156_v63, %v1094_v61  ;;  %v1022_v6 = vadd.f32 %v1021_v62, %v1964_v50  ;;  %v1099_v50 = vmul.f32 %v1996_v22, %v1996_v22 }
 0x131   :  { %v1023_v7 = vadd.f32 %v1022_v6, %v1990_v13  ;;  %v1158_v8 = vadd.f32 %v1157_v3, %v1095_v0  ;;  %v1100_v13 = vmul.f32 %v2022_v52, %v2022_v52  ;;  %v1113_v6 = vmul.f32 %v2127_v2, %v2127_v2 }
 0x133   :  { %v1159_v11 = vadd.f32 %v1158_v8, %v1096_v43  ;;  %v1024_v51 = vadd.f32 %v1023_v7, %v1999_v23 }
 0x135   :  { %v1025_v15 = vadd.f32 %v1024_v51, %v1987_v12  ;;  %v1160_v20 = vadd.f32 %v1159_v11, %v1097_v14  ;;  %v1102_v12 = vmul.f32 %v2019_v49, %v2019_v49 }
 0x137   :  { %v1161_v21 = vadd.f32 %v1160_v20, %v1098_v42  ;;  %v1026_v24 = vadd.f32 %v1025_v15, %v1996_v22  ;;  %v1103_v22 = vmul.f32 %v2028_v59, %v2028_v59  ;;  %v1117_v15 = vmul.f32 %v2158_v10, %v2158_v10 }
 0x139   :  { %v1027_v25 = vadd.f32 %v1026_v24, %v2022_v52  ;;  %v1162_v26 = vadd.f32 %v1161_v21, %v1099_v50  ;;  %v1104_v52 = vmul.f32 %v2054_v28, %v2054_v28 }
 0x13b   :  { %v1163_v30 = vadd.f32 %v1162_v26, %v1100_v13  ;;  %v1028_v23 = vadd.f32 %v1027_v25, %v2031_v60 }
 0x13d   :  { %v1029_v33 = vadd.f32 %v1028_v23, %v2019_v49  ;;  %v1164_v34 = vadd.f32 %v1163_v30, %v1101_v32  ;;  %v1106_v49 = vmul.f32 %v2051_v27, %v2051_v27 }
 0x13f   :  { %v1165_v37 = vadd.f32 %v1164_v34, %v1102_v12  ;;  %v1030_v40 = vadd.f32 %v1029_v33, %v2028_v59  ;;  %v1107_v59 = vmul.f32 %v2060_v35, %v2060_v35 }
 0x141   :  { %v1031_v41 = vadd.f32 %v1030_v40, %v2054_v28  ;;  %v1166_v44 = vadd.f32 %v1165_v37, %v1103_v22  ;;  %v1108_v28 = vmul.f32 %v2086_v5, %v2086_v5 }
 0x143   :  { %v1167_v45 = vadd.f32 %v1166_v44, %v1104_v52  ;;  %v1032_v60 = vadd.f32 %v1031_v41, %v2063_v36 }
 0x145   :  { %v1033_v47 = vadd.f32 %v1032_v60, %v2051_v27  ;;  %v1168_v18 = vadd.f32 %v1167_v45, %v1105_v46  ;;  %v1110_v27 = vmul.f32 %v2083_v4, %v2083_v4 }
 0x147   :  { %v1169_v48 = vadd.f32 %v1168_v18, %v1106_v49  ;;  %v1034_v53 = vadd.f32 %v1033_v47, %v2060_v35  ;;  %v1111_v35 = vmul.f32 %v2092_v16, %v2092_v16 }
 0x149   :  { %v1035_v38 = vadd.f32 %v1034_v53, %v2086_v5  ;;  %v1170_v9 = vadd.f32 %v1169_v48, %v1107_v59  ;;  %v1112_v5 = vmul.f32 %v2118_v56, %v2118_v56 }
 0x14b   :  { %v1171_v54 = vadd.f32 %v1170_v9, %v1108_v28  ;;  %v1036_v36 = vadd.f32 %v1035_v38, %v2095_v19 }
 0x14d   :  { %v1037_v58 = vadd.f32 %v1036_v36, %v2083_v4  ;;  %v1172_v17 = vadd.f32 %v1171_v54, %v1109_v57  ;;  %v1114_v4 = vmul.f32 %v2115_v55, %v2115_v55 }
 0x14f   :  { %v1173_v61 = vadd.f32 %v1172_v17, %v1110_v27  ;;  %v1038_v62 = vadd.f32 %v1037_v58, %v2092_v16  ;;  %v1115_v16 = vmul.f32 %v2124_v1, %v2124_v1 }
 0x151   :  { %v1039_v63 = vadd.f32 %v1038_v62, %v2118_v56  ;;  %v1174_v0 = vadd.f32 %v1173_v61, %v1111_v35  ;;  %v1116_v56 = vmul.f32 %v2149_v31, %v2149_v31 }
 0x153   :  { %v1175_v3 = vadd.f32 %v1174_v0, %v1112_v5  ;;  %v1040_v19 = vadd.f32 %v1039_v63, %v2127_v2 }
 0x155   :  { %v1041_v43 = vadd.f32 %v1040_v19, %v2115_v55  ;;  %v1176_v7 = vadd.f32 %v1175_v3, %v1113_v6  ;;  %v1118_v55 = vmul.f32 %v2146_v29, %v2146_v29 }
 0x157   :  { %v1177_v8 = vadd.f32 %v1176_v7, %v1114_v4  ;;  %v1042_v11 = vadd.f32 %v1041_v43, %v2124_v1  ;;  %v1119_v1 = vmul.f32 %v2155_v39, %v2155_v39 }
 0x159   :  { %v1043_v51 = vadd.f32 %v1042_v11, %v2149_v31  ;;  %v1178_v14 = vadd.f32 %v1177_v8, %v1115_v16 }
 0x15b   :  { %v1179_v42 = vadd.f32 %v1178_v14, %v1116_v56  ;;  %v1044_v2 = vadd.f32 %v1043_v51, %v2158_v10 }
 0x15d   :  { %v1045_v20 = vadd.f32 %v1044_v2, %v2146_v29  ;;  %v1180_v50 = vadd.f32 %v1179_v42, %v1117_v15  ;;  %v983_v29 = vld [vmem:[%s2275_s4] sm:$0x1] }
 0x15f   :  { %v1046_v21 = vadd.f32 %v1045_v20, %v2155_v39  ;;  %v1181_v24 = vadd.f32 %v1180_v50, %v1118_v55  ;;  %v1055_v39 = vld [vmem:[%s2276_s5] sm:$0x1] }
 0x161   :  { %v1047_v31 = vrot.slane %v1046_v21, 4  ;;  %v1182_v13 = vadd.f32 %v1181_v24, %v1119_v1 }
 0x163   :  { %v1048_v25 = vadd.f32 %v1047_v31, %v1046_v21  ;;  %v1183_v26 = vrot.slane %v1182_v13, 4 }
 0x165   :  { %v1049_v30 = vrot.slane %v1048_v25, 2  ;;  %v1184_v23 = vadd.f32 %v1183_v26, %v1182_v13 }
 0x167   :  { %v1050_v32 = vadd.f32 %v1049_v30, %v1048_v25  ;;  %v1185_v10 = vrot.slane %v1184_v23, 2 }
 0x169   :  { %v1051_v12 = vrot.slane %v1050_v32, 1  ;;  %v1186_v33 = vadd.f32 %v1185_v10, %v1184_v23 }
 0x16b   :  { %v1052_v34 = vadd.f32 %v1051_v12, %v1050_v32  ;;  %v1187_v22 = vrot.slane %v1186_v33, 1 }
 0x16d   :  { %v1053_v37 = vadd.f32 %v1052_v34, %v983_v29  ;;  %v1188_v40 = vadd.f32 %v1187_v22, %v1186_v33 }
 0x16f   :  { %1054 = vst [vmem:[%s2275_s4] sm:$0x1] %v1053_v37  ;;  %v1189_v52 = vadd.f32 %v1188_v40, %v1055_v39 }
 0x171   :  { %1190 = vst [vmem:[%s2276_s5] sm:$0x1] %v1189_v52 }

// kernel: blur_generator_forward.55
= control target key start
LH: loop header
LB: loop body
LE: loop exit
PB: predicated region body
PF: predicated region fallthrough
CT: control target
= control target key end

     0   :  { %vm285_vm0 = vcmask 588800   ;;  %vm382_vm1 = vcmask 1043456   ;;  %v1771_v39 = vmov 0.0   ;;  %s2320_s1 = inlined_call_operand.vmem [shape: bf16[72,128], index: 1, kind: input, shape index: {}]   ;;  %s2321_s0 = inlined_call_operand.vmem [shape: bf16[512,72], index: 0, kind: input, shape index: {}]   ;;  %s2322_s2 = inlined_call_operand.vmem [shape: f32[1,128], index: 2, kind: input, shape index: {}]   ;;  %s2323_s4 = inlined_call_operand.vmem [shape: f32[1,128], index: 4, kind: output, shape index: {1}]   ;;  %s2324_s5 = inlined_call_operand.vmem [shape: f32[1,128], index: 5, kind: output, shape index: {2}]   ;;  %s2325_s3 = inlined_call_operand.vmem [shape: bf16[512,128], index: 3, kind: output, shape index: {0}]  }
   0x1   :  { %v1734_v0 = vld [vmem:[%s2320_s1] sm:$0xff]   ;;  %v1735_v1 = vld [vmem:[%s2320_s1 + $0x8] sm:$0xff]   ;;  %v1736_v2 = vld [vmem:[%s2320_s1 + $0x10] sm:$0xff]   ;;  %999 = vst [vmem:[%s2323_s4] sm:$0x1] %v1771_v39 }
   0x2   :  { %1647 = vmatprep.subr.bf16.mxu0 %v1734_v0  ;;  %1721 = vmatprep.subr.bf16.mxu1 %v1734_v0  ;;  %v1739_v3 = vld [vmem:[%s2321_s0] sm:$0xff]   ;;  %v1737_v4 = vld [vmem:[%s2320_s1 + $0x18] sm:$0xff]   ;;  %v1740_v7 = vld [vmem:[%s2321_s0 + $0x8] sm:$0xff]   ;;  %1000 = vst [vmem:[%s2324_s5] sm:$0x1] %v1771_v39 }
   0x3   :  { %1648 = vmatpush3.bf16.msra.mxu0 %v1734_v0  ;;  %1726 = vmatpush3.bf16.msra.mxu1 %v1734_v0  ;;  %v1738_v5 = vld [vmem:[%s2320_s1 + $0x20] ss:$0 sps:$4 sm:$0xff]   ;;  %v1741_v8 = vld [vmem:[%s2321_s0 + $0x10] sm:$0xff]   ;;  %v1756_v10 = vld [vmem:[%s2321_s0 + $0x88] sm:$0xff]  }
   0x4   :  { %1649 = vmatprep.subr.bf16.mxu0 %v1735_v1  ;;  %1722 = vmatprep.subr.bf16.mxu1 %v1735_v1  ;;  %v384_v6 = vsel %vm382_vm1, %v1738_v5, 0  ;;  %v1755_v9 = vld [vmem:[%s2321_s0 + $0x80] sm:$0xff]   ;;  %v1757_v11 = vld [vmem:[%s2321_s0 + $0x90] sm:$0xff]   ;;  %v1742_v12 = vld [vmem:[%s2321_s0 + $0x18] sm:$0xff]  }
   0x5   :  { %1657 = vmatprep.mubr.msk.bf16.mxu0 %vm285_vm0, %v1739_v3  ;;  %1689 = vmatprep.mubr.msk.bf16.mxu1 %vm285_vm0, %v1755_v9  ;;  %v1743_v13 = vld [vmem:[%s2321_s0 + $0x20] sm:$0xff]   ;;  %v1758_v14 = vld [vmem:[%s2321_s0 + $0x98] sm:$0xff]   ;;  %v1744_v16 = vld [vmem:[%s2321_s0 + $0x28] sm:$0xff]  }
   0x6   :  { %v1759_v15 = vld [vmem:[%s2321_s0 + $0xa0] sm:$0xff]   ;;  %v1745_v17 = vld [vmem:[%s2321_s0 + $0x30] sm:$0xff]   ;;  %v1760_v18 = vld [vmem:[%s2321_s0 + $0xa8] sm:$0xff]  }
   0x7   :  { %1650 = vmatpush3.bf16.msra.mxu0 %v1735_v1  ;;  %1727 = vmatpush3.bf16.msra.mxu1 %v1735_v1  ;;  %v1761_v19 = vld [vmem:[%s2321_s0 + $0xb0] sm:$0xff]   ;;  %v1746_v20 = vld [vmem:[%s2321_s0 + $0x38] sm:$0xff]   ;;  %v1747_v21 = vld [vmem:[%s2321_s0 + $0x40] sm:$0xff]  }
   0x8   :  { %1651 = vmatprep.subr.bf16.mxu0 %v1736_v2  ;;  %1723 = vmatprep.subr.bf16.mxu1 %v1736_v2  ;;  %v1762_v22 = vld [vmem:[%s2321_s0 + $0xb8] sm:$0xff]   ;;  %v1763_v23 = vld [vmem:[%s2321_s0 + $0xc0] sm:$0xff]   ;;  %v1748_v24 = vld [vmem:[%s2321_s0 + $0x48] sm:$0xff]  }
   0x9   :  { %v1749_v25 = vld [vmem:[%s2321_s0 + $0x50] sm:$0xff]   ;;  %v1764_v26 = vld [vmem:[%s2321_s0 + $0xc8] sm:$0xff]   ;;  %v1750_v28 = vld [vmem:[%s2321_s0 + $0x58] sm:$0xff]  }
   0xa   :  { %v1765_v27 = vld [vmem:[%s2321_s0 + $0xd0] sm:$0xff]   ;;  %v1751_v29 = vld [vmem:[%s2321_s0 + $0x60] sm:$0xff]   ;;  %v1766_v30 = vld [vmem:[%s2321_s0 + $0xd8] sm:$0xff]  }
   0xb   :  { %1652 = vmatpush3.bf16.msra.mxu0 %v1736_v2  ;;  %1728 = vmatpush3.bf16.msra.mxu1 %v1736_v2  ;;  %v1767_v31 = vld [vmem:[%s2321_s0 + $0xe0] sm:$0xff]   ;;  %v1752_v32 = vld [vmem:[%s2321_s0 + $0x68] sm:$0xff]   ;;  %v1753_v33 = vld [vmem:[%s2321_s0 + $0x70] sm:$0xff]  }
   0xc   :  { %1653 = vmatprep.subr.bf16.mxu0 %v1737_v4  ;;  %1724 = vmatprep.subr.bf16.mxu1 %v1737_v4  ;;  %v1768_v34 = vld [vmem:[%s2321_s0 + $0xe8] sm:$0xff]   ;;  %v1769_v35 = vld [vmem:[%s2321_s0 + $0xf0] sm:$0xff]   ;;  %v1754_v36 = vld [vmem:[%s2321_s0 + $0x78] sm:$0xff]  }
   0xd   :  { %v1770_v37 = vld [vmem:[%s2321_s0 + $0xf8] sm:$0xff]   ;;  %v1948_v38 = vld [vmem:[%s2322_s2] ss:$0 sm:$0xff] }
   0xf   :  { %1654 = vmatpush3.bf16.msra.mxu0 %v1737_v4  ;;  %1729 = vmatpush3.bf16.msra.mxu1 %v1737_v4 }
  0x10   :  { %1731 = vmatprep.subr.msk.bf16.mxu0 %vm382_vm1, %v1738_v5  ;;  %1732 = vmatprep.subr.msk.bf16.mxu1 %vm382_vm1, %v1738_v5 }
  0x13   :  { %1656 = vmatpush3.bf16.msra.mxu0 %v384_v6  ;;  %1730 = vmatpush3.bf16.msra.mxu1 %v384_v6 }
  0x16   :  { %1658 = vmatmul.mubr.msk.bf16.vlgmr.msra.gmra.mrb[0].mxu0 %vm285_vm0, %v1740_v7  ;;  %1690 = vmatmul.mubr.msk.bf16.vlgmr.msra.gmra.mrb[0].mxu1 %vm285_vm0, %v1756_v10 }
  0x17   :  { %1661 = vmatprep.mubr.msk.bf16.mxu0 %vm285_vm0, %v1741_v8  ;;  %1693 = vmatprep.mubr.msk.bf16.mxu1 %vm285_vm0, %v1757_v11 }
  0x1e   :  { %1662 = vmatmul.mubr.msk.bf16.gmra.mrb[4].mxu0 %vm285_vm0, %v1742_v12  ;;  %1694 = vmatmul.mubr.msk.bf16.gmra.mrb[4].mxu1 %vm285_vm0, %v1758_v14 }
  0x1f   :  { %1665 = vmatprep.mubr.msk.bf16.mxu0 %vm285_vm0, %v1743_v13  ;;  %1697 = vmatprep.mubr.msk.bf16.mxu1 %vm285_vm0, %v1759_v15 }
  0x26   :  { %1666 = vmatmul.mubr.msk.bf16.gmra.mrb[8].mxu0 %vm285_vm0, %v1744_v16  ;;  %1698 = vmatmul.mubr.msk.bf16.gmra.mrb[8].mxu1 %vm285_vm0, %v1760_v18 }
  0x27   :  { %1669 = vmatprep.mubr.msk.bf16.mxu0 %vm285_vm0, %v1745_v17  ;;  %1701 = vmatprep.mubr.msk.bf16.mxu1 %vm285_vm0, %v1761_v19 }
  0x2e   :  { %1670 = vmatmul.mubr.msk.bf16.gmra.mrb[12].mxu0 %vm285_vm0, %v1746_v20  ;;  %1702 = vmatmul.mubr.msk.bf16.gmra.mrb[12].mxu1 %vm285_vm0, %v1762_v22 }
  0x2f   :  { %1673 = vmatprep.mubr.msk.bf16.mxu0 %vm285_vm0, %v1747_v21  ;;  %1705 = vmatprep.mubr.msk.bf16.mxu1 %vm285_vm0, %v1763_v23 }
  0x36   :  { %1674 = vmatmul.mubr.msk.bf16.gmra.mrb[16].mxu0 %vm285_vm0, %v1748_v24  ;;  %1706 = vmatmul.mubr.msk.bf16.gmra.mrb[16].mxu1 %vm285_vm0, %v1764_v26 }
  0x37   :  { %1677 = vmatprep.mubr.msk.bf16.mxu0 %vm285_vm0, %v1749_v25  ;;  %1709 = vmatprep.mubr.msk.bf16.mxu1 %vm285_vm0, %v1765_v27 }
  0x3e   :  { %1678 = vmatmul.mubr.msk.bf16.gmra.mrb[20].mxu0 %vm285_vm0, %v1750_v28  ;;  %1710 = vmatmul.mubr.msk.bf16.gmra.mrb[20].mxu1 %vm285_vm0, %v1766_v30 }
  0x3f   :  { %1681 = vmatprep.mubr.msk.bf16.mxu0 %vm285_vm0, %v1751_v29  ;;  %1713 = vmatprep.mubr.msk.bf16.mxu1 %vm285_vm0, %v1767_v31 }
  0x46   :  { %1682 = vmatmul.mubr.msk.bf16.gmra.mrb[24].mxu0 %vm285_vm0, %v1752_v32  ;;  %1714 = vmatmul.mubr.msk.bf16.gmra.mrb[24].mxu1 %vm285_vm0, %v1768_v34 }
  0x47   :  { %1685 = vmatprep.mubr.msk.bf16.mxu0 %vm285_vm0, %v1753_v33  ;;  %1717 = vmatprep.mubr.msk.bf16.mxu1 %vm285_vm0, %v1769_v35 }
  0x4e   :  { %1686 = vmatmul.mubr.msk.bf16.gmra.mrb[28].mxu0 %vm285_vm0, %v1754_v36  ;;  %1718 = vmatmul.mubr.msk.bf16.gmra.mrb[28].mxu1 %vm285_vm0, %v1770_v37 }
  0xe9   :  { %v1659_v40 = vpop.f32.mrb[0].mxu0  ;;  %v1691_v44 = vpop.f32.mrb[0].mxu1 }
  0xea   :  { %v420_v41 = vpop.f32.mrb[1].mxu0  ;;  %v429_v45 = vadd.f32 %v1659_v40, %v1948_v38  ;;  %v1960_v48 = vadd.f32 %v1691_v44, %v1948_v38  ;;  %v548_v49 = vpop.f32.mrb[1].mxu1 }
  0xeb   :  { %v421_v42 = vadd.f32 %v1948_v38, %v420_v41  ;;  %v1660_v43 = vpop.f32.mrb[2].mxu0  ;;  %v1692_v51 = vpop.f32.mrb[2].mxu1  ;;  %v1964_v53 = vadd.f32 %v1948_v38, %v548_v49 }
  0xec   :  { %v432_v46 = vadd.f32 %v1660_v43, %v1948_v38  ;;  %v423_v47 = vpop.f32.mrb[3].mxu0  ;;  %v1967_v54 = vadd.f32 %v1692_v51, %v1948_v38  ;;  %v551_v55 = vpop.f32.mrb[3].mxu1  ;;  %v1076_v62 = vmul.f32 %v429_v45, %v429_v45 }
  0xed   :  { %v424_v50 = vadd.f32 %v1948_v38, %v423_v47  ;;  %v1074_v56 = vmul.f32 %v421_v42, %v421_v42  ;;  %v1975_v61 = vadd.f32 %v1948_v38, %v551_v55 }
  0xee   :  { %v1427_v52 = vpack.c.bf16 %v432_v46, %v429_v45  ;;  %v1507_v60 = vpack.c.bf16 %v1967_v54, %v1960_v48  ;;  %v1077_v4 = vmul.f32 %v432_v46, %v432_v46 }
  0xef   :  { %v1422_v57 = vpack.c.bf16 %v424_v50, %v421_v42  ;;  %v1002_v58 = vadd.f32 %v424_v50, %v421_v42  ;;  %v1075_v59 = vmul.f32 %v424_v50, %v424_v50  ;;  %v1502_v3 = vpack.c.bf16 %v1975_v61, %v1964_v53 }
  0xf0   :  { %1579 = vst [vmem:[%s2325_s3 + $0x8] sm:$0xff] %v1427_v52   ;;  %1595 = vst [vmem:[%s2325_s3 + $0x88] sm:$0xff] %v1507_v60  }
  0xf1   :  { %1423 = vst [vmem:[%s2325_s3] sm:$0xff] %v1422_v57   ;;  %v1003_v63 = vadd.f32 %v1002_v58, %v429_v45  ;;  %v1138_v0 = vadd.f32 %v1075_v59, %v1074_v56  ;;  %v1663_v1 = vpop.f32.mrb[4].mxu0  ;;  %v1695_v9 = vpop.f32.mrb[4].mxu1  ;;  %1594 = vst [vmem:[%s2325_s3 + $0x80] sm:$0xff] %v1502_v3  }
  0xf2   :  { %v436_v2 = vpop.f32.mrb[5].mxu0  ;;  %v445_v10 = vadd.f32 %v1663_v1, %v1948_v38  ;;  %v564_v13 = vpop.f32.mrb[5].mxu1  ;;  %v1993_v20 = vadd.f32 %v1695_v9, %v1948_v38 }
  0xf3   :  { %v1139_v5 = vadd.f32 %v1138_v0, %v1076_v62  ;;  %v437_v6 = vadd.f32 %v1948_v38, %v436_v2  ;;  %v1004_v7 = vadd.f32 %v1003_v63, %v432_v46  ;;  %v1664_v8 = vpop.f32.mrb[6].mxu0  ;;  %v1696_v18 = vpop.f32.mrb[6].mxu1  ;;  %v1996_v21 = vadd.f32 %v1948_v38, %v564_v13 }
  0xf4   :  { %v448_v11 = vadd.f32 %v1664_v8, %v1948_v38  ;;  %v439_v12 = vpop.f32.mrb[7].mxu0  ;;  %v567_v22 = vpop.f32.mrb[7].mxu1  ;;  %v2002_v27 = vadd.f32 %v1696_v18, %v1948_v38  ;;  %v1080_v29 = vmul.f32 %v445_v10, %v445_v10 }
  0xf5   :  { %v1005_v14 = vadd.f32 %v1004_v7, %v437_v6  ;;  %v1078_v15 = vmul.f32 %v437_v6, %v437_v6  ;;  %v1140_v16 = vadd.f32 %v1139_v5, %v1077_v4  ;;  %v440_v17 = vadd.f32 %v1948_v38, %v439_v12 }
  0xf6   :  { %v1437_v19 = vpack.c.bf16 %v448_v11, %v445_v10  ;;  %v2005_v28 = vadd.f32 %v1948_v38, %v567_v22  ;;  %v1517_v34 = vpack.c.bf16 %v2002_v27, %v1993_v20  ;;  %v1081_v36 = vmul.f32 %v448_v11, %v448_v11 }
  0xf7   :  { %v1141_v23 = vadd.f32 %v1140_v16, %v1078_v15  ;;  %v1432_v24 = vpack.c.bf16 %v440_v17, %v437_v6  ;;  %v1006_v25 = vadd.f32 %v1005_v14, %v440_v17  ;;  %v1079_v26 = vmul.f32 %v440_v17, %v440_v17 }
  0xf8   :  { %1581 = vst [vmem:[%s2325_s3 + $0x18] sm:$0xff] %v1437_v19   ;;  %v1512_v35 = vpack.c.bf16 %v2005_v28, %v1996_v21  ;;  %1597 = vst [vmem:[%s2325_s3 + $0x98] sm:$0xff] %v1517_v34  }
  0xf9   :  { %1580 = vst [vmem:[%s2325_s3 + $0x10] sm:$0xff] %v1432_v24   ;;  %v1007_v30 = vadd.f32 %v1006_v25, %v445_v10  ;;  %v1142_v31 = vadd.f32 %v1141_v23, %v1079_v26  ;;  %v1667_v32 = vpop.f32.mrb[8].mxu0  ;;  %v1699_v42 = vpop.f32.mrb[8].mxu1 }
  0xfa   :  { %v452_v33 = vpop.f32.mrb[9].mxu0  ;;  %v461_v43 = vadd.f32 %v1667_v32, %v1948_v38  ;;  %1596 = vst [vmem:[%s2325_s3 + $0x90] sm:$0xff] %v1512_v35   ;;  %v580_v46 = vpop.f32.mrb[9].mxu1  ;;  %v2025_v56 = vadd.f32 %v1699_v42, %v1948_v38 }
  0xfb   :  { %v1143_v37 = vadd.f32 %v1142_v31, %v1080_v29  ;;  %v453_v39 = vadd.f32 %v1948_v38, %v452_v33  ;;  %v1008_v40 = vadd.f32 %v1007_v30, %v448_v11  ;;  %v1668_v41 = vpop.f32.mrb[10].mxu0  ;;  %v1700_v52 = vpop.f32.mrb[10].mxu1  ;;  %v2028_v57 = vadd.f32 %v1948_v38, %v580_v46 }
  0xfc   :  { %v464_v44 = vadd.f32 %v1668_v41, %v1948_v38  ;;  %v455_v45 = vpop.f32.mrb[11].mxu0  ;;  %v583_v58 = vpop.f32.mrb[11].mxu1  ;;  %v2034_v0 = vadd.f32 %v1700_v52, %v1948_v38  ;;  %v1084_v2 = vmul.f32 %v461_v43, %v461_v43 }
  0xfd   :  { %v1009_v47 = vadd.f32 %v1008_v40, %v453_v39  ;;  %v1082_v49 = vmul.f32 %v453_v39, %v453_v39  ;;  %v1144_v50 = vadd.f32 %v1143_v37, %v1081_v36  ;;  %v456_v51 = vadd.f32 %v1948_v38, %v455_v45 }
  0xfe   :  { %v1447_v55 = vpack.c.bf16 %v464_v44, %v461_v43  ;;  %v2037_v1 = vadd.f32 %v1948_v38, %v583_v58  ;;  %v1527_v7 = vpack.c.bf16 %v2034_v0, %v2025_v56  ;;  %v1085_v9 = vmul.f32 %v464_v44, %v464_v44 }
  0xff   :  { %v1145_v59 = vadd.f32 %v1144_v50, %v1082_v49  ;;  %v1442_v60 = vpack.c.bf16 %v456_v51, %v453_v39  ;;  %v1010_v62 = vadd.f32 %v1009_v47, %v456_v51  ;;  %v1083_v63 = vmul.f32 %v456_v51, %v456_v51 }
 0x100   :  { %1583 = vst [vmem:[%s2325_s3 + $0x28] sm:$0xff] %v1447_v55   ;;  %v1522_v8 = vpack.c.bf16 %v2037_v1, %v2028_v57  ;;  %1599 = vst [vmem:[%s2325_s3 + $0xa8] sm:$0xff] %v1527_v7  }
 0x101   :  { %1582 = vst [vmem:[%s2325_s3 + $0x20] sm:$0xff] %v1442_v60   ;;  %v1011_v3 = vadd.f32 %v1010_v62, %v461_v43  ;;  %v1146_v4 = vadd.f32 %v1145_v59, %v1083_v63  ;;  %v1671_v5 = vpop.f32.mrb[12].mxu0  ;;  %v1703_v14 = vpop.f32.mrb[12].mxu1 }
 0x102   :  { %v468_v6 = vpop.f32.mrb[13].mxu0  ;;  %v477_v15 = vadd.f32 %v1671_v5, %v1948_v38  ;;  %1598 = vst [vmem:[%s2325_s3 + $0xa0] sm:$0xff] %v1522_v8   ;;  %v596_v18 = vpop.f32.mrb[13].mxu1  ;;  %v2057_v29 = vadd.f32 %v1703_v14, %v1948_v38 }
 0x103   :  { %v1147_v10 = vadd.f32 %v1146_v4, %v1084_v2  ;;  %v469_v11 = vadd.f32 %v1948_v38, %v468_v6  ;;  %v1012_v12 = vadd.f32 %v1011_v3, %v464_v44  ;;  %v1672_v13 = vpop.f32.mrb[14].mxu0  ;;  %v1704_v25 = vpop.f32.mrb[14].mxu1  ;;  %v2060_v30 = vadd.f32 %v1948_v38, %v596_v18 }
 0x104   :  { %v480_v16 = vadd.f32 %v1672_v13, %v1948_v38  ;;  %v471_v17 = vpop.f32.mrb[15].mxu0  ;;  %v599_v31 = vpop.f32.mrb[15].mxu1  ;;  %v2066_v36 = vadd.f32 %v1704_v25, %v1948_v38  ;;  %v1088_v39 = vmul.f32 %v477_v15, %v477_v15 }
 0x105   :  { %v1013_v19 = vadd.f32 %v1012_v12, %v469_v11  ;;  %v1086_v22 = vmul.f32 %v469_v11, %v469_v11  ;;  %v1148_v23 = vadd.f32 %v1147_v10, %v1085_v9  ;;  %v472_v24 = vadd.f32 %v1948_v38, %v471_v17 }
 0x106   :  { %v1457_v26 = vpack.c.bf16 %v480_v16, %v477_v15  ;;  %v2069_v37 = vadd.f32 %v1948_v38, %v599_v31  ;;  %v1537_v44 = vpack.c.bf16 %v2066_v36, %v2057_v29  ;;  %v1089_v46 = vmul.f32 %v480_v16, %v480_v16 }
 0x107   :  { %v1149_v32 = vadd.f32 %v1148_v23, %v1086_v22  ;;  %v1452_v33 = vpack.c.bf16 %v472_v24, %v469_v11  ;;  %v1014_v34 = vadd.f32 %v1013_v19, %v472_v24  ;;  %v1087_v35 = vmul.f32 %v472_v24, %v472_v24 }
 0x108   :  { %1585 = vst [vmem:[%s2325_s3 + $0x38] sm:$0xff] %v1457_v26   ;;  %v1532_v45 = vpack.c.bf16 %v2069_v37, %v2060_v30  ;;  %1601 = vst [vmem:[%s2325_s3 + $0xb8] sm:$0xff] %v1537_v44  }
 0x109   :  { %1584 = vst [vmem:[%s2325_s3 + $0x30] sm:$0xff] %v1452_v33   ;;  %v1015_v40 = vadd.f32 %v1014_v34, %v477_v15  ;;  %v1150_v41 = vadd.f32 %v1149_v32, %v1087_v35  ;;  %v1675_v42 = vpop.f32.mrb[16].mxu0  ;;  %v1707_v52 = vpop.f32.mrb[16].mxu1 }
 0x10a   :  { %v484_v43 = vpop.f32.mrb[17].mxu0  ;;  %v493_v55 = vadd.f32 %v1675_v42, %v1948_v38  ;;  %1600 = vst [vmem:[%s2325_s3 + $0xb0] sm:$0xff] %v1532_v45   ;;  %v612_v60 = vpop.f32.mrb[17].mxu1  ;;  %v2089_v6 = vadd.f32 %v1707_v52, %v1948_v38 }
 0x10b   :  { %v1151_v47 = vadd.f32 %v1150_v41, %v1088_v39  ;;  %v485_v49 = vadd.f32 %v1948_v38, %v484_v43  ;;  %v1016_v50 = vadd.f32 %v1015_v40, %v480_v16  ;;  %v1676_v51 = vpop.f32.mrb[18].mxu0  ;;  %v1708_v4 = vpop.f32.mrb[18].mxu1  ;;  %v2092_v7 = vadd.f32 %v1948_v38, %v612_v60 }
 0x10c   :  { %v496_v58 = vadd.f32 %v1676_v51, %v1948_v38  ;;  %v487_v59 = vpop.f32.mrb[19].mxu0  ;;  %v615_v8 = vpop.f32.mrb[19].mxu1  ;;  %v2098_v13 = vadd.f32 %v1708_v4, %v1948_v38  ;;  %v1092_v15 = vmul.f32 %v493_v55, %v493_v55 }
 0x10d   :  { %v1017_v62 = vadd.f32 %v1016_v50, %v485_v49  ;;  %v1090_v63 = vmul.f32 %v485_v49, %v485_v49  ;;  %v1152_v2 = vadd.f32 %v1151_v47, %v1089_v46  ;;  %v488_v3 = vadd.f32 %v1948_v38, %v487_v59 }
 0x10e   :  { %v1467_v5 = vpack.c.bf16 %v496_v58, %v493_v55  ;;  %v2101_v14 = vadd.f32 %v1948_v38, %v615_v8  ;;  %v1547_v22 = vpack.c.bf16 %v2098_v13, %v2089_v6  ;;  %v1093_v24 = vmul.f32 %v496_v58, %v496_v58 }
 0x10f   :  { %v1153_v9 = vadd.f32 %v1152_v2, %v1090_v63  ;;  %v1462_v10 = vpack.c.bf16 %v488_v3, %v485_v49  ;;  %v1018_v11 = vadd.f32 %v1017_v62, %v488_v3  ;;  %v1091_v12 = vmul.f32 %v488_v3, %v488_v3 }
 0x110   :  { %1587 = vst [vmem:[%s2325_s3 + $0x48] sm:$0xff] %v1467_v5   ;;  %v1542_v23 = vpack.c.bf16 %v2101_v14, %v2092_v7  ;;  %1603 = vst [vmem:[%s2325_s3 + $0xc8] sm:$0xff] %v1547_v22  }
 0x111   :  { %1586 = vst [vmem:[%s2325_s3 + $0x40] sm:$0xff] %v1462_v10   ;;  %v1019_v16 = vadd.f32 %v1018_v11, %v493_v55  ;;  %v1154_v17 = vadd.f32 %v1153_v9, %v1091_v12  ;;  %v1679_v18 = vpop.f32.mrb[20].mxu0  ;;  %v1711_v33 = vpop.f32.mrb[20].mxu1 }
 0x112   :  { %v500_v19 = vpop.f32.mrb[21].mxu0  ;;  %v509_v34 = vadd.f32 %v1679_v18, %v1948_v38  ;;  %1602 = vst [vmem:[%s2325_s3 + $0xc0] sm:$0xff] %v1542_v23   ;;  %v628_v40 = vpop.f32.mrb[21].mxu1  ;;  %v2121_v47 = vadd.f32 %v1711_v33, %v1948_v38 }
 0x113   :  { %v1155_v25 = vadd.f32 %v1154_v17, %v1092_v15  ;;  %v501_v26 = vadd.f32 %v1948_v38, %v500_v19  ;;  %v1020_v31 = vadd.f32 %v1019_v16, %v496_v58  ;;  %v1680_v32 = vpop.f32.mrb[22].mxu0  ;;  %v1712_v45 = vpop.f32.mrb[22].mxu1  ;;  %v2124_v49 = vadd.f32 %v1948_v38, %v628_v40 }
 0x114   :  { %v512_v35 = vadd.f32 %v1680_v32, %v1948_v38  ;;  %v503_v39 = vpop.f32.mrb[23].mxu0  ;;  %v631_v50 = vpop.f32.mrb[23].mxu1  ;;  %v2130_v59 = vadd.f32 %v1712_v45, %v1948_v38  ;;  %v1096_v62 = vmul.f32 %v509_v34, %v509_v34 }
 0x115   :  { %v1021_v41 = vadd.f32 %v1020_v31, %v501_v26  ;;  %v1094_v42 = vmul.f32 %v501_v26, %v501_v26  ;;  %v1156_v43 = vadd.f32 %v1155_v25, %v1093_v24  ;;  %v504_v44 = vadd.f32 %v1948_v38, %v503_v39 }
 0x116   :  { %v1477_v46 = vpack.c.bf16 %v512_v35, %v509_v34  ;;  %v2133_v60 = vadd.f32 %v1948_v38, %v631_v50  ;;  %v1557_v5 = vpack.c.bf16 %v2130_v59, %v2121_v47  ;;  %v1097_v9 = vmul.f32 %v512_v35, %v512_v35 }
 0x117   :  { %v1157_v51 = vadd.f32 %v1156_v43, %v1094_v42  ;;  %v1472_v52 = vpack.c.bf16 %v504_v44, %v501_v26  ;;  %v1022_v55 = vadd.f32 %v1021_v41, %v504_v44  ;;  %v1095_v58 = vmul.f32 %v504_v44, %v504_v44 }
 0x118   :  { %1589 = vst [vmem:[%s2325_s3 + $0x58] sm:$0xff] %v1477_v46   ;;  %v1552_v8 = vpack.c.bf16 %v2133_v60, %v2124_v49  ;;  %1605 = vst [vmem:[%s2325_s3 + $0xd8] sm:$0xff] %v1557_v5  }
 0x119   :  { %1588 = vst [vmem:[%s2325_s3 + $0x50] sm:$0xff] %v1472_v52   ;;  %v1023_v63 = vadd.f32 %v1022_v55, %v509_v34  ;;  %v1158_v2 = vadd.f32 %v1157_v51, %v1095_v58  ;;  %v1683_v3 = vpop.f32.mrb[24].mxu0  ;;  %v1715_v16 = vpop.f32.mrb[24].mxu1 }
 0x11a   :  { %v516_v4 = vpop.f32.mrb[25].mxu0  ;;  %v525_v17 = vadd.f32 %v1683_v3, %v1948_v38  ;;  %1604 = vst [vmem:[%s2325_s3 + $0xd0] sm:$0xff] %v1552_v8   ;;  %v644_v22 = vpop.f32.mrb[25].mxu1  ;;  %v2153_v33 = vadd.f32 %v1715_v16, %v1948_v38 }
 0x11b   :  { %v1159_v10 = vadd.f32 %v1158_v2, %v1096_v62  ;;  %v517_v11 = vadd.f32 %v1948_v38, %v516_v4  ;;  %v1024_v12 = vadd.f32 %v1023_v63, %v512_v35  ;;  %v1684_v15 = vpop.f32.mrb[26].mxu0  ;;  %v1716_v31 = vpop.f32.mrb[26].mxu1  ;;  %v2156_v34 = vadd.f32 %v1948_v38, %v644_v22 }
 0x11c   :  { %v528_v18 = vadd.f32 %v1684_v15, %v1948_v38  ;;  %v519_v19 = vpop.f32.mrb[27].mxu0  ;;  %v647_v35 = vpop.f32.mrb[27].mxu1  ;;  %v2162_v43 = vadd.f32 %v1716_v31, %v1948_v38  ;;  %v1100_v45 = vmul.f32 %v525_v17, %v525_v17 }
 0x11d   :  { %v1025_v23 = vadd.f32 %v1024_v12, %v517_v11  ;;  %v1098_v24 = vmul.f32 %v517_v11, %v517_v11  ;;  %v1160_v25 = vadd.f32 %v1159_v10, %v1097_v9  ;;  %v520_v26 = vadd.f32 %v1948_v38, %v519_v19 }
 0x11e   :  { %v1487_v32 = vpack.c.bf16 %v528_v18, %v525_v17  ;;  %v2165_v44 = vadd.f32 %v1948_v38, %v647_v35  ;;  %v1567_v55 = vpack.c.bf16 %v2162_v43, %v2153_v33  ;;  %v1101_v62 = vmul.f32 %v528_v18, %v528_v18 }
 0x11f   :  { %v1161_v39 = vadd.f32 %v1160_v25, %v1098_v24  ;;  %v1482_v40 = vpack.c.bf16 %v520_v26, %v517_v11  ;;  %v1026_v41 = vadd.f32 %v1025_v23, %v520_v26  ;;  %v1099_v42 = vmul.f32 %v520_v26, %v520_v26 }
 0x120   :  { %1591 = vst [vmem:[%s2325_s3 + $0x68] sm:$0xff] %v1487_v32   ;;  %v1562_v58 = vpack.c.bf16 %v2165_v44, %v2156_v34  ;;  %1607 = vst [vmem:[%s2325_s3 + $0xe8] sm:$0xff] %v1567_v55  }
 0x121   :  { %1590 = vst [vmem:[%s2325_s3 + $0x60] sm:$0xff] %v1482_v40   ;;  %v1027_v46 = vadd.f32 %v1026_v41, %v525_v17  ;;  %v1162_v50 = vadd.f32 %v1161_v39, %v1099_v42  ;;  %v1687_v51 = vpop.f32.mrb[28].mxu0  ;;  %v1719_v5 = vpop.f32.mrb[28].mxu1 }
 0x122   :  { %v532_v52 = vpop.f32.mrb[29].mxu0  ;;  %v541_v8 = vadd.f32 %v1687_v51, %v1948_v38  ;;  %1606 = vst [vmem:[%s2325_s3 + $0xe0] sm:$0xff] %v1562_v58   ;;  %v660_v11 = vpop.f32.mrb[29].mxu1  ;;  %v2185_v22 = vadd.f32 %v1719_v5, %v1948_v38 }
 0x123   :  { %v1163_v63 = vadd.f32 %v1162_v50, %v1100_v45  ;;  %v533_v2 = vadd.f32 %v1948_v38, %v532_v52  ;;  %v1028_v3 = vadd.f32 %v1027_v46, %v528_v18  ;;  %v1688_v4 = vpop.f32.mrb[30].mxu0  ;;  %v1720_v18 = vpop.f32.mrb[30].mxu1  ;;  %v2188_v23 = vadd.f32 %v1948_v38, %v660_v11 }
 0x124   :  { %v544_v9 = vadd.f32 %v1688_v4, %v1948_v38  ;;  %v535_v10 = vpop.f32.mrb[31].mxu0  ;;  %v663_v24 = vpop.f32.mrb[31].mxu1  ;;  %v2194_v35 = vadd.f32 %v1720_v18, %v1948_v38  ;;  %v1104_v40 = vmul.f32 %v541_v8, %v541_v8 }
 0x125   :  { %v1029_v12 = vadd.f32 %v1028_v3, %v533_v2  ;;  %v1102_v15 = vmul.f32 %v533_v2, %v533_v2  ;;  %v1164_v16 = vadd.f32 %v1163_v63, %v1101_v62  ;;  %v536_v17 = vadd.f32 %v1948_v38, %v535_v10 }
 0x126   :  { %v1497_v19 = vpack.c.bf16 %v544_v9, %v541_v8  ;;  %v2197_v39 = vadd.f32 %v1948_v38, %v663_v24  ;;  %v1577_v45 = vpack.c.bf16 %v2194_v35, %v2185_v22  ;;  %v1105_v50 = vmul.f32 %v544_v9, %v544_v9 }
 0x127   :  { %v1165_v25 = vadd.f32 %v1164_v16, %v1102_v15  ;;  %v1492_v26 = vpack.c.bf16 %v536_v17, %v533_v2  ;;  %v1030_v31 = vadd.f32 %v1029_v12, %v536_v17  ;;  %v1103_v32 = vmul.f32 %v536_v17, %v536_v17 }
 0x128   :  { %1593 = vst [vmem:[%s2325_s3 + $0x78] sm:$0xff] %v1497_v19   ;;  %v1572_v46 = vpack.c.bf16 %v2197_v39, %v2188_v23  ;;  %v1106_v38 = vmul.f32 %v1964_v53, %v1964_v53  ;;  %1609 = vst [vmem:[%s2325_s3 + $0xf8] sm:$0xff] %v1577_v45   ;;  %v1107_v2 = vmul.f32 %v1975_v61, %v1975_v61 }
 0x129   :  { %1592 = vst [vmem:[%s2325_s3 + $0x70] sm:$0xff] %v1492_v26   ;;  %v1031_v41 = vadd.f32 %v1030_v31, %v541_v8  ;;  %v1166_v42 = vadd.f32 %v1165_v25, %v1103_v32  ;;  %v1108_v3 = vmul.f32 %v1960_v48, %v1960_v48  ;;  %v1109_v8 = vmul.f32 %v1967_v54, %v1967_v54 }
 0x12a   :  { %1608 = vst [vmem:[%s2325_s3 + $0xf0] sm:$0xff] %v1572_v46   ;;  %v1111_v16 = vmul.f32 %v2005_v28, %v2005_v28  ;;  %v1115_v32 = vmul.f32 %v2037_v1, %v2037_v1 }
 0x12b   :  { %v1167_v51 = vadd.f32 %v1166_v42, %v1104_v40  ;;  %v1032_v52 = vadd.f32 %v1031_v41, %v544_v9 }
 0x12d   :  { %v1033_v55 = vadd.f32 %v1032_v52, %v1964_v53  ;;  %v1168_v58 = vadd.f32 %v1167_v51, %v1105_v50  ;;  %v1110_v53 = vmul.f32 %v1996_v21, %v1996_v21  ;;  %v1119_v52 = vmul.f32 %v2069_v37, %v2069_v37 }
 0x12f   :  { %v1169_v62 = vadd.f32 %v1168_v58, %v1106_v38  ;;  %v1034_v63 = vadd.f32 %v1033_v55, %v1975_v61 }
 0x131   :  { %v1035_v4 = vadd.f32 %v1034_v63, %v1960_v48  ;;  %v1170_v5 = vadd.f32 %v1169_v62, %v1107_v2  ;;  %v1112_v48 = vmul.f32 %v1993_v20, %v1993_v20 }
 0x133   :  { %v1171_v9 = vadd.f32 %v1170_v5, %v1108_v3  ;;  %v1036_v10 = vadd.f32 %v1035_v4, %v1967_v54  ;;  %v1113_v54 = vmul.f32 %v2002_v27, %v2002_v27  ;;  %v1123_v4 = vmul.f32 %v2101_v14, %v2101_v14 }
 0x135   :  { %v1037_v11 = vadd.f32 %v1036_v10, %v1996_v21  ;;  %v1172_v12 = vadd.f32 %v1171_v9, %v1109_v8  ;;  %v1114_v21 = vmul.f32 %v2028_v57, %v2028_v57 }
 0x137   :  { %v1173_v15 = vadd.f32 %v1172_v12, %v1110_v53  ;;  %v1038_v61 = vadd.f32 %v1037_v11, %v2005_v28 }
 0x139   :  { %v1039_v17 = vadd.f32 %v1038_v61, %v1993_v20  ;;  %v1174_v18 = vadd.f32 %v1173_v15, %v1111_v16  ;;  %v1116_v20 = vmul.f32 %v2025_v56, %v2025_v56  ;;  %v1127_v15 = vmul.f32 %v2133_v60, %v2133_v60 }
 0x13b   :  { %v1175_v19 = vadd.f32 %v1174_v18, %v1112_v48  ;;  %v1040_v24 = vadd.f32 %v1039_v17, %v2002_v27  ;;  %v1117_v27 = vmul.f32 %v2034_v0, %v2034_v0 }
 0x13d   :  { %v1041_v25 = vadd.f32 %v1040_v24, %v2028_v57  ;;  %v1176_v26 = vadd.f32 %v1175_v19, %v1113_v54  ;;  %v1118_v57 = vmul.f32 %v2060_v30, %v2060_v30  ;;  %v1131_v24 = vmul.f32 %v2165_v44, %v2165_v44 }
 0x13f   :  { %v1177_v31 = vadd.f32 %v1176_v26, %v1114_v21  ;;  %v1042_v28 = vadd.f32 %v1041_v25, %v2037_v1 }
 0x141   :  { %v1043_v40 = vadd.f32 %v1042_v28, %v2025_v56  ;;  %v1178_v41 = vadd.f32 %v1177_v31, %v1115_v32  ;;  %v1120_v56 = vmul.f32 %v2057_v29, %v2057_v29 }
 0x143   :  { %v1179_v42 = vadd.f32 %v1178_v41, %v1116_v20  ;;  %v1044_v45 = vadd.f32 %v1043_v40, %v2034_v0  ;;  %v1121_v0 = vmul.f32 %v2066_v36, %v2066_v36  ;;  %v1135_v40 = vmul.f32 %v2197_v39, %v2197_v39 }
 0x145   :  { %v1045_v46 = vadd.f32 %v1044_v45, %v2060_v30  ;;  %v1180_v50 = vadd.f32 %v1179_v42, %v1117_v27  ;;  %v1122_v30 = vmul.f32 %v2092_v7, %v2092_v7 }
 0x147   :  { %v1181_v51 = vadd.f32 %v1180_v50, %v1118_v57  ;;  %v1046_v1 = vadd.f32 %v1045_v46, %v2069_v37 }
 0x149   :  { %v1047_v38 = vadd.f32 %v1046_v1, %v2057_v29  ;;  %v1182_v55 = vadd.f32 %v1181_v51, %v1119_v52  ;;  %v1124_v29 = vmul.f32 %v2089_v6, %v2089_v6 }
 0x14b   :  { %v1183_v58 = vadd.f32 %v1182_v55, %v1120_v56  ;;  %v1048_v62 = vadd.f32 %v1047_v38, %v2066_v36  ;;  %v1125_v36 = vmul.f32 %v2098_v13, %v2098_v13 }
 0x14d   :  { %v1049_v63 = vadd.f32 %v1048_v62, %v2092_v7  ;;  %v1184_v2 = vadd.f32 %v1183_v58, %v1121_v0  ;;  %v1126_v7 = vmul.f32 %v2124_v49, %v2124_v49 }
 0x14f   :  { %v1185_v3 = vadd.f32 %v1184_v2, %v1122_v30  ;;  %v1050_v37 = vadd.f32 %v1049_v63, %v2101_v14 }
 0x151   :  { %v1051_v5 = vadd.f32 %v1050_v37, %v2089_v6  ;;  %v1186_v8 = vadd.f32 %v1185_v3, %v1123_v4  ;;  %v1128_v6 = vmul.f32 %v2121_v47, %v2121_v47 }
 0x153   :  { %v1187_v9 = vadd.f32 %v1186_v8, %v1124_v29  ;;  %v1052_v10 = vadd.f32 %v1051_v5, %v2098_v13  ;;  %v1129_v13 = vmul.f32 %v2130_v59, %v2130_v59 }
 0x155   :  { %v1053_v53 = vadd.f32 %v1052_v10, %v2124_v49  ;;  %v1188_v11 = vadd.f32 %v1187_v9, %v1125_v36  ;;  %v1130_v49 = vmul.f32 %v2156_v34, %v2156_v34 }
 0x157   :  { %v1189_v12 = vadd.f32 %v1188_v11, %v1126_v7  ;;  %v1054_v14 = vadd.f32 %v1053_v53, %v2133_v60 }
 0x159   :  { %v1055_v61 = vadd.f32 %v1054_v14, %v2121_v47  ;;  %v1190_v16 = vadd.f32 %v1189_v12, %v1127_v15  ;;  %v1132_v47 = vmul.f32 %v2153_v33, %v2153_v33 }
 0x15b   :  { %v1191_v48 = vadd.f32 %v1190_v16, %v1128_v6  ;;  %v1056_v17 = vadd.f32 %v1055_v61, %v2130_v59  ;;  %v1133_v59 = vmul.f32 %v2162_v43, %v2162_v43 }
 0x15d   :  { %v1057_v18 = vadd.f32 %v1056_v17, %v2156_v34  ;;  %v1192_v54 = vadd.f32 %v1191_v48, %v1129_v13  ;;  %v1134_v34 = vmul.f32 %v2188_v23, %v2188_v23 }
 0x15f   :  { %v1193_v19 = vadd.f32 %v1192_v54, %v1130_v49  ;;  %v1058_v60 = vadd.f32 %v1057_v18, %v2165_v44 }
 0x161   :  { %v1059_v21 = vadd.f32 %v1058_v60, %v2153_v33  ;;  %v1194_v25 = vadd.f32 %v1193_v19, %v1131_v24  ;;  %v1136_v33 = vmul.f32 %v2185_v22, %v2185_v22 }
 0x163   :  { %v1195_v26 = vadd.f32 %v1194_v25, %v1132_v47  ;;  %v1060_v31 = vadd.f32 %v1059_v21, %v2162_v43  ;;  %v1137_v43 = vmul.f32 %v2194_v35, %v2194_v35 }
 0x165   :  { %v1061_v28 = vadd.f32 %v1060_v31, %v2188_v23  ;;  %v1196_v32 = vadd.f32 %v1195_v26, %v1133_v59 }
 0x167   :  { %v1197_v20 = vadd.f32 %v1196_v32, %v1134_v34  ;;  %v1062_v44 = vadd.f32 %v1061_v28, %v2197_v39 }
 0x169   :  { %v1063_v41 = vadd.f32 %v1062_v44, %v2185_v22  ;;  %v1198_v27 = vadd.f32 %v1197_v20, %v1135_v40  ;;  %v1001_v22 = vld [vmem:[%s2323_s4] sm:$0x1] }
 0x16b   :  { %v1064_v42 = vadd.f32 %v1063_v41, %v2194_v35  ;;  %v1199_v45 = vadd.f32 %v1198_v27, %v1136_v33  ;;  %v1073_v35 = vld [vmem:[%s2324_s5] sm:$0x1] }
 0x16d   :  { %v1065_v23 = vrot.slane %v1064_v42, 4  ;;  %v1200_v57 = vadd.f32 %v1199_v45, %v1137_v43 }
 0x16f   :  { %v1066_v46 = vadd.f32 %v1065_v23, %v1064_v42  ;;  %v1201_v50 = vrot.slane %v1200_v57, 4 }
 0x171   :  { %v1067_v51 = vrot.slane %v1066_v46, 2  ;;  %v1202_v1 = vadd.f32 %v1201_v50, %v1200_v57 }
 0x173   :  { %v1068_v52 = vadd.f32 %v1067_v51, %v1066_v46  ;;  %v1203_v39 = vrot.slane %v1202_v1, 2 }
 0x175   :  { %v1069_v56 = vrot.slane %v1068_v52, 1  ;;  %v1204_v38 = vadd.f32 %v1203_v39, %v1202_v1 }
 0x177   :  { %v1070_v55 = vadd.f32 %v1069_v56, %v1068_v52  ;;  %v1205_v0 = vrot.slane %v1204_v38, 1 }
 0x179   :  { %v1071_v58 = vadd.f32 %v1070_v55, %v1001_v22  ;;  %v1206_v62 = vadd.f32 %v1205_v0, %v1204_v38 }
 0x17b   :  { %1072 = vst [vmem:[%s2323_s4] sm:$0x1] %v1071_v58  ;;  %v1207_v30 = vadd.f32 %v1206_v62, %v1073_v35 }
 0x17d   :  { %1208 = vst [vmem:[%s2324_s5] sm:$0x1] %v1207_v30 }

// kernel: blur_generator_forward.57
= control target key start
LH: loop header
LB: loop body
LE: loop exit
PB: predicated region body
PF: predicated region fallthrough
CT: control target
= control target key end

     0   :  { %vm117_vm0 = vcmask 588800   ;;  %vm142_vm1 = vcmask 1043456   ;;  %v571_v14 = vmov 0.0   ;;  %s712_s1 = inlined_call_operand.vmem [shape: bf16[72,128], index: 1, kind: input, shape index: {}]   ;;  %s713_s0 = inlined_call_operand.vmem [shape: bf16[128,72], index: 0, kind: input, shape index: {}]   ;;  %s714_s4 = inlined_call_operand.vmem [shape: f32[1,128], index: 4, kind: output, shape index: {1}]   ;;  %s715_s5 = inlined_call_operand.vmem [shape: f32[1,128], index: 5, kind: output, shape index: {2}]   ;;  %s716_s2 = inlined_call_operand.vmem [shape: f32[1,128], index: 2, kind: input, shape index: {}]   ;;  %s717_s3 = inlined_call_operand.vmem [shape: bf16[128,128], index: 3, kind: output, shape index: {0}]  }
   0x1   :  { %v558_v0 = vld [vmem:[%s712_s1] sm:$0xff]   ;;  %v559_v1 = vld [vmem:[%s712_s1 + $0x8] sm:$0xff]   ;;  %v560_v2 = vld [vmem:[%s712_s1 + $0x10] sm:$0xff]   ;;  %327 = vst [vmem:[%s714_s4] sm:$0x1] %v571_v14 }
   0x2   :  { %519 = vmatprep.subr.bf16.mxu0 %v558_v0  ;;  %545 = vmatprep.subr.bf16.mxu1 %v558_v0  ;;  %v563_v3 = vld [vmem:[%s713_s0] sm:$0xff]   ;;  %v561_v4 = vld [vmem:[%s712_s1 + $0x18] sm:$0xff]   ;;  %v564_v8 = vld [vmem:[%s713_s0 + $0x8] sm:$0xff]   ;;  %328 = vst [vmem:[%s715_s5] sm:$0x1] %v571_v14 }
   0x3   :  { %520 = vmatpush3.bf16.msra.mxu0 %v558_v0  ;;  %550 = vmatpush3.bf16.msra.mxu1 %v558_v0  ;;  %v567_v5 = vld [vmem:[%s713_s0 + $0x20] sm:$0xff]   ;;  %v568_v9 = vld [vmem:[%s713_s0 + $0x28] sm:$0xff]   ;;  %v565_v10 = vld [vmem:[%s713_s0 + $0x10] sm:$0xff]  }
   0x4   :  { %521 = vmatprep.subr.bf16.mxu0 %v559_v1  ;;  %546 = vmatprep.subr.bf16.mxu1 %v559_v1  ;;  %v562_v6 = vld [vmem:[%s712_s1 + $0x20] ss:$0 sps:$4 sm:$0xff]   ;;  %v569_v11 = vld [vmem:[%s713_s0 + $0x30] sm:$0xff]   ;;  %v566_v12 = vld [vmem:[%s713_s0 + $0x18] sm:$0xff]  }
   0x5   :  { %529 = vmatprep.mubr.msk.bf16.mxu0 %vm117_vm0, %v563_v3  ;;  %537 = vmatprep.mubr.msk.bf16.mxu1 %vm117_vm0, %v567_v5  ;;  %v144_v7 = vsel %vm142_vm1, %v562_v6, 0  ;;  %v570_v13 = vld [vmem:[%s713_s0 + $0x38] sm:$0xff]   ;;  %v405_v15 = vld [vmem:[%s716_s2] ss:$0 sm:$0xff] }
   0x7   :  { %522 = vmatpush3.bf16.msra.mxu0 %v559_v1  ;;  %551 = vmatpush3.bf16.msra.mxu1 %v559_v1 }
   0x8   :  { %523 = vmatprep.subr.bf16.mxu0 %v560_v2  ;;  %547 = vmatprep.subr.bf16.mxu1 %v560_v2 }
   0xb   :  { %524 = vmatpush3.bf16.msra.mxu0 %v560_v2  ;;  %552 = vmatpush3.bf16.msra.mxu1 %v560_v2 }
   0xc   :  { %525 = vmatprep.subr.bf16.mxu0 %v561_v4  ;;  %548 = vmatprep.subr.bf16.mxu1 %v561_v4 }
   0xf   :  { %526 = vmatpush3.bf16.msra.mxu0 %v561_v4  ;;  %553 = vmatpush3.bf16.msra.mxu1 %v561_v4 }
  0x10   :  { %555 = vmatprep.subr.msk.bf16.mxu0 %vm142_vm1, %v562_v6  ;;  %556 = vmatprep.subr.msk.bf16.mxu1 %vm142_vm1, %v562_v6 }
  0x13   :  { %528 = vmatpush3.bf16.msra.mxu0 %v144_v7  ;;  %554 = vmatpush3.bf16.msra.mxu1 %v144_v7 }
  0x16   :  { %530 = vmatmul.mubr.msk.bf16.vlgmr.msra.gmra.mrb[0].mxu0 %vm117_vm0, %v564_v8  ;;  %538 = vmatmul.mubr.msk.bf16.vlgmr.msra.gmra.mrb[0].mxu1 %vm117_vm0, %v568_v9 }
  0x17   :  { %533 = vmatprep.mubr.msk.bf16.mxu0 %vm117_vm0, %v565_v10  ;;  %541 = vmatprep.mubr.msk.bf16.mxu1 %vm117_vm0, %v569_v11 }
  0x1e   :  { %534 = vmatmul.mubr.msk.bf16.gmra.mrb[4].mxu0 %vm117_vm0, %v566_v12  ;;  %542 = vmatmul.mubr.msk.bf16.gmra.mrb[4].mxu1 %vm117_vm0, %v570_v13 }
  0xe9   :  { %v531_v16 = vpop.f32.mrb[0].mxu0  ;;  %v539_v17 = vpop.f32.mrb[0].mxu1 }
  0xea   :  { %v180_v18 = vpop.f32.mrb[1].mxu0  ;;  %v658_v19 = vadd.f32 %v539_v17, %v405_v15  ;;  %v212_v20 = vpop.f32.mrb[1].mxu1  ;;  %v189_v25 = vadd.f32 %v531_v16, %v405_v15 }
  0xeb   :  { %v181_v21 = vadd.f32 %v405_v15, %v180_v18  ;;  %v532_v22 = vpop.f32.mrb[2].mxu0  ;;  %v660_v23 = vadd.f32 %v405_v15, %v212_v20  ;;  %v540_v24 = vpop.f32.mrb[2].mxu1 }
  0xec   :  { %v192_v26 = vadd.f32 %v532_v22, %v405_v15  ;;  %v183_v27 = vpop.f32.mrb[3].mxu0  ;;  %v662_v28 = vadd.f32 %v540_v24, %v405_v15  ;;  %v215_v29 = vpop.f32.mrb[3].mxu1  ;;  %v356_v39 = vmul.f32 %v189_v25, %v189_v25  ;;  %v364_v20 = vmul.f32 %v658_v19, %v658_v19 }
  0xed   :  { %v184_v30 = vadd.f32 %v405_v15, %v183_v27  ;;  %v216_v31 = vadd.f32 %v405_v15, %v215_v29  ;;  %v354_v32 = vmul.f32 %v181_v21, %v181_v21  ;;  %v362_v13 = vmul.f32 %v660_v23, %v660_v23 }
  0xee   :  { %v467_v33 = vpack.c.bf16 %v192_v26, %v189_v25  ;;  %v487_v34 = vpack.c.bf16 %v662_v28, %v658_v19  ;;  %v357_v47 = vmul.f32 %v192_v26, %v192_v26  ;;  %v365_v24 = vmul.f32 %v662_v28, %v662_v28 }
  0xef   :  { %v462_v35 = vpack.c.bf16 %v184_v30, %v181_v21  ;;  %v330_v36 = vadd.f32 %v184_v30, %v181_v21  ;;  %v355_v37 = vmul.f32 %v184_v30, %v184_v30  ;;  %v482_v38 = vpack.c.bf16 %v216_v31, %v660_v23 }
  0xf0   :  { %499 = vst [vmem:[%s717_s3 + $0x8] sm:$0xff] %v467_v33   ;;  %503 = vst [vmem:[%s717_s3 + $0x28] sm:$0xff] %v487_v34   ;;  %v363_v18 = vmul.f32 %v216_v31, %v216_v31 }
  0xf1   :  { %463 = vst [vmem:[%s717_s3] sm:$0xff] %v462_v35   ;;  %v331_v40 = vadd.f32 %v330_v36, %v189_v25  ;;  %v370_v41 = vadd.f32 %v355_v37, %v354_v32  ;;  %v535_v42 = vpop.f32.mrb[4].mxu0  ;;  %502 = vst [vmem:[%s717_s3 + $0x20] sm:$0xff] %v482_v38   ;;  %v543_v43 = vpop.f32.mrb[4].mxu1 }
  0xf2   :  { %v196_v44 = vpop.f32.mrb[5].mxu0  ;;  %v237_v45 = vadd.f32 %v543_v43, %v405_v15  ;;  %v228_v46 = vpop.f32.mrb[5].mxu1  ;;  %v205_v53 = vadd.f32 %v535_v42, %v405_v15 }
  0xf3   :  { %v371_v48 = vadd.f32 %v370_v41, %v356_v39  ;;  %v197_v49 = vadd.f32 %v405_v15, %v196_v44  ;;  %v332_v50 = vadd.f32 %v331_v40, %v192_v26  ;;  %v536_v51 = vpop.f32.mrb[6].mxu0  ;;  %v544_v52 = vpop.f32.mrb[6].mxu1  ;;  %v229_v63 = vadd.f32 %v405_v15, %v228_v46 }
  0xf4   :  { %v208_v54 = vadd.f32 %v536_v51, %v405_v15  ;;  %v199_v55 = vpop.f32.mrb[7].mxu0  ;;  %v240_v56 = vadd.f32 %v544_v52, %v405_v15  ;;  %v231_v57 = vpop.f32.mrb[7].mxu1  ;;  %v360_v6 = vmul.f32 %v205_v53, %v205_v53  ;;  %v368_v34 = vmul.f32 %v237_v45, %v237_v45 }
  0xf5   :  { %v333_v58 = vadd.f32 %v332_v50, %v197_v49  ;;  %v358_v59 = vmul.f32 %v197_v49, %v197_v49  ;;  %v372_v60 = vadd.f32 %v371_v48, %v357_v47  ;;  %v200_v61 = vadd.f32 %v405_v15, %v199_v55  ;;  %v329_v48 = vld [vmem:[%s714_s4] sm:$0x1] }
  0xf6   :  { %v477_v62 = vpack.c.bf16 %v208_v54, %v205_v53  ;;  %v497_v0 = vpack.c.bf16 %v240_v56, %v237_v45  ;;  %v232_v5 = vadd.f32 %v405_v15, %v231_v57  ;;  %v361_v10 = vmul.f32 %v208_v54, %v208_v54  ;;  %v353_v50 = vld [vmem:[%s715_s5] sm:$0x1] }
  0xf7   :  { %v373_v1 = vadd.f32 %v372_v60, %v358_v59  ;;  %v472_v2 = vpack.c.bf16 %v200_v61, %v197_v49  ;;  %v334_v3 = vadd.f32 %v333_v58, %v200_v61  ;;  %v359_v4 = vmul.f32 %v200_v61, %v200_v61 }
  0xf8   :  { %501 = vst [vmem:[%s717_s3 + $0x18] sm:$0xff] %v477_v62   ;;  %505 = vst [vmem:[%s717_s3 + $0x38] sm:$0xff] %v497_v0   ;;  %v492_v9 = vpack.c.bf16 %v232_v5, %v229_v63  ;;  %v366_v27 = vmul.f32 %v229_v63, %v229_v63  ;;  %v367_v33 = vmul.f32 %v232_v5, %v232_v5 }
  0xf9   :  { %500 = vst [vmem:[%s717_s3 + $0x10] sm:$0xff] %v472_v2   ;;  %v335_v7 = vadd.f32 %v334_v3, %v205_v53  ;;  %v374_v8 = vadd.f32 %v373_v1, %v359_v4  ;;  %v369_v36 = vmul.f32 %v240_v56, %v240_v56 }
  0xfa   :  { %504 = vst [vmem:[%s717_s3 + $0x30] sm:$0xff] %v492_v9  }
  0xfb   :  { %v375_v11 = vadd.f32 %v374_v8, %v360_v6  ;;  %v336_v12 = vadd.f32 %v335_v7, %v208_v54 }
  0xfd   :  { %v337_v14 = vadd.f32 %v336_v12, %v660_v23  ;;  %v376_v15 = vadd.f32 %v375_v11, %v361_v10 }
  0xff   :  { %v377_v16 = vadd.f32 %v376_v15, %v362_v13  ;;  %v338_v17 = vadd.f32 %v337_v14, %v216_v31 }
 0x101   :  { %v339_v21 = vadd.f32 %v338_v17, %v658_v19  ;;  %v378_v22 = vadd.f32 %v377_v16, %v363_v18 }
 0x103   :  { %v379_v25 = vadd.f32 %v378_v22, %v364_v20  ;;  %v340_v26 = vadd.f32 %v339_v21, %v662_v28 }
 0x105   :  { %v341_v29 = vadd.f32 %v340_v26, %v229_v63  ;;  %v380_v30 = vadd.f32 %v379_v25, %v365_v24 }
 0x107   :  { %v381_v23 = vadd.f32 %v380_v30, %v366_v27  ;;  %v342_v32 = vadd.f32 %v341_v29, %v232_v5 }
 0x109   :  { %v343_v31 = vadd.f32 %v342_v32, %v237_v45  ;;  %v382_v35 = vadd.f32 %v381_v23, %v367_v33 }
 0x10b   :  { %v344_v37 = vadd.f32 %v343_v31, %v240_v56  ;;  %v383_v38 = vadd.f32 %v382_v35, %v368_v34 }
 0x10d   :  { %v345_v19 = vrot.slane %v344_v37, 4  ;;  %v384_v39 = vadd.f32 %v383_v38, %v369_v36 }
 0x10f   :  { %v346_v40 = vadd.f32 %v345_v19, %v344_v37  ;;  %v385_v41 = vrot.slane %v384_v39, 4 }
 0x111   :  { %v347_v42 = vrot.slane %v346_v40, 2  ;;  %v386_v43 = vadd.f32 %v385_v41, %v384_v39 }
 0x113   :  { %v348_v44 = vadd.f32 %v347_v42, %v346_v40  ;;  %v387_v28 = vrot.slane %v386_v43, 2 }
 0x115   :  { %v349_v46 = vrot.slane %v348_v44, 1  ;;  %v388_v47 = vadd.f32 %v387_v28, %v386_v43 }
 0x117   :  { %v350_v49 = vadd.f32 %v349_v46, %v348_v44  ;;  %v389_v45 = vrot.slane %v388_v47, 1 }
 0x119   :  { %v351_v51 = vadd.f32 %v350_v49, %v329_v48  ;;  %v390_v52 = vadd.f32 %v389_v45, %v388_v47 }
 0x11b   :  { %352 = vst [vmem:[%s714_s4] sm:$0x1] %v351_v51  ;;  %v391_v53 = vadd.f32 %v390_v52, %v353_v50 }
 0x11d   :  { %392 = vst [vmem:[%s715_s5] sm:$0x1] %v391_v53 }

// kernel: blur_generator_forward.58
= control target key start
LH: loop header
LB: loop body
LE: loop exit
PB: predicated region body
PF: predicated region fallthrough
CT: control target
= control target key end

     0   :  { %vm172_vm0 = vcmask 125952   ;;  %s416_s0 = inlined_call_operand.vmem [shape: bf16[1,128,16], index: 0, kind: input, shape index: {}]   ;;  %s417_s1 = inlined_call_operand.vmem [shape: f32[1,1,16], index: 1, kind: input, shape index: {}]   ;;  %s418_s2 = inlined_call_operand.vmem [shape: f32[1,1,16], index: 2, kind: input, shape index: {}]   ;;  %s419_s3 = inlined_call_operand.vmem [shape: bf16[1,128,16], index: 3, kind: output, shape index: {}]  }
   0x1   :  { %v228_v0 = vld [vmem:[%s416_s0] sm:$0xff]   ;;  %v259_v4 = vld [vmem:[%s416_s0 + $0x8] sm:$0xff]   ;;  %v260_v5 = vld [vmem:[%s416_s0 + $0x10] sm:$0xff]  }
   0x2   :  { %v292_v1 = vld [vmem:[%s417_s1] ss:$0 sm:$0xff]  ;;  %v229_v2 = vunpack.c.l.bf16 %v228_v0  ;;  %v230_v3 = vunpack.c.h.bf16 %v228_v0  ;;  %v261_v6 = vld [vmem:[%s416_s0 + $0x18] sm:$0xff]   ;;  %v233_v8 = vunpack.c.l.bf16 %v259_v4  ;;  %v234_v9 = vunpack.c.h.bf16 %v259_v4  ;;  %v263_v41 = vld [vmem:[%s416_s0 + $0x28] sm:$0xff]  }
   0x3   :  { %v306_v7 = vld [vmem:[%s418_s2] ss:$0 sm:$0xff]  ;;  %v237_v10 = vunpack.c.l.bf16 %v260_v5  ;;  %v238_v11 = vunpack.c.h.bf16 %v260_v5  ;;  %v241_v14 = vunpack.c.l.bf16 %v261_v6  ;;  %v242_v15 = vunpack.c.h.bf16 %v261_v6  ;;  %v264_v42 = vld [vmem:[%s416_s0 + $0x30] sm:$0xff]   ;;  %v265_v47 = vld [vmem:[%s416_s0 + $0x38] sm:$0xff]  }
   0x4   :  { %v53_v12 = vmul.f32 %v229_v2, %v292_v1  ;;  %v54_v13 = vmul.f32 %v230_v3, %v292_v1  ;;  %v55_v16 = vmul.f32 %v233_v8, %v292_v1  ;;  %v56_v17 = vmul.f32 %v234_v9, %v292_v1  ;;  %v262_v36 = vld [vmem:[%s416_s0 + $0x20] sm:$0xff]  }
   0x5   :  { %v57_v18 = vmul.f32 %v237_v10, %v292_v1  ;;  %v58_v19 = vmul.f32 %v238_v11, %v292_v1  ;;  %v59_v22 = vmul.f32 %v241_v14, %v292_v1  ;;  %v60_v23 = vmul.f32 %v242_v15, %v292_v1 }
   0x6   :  { %v76_v20 = vadd.f32 %v306_v7, %v53_v12  ;;  %v77_v21 = vadd.f32 %v306_v7, %v54_v13  ;;  %v78_v24 = vadd.f32 %v306_v7, %v55_v16  ;;  %v79_v25 = vadd.f32 %v306_v7, %v56_v17 }
   0x7   :  { %v80_v26 = vadd.f32 %v306_v7, %v57_v18  ;;  %v81_v27 = vadd.f32 %v306_v7, %v58_v19  ;;  %v82_v30 = vadd.f32 %v306_v7, %v59_v22  ;;  %v83_v31 = vadd.f32 %v306_v7, %v60_v23 }
   0x8   :  { %v92_v28 = vmax.f32 %v76_v20, 0.0  ;;  %v93_v29 = vmax.f32 %v77_v21, 0.0  ;;  %v94_v32 = vmax.f32 %v78_v24, 0.0  ;;  %v95_v33 = vmax.f32 %v79_v25, 0.0 }
   0x9   :  { %v96_v34 = vmax.f32 %v80_v26, 0.0  ;;  %v97_v35 = vmax.f32 %v81_v27, 0.0  ;;  %v98_v39 = vmax.f32 %v82_v30, 0.0  ;;  %v99_v40 = vmax.f32 %v83_v31, 0.0 }
   0xa   :  { %v211_v37 = vpack.c.bf16 %v92_v28, %v92_v28  ;;  %v212_v38 = vpack.c.bf16 %v93_v29, %v93_v29  ;;  %v213_v43 = vpack.c.bf16 %v94_v32, %v94_v32  ;;  %v214_v44 = vpack.c.bf16 %v95_v33, %v95_v33 }
   0xb   :  { %v215_v45 = vpack.c.bf16 %v96_v34, %v96_v34  ;;  %v216_v46 = vpack.c.bf16 %v97_v35, %v97_v35  ;;  %v217_v48 = vpack.c.bf16 %v98_v39, %v98_v39  ;;  %v218_v49 = vpack.c.bf16 %v99_v40, %v99_v40 }
   0xc   :  { %173 = vst.msk [vmem:[%s419_s3] sm:$0xf] %vm172_vm0, %v211_v37  ;;  %174 = vst.msk [vmem:[%s419_s3 + $0x4] sm:$0xf] %vm172_vm0, %v212_v38  ;;  %v245_v50 = vunpack.c.l.bf16 %v262_v36  ;;  %v246_v51 = vunpack.c.h.bf16 %v262_v36  ;;  %v249_v52 = vunpack.c.l.bf16 %v263_v41  ;;  %v250_v53 = vunpack.c.h.bf16 %v263_v41 }
   0xd   :  { %175 = vst.msk [vmem:[%s419_s3 + $0x8] sm:$0xf] %vm172_vm0, %v213_v43  ;;  %176 = vst.msk [vmem:[%s419_s3 + $0xc] sm:$0xf] %vm172_vm0, %v214_v44  ;;  %v253_v54 = vunpack.c.l.bf16 %v264_v42  ;;  %v254_v55 = vunpack.c.h.bf16 %v264_v42  ;;  %v257_v58 = vunpack.c.l.bf16 %v265_v47  ;;  %v258_v59 = vunpack.c.h.bf16 %v265_v47 }
   0xe   :  { %177 = vst.msk [vmem:[%s419_s3 + $0x10] sm:$0xf] %vm172_vm0, %v215_v45  ;;  %178 = vst.msk [vmem:[%s419_s3 + $0x14] sm:$0xf] %vm172_vm0, %v216_v46  ;;  %v61_v56 = vmul.f32 %v245_v50, %v292_v1  ;;  %v62_v57 = vmul.f32 %v246_v51, %v292_v1  ;;  %v63_v60 = vmul.f32 %v249_v52, %v292_v1 }
   0xf   :  { %179 = vst.msk [vmem:[%s419_s3 + $0x18] sm:$0xf] %vm172_vm0, %v217_v48  ;;  %180 = vst.msk [vmem:[%s419_s3 + $0x1c] sm:$0xf] %vm172_vm0, %v218_v49  ;;  %v64_v61 = vmul.f32 %v250_v53, %v292_v1  ;;  %v65_v62 = vmul.f32 %v253_v54, %v292_v1  ;;  %v66_v63 = vmul.f32 %v254_v55, %v292_v1 }
  0x10   :  { %v84_v0 = vadd.f32 %v306_v7, %v61_v56  ;;  %v85_v2 = vadd.f32 %v306_v7, %v62_v57  ;;  %v67_v3 = vmul.f32 %v257_v58, %v292_v1  ;;  %v68_v4 = vmul.f32 %v258_v59, %v292_v1 }
  0x11   :  { %v86_v5 = vadd.f32 %v306_v7, %v63_v60  ;;  %v87_v6 = vadd.f32 %v306_v7, %v64_v61  ;;  %v88_v8 = vadd.f32 %v306_v7, %v65_v62  ;;  %v89_v9 = vadd.f32 %v306_v7, %v66_v63 }
  0x12   :  { %v100_v10 = vmax.f32 %v84_v0, 0.0  ;;  %v101_v11 = vmax.f32 %v85_v2, 0.0  ;;  %v90_v12 = vadd.f32 %v306_v7, %v67_v3  ;;  %v91_v13 = vadd.f32 %v306_v7, %v68_v4 }
  0x13   :  { %v102_v14 = vmax.f32 %v86_v5, 0.0  ;;  %v103_v15 = vmax.f32 %v87_v6, 0.0  ;;  %v104_v16 = vmax.f32 %v88_v8, 0.0  ;;  %v105_v17 = vmax.f32 %v89_v9, 0.0 }
  0x14   :  { %v219_v18 = vpack.c.bf16 %v100_v10, %v100_v10  ;;  %v220_v1 = vpack.c.bf16 %v101_v11, %v101_v11  ;;  %v106_v19 = vmax.f32 %v90_v12, 0.0  ;;  %v107_v20 = vmax.f32 %v91_v13, 0.0 }
  0x15   :  { %v221_v21 = vpack.c.bf16 %v102_v14, %v102_v14  ;;  %v222_v22 = vpack.c.bf16 %v103_v15, %v103_v15  ;;  %v223_v23 = vpack.c.bf16 %v104_v16, %v104_v16  ;;  %v224_v24 = vpack.c.bf16 %v105_v17, %v105_v17 }
  0x16   :  { %181 = vst.msk [vmem:[%s419_s3 + $0x20] sm:$0xf] %vm172_vm0, %v219_v18  ;;  %182 = vst.msk [vmem:[%s419_s3 + $0x24] sm:$0xf] %vm172_vm0, %v220_v1  ;;  %v225_v7 = vpack.c.bf16 %v106_v19, %v106_v19  ;;  %v226_v25 = vpack.c.bf16 %v107_v20, %v107_v20 }
  0x17   :  { %183 = vst.msk [vmem:[%s419_s3 + $0x28] sm:$0xf] %vm172_vm0, %v221_v21  ;;  %184 = vst.msk [vmem:[%s419_s3 + $0x2c] sm:$0xf] %vm172_vm0, %v222_v22 }
  0x18   :  { %185 = vst.msk [vmem:[%s419_s3 + $0x30] sm:$0xf] %vm172_vm0, %v223_v23  ;;  %186 = vst.msk [vmem:[%s419_s3 + $0x34] sm:$0xf] %vm172_vm0, %v224_v24 }
  0x19   :  { %187 = vst.msk [vmem:[%s419_s3 + $0x38] sm:$0xf] %vm172_vm0, %v225_v7  ;;  %188 = vst.msk [vmem:[%s419_s3 + $0x3c] sm:$0xf] %vm172_vm0, %v226_v25 }

// kernel: blur_generator_forward.59
= control target key start
LH: loop header
LB: loop body
LE: loop exit
PB: predicated region body
PF: predicated region fallthrough
CT: control target
= control target key end

     0   :  { %v635_v0 = vmov 0   ;;  %vm185_vm0 = vcmask 130048   ;;  %v636_v26 = vmov 0.0   ;;  %s831_s1 = inlined_call_operand.vmem [shape: bf16[144,128], index: 1, kind: input, shape index: {}]   ;;  %s832_s0 = inlined_call_operand.vmem [shape: bf16[128,144], index: 0, kind: input, shape index: {}]   ;;  %s833_s4 = inlined_call_operand.vmem [shape: f32[1,128], index: 4, kind: output, shape index: {1}]   ;;  %s834_s5 = inlined_call_operand.vmem [shape: f32[1,128], index: 5, kind: output, shape index: {2}]   ;;  %s835_s2 = inlined_call_operand.vmem [shape: f32[1,128], index: 2, kind: input, shape index: {}]   ;;  %s836_s3 = inlined_call_operand.vmem [shape: bf16[128,128], index: 3, kind: output, shape index: {0}]  }
   0x1   :  { %210 = vmatprep.subr.bf16.mxu0 %v635_v0  ;;  %v602_v1 = vld [vmem:[%s831_s1] sm:$0xff]   ;;  %582 = vmatprep.subr.bf16.mxu1 %v635_v0  ;;  %v603_v2 = vld [vmem:[%s831_s1 + $0x8] sm:$0xff]   ;;  %v604_v3 = vld [vmem:[%s831_s1 + $0x10] sm:$0xff]   ;;  %391 = vst [vmem:[%s833_s4] sm:$0x1] %v636_v26 }
   0x2   :  { %211 = vmatpush1.bf16.msra.mxu0 %v602_v1  ;;  %591 = vmatpush1.bf16.msra.mxu1 %v602_v1  ;;  %v605_v4 = vld [vmem:[%s831_s1 + $0x18] sm:$0xff]   ;;  %v613_v5 = vld [vmem:[%s832_s0 + $0x4] ss:$8 sps:$4 sm:$0xff]   ;;  %v608_v9 = vld [vmem:[%s831_s1 + $0x30] sm:$0xff]   ;;  %392 = vst [vmem:[%s834_s5] sm:$0x1] %v636_v26 }
   0x3   :  { %212 = vmatprep.subr.bf16.mxu0 %v635_v0  ;;  %583 = vmatprep.subr.bf16.mxu1 %v635_v0  ;;  %v619_v6 = vld [vmem:[%s832_s0 + $0x44] ss:$8 sps:$4 sm:$0xff]   ;;  %v609_v10 = vld [vmem:[%s831_s1 + $0x38] sm:$0xff]   ;;  %v611_v12 = vld [vmem:[%s832_s0] ss:$8 sps:$4 sm:$0xff]  }
   0x4   :  { %495 = vmatprep.mubr.msk.bf16.mxu0 %vm185_vm0, %v613_v5  ;;  %v606_v7 = vld [vmem:[%s831_s1 + $0x20] sm:$0xff]   ;;  %499 = vmatprep.mubr.msk.bf16.mxu1 %vm185_vm0, %v619_v6  ;;  %v607_v8 = vld [vmem:[%s831_s1 + $0x28] sm:$0xff]   ;;  %v614_v14 = vld [vmem:[%s832_s0 + $0x14] ss:$8 sps:$4 sm:$0xff]  }
   0x5   :  { %v610_v11 = vld [vmem:[%s831_s1 + $0x40] sm:$0xff]   ;;  %v623_v15 = vld [vmem:[%s832_s0 + $0x54] ss:$8 sps:$4 sm:$0xff]   ;;  %v616_v16 = vld [vmem:[%s832_s0 + $0x10] ss:$8 sps:$4 sm:$0xff]  }
   0x6   :  { %213 = vmatpush1.bf16.msra.mxu0 %v603_v2  ;;  %592 = vmatpush1.bf16.msra.mxu1 %v603_v2  ;;  %v617_v13 = vld [vmem:[%s832_s0 + $0x40] ss:$8 sps:$4 sm:$0xff]   ;;  %v625_v17 = vld [vmem:[%s832_s0 + $0x50] ss:$8 sps:$4 sm:$0xff]   ;;  %v620_v18 = vld [vmem:[%s832_s0 + $0x24] ss:$8 sps:$4 sm:$0xff]  }
   0x7   :  { %214 = vmatprep.subr.bf16.mxu0 %v635_v0  ;;  %584 = vmatprep.subr.bf16.mxu1 %v635_v0  ;;  %v629_v19 = vld [vmem:[%s832_s0 + $0x64] ss:$8 sps:$4 sm:$0xff]   ;;  %v622_v20 = vld [vmem:[%s832_s0 + $0x20] ss:$8 sps:$4 sm:$0xff]   ;;  %v626_v22 = vld [vmem:[%s832_s0 + $0x34] ss:$8 sps:$4 sm:$0xff]  }
   0x8   :  { %v631_v21 = vld [vmem:[%s832_s0 + $0x60] ss:$8 sps:$4 sm:$0xff]   ;;  %v632_v23 = vld [vmem:[%s832_s0 + $0x74] ss:$8 sps:$4 sm:$0xff]   ;;  %v628_v24 = vld [vmem:[%s832_s0 + $0x30] ss:$8 sps:$4 sm:$0xff]  }
   0x9   :  { %v634_v25 = vld [vmem:[%s832_s0 + $0x70] ss:$8 sps:$4 sm:$0xff]   ;;  %v759_v27 = vld [vmem:[%s835_s2] ss:$0 sm:$0xff] }
   0xa   :  { %215 = vmatpush1.bf16.msra.mxu0 %v604_v3  ;;  %593 = vmatpush1.bf16.msra.mxu1 %v604_v3 }
   0xb   :  { %216 = vmatprep.subr.bf16.mxu0 %v635_v0  ;;  %585 = vmatprep.subr.bf16.mxu1 %v635_v0 }
   0xe   :  { %217 = vmatpush1.bf16.msra.mxu0 %v605_v4  ;;  %594 = vmatpush1.bf16.msra.mxu1 %v605_v4 }
   0xf   :  { %218 = vmatprep.subr.bf16.mxu0 %v635_v0  ;;  %586 = vmatprep.subr.bf16.mxu1 %v635_v0 }
  0x12   :  { %219 = vmatpush1.bf16.msra.mxu0 %v606_v7  ;;  %595 = vmatpush1.bf16.msra.mxu1 %v606_v7 }
  0x13   :  { %220 = vmatprep.subr.bf16.mxu0 %v635_v0  ;;  %587 = vmatprep.subr.bf16.mxu1 %v635_v0 }
  0x16   :  { %221 = vmatpush1.bf16.msra.mxu0 %v607_v8  ;;  %596 = vmatpush1.bf16.msra.mxu1 %v607_v8 }
  0x17   :  { %222 = vmatprep.subr.bf16.mxu0 %v635_v0  ;;  %588 = vmatprep.subr.bf16.mxu1 %v635_v0 }
  0x1a   :  { %223 = vmatpush1.bf16.msra.mxu0 %v608_v9  ;;  %597 = vmatpush1.bf16.msra.mxu1 %v608_v9 }
  0x1b   :  { %224 = vmatprep.subr.bf16.mxu0 %v635_v0  ;;  %589 = vmatprep.subr.bf16.mxu1 %v635_v0 }
  0x1e   :  { %225 = vmatpush1.bf16.msra.mxu0 %v609_v10  ;;  %598 = vmatpush1.bf16.msra.mxu1 %v609_v10 }
  0x1f   :  { %226 = vmatprep.subr.bf16.mxu0 %v635_v0  ;;  %590 = vmatprep.subr.bf16.mxu1 %v635_v0 }
  0x22   :  { %227 = vmatpush1.bf16.msra.mxu0 %v610_v11  ;;  %599 = vmatpush1.bf16.msra.mxu1 %v610_v11 }
  0x25   :  { %243 = vmatmul.mubr.bf16.vlgmr.msra.gmra.mrb[0].mxu0 %v611_v12  ;;  %275 = vmatmul.mubr.bf16.vlgmr.msra.gmra.mrb[0].mxu1 %v617_v13 }
  0x26   :  { %496 = vmatprep.mubr.msk.bf16.mxu0 %vm185_vm0, %v614_v14  ;;  %500 = vmatprep.mubr.msk.bf16.mxu1 %vm185_vm0, %v623_v15 }
  0x2d   :  { %251 = vmatmul.mubr.bf16.gmra.mrb[4].mxu0 %v616_v16  ;;  %283 = vmatmul.mubr.bf16.gmra.mrb[4].mxu1 %v625_v17 }
  0x2e   :  { %497 = vmatprep.mubr.msk.bf16.mxu0 %vm185_vm0, %v620_v18  ;;  %501 = vmatprep.mubr.msk.bf16.mxu1 %vm185_vm0, %v629_v19 }
  0x35   :  { %259 = vmatmul.mubr.bf16.gmra.mrb[8].mxu0 %v622_v20  ;;  %291 = vmatmul.mubr.bf16.gmra.mrb[8].mxu1 %v631_v21 }
  0x36   :  { %498 = vmatprep.mubr.msk.bf16.mxu0 %vm185_vm0, %v626_v22  ;;  %502 = vmatprep.mubr.msk.bf16.mxu1 %vm185_vm0, %v632_v23 }
  0x3d   :  { %267 = vmatmul.mubr.bf16.gmra.mrb[12].mxu0 %v628_v24  ;;  %299 = vmatmul.mubr.bf16.gmra.mrb[12].mxu1 %v634_v25 }
  0xf8   :  { %v244_v28 = vpop.f32.mrb[0].mxu0  ;;  %v276_v29 = vpop.f32.mrb[0].mxu1 }
  0xf9   :  { %v245_v30 = vadd.f32 %v759_v27, %v244_v28  ;;  %v246_v31 = vpop.f32.mrb[1].mxu0  ;;  %v763_v32 = vadd.f32 %v759_v27, %v276_v29  ;;  %v278_v33 = vpop.f32.mrb[1].mxu1 }
  0xfa   :  { %v247_v34 = vpop.f32.mrb[2].mxu0  ;;  %v279_v35 = vpop.f32.mrb[2].mxu1 }
  0xfb   :  { %v248_v36 = vadd.f32 %v759_v27, %v247_v34  ;;  %v249_v37 = vpop.f32.mrb[3].mxu0  ;;  %v767_v38 = vadd.f32 %v759_v27, %v279_v35  ;;  %v281_v39 = vpop.f32.mrb[3].mxu1  ;;  %v418_v40 = vmul.f32 %v245_v30, %v245_v30 }
  0xfd   :  { %v538_v41 = vpack.c.bf16 %v248_v36, %v245_v30  ;;  %v394_v42 = vadd.f32 %v248_v36, %v245_v30  ;;  %v419_v43 = vmul.f32 %v248_v36, %v248_v36  ;;  %v558_v44 = vpack.c.bf16 %v767_v38, %v763_v32 }
  0xff   :  { %539 = vst [vmem:[%s836_s3] sm:$0xff] %v538_v41   ;;  %v434_v45 = vadd.f32 %v419_v43, %v418_v40  ;;  %578 = vst [vmem:[%s836_s3 + $0x20] sm:$0xff] %v558_v44   ;;  %v426_v44 = vmul.f32 %v763_v32, %v763_v32 }
 0x100   :  { %v252_v46 = vpop.f32.mrb[4].mxu0  ;;  %v284_v47 = vpop.f32.mrb[4].mxu1 }
 0x101   :  { %v253_v48 = vadd.f32 %v759_v27, %v252_v46  ;;  %v254_v49 = vpop.f32.mrb[5].mxu0  ;;  %v286_v50 = vpop.f32.mrb[5].mxu1  ;;  %v779_v52 = vadd.f32 %v759_v27, %v284_v47 }
 0x102   :  { %v255_v51 = vpop.f32.mrb[6].mxu0  ;;  %v287_v53 = vpop.f32.mrb[6].mxu1 }
 0x103   :  { %v395_v54 = vadd.f32 %v394_v42, %v253_v48  ;;  %v420_v55 = vmul.f32 %v253_v48, %v253_v48  ;;  %v256_v56 = vadd.f32 %v759_v27, %v255_v51  ;;  %v257_v57 = vpop.f32.mrb[7].mxu0  ;;  %v289_v58 = vpop.f32.mrb[7].mxu1  ;;  %v288_v59 = vadd.f32 %v759_v27, %v287_v53 }
 0x104   :  { %v428_v49 = vmul.f32 %v779_v52, %v779_v52 }
 0x105   :  { %v435_v60 = vadd.f32 %v434_v45, %v420_v55  ;;  %v543_v61 = vpack.c.bf16 %v256_v56, %v253_v48  ;;  %v396_v62 = vadd.f32 %v395_v54, %v256_v56  ;;  %v421_v63 = vmul.f32 %v256_v56, %v256_v56 }
 0x106   :  { %v563_v0 = vpack.c.bf16 %v288_v59, %v779_v52  ;;  %v429_v53 = vmul.f32 %v288_v59, %v288_v59 }
 0x107   :  { %575 = vst [vmem:[%s836_s3 + $0x8] sm:$0xff] %v543_v61   ;;  %v436_v1 = vadd.f32 %v435_v60, %v421_v63 }
 0x108   :  { %v260_v2 = vpop.f32.mrb[8].mxu0  ;;  %579 = vst [vmem:[%s836_s3 + $0x28] sm:$0xff] %v563_v0   ;;  %v292_v3 = vpop.f32.mrb[8].mxu1 }
 0x109   :  { %v261_v4 = vadd.f32 %v759_v27, %v260_v2  ;;  %v262_v5 = vpop.f32.mrb[9].mxu0  ;;  %v294_v6 = vpop.f32.mrb[9].mxu1  ;;  %v293_v8 = vadd.f32 %v759_v27, %v292_v3 }
 0x10a   :  { %v263_v7 = vpop.f32.mrb[10].mxu0  ;;  %v295_v9 = vpop.f32.mrb[10].mxu1 }
 0x10b   :  { %v397_v10 = vadd.f32 %v396_v62, %v261_v4  ;;  %v422_v11 = vmul.f32 %v261_v4, %v261_v4  ;;  %v264_v12 = vadd.f32 %v759_v27, %v263_v7  ;;  %v265_v13 = vpop.f32.mrb[11].mxu0  ;;  %v297_v14 = vpop.f32.mrb[11].mxu1  ;;  %v296_v15 = vadd.f32 %v759_v27, %v295_v9 }
 0x10c   :  { %v430_v56 = vmul.f32 %v293_v8, %v293_v8  ;;  %v417_v14 = vld [vmem:[%s834_s5] sm:$0x1] }
 0x10d   :  { %v437_v16 = vadd.f32 %v436_v1, %v422_v11  ;;  %v548_v17 = vpack.c.bf16 %v264_v12, %v261_v4  ;;  %v398_v18 = vadd.f32 %v397_v10, %v264_v12  ;;  %v423_v19 = vmul.f32 %v264_v12, %v264_v12  ;;  %v393_v11 = vld [vmem:[%s833_s4] sm:$0x1] }
 0x10e   :  { %v568_v20 = vpack.c.bf16 %v296_v15, %v293_v8  ;;  %v431_v61 = vmul.f32 %v296_v15, %v296_v15 }
 0x10f   :  { %576 = vst [vmem:[%s836_s3 + $0x10] sm:$0xff] %v548_v17   ;;  %v438_v21 = vadd.f32 %v437_v16, %v423_v19 }
 0x110   :  { %v268_v22 = vpop.f32.mrb[12].mxu0  ;;  %580 = vst [vmem:[%s836_s3 + $0x30] sm:$0xff] %v568_v20   ;;  %v300_v23 = vpop.f32.mrb[12].mxu1 }
 0x111   :  { %v269_v24 = vadd.f32 %v759_v27, %v268_v22  ;;  %v270_v25 = vpop.f32.mrb[13].mxu0  ;;  %v302_v26 = vpop.f32.mrb[13].mxu1  ;;  %v301_v29 = vadd.f32 %v759_v27, %v300_v23 }
 0x112   :  { %v271_v28 = vpop.f32.mrb[14].mxu0  ;;  %v303_v30 = vpop.f32.mrb[14].mxu1 }
 0x113   :  { %v399_v31 = vadd.f32 %v398_v18, %v269_v24  ;;  %v424_v33 = vmul.f32 %v269_v24, %v269_v24  ;;  %v272_v34 = vadd.f32 %v759_v27, %v271_v28  ;;  %v273_v35 = vpop.f32.mrb[15].mxu0  ;;  %v305_v36 = vpop.f32.mrb[15].mxu1  ;;  %v304_v37 = vadd.f32 %v759_v27, %v303_v30 }
 0x114   :  { %v427_v27 = vmul.f32 %v767_v38, %v767_v38  ;;  %v432_v62 = vmul.f32 %v301_v29, %v301_v29 }
 0x115   :  { %v439_v39 = vadd.f32 %v438_v21, %v424_v33  ;;  %v553_v40 = vpack.c.bf16 %v272_v34, %v269_v24  ;;  %v400_v41 = vadd.f32 %v399_v31, %v272_v34  ;;  %v425_v42 = vmul.f32 %v272_v34, %v272_v34 }
 0x116   :  { %v573_v43 = vpack.c.bf16 %v304_v37, %v301_v29  ;;  %v433_v2 = vmul.f32 %v304_v37, %v304_v37 }
 0x117   :  { %577 = vst [vmem:[%s836_s3 + $0x18] sm:$0xff] %v553_v40   ;;  %v401_v45 = vadd.f32 %v400_v41, %v763_v32  ;;  %v440_v46 = vadd.f32 %v439_v39, %v425_v42 }
 0x118   :  { %581 = vst [vmem:[%s836_s3 + $0x38] sm:$0xff] %v573_v43  }
 0x119   :  { %v402_v47 = vadd.f32 %v401_v45, %v767_v38  ;;  %v441_v48 = vadd.f32 %v440_v46, %v426_v44 }
 0x11b   :  { %v442_v50 = vadd.f32 %v441_v48, %v427_v27  ;;  %v403_v51 = vadd.f32 %v402_v47, %v779_v52 }
 0x11d   :  { %v404_v54 = vadd.f32 %v403_v51, %v288_v59  ;;  %v443_v32 = vadd.f32 %v442_v50, %v428_v49 }
 0x11f   :  { %v405_v55 = vadd.f32 %v404_v54, %v293_v8  ;;  %v444_v57 = vadd.f32 %v443_v32, %v429_v53 }
 0x121   :  { %v445_v58 = vadd.f32 %v444_v57, %v430_v56  ;;  %v406_v60 = vadd.f32 %v405_v55, %v296_v15 }
 0x123   :  { %v446_v63 = vadd.f32 %v445_v58, %v431_v61  ;;  %v407_v0 = vadd.f32 %v406_v60, %v301_v29 }
 0x125   :  { %v447_v38 = vadd.f32 %v446_v63, %v432_v62  ;;  %v408_v1 = vadd.f32 %v407_v0, %v304_v37 }
 0x127   :  { %v409_v3 = vrot.slane %v408_v1, 4  ;;  %v448_v4 = vadd.f32 %v447_v38, %v433_v2 }
 0x129   :  { %v410_v5 = vadd.f32 %v409_v3, %v408_v1  ;;  %v449_v6 = vrot.slane %v448_v4, 4 }
 0x12b   :  { %v411_v52 = vrot.slane %v410_v5, 2  ;;  %v450_v7 = vadd.f32 %v449_v6, %v448_v4 }
 0x12d   :  { %v412_v59 = vadd.f32 %v411_v52, %v410_v5  ;;  %v451_v9 = vrot.slane %v450_v7, 2 }
 0x12f   :  { %v413_v10 = vrot.slane %v412_v59, 1  ;;  %v452_v8 = vadd.f32 %v451_v9, %v450_v7 }
 0x131   :  { %v414_v12 = vadd.f32 %v413_v10, %v412_v59  ;;  %v453_v13 = vrot.slane %v452_v8, 1 }
 0x133   :  { %v415_v15 = vadd.f32 %v414_v12, %v393_v11  ;;  %v454_v16 = vadd.f32 %v453_v13, %v452_v8 }
 0x135   :  { %416 = vst [vmem:[%s833_s4] sm:$0x1] %v415_v15  ;;  %v455_v17 = vadd.f32 %v454_v16, %v417_v14 }
 0x137   :  { %456 = vst [vmem:[%s834_s5] sm:$0x1] %v455_v17 }

// kernel: blur_generator_forward.61
= control target key start
LH: loop header
LB: loop body
LE: loop exit
PB: predicated region body
PF: predicated region fallthrough
CT: control target
= control target key end

     0   :  { %v311_v0 = vmov 0   ;;  %vm119_vm0 = vcmask 130048   ;;  %v312_v14 = vmov 0.0   ;;  %s409_s1 = inlined_call_operand.vmem [shape: bf16[144,128], index: 1, kind: input, shape index: {}]   ;;  %s410_s0 = inlined_call_operand.vmem [shape: bf16[32,144], index: 0, kind: input, shape index: {}]   ;;  %s411_s4 = inlined_call_operand.vmem [shape: f32[1,128], index: 4, kind: output, shape index: {1}]   ;;  %s412_s5 = inlined_call_operand.vmem [shape: f32[1,128], index: 5, kind: output, shape index: {2}]   ;;  %s413_s2 = inlined_call_operand.vmem [shape: f32[1,128], index: 2, kind: input, shape index: {}]   ;;  %s414_s3 = inlined_call_operand.vmem [shape: bf16[32,128], index: 3, kind: output, shape index: {0}]  }
   0x1   :  { %126 = vmatprep.subr.bf16.mxu0 %v311_v0  ;;  %276 = vmatprep.subr.bf16.mxu1 %v311_v0  ;;  %v296_v1 = vld [vmem:[%s409_s1] sm:$0xff]   ;;  %v297_v2 = vld [vmem:[%s409_s1 + $0x8] sm:$0xff]   ;;  %v298_v3 = vld [vmem:[%s409_s1 + $0x10] sm:$0xff]   ;;  %199 = vst [vmem:[%s411_s4] sm:$0x1] %v312_v14 }
   0x2   :  { %127 = vmatpush1.bf16.msra.mxu0 %v296_v1  ;;  %285 = vmatpush1.bf16.msra.mxu1 %v296_v1  ;;  %v299_v4 = vld [vmem:[%s409_s1 + $0x18] sm:$0xff]   ;;  %v307_v5 = vld [vmem:[%s410_s0 + $0x4] ss:$8 sps:$4 sm:$0xff]   ;;  %v302_v9 = vld [vmem:[%s409_s1 + $0x30] sm:$0xff]   ;;  %200 = vst [vmem:[%s412_s5] sm:$0x1] %v312_v14 }
   0x3   :  { %128 = vmatprep.subr.bf16.mxu0 %v311_v0  ;;  %277 = vmatprep.subr.bf16.mxu1 %v311_v0  ;;  %v310_v6 = vld [vmem:[%s410_s0 + $0x14] ss:$8 sps:$4 sm:$0xff]   ;;  %v300_v7 = vld [vmem:[%s409_s1 + $0x20] sm:$0xff]   ;;  %v301_v8 = vld [vmem:[%s409_s1 + $0x28] sm:$0xff]  }
   0x4   :  { %255 = vmatprep.mubr.msk.bf16.mxu0 %vm119_vm0, %v307_v5  ;;  %256 = vmatprep.mubr.msk.bf16.mxu1 %vm119_vm0, %v310_v6  ;;  %v303_v10 = vld [vmem:[%s409_s1 + $0x38] sm:$0xff]   ;;  %v304_v11 = vld [vmem:[%s409_s1 + $0x40] sm:$0xff]  }
   0x5   :  { %v305_v12 = vld [vmem:[%s410_s0] ss:$8 sps:$4 sm:$0xff]   ;;  %v308_v13 = vld [vmem:[%s410_s0 + $0x10] ss:$8 sps:$4 sm:$0xff]  }
   0x6   :  { %129 = vmatpush1.bf16.msra.mxu0 %v297_v2  ;;  %286 = vmatpush1.bf16.msra.mxu1 %v297_v2  ;;  %v241_v15 = vld [vmem:[%s413_s2] ss:$0 sm:$0xff] }
   0x7   :  { %130 = vmatprep.subr.bf16.mxu0 %v311_v0  ;;  %278 = vmatprep.subr.bf16.mxu1 %v311_v0 }
   0x8   :  { %v201_v49 = vld [vmem:[%s411_s4] sm:$0x1] }
   0x9   :  { %v213_v52 = vld [vmem:[%s412_s5] sm:$0x1] }
   0xa   :  { %131 = vmatpush1.bf16.msra.mxu0 %v298_v3  ;;  %287 = vmatpush1.bf16.msra.mxu1 %v298_v3 }
   0xb   :  { %132 = vmatprep.subr.bf16.mxu0 %v311_v0  ;;  %279 = vmatprep.subr.bf16.mxu1 %v311_v0 }
   0xe   :  { %133 = vmatpush1.bf16.msra.mxu0 %v299_v4  ;;  %288 = vmatpush1.bf16.msra.mxu1 %v299_v4 }
   0xf   :  { %134 = vmatprep.subr.bf16.mxu0 %v311_v0  ;;  %280 = vmatprep.subr.bf16.mxu1 %v311_v0 }
  0x12   :  { %135 = vmatpush1.bf16.msra.mxu0 %v300_v7  ;;  %289 = vmatpush1.bf16.msra.mxu1 %v300_v7 }
  0x13   :  { %136 = vmatprep.subr.bf16.mxu0 %v311_v0  ;;  %281 = vmatprep.subr.bf16.mxu1 %v311_v0 }
  0x16   :  { %137 = vmatpush1.bf16.msra.mxu0 %v301_v8  ;;  %290 = vmatpush1.bf16.msra.mxu1 %v301_v8 }
  0x17   :  { %138 = vmatprep.subr.bf16.mxu0 %v311_v0  ;;  %282 = vmatprep.subr.bf16.mxu1 %v311_v0 }
  0x1a   :  { %139 = vmatpush1.bf16.msra.mxu0 %v302_v9  ;;  %291 = vmatpush1.bf16.msra.mxu1 %v302_v9 }
  0x1b   :  { %140 = vmatprep.subr.bf16.mxu0 %v311_v0  ;;  %283 = vmatprep.subr.bf16.mxu1 %v311_v0 }
  0x1e   :  { %141 = vmatpush1.bf16.msra.mxu0 %v303_v10  ;;  %292 = vmatpush1.bf16.msra.mxu1 %v303_v10 }
  0x1f   :  { %142 = vmatprep.subr.bf16.mxu0 %v311_v0  ;;  %284 = vmatprep.subr.bf16.mxu1 %v311_v0 }
  0x22   :  { %143 = vmatpush1.bf16.msra.mxu0 %v304_v11  ;;  %293 = vmatpush1.bf16.msra.mxu1 %v304_v11 }
  0x25   :  { %159 = vmatmul.mubr.bf16.vlgmr.msra.gmra.mrb[0].mxu0 %v305_v12  ;;  %167 = vmatmul.mubr.bf16.vlgmr.msra.gmra.mrb[0].mxu1 %v308_v13 }
  0xf8   :  { %v160_v16 = vpop.f32.mrb[0].mxu0  ;;  %v168_v17 = vpop.f32.mrb[0].mxu1 }
  0xf9   :  { %v161_v18 = vadd.f32 %v241_v15, %v160_v16  ;;  %v162_v19 = vpop.f32.mrb[1].mxu0  ;;  %v169_v20 = vadd.f32 %v241_v15, %v168_v17  ;;  %v170_v21 = vpop.f32.mrb[1].mxu1 }
  0xfa   :  { %v163_v22 = vpop.f32.mrb[2].mxu0  ;;  %v171_v23 = vpop.f32.mrb[2].mxu1 }
  0xfb   :  { %v164_v24 = vadd.f32 %v241_v15, %v163_v22  ;;  %v165_v25 = vpop.f32.mrb[3].mxu0  ;;  %v172_v26 = vadd.f32 %v241_v15, %v171_v23  ;;  %v173_v27 = vpop.f32.mrb[3].mxu1  ;;  %v214_v28 = vmul.f32 %v161_v18, %v161_v18  ;;  %v216_v29 = vmul.f32 %v169_v20, %v169_v20 }
  0xfd   :  { %v268_v30 = vpack.c.bf16 %v164_v24, %v161_v18  ;;  %v202_v31 = vadd.f32 %v164_v24, %v161_v18  ;;  %v215_v32 = vmul.f32 %v164_v24, %v164_v24  ;;  %v273_v33 = vpack.c.bf16 %v172_v26, %v169_v20 }
  0xfe   :  { %v217_v37 = vmul.f32 %v172_v26, %v172_v26 }
  0xff   :  { %269 = vst [vmem:[%s414_s3] sm:$0xff] %v268_v30   ;;  %v218_v34 = vadd.f32 %v215_v32, %v214_v28  ;;  %275 = vst [vmem:[%s414_s3 + $0x8] sm:$0xff] %v273_v33   ;;  %v203_v35 = vadd.f32 %v202_v31, %v169_v20 }
 0x101   :  { %v204_v36 = vadd.f32 %v203_v35, %v172_v26  ;;  %v219_v38 = vadd.f32 %v218_v34, %v216_v29 }
 0x103   :  { %v205_v39 = vrot.slane %v204_v36, 4  ;;  %v220_v40 = vadd.f32 %v219_v38, %v217_v37 }
 0x105   :  { %v206_v41 = vadd.f32 %v205_v39, %v204_v36  ;;  %v221_v42 = vrot.slane %v220_v40, 4 }
 0x107   :  { %v207_v43 = vrot.slane %v206_v41, 2  ;;  %v222_v44 = vadd.f32 %v221_v42, %v220_v40 }
 0x109   :  { %v208_v45 = vadd.f32 %v207_v43, %v206_v41  ;;  %v223_v46 = vrot.slane %v222_v44, 2 }
 0x10b   :  { %v209_v47 = vrot.slane %v208_v45, 1  ;;  %v224_v48 = vadd.f32 %v223_v46, %v222_v44 }
 0x10d   :  { %v210_v50 = vadd.f32 %v209_v47, %v208_v45  ;;  %v225_v51 = vrot.slane %v224_v48, 1 }
 0x10f   :  { %v211_v53 = vadd.f32 %v210_v50, %v201_v49  ;;  %v226_v54 = vadd.f32 %v225_v51, %v224_v48 }
 0x111   :  { %212 = vst [vmem:[%s411_s4] sm:$0x1] %v211_v53  ;;  %v227_v55 = vadd.f32 %v226_v54, %v213_v52 }
 0x113   :  { %228 = vst [vmem:[%s412_s5] sm:$0x1] %v227_v55 }

// kernel: blur_generator_forward.62
= control target key start
LH: loop header
LB: loop body
LE: loop exit
PB: predicated region body
PF: predicated region fallthrough
CT: control target
= control target key end

     0   :  { %vm64_vm0 = vcmask 257024   ;;  %s136_s0 = inlined_call_operand.vmem [shape: bf16[1,32,32], index: 0, kind: input, shape index: {}]   ;;  %s137_s1 = inlined_call_operand.vmem [shape: f32[1,1,32], index: 1, kind: input, shape index: {}]   ;;  %s138_s2 = inlined_call_operand.vmem [shape: f32[1,1,32], index: 2, kind: input, shape index: {}]   ;;  %s139_s3 = inlined_call_operand.vmem [shape: bf16[1,32,32], index: 3, kind: output, shape index: {}]  }
   0x1   :  { %v84_v0 = vld [vmem:[%s136_s0] sm:$0xff]   ;;  %v91_v4 = vld [vmem:[%s136_s0 + $0x8] sm:$0xff]  }
   0x2   :  { %v73_v1 = vld [vmem:[%s137_s1] ss:$0 sm:$0xff]  ;;  %v85_v2 = vunpack.c.l.bf16 %v84_v0  ;;  %v86_v3 = vunpack.c.h.bf16 %v84_v0  ;;  %v89_v6 = vunpack.c.l.bf16 %v91_v4  ;;  %v90_v7 = vunpack.c.h.bf16 %v91_v4 }
   0x3   :  { %v74_v5 = vld [vmem:[%s138_s2] ss:$0 sm:$0xff] }
   0x4   :  { %v29_v8 = vmul.f32 %v85_v2, %v73_v1  ;;  %v30_v9 = vmul.f32 %v86_v3, %v73_v1  ;;  %v31_v10 = vmul.f32 %v89_v6, %v73_v1  ;;  %v32_v11 = vmul.f32 %v90_v7, %v73_v1 }
   0x6   :  { %v40_v12 = vadd.f32 %v74_v5, %v29_v8  ;;  %v41_v13 = vadd.f32 %v74_v5, %v30_v9  ;;  %v42_v14 = vadd.f32 %v74_v5, %v31_v10  ;;  %v43_v15 = vadd.f32 %v74_v5, %v32_v11 }
   0x8   :  { %v44_v16 = vmax.f32 %v40_v12, 0.0  ;;  %v45_v17 = vmax.f32 %v41_v13, 0.0  ;;  %v46_v18 = vmax.f32 %v42_v14, 0.0  ;;  %v47_v19 = vmax.f32 %v43_v15, 0.0 }
   0xa   :  { %v79_v20 = vpack.c.bf16 %v44_v16, %v44_v16  ;;  %v80_v21 = vpack.c.bf16 %v45_v17, %v45_v17  ;;  %v81_v22 = vpack.c.bf16 %v46_v18, %v46_v18  ;;  %v82_v23 = vpack.c.bf16 %v47_v19, %v47_v19 }
   0xc   :  { %65 = vst.msk [vmem:[%s139_s3] sm:$0xf] %vm64_vm0, %v79_v20  ;;  %66 = vst.msk [vmem:[%s139_s3 + $0x4] sm:$0xf] %vm64_vm0, %v80_v21 }
   0xd   :  { %67 = vst.msk [vmem:[%s139_s3 + $0x8] sm:$0xf] %vm64_vm0, %v81_v22  ;;  %68 = vst.msk [vmem:[%s139_s3 + $0xc] sm:$0xf] %vm64_vm0, %v82_v23 }

// kernel: blur_generator_forward.67
= control target key start
LH: loop header
LB: loop body
LE: loop exit
PB: predicated region body
PF: predicated region fallthrough
CT: control target
= control target key end

     0   :  { %s381_s9 = smov 0   ;;  %s383_s10 = smov 0   ;;  %s431_s0 = inlined_call_operand.vmem [shape: bf16[2,16,32], index: 0, kind: input, shape index: {}]   ;;  %s432_s1 = inlined_call_operand.vmem [shape: f32[2,1,32], index: 1, kind: output, shape index: {0}]   ;;  %s433_s2 = inlined_call_operand.vmem [shape: f32[2,1,32], index: 2, kind: output, shape index: {1}]  }
   0x1   :  { %s385_s11 = smov 0  }
   0x2 LB: > { %s25_s12 = sadd.s32 1, %s359_s10  ;;  %p306_p0 = scmp.ge.s32.totalorder %s363_s11, 1  ;;  %s363_s11 = sphi %s385_s11, %s13_s11   ;;  %s359_s10 = sphi %s383_s10, %s435_s10   ;;  %s355_s9 = sphi %s381_s9, %s434_s9  }
   0x3   : > { %p27_p1 = scmp.ge.s32.totalorder %s25_s12, 2  ;;  %p134_p2 = scmp.lt.s32.totalorder %s363_s11, 3 }
   0x5   : > { %s437_s12 = smov (%p27_p1, %s25_s12), 0  ;;  %p135_p3 = pnand %p306_p0, %p134_p2 }
   0x6   : > { %p162_p4 = scmp.lt.s32.totalorder (!%p135_p3), %s355_s9, 1  ;;  %vm181_vm0 = vcmask (!%p135_p3), 253952   ;;  %v365_v0 = vmov (!%p135_p3), 0.0   ;;  %vm189_vm1 = vcmask (!%p135_p3), 261120  }
   0x7   : > { %138 = sbr.rel (%p135_p3) target bundleno = 40 (0x28), region = 24 }
   0xe   : > { %s439_s9 = smov (!%p162_p4, %s355_s9), 1 }
   0xf   : > { %s311_s13 = sshll.u32 %s439_s9, 3  ;;  %s402_s16 = scalar_lea.vmem %s432_s1, %s439_s9 }
  0x10   : > { %s169_s19 = scalar_lea.vmem %s431_s0, %s311_s13  ;;  %182 = vst.msk [vmem:[%s402_s16] sm:$0x1] %vm181_vm0, %v365_v0  ;;  %s412_s22 = scalar_lea.vmem %s433_s2, %s439_s9 }
  0x11   : > { %v313_v1 = vld [vmem:[%s169_s19] sm:$0xff]   ;;  %183 = vst.msk [vmem:[%s412_s22] sm:$0x1] %vm181_vm0, %v365_v0 }
  0x12   : > { %v314_v2 = vunpack.c.l.bf16 %v313_v1  ;;  %v315_v3 = vunpack.c.h.bf16 %v313_v1 }
  0x14   : > { %v190_v4 = vsel %vm189_vm1, %v314_v2, 0.0  ;;  %v191_v5 = vsel %vm189_vm1, %v315_v3, 0.0  ;;  %v203_v6 = vmul.f32 %v314_v2, %v314_v2  ;;  %v204_v7 = vmul.f32 %v315_v3, %v315_v3 }
  0x15   : > { %v192_v8 = vadd.f32 %v191_v5, %v190_v4 }
  0x16   : > { %v205_v9 = vsel %vm189_vm1, %v203_v6, 0.0  ;;  %v206_v10 = vsel %vm189_vm1, %v204_v7, 0.0 }
  0x17   : > { %v193_v11 = vrot.slane %v192_v8, 4  ;;  %v207_v12 = vadd.f32 %v206_v10, %v205_v9  ;;  %v188_v21 = vld [vmem:[%s402_s16] sm:$0x1] }
  0x18   : > { %v202_v24 = vld [vmem:[%s412_s22] sm:$0x1] }
  0x19   : > { %v194_v13 = vadd.f32 %v193_v11, %v192_v8  ;;  %v208_v14 = vrot.slane %v207_v12, 4 }
  0x1b   : > { %v195_v15 = vrot.slane %v194_v13, 2  ;;  %v209_v16 = vadd.f32 %v208_v14, %v207_v12 }
  0x1d   : > { %v196_v17 = vadd.f32 %v195_v15, %v194_v13  ;;  %v210_v18 = vrot.slane %v209_v16, 2 }
  0x1f   : > { %v197_v19 = vrot.slane %v196_v17, 1  ;;  %v211_v20 = vadd.f32 %v210_v18, %v209_v16 }
  0x21   : > { %v198_v22 = vadd.f32 %v197_v19, %v196_v17  ;;  %v212_v23 = vrot.slane %v211_v20, 1 }
  0x23   : > { %v199_v25 = vadd.f32 %v198_v22, %v188_v21  ;;  %v213_v26 = vadd.f32 %v212_v23, %v211_v20 }
  0x25   : > { %201 = vst.msk [vmem:[%s402_s16] sm:$0x1] %vm181_vm0, %v199_v25  ;;  %v214_v27 = vadd.f32 %v213_v26, %v202_v24 }
  0x27   : > { %215 = vst.msk [vmem:[%s412_s22] sm:$0x1] %vm181_vm0, %v214_v27 }
  0x28 PF: > { %s13_s11 = sadd.s32 1, %s363_s11   ;;  %s434_s9 = smov %s359_s10 }
  0x29   : > { %p10_p5 = scmp.ge.s32.totalorder %s13_s11, 4   ;;  %s435_s10 = smov %s437_s12 }
  0x2b   :  { %12 = sbr.rel (!%p10_p5) target bundleno = 2 (0x2), region = 70 }

// kernel: blur_generator_forward.63
= control target key start
LH: loop header
LB: loop body
LE: loop exit
PB: predicated region body
PF: predicated region fallthrough
CT: control target
= control target key end

     0   :  { %vm207_vm0 = vcmask 261120   ;;  %v491_v24 = vmov 0.0   ;;  %s621_s1 = inlined_call_operand.vmem [shape: bf16[288,128], index: 1, kind: input, shape index: {}]   ;;  %s622_s0 = inlined_call_operand.vmem [shape: bf16[32,288], index: 0, kind: input, shape index: {}]   ;;  %s623_s4 = inlined_call_operand.vmem [shape: f32[1,128], index: 4, kind: output, shape index: {1}]   ;;  %s624_s5 = inlined_call_operand.vmem [shape: f32[1,128], index: 5, kind: output, shape index: {2}]   ;;  %s625_s2 = inlined_call_operand.vmem [shape: f32[1,128], index: 2, kind: input, shape index: {}]   ;;  %s626_s3 = inlined_call_operand.vmem [shape: bf16[32,128], index: 3, kind: output, shape index: {0}]  }
   0x1   :  { %v465_v0 = vld [vmem:[%s621_s1 + $0x40] sm:$0xff]   ;;  %v467_v2 = vld [vmem:[%s621_s1 + $0x48] sm:$0xff]   ;;  %v469_v4 = vld [vmem:[%s621_s1 + $0x50] sm:$0xff]   ;;  %336 = vst [vmem:[%s623_s4] sm:$0x1] %v491_v24 }
   0x2   :  { %v466_v1 = vld [vmem:[%s621_s1] sm:$0xff]   ;;  %424 = vmatprep.subr.bf16.mxu0 %v465_v0  ;;  %v468_v3 = vld [vmem:[%s621_s1 + $0x8] sm:$0xff]   ;;  %v470_v5 = vld [vmem:[%s621_s1 + $0x10] sm:$0xff]   ;;  %337 = vst [vmem:[%s624_s5] sm:$0x1] %v491_v24 }
   0x3   :  { %425 = vmatpush3.bf16.msra.mxu0 %v466_v1  ;;  %v471_v6 = vld [vmem:[%s621_s1 + $0x58] sm:$0xff]   ;;  %v473_v8 = vld [vmem:[%s621_s1 + $0x60] sm:$0xff]   ;;  %v475_v11 = vld [vmem:[%s621_s1 + $0x68] sm:$0xff]  }
   0x4   :  { %426 = vmatprep.subr.bf16.mxu0 %v467_v2  ;;  %v472_v7 = vld [vmem:[%s621_s1 + $0x18] sm:$0xff]   ;;  %v474_v9 = vld [vmem:[%s621_s1 + $0x20] sm:$0xff]   ;;  %v476_v12 = vld [vmem:[%s621_s1 + $0x28] sm:$0xff]  }
   0x5   :  { %v480_v10 = vld [vmem:[%s621_s1 + $0x80] sm:$0xff]   ;;  %v477_v13 = vld [vmem:[%s621_s1 + $0x70] sm:$0xff]   ;;  %v485_v15 = vld [vmem:[%s621_s1 + $0x88] sm:$0xff]  }
   0x6   :  { %456 = vmatprep.subr.bf16.mxu1 %v480_v10  ;;  %v484_v14 = vld [vmem:[%s622_s0 + $0x4] ss:$12 sps:$4 sm:$0xff]   ;;  %v486_v16 = vld [vmem:[%s622_s0 + $0x8] ss:$12 sps:$4 sm:$0xff]   ;;  %v487_v17 = vld [vmem:[%s622_s0 + $0x20] ss:$12 sps:$4 sm:$0xff]  }
   0x7   :  { %427 = vmatpush3.bf16.msra.mxu0 %v468_v3  ;;  %457 = vmatpush3.bf16.msra.mxu1 %v480_v10  ;;  %v478_v18 = vld [vmem:[%s621_s1 + $0x30] sm:$0xff]   ;;  %v479_v19 = vld [vmem:[%s621_s1 + $0x78] sm:$0xff]   ;;  %v482_v21 = vld [vmem:[%s622_s0] ss:$12 sps:$4 sm:$0xff]  }
   0x8   :  { %428 = vmatprep.subr.bf16.mxu0 %v469_v4  ;;  %246 = vmatprep.mubr.bf16.mxu0 %v484_v14  ;;  %v481_v20 = vld [vmem:[%s621_s1 + $0x38] sm:$0xff]   ;;  %v378_v31 = vld [vmem:[%s625_s2] ss:$0 sm:$0xff] }
   0x9   :  { %458 = vmatprep.subr.bf16.mxu1 %v485_v15  ;;  %460 = vmatprep.mubr.msk.bf16.mxu1 %vm207_vm0, %v486_v16  ;;  %v488_v22 = vld [vmem:[%s622_s0 + $0x1c] ss:$12 sps:$4 sm:$0xff]   ;;  %v490_v23 = vld [vmem:[%s622_s0 + $0x18] ss:$12 sps:$4 sm:$0xff]   ;;  %v350_v10 = vld [vmem:[%s624_s5] sm:$0x1] }
   0xb   :  { %429 = vmatpush3.bf16.msra.mxu0 %v470_v5  ;;  %459 = vmatpush3.bf16.msra.mxu1 %v485_v15 }
   0xc   :  { %430 = vmatprep.subr.bf16.mxu0 %v471_v6 }
   0xe   :  { %461 = vmatmul.mubr.msk.bf16.vlgmr.msra.gmra.mrb[0].mxu1 %vm207_vm0, %v487_v17 }
   0xf   :  { %431 = vmatpush3.bf16.msra.mxu0 %v472_v7  ;;  %v338_v7 = vld [vmem:[%s623_s4] sm:$0x1] }
  0x10   :  { %432 = vmatprep.subr.bf16.mxu0 %v473_v8 }
  0x13   :  { %433 = vmatpush3.bf16.msra.mxu0 %v474_v9 }
  0x14   :  { %434 = vmatprep.subr.bf16.mxu0 %v475_v11 }
  0x17   :  { %435 = vmatpush3.bf16.msra.mxu0 %v476_v12 }
  0x18   :  { %436 = vmatprep.subr.bf16.mxu0 %v477_v13 }
  0x1b   :  { %437 = vmatpush3.bf16.msra.mxu0 %v478_v18 }
  0x1c   :  { %438 = vmatprep.subr.bf16.mxu0 %v479_v19 }
  0x1f   :  { %439 = vmatpush3.bf16.msra.mxu0 %v481_v20 }
  0x22   :  { %247 = vmatmul.mubr.bf16.vlgmr.msra.gmra.mrb[0].mxu0 %v482_v21 }
  0x23   :  { %254 = vmatprep.mubr.bf16.mxu0 %v488_v22 }
  0x2a   :  { %255 = vmatmul.mubr.bf16.gmra.mrb[4].mxu0 %v490_v23 }
  0xe1   :  { %v462_v25 = vpop.f32.mrb[0].mxu1 }
  0xe2   :  { %v297_v26 = vpop.f32.mrb[1].mxu1 }
  0xe3   :  { %v463_v27 = vpop.f32.mrb[2].mxu1 }
  0xe4   :  { %v300_v28 = vpop.f32.mrb[3].mxu1 }
  0xf5   :  { %v440_v29 = vpop.f32.mrb[0].mxu0 }
  0xf6   :  { %v441_v30 = vpop.f32.mrb[1].mxu0 }
  0xf7   :  { %v442_v32 = vadd.f32 %v441_v30, %v440_v29  ;;  %v443_v33 = vpop.f32.mrb[2].mxu0 }
  0xf8   :  { %v444_v34 = vpop.f32.mrb[3].mxu0 }
  0xf9   :  { %v445_v35 = vadd.f32 %v444_v34, %v443_v33  ;;  %v249_v36 = vadd.f32 %v442_v32, %v378_v31 }
  0xfb   :  { %v298_v37 = vadd.f32 %v297_v26, %v249_v36  ;;  %v252_v38 = vadd.f32 %v445_v35, %v378_v31 }
  0xfd   :  { %v301_v39 = vadd.f32 %v300_v28, %v252_v38  ;;  %v446_v40 = vpop.f32.mrb[4].mxu0  ;;  %v351_v41 = vmul.f32 %v298_v37, %v298_v37 }
  0xfe   :  { %v447_v42 = vpop.f32.mrb[5].mxu0 }
  0xff   :  { %v416_v43 = vpack.c.bf16 %v301_v39, %v298_v37  ;;  %v339_v44 = vadd.f32 %v301_v39, %v298_v37  ;;  %v352_v45 = vmul.f32 %v301_v39, %v301_v39  ;;  %v448_v46 = vadd.f32 %v447_v42, %v446_v40  ;;  %v449_v47 = vpop.f32.mrb[6].mxu0 }
 0x100   :  { %v450_v48 = vpop.f32.mrb[7].mxu0 }
 0x101   :  { %417 = vst [vmem:[%s626_s3] sm:$0xff] %v416_v43   ;;  %v355_v49 = vadd.f32 %v352_v45, %v351_v41  ;;  %v257_v50 = vadd.f32 %v448_v46, %v378_v31  ;;  %v451_v51 = vadd.f32 %v450_v48, %v449_v47 }
 0x103   :  { %v306_v52 = vadd.f32 %v462_v25, %v257_v50  ;;  %v260_v53 = vadd.f32 %v451_v51, %v378_v31 }
 0x105   :  { %v340_v54 = vadd.f32 %v339_v44, %v306_v52  ;;  %v353_v55 = vmul.f32 %v306_v52, %v306_v52  ;;  %v309_v56 = vadd.f32 %v463_v27, %v260_v53 }
 0x107   :  { %v356_v57 = vadd.f32 %v355_v49, %v353_v55  ;;  %v421_v58 = vpack.c.bf16 %v309_v56, %v306_v52  ;;  %v341_v59 = vadd.f32 %v340_v54, %v309_v56  ;;  %v354_v60 = vmul.f32 %v309_v56, %v309_v56 }
 0x109   :  { %423 = vst [vmem:[%s626_s3 + $0x8] sm:$0xff] %v421_v58   ;;  %v342_v61 = vrot.slane %v341_v59, 4  ;;  %v357_v62 = vadd.f32 %v356_v57, %v354_v60 }
 0x10b   :  { %v343_v63 = vadd.f32 %v342_v61, %v341_v59  ;;  %v358_v0 = vrot.slane %v357_v62, 4 }
 0x10d   :  { %v344_v1 = vrot.slane %v343_v63, 2  ;;  %v359_v2 = vadd.f32 %v358_v0, %v357_v62 }
 0x10f   :  { %v345_v3 = vadd.f32 %v344_v1, %v343_v63  ;;  %v360_v4 = vrot.slane %v359_v2, 2 }
 0x111   :  { %v346_v5 = vrot.slane %v345_v3, 1  ;;  %v361_v6 = vadd.f32 %v360_v4, %v359_v2 }
 0x113   :  { %v347_v8 = vadd.f32 %v346_v5, %v345_v3  ;;  %v362_v9 = vrot.slane %v361_v6, 1 }
 0x115   :  { %v348_v11 = vadd.f32 %v347_v8, %v338_v7  ;;  %v363_v12 = vadd.f32 %v362_v9, %v361_v6 }
 0x117   :  { %349 = vst [vmem:[%s623_s4] sm:$0x1] %v348_v11  ;;  %v364_v13 = vadd.f32 %v363_v12, %v350_v10 }
 0x119   :  { %365 = vst [vmem:[%s624_s5] sm:$0x1] %v364_v13 }

// kernel: blur_generator_forward.81
= control target key start
LH: loop header
LB: loop body
LE: loop exit
PB: predicated region body
PF: predicated region fallthrough
CT: control target
= control target key end

     0   :  { %vm34_vm0 = vcmask 519168   ;;  %s74_s0 = inlined_call_operand.vmem [shape: bf16[1,8,64], index: 0, kind: input, shape index: {}]   ;;  %s75_s1 = inlined_call_operand.vmem [shape: f32[1,1,64], index: 1, kind: input, shape index: {}]   ;;  %s76_s2 = inlined_call_operand.vmem [shape: f32[1,1,64], index: 2, kind: input, shape index: {}]   ;;  %s77_s3 = inlined_call_operand.vmem [shape: bf16[1,8,64], index: 3, kind: output, shape index: {}]  }
   0x1   :  { %v14_v0 = vld [vmem:[%s74_s0] sm:$0xf] }
   0x2   :  { %v40_v1 = vld [vmem:[%s75_s1] ss:$0 sm:$0xff]  ;;  %v15_v2 = vunpack.c.l.bf16 %v14_v0 }
   0x3   :  { %v41_v3 = vld [vmem:[%s76_s2] ss:$0 sm:$0xff] }
   0x4   :  { %v23_v4 = vmul.f32 %v40_v1, %v15_v2 }
   0x6   :  { %v31_v5 = vadd.f32 %v41_v3, %v23_v4 }
   0x8   :  { %v32_v6 = vmax.f32 %v31_v5, 0.0 }
   0xa   :  { %v33_v7 = vpack.c.bf16 %v32_v6, %v32_v6 }
   0xc   :  { %35 = vst.msk [vmem:[%s77_s3] sm:$0xf] %vm34_vm0, %v33_v7 }

// kernel: blur_generator_forward.80
= control target key start
LH: loop header
LB: loop body
LE: loop exit
PB: predicated region body
PF: predicated region fallthrough
CT: control target
= control target key end

     0   :  { %v383_v1 = vmov 0.0   ;;  %vm384_vm0 = vmmov 0   ;;  %vm181_vm1 = vcmask 261120   ;;  %s499_s1 = inlined_call_operand.vmem [shape: bf16[288,128], index: 1, kind: input, shape index: {}]   ;;  %s500_s4 = inlined_call_operand.vmem [shape: f32[1,128], index: 4, kind: output, shape index: {1}]   ;;  %s501_s5 = inlined_call_operand.vmem [shape: f32[1,128], index: 5, kind: output, shape index: {2}]   ;;  %s502_s0 = inlined_call_operand.vmem [shape: bf16[8,288], index: 0, kind: input, shape index: {}]   ;;  %s503_s2 = inlined_call_operand.vmem [shape: f32[1,128], index: 2, kind: input, shape index: {}]   ;;  %s504_s3 = inlined_call_operand.vmem [shape: bf16[8,128], index: 3, kind: output, shape index: {0}]  }
   0x1   :  { %v362_v0 = vld [vmem:[%s499_s1 + $0x40] sm:$0xff]   ;;  %352 = vmatprep.subr.bf16.mxu1 %v383_v1  ;;  %271 = vst [vmem:[%s500_s4] sm:$0x1] %v383_v1  ;;  %272 = vst [vmem:[%s501_s5] sm:$0x1] %v383_v1  ;;  %356 = vmatprep.mubr.msk.bf16.mxu1 %vm384_vm0, %v383_v1  ;;  %v364_v3 = vld [vmem:[%s499_s1 + $0x48] sm:$0xff]  }
   0x2   :  { %v363_v2 = vld [vmem:[%s499_s1] sm:$0xff]   ;;  %327 = vmatprep.subr.bf16.mxu0 %v362_v0  ;;  %v365_v4 = vld [vmem:[%s499_s1 + $0x8] sm:$0xff]   ;;  %v366_v5 = vld [vmem:[%s499_s1 + $0x50] sm:$0xff]  }
   0x3   :  { %328 = vmatpush3.bf16.msra.mxu0 %v363_v2  ;;  %v367_v6 = vld [vmem:[%s499_s1 + $0x10] sm:$0xff]   ;;  %v368_v7 = vld [vmem:[%s499_s1 + $0x58] sm:$0xff]   ;;  %v370_v9 = vld [vmem:[%s499_s1 + $0x60] sm:$0xff]  }
   0x4   :  { %329 = vmatprep.subr.bf16.mxu0 %v364_v3  ;;  %v369_v8 = vld [vmem:[%s499_s1 + $0x18] sm:$0xff]   ;;  %v371_v10 = vld [vmem:[%s499_s1 + $0x20] sm:$0xff]   ;;  %v372_v12 = vld [vmem:[%s499_s1 + $0x68] sm:$0xff]  }
   0x5   :  { %v376_v11 = vld [vmem:[%s499_s1 + $0x80] sm:$0xff]   ;;  %v373_v15 = vld [vmem:[%s499_s1 + $0x28] sm:$0xff]   ;;  %v374_v17 = vld [vmem:[%s499_s1 + $0x70] sm:$0xff]  }
   0x6   :  { %353 = vmatpush3.bf16.msra.mxu1 %v376_v11  ;;  %v18_v13 = vld [vmem:[%s502_s0] sm:$0xff]  ;;  %v382_v16 = vld [vmem:[%s499_s1 + $0x88] sm:$0xff]   ;;  %v375_v19 = vld [vmem:[%s499_s1 + $0x30] sm:$0xff]  }
   0x7   :  { %330 = vmatpush3.bf16.msra.mxu0 %v365_v4  ;;  %354 = vmatprep.subr.bf16.mxu1 %v383_v1  ;;  %v306_v14 = vcombine.high %v18_v13, %v18_v13  ;;  %v381_v18 = vld [vmem:[%s502_s0 + $0x8] ss:$0 sps:$4 sm:$0xff]   ;;  %v377_v20 = vld [vmem:[%s499_s1 + $0x78] sm:$0xff]   ;;  %v305_v22 = vcombine.low %v18_v13, %v18_v13  ;;  %v304_v29 = vld [vmem:[%s503_s2] ss:$0 sm:$0xff] }
   0x8   :  { %331 = vmatprep.subr.bf16.mxu0 %v366_v5  ;;  %v378_v21 = vld [vmem:[%s499_s1 + $0x38] sm:$0xff]   ;;  %v273_v46 = vld [vmem:[%s500_s4] sm:$0x1] }
   0x9   :  { %217 = vmatprep.mubr.bf16.mxu0 %v306_v14  ;;  %v282_v49 = vld [vmem:[%s501_s5] sm:$0x1] }
   0xa   :  { %355 = vmatpush3.bf16.msra.mxu1 %v382_v16 }
   0xb   :  { %332 = vmatpush3.bf16.msra.mxu0 %v367_v6 }
   0xc   :  { %333 = vmatprep.subr.bf16.mxu0 %v368_v7 }
   0xd   :  { %357 = vmatmul.mubr.msk.bf16.vlgmr.msra.gmra.mrb[0].mxu1 %vm181_vm1, %v381_v18 }
   0xf   :  { %334 = vmatpush3.bf16.msra.mxu0 %v369_v8 }
  0x10   :  { %335 = vmatprep.subr.bf16.mxu0 %v370_v9 }
  0x13   :  { %336 = vmatpush3.bf16.msra.mxu0 %v371_v10 }
  0x14   :  { %337 = vmatprep.subr.bf16.mxu0 %v372_v12 }
  0x17   :  { %338 = vmatpush3.bf16.msra.mxu0 %v373_v15 }
  0x18   :  { %339 = vmatprep.subr.bf16.mxu0 %v374_v17 }
  0x1b   :  { %340 = vmatpush3.bf16.msra.mxu0 %v375_v19 }
  0x1c   :  { %341 = vmatprep.subr.bf16.mxu0 %v377_v20 }
  0x1f   :  { %342 = vmatpush3.bf16.msra.mxu0 %v378_v21 }
  0x22   :  { %218 = vmatmul.mubr.bf16.vlgmr.msra.gmra.mrb[0].mxu0 %v305_v22 }
  0xe0   :  { %v259_v23 = vpop.f32.mrb[0].mxu1 }
  0xe1   :  { %v358_v24 = vpop.f32.mrb[1].mxu1 }
  0xe2   :  { %v262_v25 = vpop.f32.mrb[2].mxu1 }
  0xe3   :  { %v359_v26 = vpop.f32.mrb[3].mxu1 }
  0xf5   :  { %v343_v27 = vpop.f32.mrb[0].mxu0 }
  0xf6   :  { %v344_v28 = vpop.f32.mrb[1].mxu0 }
  0xf7   :  { %v345_v30 = vadd.f32 %v344_v28, %v343_v27  ;;  %v346_v31 = vpop.f32.mrb[2].mxu0 }
  0xf8   :  { %v347_v32 = vpop.f32.mrb[3].mxu0 }
  0xf9   :  { %v220_v33 = vadd.f32 %v345_v30, %v304_v29 }
  0xfb   :  { %v260_v34 = vadd.f32 %v259_v23, %v220_v33 }
  0xfd   :  { %v265_v35 = vpack.c.bf16 %v260_v34, %v260_v34  ;;  %v274_v36 = vrot.slane %v260_v34, 4  ;;  %v283_v37 = vmul.f32 %v260_v34, %v260_v34 }
  0xff   :  { %266 = vst [vmem:[%s504_s3] sm:$0xf] %v265_v35  ;;  %v275_v38 = vadd.f32 %v274_v36, %v260_v34  ;;  %v284_v39 = vrot.slane %v283_v37, 4 }
 0x101   :  { %v276_v40 = vrot.slane %v275_v38, 2  ;;  %v285_v41 = vadd.f32 %v284_v39, %v283_v37 }
 0x103   :  { %v277_v42 = vadd.f32 %v276_v40, %v275_v38  ;;  %v286_v43 = vrot.slane %v285_v41, 2 }
 0x105   :  { %v278_v44 = vrot.slane %v277_v42, 1  ;;  %v287_v45 = vadd.f32 %v286_v43, %v285_v41 }
 0x107   :  { %v279_v47 = vadd.f32 %v278_v44, %v277_v42  ;;  %v288_v48 = vrot.slane %v287_v45, 1 }
 0x109   :  { %v280_v50 = vadd.f32 %v279_v47, %v273_v46  ;;  %v289_v51 = vadd.f32 %v288_v48, %v287_v45 }
 0x10b   :  { %281 = vst [vmem:[%s500_s4] sm:$0x1] %v280_v50  ;;  %v290_v52 = vadd.f32 %v289_v51, %v282_v49 }
 0x10d   :  { %291 = vst [vmem:[%s501_s5] sm:$0x1] %v290_v52 }

// kernel: tile.18
= control target key start
LH: loop header
LB: loop body
LE: loop exit
PB: predicated region body
PF: predicated region fallthrough
CT: control target
= control target key end

     0   :  { %s22_s0 = inlined_call_operand.vmem [shape: f32[32], index: 0, kind: input, shape index: {}]   ;;  %s23_s1 = inlined_call_operand.vmem [shape: f32[4,32], index: 1, kind: output, shape index: {}]  }
   0x1   :  { %v4_v0 = vld [vmem:[%s22_s0] ss:$0 sm:$0xff] }
   0x2   :  { %5 = vst [vmem:[%s23_s1] sm:$0xf] %v4_v0 }

// kernel: blur_generator_forward.84
= control target key start
LH: loop header
LB: loop body
LE: loop exit
PB: predicated region body
PF: predicated region fallthrough
CT: control target
= control target key end

     0   :  { %v134_v0 = vmov 0.0   ;;  %vm135_vm0 = vmmov 0   ;;  %vm55_vm1 = vcmask 523264   ;;  %s177_s1 = inlined_call_operand.vmem [shape: bf16[64,128], index: 1, kind: input, shape index: {}]   ;;  %s178_s0 = inlined_call_operand.vmem [shape: bf16[8,64], index: 0, kind: input, shape index: {}]   ;;  %s179_s2 = inlined_call_operand.vmem [shape: f32[1,128], index: 2, kind: input, shape index: {}]   ;;  %s180_s3 = inlined_call_operand.vmem [shape: bf16[8,128], index: 3, kind: output, shape index: {}]  }
   0x1   :  { %116 = vmatprep.subr.bf16.mxu0 %v134_v0  ;;  %v130_v1 = vld [vmem:[%s177_s1] sm:$0xff]   ;;  %124 = vmatprep.mubr.msk.bf16.mxu0 %vm135_vm0, %v134_v0  ;;  %v131_v2 = vld [vmem:[%s177_s1 + $0x8] sm:$0xff]   ;;  %v132_v3 = vld [vmem:[%s177_s1 + $0x10] sm:$0xff]  }
   0x2   :  { %117 = vmatpush3.bf16.msra.mxu0 %v130_v1  ;;  %v133_v4 = vld [vmem:[%s177_s1 + $0x18] sm:$0xff]   ;;  %v15_v5 = vld [vmem:[%s178_s0] sm:$0xf] }
   0x3   :  { %118 = vmatprep.subr.bf16.mxu0 %v134_v0  ;;  %v105_v6 = vld [vmem:[%s179_s2] ss:$0 sm:$0xff] }
   0x6   :  { %119 = vmatpush3.bf16.msra.mxu0 %v131_v2 }
   0x7   :  { %120 = vmatprep.subr.bf16.mxu0 %v134_v0 }
   0xa   :  { %121 = vmatpush3.bf16.msra.mxu0 %v132_v3 }
   0xb   :  { %122 = vmatprep.subr.bf16.mxu0 %v134_v0 }
   0xe   :  { %123 = vmatpush3.bf16.msra.mxu0 %v133_v4 }
  0x11   :  { %125 = vmatmul.mubr.msk.bf16.vlgmr.msra.gmra.mrb[0].mxu0 %vm55_vm1, %v15_v5 }
  0xe4   :  { %v93_v7 = vpop.f32.mrb[0].mxu0 }
  0xe5   :  { %v94_v8 = vadd.f32 %v105_v6, %v93_v7  ;;  %v126_v9 = vpop.f32.mrb[1].mxu0 }
  0xe6   :  { %v96_v10 = vpop.f32.mrb[2].mxu0 }
  0xe7   :  { %v99_v11 = vpack.c.bf16 %v94_v8, %v94_v8  ;;  %v127_v12 = vpop.f32.mrb[3].mxu0 }
  0xe9   :  { %100 = vst [vmem:[%s180_s3] sm:$0xf] %v99_v11 }

// kernel: blur_generator_forward.82
= control target key start
LH: loop header
LB: loop body
LE: loop exit
PB: predicated region body
PF: predicated region fallthrough
CT: control target
= control target key end

     0   :  { %v643_v35 = vmov 0.0   ;;  %vm644_vm0 = vmmov 0   ;;  %vm333_vm1 = vcmask 523264   ;;  %s816_s1 = inlined_call_operand.vmem [shape: bf16[576,128], index: 1, kind: input, shape index: {}]   ;;  %s817_s0 = inlined_call_operand.vmem [shape: bf16[8,576], index: 0, kind: input, shape index: {}]   ;;  %s818_s4 = inlined_call_operand.vmem [shape: f32[1,128], index: 4, kind: output, shape index: {1}]   ;;  %s819_s5 = inlined_call_operand.vmem [shape: f32[1,128], index: 5, kind: output, shape index: {2}]   ;;  %s820_s2 = inlined_call_operand.vmem [shape: f32[1,128], index: 2, kind: input, shape index: {}]   ;;  %s821_s3 = inlined_call_operand.vmem [shape: bf16[8,128], index: 3, kind: output, shape index: {0}]  }
   0x1   :  { %v602_v0 = vld [vmem:[%s816_s1 + $0x40] sm:$0xff]   ;;  %v606_v4 = vld [vmem:[%s816_s1 + $0x48] sm:$0xff]   ;;  %v610_v8 = vld [vmem:[%s816_s1 + $0x50] sm:$0xff]   ;;  %463 = vst [vmem:[%s818_s4] sm:$0x1] %v643_v35 }
   0x2   :  { %v603_v1 = vld [vmem:[%s816_s1] sm:$0xff]   ;;  %539 = vmatprep.subr.bf16.mxu0 %v602_v0  ;;  %v607_v5 = vld [vmem:[%s816_s1 + $0x8] sm:$0xff]   ;;  %v611_v9 = vld [vmem:[%s816_s1 + $0x10] sm:$0xff]   ;;  %464 = vst [vmem:[%s819_s5] sm:$0x1] %v643_v35 }
   0x3   :  { %v604_v2 = vld [vmem:[%s816_s1 + $0xc0] sm:$0xff]   ;;  %540 = vmatpush3.bf16.msra.mxu0 %v603_v1  ;;  %v608_v6 = vld [vmem:[%s816_s1 + $0xc8] sm:$0xff]   ;;  %v612_v10 = vld [vmem:[%s816_s1 + $0xd0] sm:$0xff]  }
   0x4   :  { %v605_v3 = vld [vmem:[%s816_s1 + $0x80] sm:$0xff]   ;;  %561 = vmatprep.subr.bf16.mxu1 %v604_v2  ;;  %541 = vmatprep.subr.bf16.mxu0 %v606_v4  ;;  %v609_v7 = vld [vmem:[%s816_s1 + $0x88] sm:$0xff]   ;;  %v613_v11 = vld [vmem:[%s816_s1 + $0x90] sm:$0xff]  }
   0x5   :  { %562 = vmatpush3.bf16.msra.mxu1 %v605_v3  ;;  %v614_v12 = vld [vmem:[%s816_s1 + $0x58] sm:$0xff]   ;;  %v618_v16 = vld [vmem:[%s816_s1 + $0x60] sm:$0xff]   ;;  %v622_v20 = vld [vmem:[%s816_s1 + $0x68] sm:$0xff]  }
   0x6   :  { %563 = vmatprep.subr.bf16.mxu1 %v608_v6  ;;  %v615_v13 = vld [vmem:[%s816_s1 + $0x18] sm:$0xff]   ;;  %v619_v17 = vld [vmem:[%s816_s1 + $0x20] sm:$0xff]   ;;  %v623_v21 = vld [vmem:[%s816_s1 + $0x28] sm:$0xff]  }
   0x7   :  { %542 = vmatpush3.bf16.msra.mxu0 %v607_v5  ;;  %v616_v14 = vld [vmem:[%s816_s1 + $0xd8] sm:$0xff]   ;;  %v620_v18 = vld [vmem:[%s816_s1 + $0xe0] sm:$0xff]   ;;  %v624_v22 = vld [vmem:[%s816_s1 + $0xe8] sm:$0xff]  }
   0x8   :  { %543 = vmatprep.subr.bf16.mxu0 %v610_v8  ;;  %v617_v15 = vld [vmem:[%s816_s1 + $0x98] sm:$0xff]   ;;  %v621_v19 = vld [vmem:[%s816_s1 + $0xa0] sm:$0xff]   ;;  %v625_v23 = vld [vmem:[%s816_s1 + $0xa8] sm:$0xff]  }
   0x9   :  { %564 = vmatpush3.bf16.msra.mxu1 %v609_v7  ;;  %v626_v24 = vld [vmem:[%s816_s1 + $0x70] sm:$0xff]   ;;  %v630_v28 = vld [vmem:[%s816_s1 + $0x78] sm:$0xff]   ;;  %v18_v31 = vld [vmem:[%s817_s0] sm:$0xff] }
   0xa   :  { %565 = vmatprep.subr.bf16.mxu1 %v612_v10  ;;  %v627_v25 = vld [vmem:[%s816_s1 + $0x30] sm:$0xff]   ;;  %v631_v29 = vld [vmem:[%s816_s1 + $0x38] sm:$0xff]   ;;  %v497_v32 = vcombine.low %v18_v31, %v18_v31  ;;  %v498_v33 = vcombine.high %v18_v31, %v18_v31  ;;  %v19_v36 = vld [vmem:[%s817_s0 + $0x8] sm:$0xff] }
   0xb   :  { %544 = vmatpush3.bf16.msra.mxu0 %v611_v9  ;;  %v628_v26 = vld [vmem:[%s816_s1 + $0xf0] sm:$0xff]   ;;  %v632_v30 = vld [vmem:[%s816_s1 + $0xf8] sm:$0xff]   ;;  %v499_v37 = vcombine.low %v19_v36, %v19_v36  ;;  %v500_v38 = vcombine.high %v19_v36, %v19_v36  ;;  %v639_v39 = vld [vmem:[%s816_s1 + $0x100] sm:$0xff]  }
   0xc   :  { %545 = vmatprep.subr.bf16.mxu0 %v614_v12  ;;  %v629_v27 = vld [vmem:[%s816_s1 + $0xb0] sm:$0xff]   ;;  %v636_v34 = vld [vmem:[%s816_s1 + $0xb8] sm:$0xff]   ;;  %369 = vmatprep.mubr.bf16.mxu0 %v498_v33  ;;  %v640_v40 = vld [vmem:[%s816_s1 + $0x108] sm:$0xff]  }
   0xd   :  { %566 = vmatpush3.bf16.msra.mxu1 %v613_v11  ;;  %409 = vmatprep.mubr.bf16.mxu1 %v500_v38  ;;  %v641_v41 = vld [vmem:[%s816_s1 + $0x110] sm:$0xff]   ;;  %v642_v42 = vld [vmem:[%s816_s1 + $0x118] sm:$0xff]   ;;  %v496_v45 = vld [vmem:[%s820_s2] ss:$0 sm:$0xff] }
   0xe   :  { %567 = vmatprep.subr.bf16.mxu1 %v616_v14  ;;  %v635_v43 = vld [vmem:[%s817_s0 + $0x10] ss:$0 sps:$4 sm:$0xff]   ;;  %v465_v9 = vld [vmem:[%s818_s4] sm:$0x1] }
   0xf   :  { %546 = vmatpush3.bf16.msra.mxu0 %v615_v13  ;;  %v474_v12 = vld [vmem:[%s819_s5] sm:$0x1] }
  0x10   :  { %547 = vmatprep.subr.bf16.mxu0 %v618_v16 }
  0x11   :  { %568 = vmatpush3.bf16.msra.mxu1 %v617_v15 }
  0x12   :  { %569 = vmatprep.subr.bf16.mxu1 %v620_v18 }
  0x13   :  { %548 = vmatpush3.bf16.msra.mxu0 %v619_v17 }
  0x14   :  { %549 = vmatprep.subr.bf16.mxu0 %v622_v20 }
  0x15   :  { %570 = vmatpush3.bf16.msra.mxu1 %v621_v19 }
  0x16   :  { %571 = vmatprep.subr.bf16.mxu1 %v624_v22 }
  0x17   :  { %550 = vmatpush3.bf16.msra.mxu0 %v623_v21 }
  0x18   :  { %551 = vmatprep.subr.bf16.mxu0 %v626_v24 }
  0x19   :  { %572 = vmatpush3.bf16.msra.mxu1 %v625_v23 }
  0x1a   :  { %573 = vmatprep.subr.bf16.mxu1 %v628_v26 }
  0x1b   :  { %552 = vmatpush3.bf16.msra.mxu0 %v627_v25 }
  0x1c   :  { %553 = vmatprep.subr.bf16.mxu0 %v630_v28 }
  0x1d   :  { %574 = vmatpush3.bf16.msra.mxu1 %v629_v27 }
  0x1e   :  { %575 = vmatprep.subr.bf16.mxu1 %v632_v30 }
  0x1f   :  { %554 = vmatpush3.bf16.msra.mxu0 %v631_v29 }
  0x20   :  { %588 = vmatprep.subr.bf16.mxu0 %v643_v35 }
  0x21   :  { %576 = vmatpush3.bf16.msra.mxu1 %v636_v34 }
  0x22   :  { %370 = vmatmul.mubr.bf16.vlgmr.msra.gmra.mrb[0].mxu0 %v497_v32 }
  0x23   :  { %589 = vmatpush3.bf16.msra.mxu0 %v639_v39  ;;  %596 = vmatprep.mubr.msk.bf16.mxu0 %vm644_vm0, %v643_v35 }
  0x24   :  { %410 = vmatmul.mubr.bf16.vlgmr.msra.gmra.mrb[0].mxu1 %v499_v37  ;;  %590 = vmatprep.subr.bf16.mxu0 %v643_v35 }
  0x27   :  { %591 = vmatpush3.bf16.msra.mxu0 %v640_v40 }
  0x28   :  { %592 = vmatprep.subr.bf16.mxu0 %v643_v35 }
  0x2b   :  { %593 = vmatpush3.bf16.msra.mxu0 %v641_v41 }
  0x2c   :  { %594 = vmatprep.subr.bf16.mxu0 %v643_v35 }
  0x2f   :  { %595 = vmatpush3.bf16.msra.mxu0 %v642_v42 }
  0x32   :  { %597 = vmatmul.mubr.msk.bf16.vlgmr.msra.gmra.mrb[4].mxu0 %vm333_vm1, %v635_v43 }
  0xf5   :  { %v555_v44 = vpop.f32.mrb[0].mxu0 }
  0xf6   :  { %v556_v46 = vpop.f32.mrb[1].mxu0 }
  0xf7   :  { %v557_v47 = vadd.f32 %v556_v46, %v555_v44  ;;  %v558_v48 = vpop.f32.mrb[2].mxu0  ;;  %v577_v49 = vpop.f32.mrb[0].mxu1 }
  0xf8   :  { %v559_v50 = vpop.f32.mrb[3].mxu0  ;;  %v578_v51 = vpop.f32.mrb[1].mxu1 }
  0xf9   :  { %v372_v52 = vadd.f32 %v557_v47, %v496_v45  ;;  %v579_v53 = vadd.f32 %v578_v51, %v577_v49  ;;  %v580_v54 = vpop.f32.mrb[2].mxu1 }
  0xfa   :  { %v581_v55 = vpop.f32.mrb[3].mxu1 }
  0xfb   :  { %v412_v56 = vadd.f32 %v579_v53, %v372_v52 }
 0x105   :  { %v451_v57 = vpop.f32.mrb[4].mxu0 }
 0x106   :  { %v452_v58 = vadd.f32 %v451_v57, %v412_v56  ;;  %v598_v59 = vpop.f32.mrb[5].mxu0 }
 0x107   :  { %v454_v60 = vpop.f32.mrb[6].mxu0 }
 0x108   :  { %v457_v61 = vpack.c.bf16 %v452_v58, %v452_v58  ;;  %v466_v62 = vrot.slane %v452_v58, 4  ;;  %v475_v63 = vmul.f32 %v452_v58, %v452_v58  ;;  %v599_v0 = vpop.f32.mrb[7].mxu0 }
 0x10a   :  { %458 = vst [vmem:[%s821_s3] sm:$0xf] %v457_v61  ;;  %v467_v1 = vadd.f32 %v466_v62, %v452_v58  ;;  %v476_v2 = vrot.slane %v475_v63, 4 }
 0x10c   :  { %v468_v3 = vrot.slane %v467_v1, 2  ;;  %v477_v4 = vadd.f32 %v476_v2, %v475_v63 }
 0x10e   :  { %v469_v5 = vadd.f32 %v468_v3, %v467_v1  ;;  %v478_v6 = vrot.slane %v477_v4, 2 }
 0x110   :  { %v470_v7 = vrot.slane %v469_v5, 1  ;;  %v479_v8 = vadd.f32 %v478_v6, %v477_v4 }
 0x112   :  { %v471_v10 = vadd.f32 %v470_v7, %v469_v5  ;;  %v480_v11 = vrot.slane %v479_v8, 1 }
 0x114   :  { %v472_v13 = vadd.f32 %v471_v10, %v465_v9  ;;  %v481_v14 = vadd.f32 %v480_v11, %v479_v8 }
 0x116   :  { %473 = vst [vmem:[%s818_s4] sm:$0x1] %v472_v13  ;;  %v482_v15 = vadd.f32 %v481_v14, %v474_v12 }
 0x118   :  { %483 = vst [vmem:[%s819_s5] sm:$0x1] %v482_v15 }

// kernel: blur_generator_forward.86
= control target key start
LH: loop header
LB: loop body
LE: loop exit
PB: predicated region body
PF: predicated region fallthrough
CT: control target
= control target key end

     0   :  { %s467_s12 = smov 0   ;;  %s469_s13 = smov 0   ;;  %s503_s0 = inlined_call_operand.vmem [shape: bf16[2,16,32], index: 0, kind: input, shape index: {}]   ;;  %s504_s1 = inlined_call_operand.vmem [shape: f32[2,1,32], index: 1, kind: input, shape index: {}]   ;;  %s505_s2 = inlined_call_operand.vmem [shape: f32[2,1,32], index: 2, kind: input, shape index: {}]   ;;  %s506_s3 = inlined_call_operand.vmem [shape: bf16[2,16,32], index: 3, kind: output, shape index: {}]  }
   0x1   :  { %s471_s14 = smov 0  }
   0x2 LB: > { %s25_s15 = sadd.s32 1, %s441_s13  ;;  %p380_p0 = scmp.ge.s32.totalorder %s445_s14, 1  ;;  %s445_s14 = sphi %s471_s14, %s13_s14   ;;  %s441_s13 = sphi %s469_s13, %s508_s13   ;;  %s437_s12 = sphi %s467_s12, %s507_s12  }
   0x3   : > { %p27_p1 = scmp.ge.s32.totalorder %s25_s15, 2  ;;  %p174_p2 = scmp.lt.s32.totalorder %s445_s14, 3 }
   0x5   : > { %s510_s15 = smov (%p27_p1, %s25_s15), 0  ;;  %p175_p3 = pnand %p380_p0, %p174_p2 }
   0x6   : > { %p213_p4 = scmp.lt.s32.totalorder (!%p175_p3), %s437_s12, 1  ;;  %vm268_vm0 = vcmask (!%p175_p3), 257024  }
   0x7   : > { %178 = sbr.rel (%p175_p3) target bundleno = 27 (0x1b), region = 32 }
   0xe   : > { %s512_s12 = smov (!%p213_p4, %s437_s12), 1 }
   0xf   : > { %s391_s16 = sshll.u32 %s512_s12, 3  ;;  %s224_s19 = scalar_lea.vmem %s504_s1, %s512_s12 }
  0x10   : > { %s220_s22 = scalar_lea.vmem %s503_s0, %s391_s16  ;;  %s227_s25 = scalar_lea.vmem %s505_s2, %s512_s12  ;;  %v385_v1 = vld [vmem:[%s224_s19] ss:$0 sm:$0xff] }
  0x11   : > { %v396_v0 = vld [vmem:[%s220_s22] sm:$0xff]   ;;  %s236_s28 = scalar_lea.vmem %s506_s3, %s391_s16 }
  0x12   : > { %v397_v2 = vunpack.c.l.bf16 %v396_v0  ;;  %v398_v3 = vunpack.c.h.bf16 %v396_v0  ;;  %v386_v4 = vld [vmem:[%s227_s25] ss:$0 sm:$0xff] }
  0x14   : > { %v249_v5 = vmul.f32 %v397_v2, %v385_v1  ;;  %v250_v6 = vmul.f32 %v398_v3, %v385_v1 }
  0x16   : > { %v258_v7 = vadd.f32 %v386_v4, %v249_v5  ;;  %v259_v8 = vadd.f32 %v386_v4, %v250_v6 }
  0x18   : > { %v393_v9 = vpack.c.bf16 %v258_v7, %v258_v7  ;;  %v394_v10 = vpack.c.bf16 %v259_v8, %v259_v8 }
  0x1a   : > { %269 = vst.msk [vmem:[%s236_s28] sm:$0xf] %vm268_vm0, %v393_v9  ;;  %270 = vst.msk [vmem:[%s236_s28 + $0x4] sm:$0xf] %vm268_vm0, %v394_v10 }
  0x1b PF: > { %s13_s14 = sadd.s32 1, %s445_s14   ;;  %s507_s12 = smov %s441_s13 }
  0x1c   : > { %p10_p5 = scmp.ge.s32.totalorder %s13_s14, 4   ;;  %s508_s13 = smov %s510_s15 }
  0x1e   :  { %12 = sbr.rel (!%p10_p5) target bundleno = 2 (0x2), region = 68 }

// kernel: tile.23
= control target key start
LH: loop header
LB: loop body
LE: loop exit
PB: predicated region body
PF: predicated region fallthrough
CT: control target
= control target key end

     0   :  { %s22_s0 = inlined_call_operand.vmem [shape: f32[16], index: 0, kind: input, shape index: {}]   ;;  %s23_s1 = inlined_call_operand.vmem [shape: f32[4,16], index: 1, kind: output, shape index: {}]  }
   0x1   :  { %v4_v0 = vld [vmem:[%s22_s0] ss:$0 sm:$0xff] }
   0x2   :  { %5 = vst [vmem:[%s23_s1] sm:$0xf] %v4_v0 }

// kernel: tile.24
= control target key start
LH: loop header
LB: loop body
LE: loop exit
PB: predicated region body
PF: predicated region fallthrough
CT: control target
= control target key end

     0   :  { %vm7_vm0 = vcmask 130048   ;;  %s37_s8 = smov 16   ;;  %s38_s9 = smov 32   ;;  %vm13_vm1 = vcmask 523648   ;;  %vm19_vm2 = vcmask 392448   ;;  %vm25_vm3 = vcmask 261248   ;;  %s55_s0 = inlined_call_operand.vmem [shape: f32[4,16], index: 0, kind: input, shape index: {}]   ;;  %s56_s1 = inlined_call_operand.vmem [shape: f32[64], index: 1, kind: output, shape index: {}]  }
   0x1   :  { %v4_v0 = vld [vmem:[%s55_s0] sm:$0xf]  ;;  %s36_s0 = smov 48  }
   0x2   :  { %5 = vst [vmem:[#allocation1] sm:$0xf] %v4_v0 }
   0x9   :  { %v10_v1 = vld [vmem:[#allocation1 + $0x3] sm:$0x1]   ;;  %v22_v2 = vld [vmem:[#allocation1 + $0x1] sm:$0x1]   ;;  %v6_v3 = vld [vmem:[#allocation1] sm:$0x1]  }
   0xa   :  { %11 = vrot.lane.b32.xlu0 %v10_v1, %s36_s0  ;;  %23 = vrot.lane.b32.xlu1 %v22_v2, %s37_s8  ;;  %v16_v4 = vld [vmem:[#allocation1 + $0x2] sm:$0x1]   ;;  %8 = vst.msk [vmem:[#allocation0] sm:$0x1] %vm7_vm0, %v6_v3  }
   0xe   :  { %17 = vrot.lane.b32.xlu0 %v16_v4, %s38_s9 }
  0x7c   :  { %v12_v5 = vpop.permute.xlu0 %11   ;;  %v24_v6 = vpop.permute.xlu1 %23  }
  0x7d   :  { %14 = vst.msk [vmem:[#allocation0] sm:$0x1] %vm13_vm1, %v12_v5  }
  0x80   :  { %v18_v7 = vpop.permute.xlu0 %17  }
  0x81   :  { %20 = vst.msk [vmem:[#allocation0] sm:$0x1] %vm19_vm2, %v18_v7  }
  0x82   :  { %26 = vst.msk [vmem:[#allocation0] sm:$0x1] %vm25_vm3, %v24_v6  }
  0x89   :  { %v30_v8 = vld [vmem:[#allocation0] sm:$0x1] }
  0x8a   :  { %32 = vst [vmem:[%s56_s1] sm:$0x1] %v30_v8 }

// kernel: blur_generator_forward.92
= control target key start
LH: loop header
LB: loop body
LE: loop exit
PB: predicated region body
PF: predicated region fallthrough
CT: control target
= control target key end

     0   :  { %s438_s9 = smov 0   ;;  %s440_s10 = smov 0   ;;  %s504_s0 = inlined_call_operand.vmem [shape: bf16[2,64,16], index: 0, kind: input, shape index: {}]   ;;  %s505_s1 = inlined_call_operand.vmem [shape: f32[2,1,16], index: 1, kind: output, shape index: {0}]   ;;  %s506_s2 = inlined_call_operand.vmem [shape: f32[2,1,16], index: 2, kind: output, shape index: {1}]  }
   0x1   :  { %s442_s11 = smov 0  }
   0x2 LB: > { %s25_s12 = sadd.s32 1, %s416_s10  ;;  %p348_p0 = scmp.ge.s32.totalorder %s420_s11, 1  ;;  %s420_s11 = sphi %s442_s11, %s13_s11   ;;  %s416_s10 = sphi %s440_s10, %s508_s10   ;;  %s412_s9 = sphi %s438_s9, %s507_s9  }
   0x3   : > { %p27_p1 = scmp.ge.s32.totalorder %s25_s12, 2  ;;  %p134_p2 = scmp.lt.s32.totalorder %s420_s11, 3 }
   0x5   : > { %s510_s12 = smov (%p27_p1, %s25_s12), 0  ;;  %p135_p3 = pnand %p348_p0, %p134_p2 }
   0x6   : > { %p162_p4 = scmp.lt.s32.totalorder (!%p135_p3), %s412_s9, 1  ;;  %vm181_vm0 = vcmask (!%p135_p3), 122880   ;;  %v422_v0 = vmov (!%p135_p3), 0.0   ;;  %vm201_vm1 = vcmask (!%p135_p3), 130048  }
   0x7   : > { %138 = sbr.rel (%p135_p3) target bundleno = 53 (0x35), region = 24 }
   0xe   : > { %s512_s9 = smov (!%p162_p4, %s412_s9), 1 }
   0xf   : > { %s353_s13 = sshll.u32 %s512_s9, 5  ;;  %s459_s16 = scalar_lea.vmem %s505_s1, %s512_s9 }
  0x10   : > { %s169_s19 = scalar_lea.vmem %s504_s0, %s353_s13  ;;  %182 = vst.msk [vmem:[%s459_s16] sm:$0x1] %vm181_vm0, %v422_v0  ;;  %s469_s22 = scalar_lea.vmem %s506_s2, %s512_s9 }
  0x11   : > { %v355_v1 = vld [vmem:[%s169_s19] sm:$0xff]   ;;  %v370_v2 = vld [vmem:[%s169_s19 + $0x8] sm:$0xff]   ;;  %v371_v3 = vld [vmem:[%s169_s19 + $0x10] sm:$0xff]   ;;  %183 = vst.msk [vmem:[%s469_s22] sm:$0x1] %vm181_vm0, %v422_v0 }
  0x12   : > { %v356_v4 = vunpack.c.l.bf16 %v355_v1  ;;  %v357_v5 = vunpack.c.h.bf16 %v355_v1  ;;  %v360_v6 = vunpack.c.l.bf16 %v370_v2  ;;  %v361_v7 = vunpack.c.h.bf16 %v370_v2  ;;  %v372_v9 = vld [vmem:[%s169_s19 + $0x18] sm:$0xff]  }
  0x13   : > { %v364_v8 = vunpack.c.l.bf16 %v371_v3  ;;  %v365_v13 = vunpack.c.h.bf16 %v371_v3  ;;  %v368_v19 = vunpack.c.l.bf16 %v372_v9  ;;  %v369_v29 = vunpack.c.h.bf16 %v372_v9 }
  0x14   : > { %v202_v10 = vsel %vm201_vm1, %v356_v4, 0.0  ;;  %v203_v11 = vsel %vm201_vm1, %v357_v5, 0.0  ;;  %v205_v12 = vsel %vm201_vm1, %v360_v6, 0.0  ;;  %v207_v15 = vsel %vm201_vm1, %v361_v7, 0.0 }
  0x15   : > { %v204_v14 = vadd.f32 %v203_v11, %v202_v10  ;;  %v227_v16 = vmul.f32 %v356_v4, %v356_v4  ;;  %v228_v17 = vmul.f32 %v357_v5, %v357_v5  ;;  %v229_v18 = vmul.f32 %v360_v6, %v360_v6 }
  0x16   : > { %v209_v21 = vsel %vm201_vm1, %v364_v8, 0.0  ;;  %v230_v22 = vmul.f32 %v361_v7, %v361_v7  ;;  %v231_v23 = vmul.f32 %v364_v8, %v364_v8  ;;  %v211_v30 = vsel %vm201_vm1, %v365_v13, 0.0 }
  0x17   : > { %v206_v20 = vadd.f32 %v205_v12, %v204_v14  ;;  %v235_v24 = vsel %vm201_vm1, %v227_v16, 0.0  ;;  %v236_v25 = vsel %vm201_vm1, %v228_v17, 0.0  ;;  %v238_v26 = vsel %vm201_vm1, %v229_v18, 0.0  ;;  %v200_v59 = vld [vmem:[%s459_s16] sm:$0x1] }
  0x18   : > { %v237_v28 = vadd.f32 %v236_v25, %v235_v24  ;;  %v232_v31 = vmul.f32 %v365_v13, %v365_v13  ;;  %v240_v32 = vsel %vm201_vm1, %v230_v22, 0.0  ;;  %v213_v35 = vsel %vm201_vm1, %v368_v19, 0.0  ;;  %v226_v0 = vld [vmem:[%s469_s22] sm:$0x1] }
  0x19   : > { %v208_v27 = vadd.f32 %v207_v15, %v206_v20  ;;  %v233_v36 = vmul.f32 %v368_v19, %v368_v19  ;;  %v242_v37 = vsel %vm201_vm1, %v231_v23, 0.0  ;;  %v215_v40 = vsel %vm201_vm1, %v369_v29, 0.0 }
  0x1a   : > { %v239_v34 = vadd.f32 %v238_v26, %v237_v28  ;;  %v234_v41 = vmul.f32 %v369_v29, %v369_v29  ;;  %v244_v42 = vsel %vm201_vm1, %v232_v31, 0.0 }
  0x1b   : > { %v210_v33 = vadd.f32 %v209_v21, %v208_v27  ;;  %v246_v45 = vsel %vm201_vm1, %v233_v36, 0.0 }
  0x1c   : > { %v241_v39 = vadd.f32 %v240_v32, %v239_v34  ;;  %v248_v48 = vsel %vm201_vm1, %v234_v41, 0.0 }
  0x1d   : > { %v212_v38 = vadd.f32 %v211_v30, %v210_v33 }
  0x1e   : > { %v243_v44 = vadd.f32 %v242_v37, %v241_v39 }
  0x1f   : > { %v214_v43 = vadd.f32 %v213_v35, %v212_v38 }
  0x20   : > { %v245_v47 = vadd.f32 %v244_v42, %v243_v44 }
  0x21   : > { %v216_v46 = vadd.f32 %v215_v40, %v214_v43 }
  0x22   : > { %v247_v50 = vadd.f32 %v246_v45, %v245_v47 }
  0x23   : > { %v217_v49 = vrot.slane %v216_v46, 4 }
  0x24   : > { %v249_v52 = vadd.f32 %v248_v48, %v247_v50 }
  0x25   : > { %v218_v51 = vadd.f32 %v217_v49, %v216_v46 }
  0x26   : > { %v250_v54 = vrot.slane %v249_v52, 4 }
  0x27   : > { %v219_v53 = vrot.slane %v218_v51, 2 }
  0x28   : > { %v251_v56 = vadd.f32 %v250_v54, %v249_v52 }
  0x29   : > { %v220_v55 = vadd.f32 %v219_v53, %v218_v51 }
  0x2a   : > { %v252_v58 = vrot.slane %v251_v56, 2 }
  0x2b   : > { %v221_v57 = vrot.slane %v220_v55, 1 }
  0x2c   : > { %v253_v61 = vadd.f32 %v252_v58, %v251_v56 }
  0x2d   : > { %v222_v60 = vadd.f32 %v221_v57, %v220_v55 }
  0x2e   : > { %v254_v63 = vrot.slane %v253_v61, 1 }
  0x2f   : > { %v223_v62 = vadd.f32 %v222_v60, %v200_v59 }
  0x30   : > { %v255_v1 = vadd.f32 %v254_v63, %v253_v61 }
  0x31   : > { %225 = vst.msk [vmem:[%s459_s16] sm:$0x1] %vm181_vm0, %v223_v62 }
  0x32   : > { %v256_v2 = vadd.f32 %v255_v1, %v226_v0 }
  0x34   : > { %257 = vst.msk [vmem:[%s469_s22] sm:$0x1] %vm181_vm0, %v256_v2 }
  0x35 PF: > { %s13_s11 = sadd.s32 1, %s420_s11   ;;  %s507_s9 = smov %s416_s10 }
  0x36   : > { %p10_p5 = scmp.ge.s32.totalorder %s13_s11, 4   ;;  %s508_s10 = smov %s510_s12 }
  0x38   :  { %12 = sbr.rel (!%p10_p5) target bundleno = 2 (0x2), region = 70 }

// kernel: blur_generator_forward.91
= control target key start
LH: loop header
LB: loop body
LE: loop exit
PB: predicated region body
PF: predicated region fallthrough
CT: control target
= control target key end

     0   :  { %vm52_vm0 = vcmask 261120   ;;  %s215_s1 = inlined_call_operand.vmem [shape: bf16[32,128], index: 1, kind: input, shape index: {}]   ;;  %s216_s0 = inlined_call_operand.vmem [shape: bf16[32,32], index: 0, kind: input, shape index: {}]   ;;  %s217_s2 = inlined_call_operand.vmem [shape: f32[1,128], index: 2, kind: input, shape index: {}]   ;;  %s218_s3 = inlined_call_operand.vmem [shape: bf16[32,128], index: 3, kind: output, shape index: {}]  }
   0x1   :  { %v170_v0 = vld [vmem:[%s215_s1] sm:$0xff]   ;;  %v171_v1 = vld [vmem:[%s215_s1 + $0x8] sm:$0xff]  }
   0x2   :  { %162 = vmatprep.subr.bf16.mxu0 %v170_v0  ;;  %v172_v2 = vld [vmem:[%s216_s0] sm:$0xff]   ;;  %v173_v3 = vld [vmem:[%s216_s0 + $0x8] sm:$0xff]  }
   0x3   :  { %163 = vmatpush3.bf16.msra.mxu0 %v170_v0  ;;  %166 = vmatprep.mubr.msk.bf16.mxu0 %vm52_vm0, %v172_v2  ;;  %v132_v5 = vld [vmem:[%s217_s2] ss:$0 sm:$0xff] }
   0x4   :  { %164 = vmatprep.subr.bf16.mxu0 %v171_v1 }
   0x7   :  { %165 = vmatpush3.bf16.msra.mxu0 %v171_v1 }
   0xa   :  { %167 = vmatmul.mubr.msk.bf16.vlgmr.msra.gmra.mrb[0].mxu0 %vm52_vm0, %v173_v3 }
  0xdd   :  { %v168_v4 = vpop.f32.mrb[0].mxu0 }
  0xde   :  { %v93_v6 = vpop.f32.mrb[1].mxu0  ;;  %v102_v8 = vadd.f32 %v168_v4, %v132_v5 }
  0xdf   :  { %v169_v7 = vpop.f32.mrb[2].mxu0  ;;  %v94_v11 = vadd.f32 %v132_v5, %v93_v6 }
  0xe0   :  { %v105_v9 = vadd.f32 %v169_v7, %v132_v5  ;;  %v96_v10 = vpop.f32.mrb[3].mxu0 }
  0xe1   :  { %v97_v12 = vadd.f32 %v132_v5, %v96_v10 }
  0xe2   :  { %v155_v13 = vpack.c.bf16 %v105_v9, %v102_v8 }
  0xe3   :  { %v150_v14 = vpack.c.bf16 %v97_v12, %v94_v11 }
  0xe4   :  { %157 = vst [vmem:[%s218_s3 + $0x8] sm:$0xff] %v155_v13  }
  0xe5   :  { %151 = vst [vmem:[%s218_s3] sm:$0xff] %v150_v14  }

// kernel: blur_generator_forward.87
= control target key start
LH: loop header
LB: loop body
LE: loop exit
PB: predicated region body
PF: predicated region fallthrough
CT: control target
= control target key end

     0   :  { %vm375_vm0 = vcmask 523264   ;;  %v788_v46 = vmov 0.0   ;;  %s984_s1 = inlined_call_operand.vmem [shape: bf16[576,128], index: 1, kind: input, shape index: {}]   ;;  %s985_s0 = inlined_call_operand.vmem [shape: bf16[32,576], index: 0, kind: input, shape index: {}]   ;;  %s986_s4 = inlined_call_operand.vmem [shape: f32[1,128], index: 4, kind: output, shape index: {1}]   ;;  %s987_s5 = inlined_call_operand.vmem [shape: f32[1,128], index: 5, kind: output, shape index: {2}]   ;;  %s988_s2 = inlined_call_operand.vmem [shape: f32[1,128], index: 2, kind: input, shape index: {}]   ;;  %s989_s3 = inlined_call_operand.vmem [shape: bf16[32,128], index: 3, kind: output, shape index: {0}]  }
   0x1   :  { %v738_v0 = vld [vmem:[%s984_s1 + $0x40] sm:$0xff]   ;;  %v742_v4 = vld [vmem:[%s984_s1 + $0x48] sm:$0xff]   ;;  %v746_v8 = vld [vmem:[%s984_s1 + $0x50] sm:$0xff]   ;;  %553 = vst [vmem:[%s986_s4] sm:$0x1] %v788_v46 }
   0x2   :  { %v739_v1 = vld [vmem:[%s984_s1] sm:$0xff]   ;;  %663 = vmatprep.subr.bf16.mxu0 %v738_v0  ;;  %v743_v5 = vld [vmem:[%s984_s1 + $0x8] sm:$0xff]   ;;  %v747_v9 = vld [vmem:[%s984_s1 + $0x10] sm:$0xff]   ;;  %554 = vst [vmem:[%s987_s5] sm:$0x1] %v788_v46 }
   0x3   :  { %v740_v2 = vld [vmem:[%s984_s1 + $0xc0] sm:$0xff]   ;;  %664 = vmatpush3.bf16.msra.mxu0 %v739_v1  ;;  %v744_v6 = vld [vmem:[%s984_s1 + $0xc8] sm:$0xff]   ;;  %v748_v10 = vld [vmem:[%s984_s1 + $0xd0] sm:$0xff]  }
   0x4   :  { %v741_v3 = vld [vmem:[%s984_s1 + $0x80] sm:$0xff]   ;;  %691 = vmatprep.subr.bf16.mxu1 %v740_v2  ;;  %665 = vmatprep.subr.bf16.mxu0 %v742_v4  ;;  %v745_v7 = vld [vmem:[%s984_s1 + $0x88] sm:$0xff]   ;;  %v749_v11 = vld [vmem:[%s984_s1 + $0x90] sm:$0xff]  }
   0x5   :  { %692 = vmatpush3.bf16.msra.mxu1 %v741_v3  ;;  %v750_v12 = vld [vmem:[%s984_s1 + $0x58] sm:$0xff]   ;;  %v754_v16 = vld [vmem:[%s984_s1 + $0x60] sm:$0xff]   ;;  %v758_v20 = vld [vmem:[%s984_s1 + $0x68] sm:$0xff]  }
   0x6   :  { %693 = vmatprep.subr.bf16.mxu1 %v744_v6  ;;  %v751_v13 = vld [vmem:[%s984_s1 + $0x18] sm:$0xff]   ;;  %v755_v17 = vld [vmem:[%s984_s1 + $0x20] sm:$0xff]   ;;  %v759_v21 = vld [vmem:[%s984_s1 + $0x28] sm:$0xff]  }
   0x7   :  { %666 = vmatpush3.bf16.msra.mxu0 %v743_v5  ;;  %v752_v14 = vld [vmem:[%s984_s1 + $0xd8] sm:$0xff]   ;;  %v756_v18 = vld [vmem:[%s984_s1 + $0xe0] sm:$0xff]   ;;  %v760_v22 = vld [vmem:[%s984_s1 + $0xe8] sm:$0xff]  }
   0x8   :  { %667 = vmatprep.subr.bf16.mxu0 %v746_v8  ;;  %v753_v15 = vld [vmem:[%s984_s1 + $0x98] sm:$0xff]   ;;  %v757_v19 = vld [vmem:[%s984_s1 + $0xa0] sm:$0xff]   ;;  %v761_v23 = vld [vmem:[%s984_s1 + $0xa8] sm:$0xff]  }
   0x9   :  { %694 = vmatpush3.bf16.msra.mxu1 %v745_v7  ;;  %v762_v24 = vld [vmem:[%s984_s1 + $0x70] sm:$0xff]   ;;  %v766_v28 = vld [vmem:[%s984_s1 + $0x78] sm:$0xff]   ;;  %v773_v34 = vld [vmem:[%s984_s1 + $0x100] sm:$0xff]  }
   0xa   :  { %695 = vmatprep.subr.bf16.mxu1 %v748_v10  ;;  %v763_v25 = vld [vmem:[%s984_s1 + $0x30] sm:$0xff]   ;;  %v767_v29 = vld [vmem:[%s984_s1 + $0x38] sm:$0xff]   ;;  %v776_v36 = vld [vmem:[%s985_s0 + $0xc] ss:$20 sps:$4 sm:$0xff]  }
   0xb   :  { %668 = vmatpush3.bf16.msra.mxu0 %v747_v9  ;;  %v764_v26 = vld [vmem:[%s984_s1 + $0xf0] sm:$0xff]   ;;  %v768_v30 = vld [vmem:[%s984_s1 + $0xf8] sm:$0xff]   ;;  %v777_v37 = vld [vmem:[%s984_s1 + $0x108] sm:$0xff]   ;;  %463 = vmatprep.mubr.bf16.mxu1 %v776_v36 }
   0xc   :  { %669 = vmatprep.subr.bf16.mxu0 %v750_v12  ;;  %v765_v27 = vld [vmem:[%s984_s1 + $0xb0] sm:$0xff]   ;;  %v771_v32 = vld [vmem:[%s985_s0 + $0x4] ss:$20 sps:$4 sm:$0xff]   ;;  %v774_v35 = vld [vmem:[%s985_s0 + $0x8] ss:$20 sps:$4 sm:$0xff]  }
   0xd   :  { %696 = vmatpush3.bf16.msra.mxu1 %v749_v11  ;;  %v769_v31 = vld [vmem:[%s985_s0] ss:$20 sps:$4 sm:$0xff]   ;;  %v772_v33 = vld [vmem:[%s984_s1 + $0xb8] sm:$0xff]   ;;  %414 = vmatprep.mubr.bf16.mxu0 %v771_v32  ;;  %v784_v42 = vld [vmem:[%s985_s0 + $0x30] ss:$20 sps:$4 sm:$0xff]  }
   0xe   :  { %697 = vmatprep.subr.bf16.mxu1 %v752_v14  ;;  %v778_v38 = vld [vmem:[%s985_s0 + $0x2c] ss:$20 sps:$4 sm:$0xff]   ;;  %v780_v39 = vld [vmem:[%s985_s0 + $0x28] ss:$20 sps:$4 sm:$0xff]   ;;  %v781_v40 = vld [vmem:[%s984_s1 + $0x110] sm:$0xff]  }
   0xf   :  { %670 = vmatpush3.bf16.msra.mxu0 %v751_v13  ;;  %v782_v41 = vld [vmem:[%s985_s0 + $0x34] ss:$20 sps:$4 sm:$0xff]   ;;  %v785_v43 = vld [vmem:[%s984_s1 + $0x118] sm:$0xff]   ;;  %v786_v44 = vld [vmem:[%s985_s0 + $0x10] ss:$20 sps:$4 sm:$0xff]  }
  0x10   :  { %671 = vmatprep.subr.bf16.mxu0 %v754_v16  ;;  %v787_v45 = vld [vmem:[%s985_s0 + $0x38] ss:$20 sps:$4 sm:$0xff]   ;;  %v595_v48 = vld [vmem:[%s988_s2] ss:$0 sm:$0xff] }
  0x11   :  { %698 = vmatpush3.bf16.msra.mxu1 %v753_v15 }
  0x12   :  { %699 = vmatprep.subr.bf16.mxu1 %v756_v18 }
  0x13   :  { %672 = vmatpush3.bf16.msra.mxu0 %v755_v17 }
  0x14   :  { %673 = vmatprep.subr.bf16.mxu0 %v758_v20 }
  0x15   :  { %700 = vmatpush3.bf16.msra.mxu1 %v757_v19 }
  0x16   :  { %701 = vmatprep.subr.bf16.mxu1 %v760_v22 }
  0x17   :  { %674 = vmatpush3.bf16.msra.mxu0 %v759_v21 }
  0x18   :  { %675 = vmatprep.subr.bf16.mxu0 %v762_v24 }
  0x19   :  { %702 = vmatpush3.bf16.msra.mxu1 %v761_v23 }
  0x1a   :  { %703 = vmatprep.subr.bf16.mxu1 %v764_v26 }
  0x1b   :  { %676 = vmatpush3.bf16.msra.mxu0 %v763_v25 }
  0x1c   :  { %677 = vmatprep.subr.bf16.mxu0 %v766_v28 }
  0x1d   :  { %704 = vmatpush3.bf16.msra.mxu1 %v765_v27 }
  0x1e   :  { %705 = vmatprep.subr.bf16.mxu1 %v768_v30 }
  0x1f   :  { %678 = vmatpush3.bf16.msra.mxu0 %v767_v29 }
  0x20   :  { %725 = vmatprep.subr.bf16.mxu0 %v773_v34 }
  0x21   :  { %706 = vmatpush3.bf16.msra.mxu1 %v772_v33 }
  0x22   :  { %415 = vmatmul.mubr.bf16.vlgmr.msra.gmra.mrb[0].mxu0 %v769_v31 }
  0x23   :  { %726 = vmatpush3.bf16.msra.mxu0 %v773_v34  ;;  %422 = vmatprep.mubr.bf16.mxu0 %v778_v38 }
  0x24   :  { %464 = vmatmul.mubr.bf16.vlgmr.msra.gmra.mrb[0].mxu1 %v774_v35  ;;  %727 = vmatprep.subr.bf16.mxu0 %v777_v37 }
  0x25   :  { %471 = vmatprep.mubr.bf16.mxu1 %v782_v41 }
  0x27   :  { %728 = vmatpush3.bf16.msra.mxu0 %v777_v37 }
  0x28   :  { %729 = vmatprep.subr.bf16.mxu0 %v781_v40 }
  0x2a   :  { %423 = vmatmul.mubr.bf16.gmra.mrb[4].mxu0 %v780_v39 }
  0x2b   :  { %733 = vmatprep.mubr.msk.bf16.mxu0 %vm375_vm0, %v786_v44  ;;  %730 = vmatpush3.bf16.msra.mxu0 %v781_v40 }
  0x2c   :  { %472 = vmatmul.mubr.bf16.gmra.mrb[4].mxu1 %v784_v42  ;;  %731 = vmatprep.subr.bf16.mxu0 %v785_v43 }
  0x2f   :  { %732 = vmatpush3.bf16.msra.mxu0 %v785_v43 }
  0x32   :  { %734 = vmatmul.mubr.msk.bf16.vlgmr.msra.gmra.mrb[8].mxu0 %vm375_vm0, %v787_v45  ;;  %v555_v45 = vld [vmem:[%s986_s4] sm:$0x1] }
  0xf5   :  { %v679_v47 = vpop.f32.mrb[0].mxu0 }
  0xf6   :  { %v680_v49 = vpop.f32.mrb[1].mxu0 }
  0xf7   :  { %v681_v50 = vadd.f32 %v680_v49, %v679_v47  ;;  %v682_v51 = vpop.f32.mrb[2].mxu0  ;;  %v707_v52 = vpop.f32.mrb[0].mxu1 }
  0xf8   :  { %v683_v53 = vpop.f32.mrb[3].mxu0  ;;  %v708_v56 = vpop.f32.mrb[1].mxu1 }
  0xf9   :  { %v417_v54 = vadd.f32 %v681_v50, %v595_v48  ;;  %v684_v55 = vadd.f32 %v683_v53, %v682_v51  ;;  %v709_v57 = vadd.f32 %v708_v56, %v707_v52  ;;  %v710_v58 = vpop.f32.mrb[2].mxu1 }
  0xfa   :  { %v711_v60 = vpop.f32.mrb[3].mxu1 }
  0xfb   :  { %v420_v59 = vadd.f32 %v684_v55, %v595_v48  ;;  %v712_v61 = vadd.f32 %v711_v60, %v710_v58  ;;  %v466_v62 = vadd.f32 %v709_v57, %v417_v54 }
  0xfd   :  { %v685_v63 = vpop.f32.mrb[4].mxu0  ;;  %v469_v1 = vadd.f32 %v712_v61, %v420_v59 }
  0xfe   :  { %v686_v0 = vpop.f32.mrb[5].mxu0 }
  0xff   :  { %v687_v2 = vadd.f32 %v686_v0, %v685_v63  ;;  %v688_v3 = vpop.f32.mrb[6].mxu0  ;;  %v713_v4 = vpop.f32.mrb[4].mxu1 }
 0x100   :  { %v689_v5 = vpop.f32.mrb[7].mxu0  ;;  %v714_v8 = vpop.f32.mrb[5].mxu1 }
 0x101   :  { %v425_v6 = vadd.f32 %v687_v2, %v595_v48  ;;  %v690_v7 = vadd.f32 %v689_v5, %v688_v3  ;;  %v715_v9 = vadd.f32 %v714_v8, %v713_v4  ;;  %v716_v10 = vpop.f32.mrb[6].mxu1 }
 0x102   :  { %v717_v12 = vpop.f32.mrb[7].mxu1 }
 0x103   :  { %v428_v11 = vadd.f32 %v690_v7, %v595_v48  ;;  %v718_v13 = vadd.f32 %v717_v12, %v716_v10  ;;  %v474_v14 = vadd.f32 %v715_v9, %v425_v6  ;;  %v567_v48 = vld [vmem:[%s987_s5] sm:$0x1] }
 0x105   :  { %v735_v15 = vpop.f32.mrb[8].mxu0  ;;  %v477_v16 = vadd.f32 %v718_v13, %v428_v11 }
 0x106   :  { %v523_v17 = vadd.f32 %v735_v15, %v474_v14  ;;  %v514_v18 = vpop.f32.mrb[9].mxu0 }
 0x107   :  { %v515_v19 = vadd.f32 %v514_v18, %v466_v62  ;;  %v736_v20 = vpop.f32.mrb[10].mxu0 }
 0x108   :  { %v526_v21 = vadd.f32 %v736_v20, %v477_v16  ;;  %v517_v22 = vpop.f32.mrb[11].mxu0  ;;  %v570_v29 = vmul.f32 %v523_v17, %v523_v17 }
 0x109   :  { %v518_v23 = vadd.f32 %v517_v22, %v469_v1  ;;  %v568_v25 = vmul.f32 %v515_v19, %v515_v19 }
 0x10a   :  { %v660_v24 = vpack.c.bf16 %v526_v21, %v523_v17  ;;  %v571_v32 = vmul.f32 %v526_v21, %v526_v21 }
 0x10b   :  { %v655_v26 = vpack.c.bf16 %v518_v23, %v515_v19  ;;  %v556_v27 = vadd.f32 %v518_v23, %v515_v19  ;;  %v569_v28 = vmul.f32 %v518_v23, %v518_v23 }
 0x10c   :  { %662 = vst [vmem:[%s989_s3 + $0x8] sm:$0xff] %v660_v24  }
 0x10d   :  { %656 = vst [vmem:[%s989_s3] sm:$0xff] %v655_v26   ;;  %v557_v30 = vadd.f32 %v556_v27, %v523_v17  ;;  %v572_v31 = vadd.f32 %v569_v28, %v568_v25 }
 0x10f   :  { %v558_v33 = vadd.f32 %v557_v30, %v526_v21  ;;  %v573_v34 = vadd.f32 %v572_v31, %v570_v29 }
 0x111   :  { %v559_v35 = vrot.slane %v558_v33, 4  ;;  %v574_v36 = vadd.f32 %v573_v34, %v571_v32 }
 0x113   :  { %v560_v37 = vadd.f32 %v559_v35, %v558_v33  ;;  %v575_v38 = vrot.slane %v574_v36, 4 }
 0x115   :  { %v561_v39 = vrot.slane %v560_v37, 2  ;;  %v576_v40 = vadd.f32 %v575_v38, %v574_v36 }
 0x117   :  { %v562_v41 = vadd.f32 %v561_v39, %v560_v37  ;;  %v577_v42 = vrot.slane %v576_v40, 2 }
 0x119   :  { %v563_v43 = vrot.slane %v562_v41, 1  ;;  %v578_v44 = vadd.f32 %v577_v42, %v576_v40 }
 0x11b   :  { %v564_v46 = vadd.f32 %v563_v43, %v562_v41  ;;  %v579_v47 = vrot.slane %v578_v44, 1 }
 0x11d   :  { %v565_v49 = vadd.f32 %v564_v46, %v555_v45  ;;  %v580_v50 = vadd.f32 %v579_v47, %v578_v44 }
 0x11f   :  { %566 = vst [vmem:[%s986_s4] sm:$0x1] %v565_v49  ;;  %v581_v51 = vadd.f32 %v580_v50, %v567_v48 }
 0x121   :  { %582 = vst [vmem:[%s987_s5] sm:$0x1] %v581_v51 }

// kernel: blur_generator_forward.93
= control target key start
LH: loop header
LB: loop body
LE: loop exit
PB: predicated region body
PF: predicated region fallthrough
CT: control target
= control target key end

     0   :  { %s548_s12 = smov 0   ;;  %s550_s13 = smov 0   ;;  %s604_s0 = inlined_call_operand.vmem [shape: bf16[2,64,16], index: 0, kind: input, shape index: {}]   ;;  %s605_s1 = inlined_call_operand.vmem [shape: f32[2,1,16], index: 1, kind: input, shape index: {}]   ;;  %s606_s2 = inlined_call_operand.vmem [shape: f32[2,1,16], index: 2, kind: input, shape index: {}]   ;;  %s607_s3 = inlined_call_operand.vmem [shape: bf16[2,64,16], index: 3, kind: output, shape index: {}]  }
   0x1   :  { %s552_s14 = smov 0  }
   0x2 LB: > { %s25_s15 = sadd.s32 1, %s522_s13  ;;  %p434_p0 = scmp.ge.s32.totalorder %s526_s14, 1  ;;  %s526_s14 = sphi %s552_s14, %s13_s14   ;;  %s522_s13 = sphi %s550_s13, %s609_s13   ;;  %s518_s12 = sphi %s548_s12, %s608_s12  }
   0x3   : > { %p27_p1 = scmp.ge.s32.totalorder %s25_s15, 2  ;;  %p174_p2 = scmp.lt.s32.totalorder %s526_s14, 3 }
   0x5   : > { %s611_s15 = smov (%p27_p1, %s25_s15), 0  ;;  %p175_p3 = pnand %p434_p0, %p174_p2 }
   0x6   : > { %p213_p4 = scmp.lt.s32.totalorder (!%p175_p3), %s518_s12, 1  ;;  %vm316_vm0 = vcmask (!%p175_p3), 125952  }
   0x7   : > { %178 = sbr.rel (%p175_p3) target bundleno = 30 (0x1e), region = 32 }
   0xe   : > { %s613_s12 = smov (!%p213_p4, %s518_s12), 1 }
   0xf   : > { %s451_s16 = sshll.u32 %s613_s12, 5  ;;  %s224_s19 = scalar_lea.vmem %s605_s1, %s613_s12 }
  0x10   : > { %s220_s22 = scalar_lea.vmem %s604_s0, %s451_s16  ;;  %s227_s25 = scalar_lea.vmem %s606_s2, %s613_s12  ;;  %v439_v1 = vld [vmem:[%s224_s19] ss:$0 sm:$0xff] }
  0x11   : > { %v462_v0 = vld [vmem:[%s220_s22] sm:$0xff]   ;;  %v477_v2 = vld [vmem:[%s220_s22 + $0x8] sm:$0xff]   ;;  %v478_v7 = vld [vmem:[%s220_s22 + $0x10] sm:$0xff]   ;;  %s236_s28 = scalar_lea.vmem %s607_s3, %s451_s16 }
  0x12   : > { %v463_v3 = vunpack.c.l.bf16 %v462_v0  ;;  %v464_v4 = vunpack.c.h.bf16 %v462_v0  ;;  %v467_v5 = vunpack.c.l.bf16 %v477_v2  ;;  %v468_v6 = vunpack.c.h.bf16 %v477_v2  ;;  %v479_v8 = vld [vmem:[%s220_s22 + $0x18] sm:$0xff]   ;;  %v440_v9 = vld [vmem:[%s227_s25] ss:$0 sm:$0xff] }
  0x13   : > { %v471_v10 = vunpack.c.l.bf16 %v478_v7  ;;  %v472_v11 = vunpack.c.h.bf16 %v478_v7  ;;  %v475_v12 = vunpack.c.l.bf16 %v479_v8  ;;  %v476_v13 = vunpack.c.h.bf16 %v479_v8 }
  0x14   : > { %v261_v14 = vmul.f32 %v463_v3, %v439_v1  ;;  %v262_v15 = vmul.f32 %v464_v4, %v439_v1  ;;  %v263_v16 = vmul.f32 %v467_v5, %v439_v1  ;;  %v264_v17 = vmul.f32 %v468_v6, %v439_v1 }
  0x15   : > { %v265_v18 = vmul.f32 %v471_v10, %v439_v1  ;;  %v266_v19 = vmul.f32 %v472_v11, %v439_v1  ;;  %v267_v20 = vmul.f32 %v475_v12, %v439_v1  ;;  %v268_v21 = vmul.f32 %v476_v13, %v439_v1 }
  0x16   : > { %v276_v22 = vadd.f32 %v440_v9, %v261_v14  ;;  %v277_v23 = vadd.f32 %v440_v9, %v262_v15  ;;  %v278_v24 = vadd.f32 %v440_v9, %v263_v16  ;;  %v279_v25 = vadd.f32 %v440_v9, %v264_v17 }
  0x17   : > { %v280_v26 = vadd.f32 %v440_v9, %v265_v18  ;;  %v281_v27 = vadd.f32 %v440_v9, %v266_v19  ;;  %v282_v28 = vadd.f32 %v440_v9, %v267_v20  ;;  %v283_v29 = vadd.f32 %v440_v9, %v268_v21 }
  0x18   : > { %v453_v30 = vpack.c.bf16 %v276_v22, %v276_v22  ;;  %v454_v31 = vpack.c.bf16 %v277_v23, %v277_v23  ;;  %v455_v32 = vpack.c.bf16 %v278_v24, %v278_v24  ;;  %v456_v33 = vpack.c.bf16 %v279_v25, %v279_v25 }
  0x19   : > { %v457_v34 = vpack.c.bf16 %v280_v26, %v280_v26  ;;  %v458_v35 = vpack.c.bf16 %v281_v27, %v281_v27  ;;  %v459_v36 = vpack.c.bf16 %v282_v28, %v282_v28  ;;  %v460_v37 = vpack.c.bf16 %v283_v29, %v283_v29 }
  0x1a   : > { %317 = vst.msk [vmem:[%s236_s28] sm:$0xf] %vm316_vm0, %v453_v30  ;;  %318 = vst.msk [vmem:[%s236_s28 + $0x4] sm:$0xf] %vm316_vm0, %v454_v31 }
  0x1b   : > { %319 = vst.msk [vmem:[%s236_s28 + $0x8] sm:$0xf] %vm316_vm0, %v455_v32  ;;  %320 = vst.msk [vmem:[%s236_s28 + $0xc] sm:$0xf] %vm316_vm0, %v456_v33 }
  0x1c   : > { %321 = vst.msk [vmem:[%s236_s28 + $0x10] sm:$0xf] %vm316_vm0, %v457_v34  ;;  %322 = vst.msk [vmem:[%s236_s28 + $0x14] sm:$0xf] %vm316_vm0, %v458_v35 }
  0x1d   : > { %323 = vst.msk [vmem:[%s236_s28 + $0x18] sm:$0xf] %vm316_vm0, %v459_v36  ;;  %324 = vst.msk [vmem:[%s236_s28 + $0x1c] sm:$0xf] %vm316_vm0, %v460_v37 }
  0x1e PF: > { %s13_s14 = sadd.s32 1, %s526_s14   ;;  %s608_s12 = smov %s522_s13 }
  0x1f   : > { %p10_p5 = scmp.ge.s32.totalorder %s13_s14, 4   ;;  %s609_s13 = smov %s611_s15 }
  0x21   :  { %12 = sbr.rel (!%p10_p5) target bundleno = 2 (0x2), region = 68 }

// kernel: tile.28
= control target key start
LH: loop header
LB: loop body
LE: loop exit
PB: predicated region body
PF: predicated region fallthrough
CT: control target
= control target key end

     0   :  { %s22_s0 = inlined_call_operand.vmem [shape: f32[8], index: 0, kind: input, shape index: {}]   ;;  %s23_s1 = inlined_call_operand.vmem [shape: f32[4,8], index: 1, kind: output, shape index: {}]  }
   0x1   :  { %v4_v0 = vld [vmem:[%s22_s0] ss:$0 sm:$0xff] }
   0x2   :  { %5 = vst [vmem:[%s23_s1] sm:$0xf] %v4_v0 }

// kernel: tile.29
= control target key start
LH: loop header
LB: loop body
LE: loop exit
PB: predicated region body
PF: predicated region fallthrough
CT: control target
= control target key end

     0   :  { %vm7_vm0 = vcmask 64512   ;;  %s37_s8 = smov 8   ;;  %s38_s9 = smov 16   ;;  %vm13_vm1 = vcmask 261312   ;;  %vm19_vm2 = vcmask 195712   ;;  %vm25_vm3 = vcmask 130112   ;;  %s55_s0 = inlined_call_operand.vmem [shape: f32[4,8], index: 0, kind: input, shape index: {}]   ;;  %s56_s1 = inlined_call_operand.vmem [shape: f32[32], index: 1, kind: output, shape index: {}]  }
   0x1   :  { %v4_v0 = vld [vmem:[%s55_s0] sm:$0xf]  ;;  %s36_s0 = smov 24  }
   0x2   :  { %5 = vst [vmem:[#allocation1] sm:$0xf] %v4_v0 }
   0x9   :  { %v10_v1 = vld [vmem:[#allocation1 + $0x3] sm:$0x1]   ;;  %v22_v2 = vld [vmem:[#allocation1 + $0x1] sm:$0x1]   ;;  %v6_v3 = vld [vmem:[#allocation1] sm:$0x1]  }
   0xa   :  { %11 = vrot.lane.b32.xlu0 %v10_v1, %s36_s0  ;;  %23 = vrot.lane.b32.xlu1 %v22_v2, %s37_s8  ;;  %v16_v4 = vld [vmem:[#allocation1 + $0x2] sm:$0x1]   ;;  %8 = vst.msk [vmem:[#allocation0] sm:$0x1] %vm7_vm0, %v6_v3  }
   0xe   :  { %17 = vrot.lane.b32.xlu0 %v16_v4, %s38_s9 }
  0x7c   :  { %v12_v5 = vpop.permute.xlu0 %11   ;;  %v24_v6 = vpop.permute.xlu1 %23  }
  0x7d   :  { %14 = vst.msk [vmem:[#allocation0] sm:$0x1] %vm13_vm1, %v12_v5  }
  0x80   :  { %v18_v7 = vpop.permute.xlu0 %17  }
  0x81   :  { %20 = vst.msk [vmem:[#allocation0] sm:$0x1] %vm19_vm2, %v18_v7  }
  0x82   :  { %26 = vst.msk [vmem:[#allocation0] sm:$0x1] %vm25_vm3, %v24_v6  }
  0x89   :  { %v30_v8 = vld [vmem:[#allocation0] sm:$0x1] }
  0x8a   :  { %32 = vst [vmem:[%s56_s1] sm:$0x1] %v30_v8 }

// kernel: blur_generator_forward.98
= control target key start
LH: loop header
LB: loop body
LE: loop exit
PB: predicated region body
PF: predicated region fallthrough
CT: control target
= control target key end

     0   :  { %vm86_vm0 = vcmask 130048   ;;  %s509_s1 = inlined_call_operand.vmem [shape: bf16[16,128], index: 1, kind: input, shape index: {}]   ;;  %s510_s0 = inlined_call_operand.vmem [shape: bf16[128,16], index: 0, kind: input, shape index: {}]   ;;  %s511_s2 = inlined_call_operand.vmem [shape: f32[1,128], index: 2, kind: input, shape index: {}]   ;;  %s512_s3 = inlined_call_operand.vmem [shape: bf16[128,128], index: 3, kind: output, shape index: {}]  }
   0x1   :  { %v418_v0 = vld [vmem:[%s509_s1] sm:$0xff]   ;;  %v421_v3 = vld [vmem:[%s510_s0 + $0x8] sm:$0xff]   ;;  %v423_v5 = vld [vmem:[%s510_s0 + $0x10] sm:$0xff]  }
   0x2   :  { %v419_v1 = vld [vmem:[%s510_s0] sm:$0xff]   ;;  %398 = vmatprep.subr.bf16.mxu0 %v418_v0  ;;  %416 = vmatprep.subr.bf16.mxu1 %v418_v0  ;;  %v422_v4 = vld [vmem:[%s510_s0 + $0x28] sm:$0xff]   ;;  %v424_v6 = vld [vmem:[%s510_s0 + $0x30] sm:$0xff]  }
   0x3   :  { %v420_v2 = vld [vmem:[%s510_s0 + $0x20] sm:$0xff]   ;;  %399 = vmatpush3.bf16.msra.mxu0 %v418_v0  ;;  %417 = vmatpush3.bf16.msra.mxu1 %v418_v0  ;;  %v425_v7 = vld [vmem:[%s510_s0 + $0x18] sm:$0xff]  }
   0x4   :  { %400 = vmatprep.mubr.msk.bf16.mxu0 %vm86_vm0, %v419_v1  ;;  %408 = vmatprep.mubr.msk.bf16.mxu1 %vm86_vm0, %v420_v2  ;;  %v426_v8 = vld [vmem:[%s510_s0 + $0x38] sm:$0xff]   ;;  %v292_v10 = vld [vmem:[%s511_s2] ss:$0 sm:$0xff] }
   0x6   :  { %401 = vmatmul.mubr.msk.bf16.vlgmr.msra.gmra.mrb[0].mxu0 %vm86_vm0, %v421_v3  ;;  %409 = vmatmul.mubr.msk.bf16.vlgmr.msra.gmra.mrb[0].mxu1 %vm86_vm0, %v422_v4 }
   0x7   :  { %404 = vmatprep.mubr.msk.bf16.mxu0 %vm86_vm0, %v423_v5  ;;  %412 = vmatprep.mubr.msk.bf16.mxu1 %vm86_vm0, %v424_v6 }
   0xe   :  { %405 = vmatmul.mubr.msk.bf16.gmra.mrb[4].mxu0 %vm86_vm0, %v425_v7  ;;  %413 = vmatmul.mubr.msk.bf16.gmra.mrb[4].mxu1 %vm86_vm0, %v426_v8 }
  0xd9   :  { %v402_v9 = vpop.f32.mrb[0].mxu0  ;;  %v410_v11 = vpop.f32.mrb[0].mxu1 }
  0xda   :  { %v145_v12 = vpop.f32.mrb[1].mxu0  ;;  %v177_v13 = vpop.f32.mrb[1].mxu1  ;;  %v154_v16 = vadd.f32 %v402_v9, %v292_v10  ;;  %v186_v17 = vadd.f32 %v410_v11, %v292_v10 }
  0xdb   :  { %v403_v14 = vpop.f32.mrb[2].mxu0  ;;  %v411_v15 = vpop.f32.mrb[2].mxu1  ;;  %v146_v22 = vadd.f32 %v292_v10, %v145_v12  ;;  %v178_v23 = vadd.f32 %v292_v10, %v177_v13 }
  0xdc   :  { %v157_v18 = vadd.f32 %v403_v14, %v292_v10  ;;  %v189_v19 = vadd.f32 %v411_v15, %v292_v10  ;;  %v148_v20 = vpop.f32.mrb[3].mxu0  ;;  %v180_v21 = vpop.f32.mrb[3].mxu1 }
  0xdd   :  { %v149_v24 = vadd.f32 %v292_v10, %v148_v20  ;;  %v181_v25 = vadd.f32 %v292_v10, %v180_v21 }
  0xde   :  { %v350_v26 = vpack.c.bf16 %v157_v18, %v154_v16  ;;  %v370_v27 = vpack.c.bf16 %v189_v19, %v186_v17 }
  0xdf   :  { %v345_v28 = vpack.c.bf16 %v149_v24, %v146_v22  ;;  %v365_v29 = vpack.c.bf16 %v181_v25, %v178_v23 }
  0xe0   :  { %382 = vst [vmem:[%s512_s3 + $0x8] sm:$0xff] %v350_v26   ;;  %386 = vst [vmem:[%s512_s3 + $0x28] sm:$0xff] %v370_v27  }
  0xe1   :  { %346 = vst [vmem:[%s512_s3] sm:$0xff] %v345_v28   ;;  %385 = vst [vmem:[%s512_s3 + $0x20] sm:$0xff] %v365_v29   ;;  %v406_v30 = vpop.f32.mrb[4].mxu0  ;;  %v414_v31 = vpop.f32.mrb[4].mxu1 }
  0xe2   :  { %v161_v32 = vpop.f32.mrb[5].mxu0  ;;  %v193_v33 = vpop.f32.mrb[5].mxu1  ;;  %v170_v36 = vadd.f32 %v406_v30, %v292_v10  ;;  %v202_v37 = vadd.f32 %v414_v31, %v292_v10 }
  0xe3   :  { %v407_v34 = vpop.f32.mrb[6].mxu0  ;;  %v415_v35 = vpop.f32.mrb[6].mxu1  ;;  %v162_v42 = vadd.f32 %v292_v10, %v161_v32  ;;  %v194_v43 = vadd.f32 %v292_v10, %v193_v33 }
  0xe4   :  { %v173_v38 = vadd.f32 %v407_v34, %v292_v10  ;;  %v205_v39 = vadd.f32 %v415_v35, %v292_v10  ;;  %v164_v40 = vpop.f32.mrb[7].mxu0  ;;  %v196_v41 = vpop.f32.mrb[7].mxu1 }
  0xe5   :  { %v165_v44 = vadd.f32 %v292_v10, %v164_v40  ;;  %v197_v45 = vadd.f32 %v292_v10, %v196_v41 }
  0xe6   :  { %v360_v46 = vpack.c.bf16 %v173_v38, %v170_v36  ;;  %v380_v47 = vpack.c.bf16 %v205_v39, %v202_v37 }
  0xe7   :  { %v355_v48 = vpack.c.bf16 %v165_v44, %v162_v42  ;;  %v375_v49 = vpack.c.bf16 %v197_v45, %v194_v43 }
  0xe8   :  { %384 = vst [vmem:[%s512_s3 + $0x18] sm:$0xff] %v360_v46   ;;  %388 = vst [vmem:[%s512_s3 + $0x38] sm:$0xff] %v380_v47  }
  0xe9   :  { %383 = vst [vmem:[%s512_s3 + $0x10] sm:$0xff] %v355_v48   ;;  %387 = vst [vmem:[%s512_s3 + $0x30] sm:$0xff] %v375_v49  }

// kernel: blur_generator_forward.94
= control target key start
LH: loop header
LB: loop body
LE: loop exit
PB: predicated region body
PF: predicated region fallthrough
CT: control target
= control target key end

     0   :  { %vm321_vm0 = vcmask 261120   ;;  %v993_v42 = vmov 0.0   ;;  %s1233_s1 = inlined_call_operand.vmem [shape: bf16[288,128], index: 1, kind: input, shape index: {}]   ;;  %s1234_s0 = inlined_call_operand.vmem [shape: bf16[128,288], index: 0, kind: input, shape index: {}]   ;;  %s1235_s4 = inlined_call_operand.vmem [shape: f32[1,128], index: 4, kind: output, shape index: {1}]   ;;  %s1236_s5 = inlined_call_operand.vmem [shape: f32[1,128], index: 5, kind: output, shape index: {2}]   ;;  %s1237_s2 = inlined_call_operand.vmem [shape: f32[1,128], index: 2, kind: input, shape index: {}]   ;;  %s1238_s3 = inlined_call_operand.vmem [shape: bf16[128,128], index: 3, kind: output, shape index: {0}]  }
   0x1   :  { %v943_v0 = vld [vmem:[%s1233_s1 + $0x40] sm:$0xff]   ;;  %v945_v2 = vld [vmem:[%s1233_s1 + $0x48] sm:$0xff]   ;;  %v947_v4 = vld [vmem:[%s1233_s1 + $0x50] sm:$0xff]   ;;  %624 = vst [vmem:[%s1235_s4] sm:$0x1] %v993_v42 }
   0x2   :  { %v944_v1 = vld [vmem:[%s1233_s1] sm:$0xff]   ;;  %832 = vmatprep.subr.bf16.mxu0 %v943_v0  ;;  %926 = vmatprep.subr.bf16.mxu1 %v943_v0  ;;  %v946_v3 = vld [vmem:[%s1233_s1 + $0x8] sm:$0xff]   ;;  %v948_v5 = vld [vmem:[%s1233_s1 + $0x10] sm:$0xff]   ;;  %625 = vst [vmem:[%s1236_s5] sm:$0x1] %v993_v42 }
   0x3   :  { %833 = vmatpush3.bf16.msra.mxu0 %v944_v1  ;;  %934 = vmatpush3.bf16.msra.mxu1 %v944_v1  ;;  %v949_v6 = vld [vmem:[%s1233_s1 + $0x58] sm:$0xff]   ;;  %v951_v8 = vld [vmem:[%s1233_s1 + $0x60] sm:$0xff]   ;;  %v953_v10 = vld [vmem:[%s1233_s1 + $0x68] sm:$0xff]  }
   0x4   :  { %834 = vmatprep.subr.bf16.mxu0 %v945_v2  ;;  %927 = vmatprep.subr.bf16.mxu1 %v945_v2  ;;  %v950_v7 = vld [vmem:[%s1233_s1 + $0x18] sm:$0xff]   ;;  %v952_v9 = vld [vmem:[%s1233_s1 + $0x20] sm:$0xff]   ;;  %v954_v13 = vld [vmem:[%s1233_s1 + $0x28] sm:$0xff]  }
   0x5   :  { %v961_v11 = vld [vmem:[%s1234_s0 + $0x4] ss:$12 sps:$4 sm:$0xff]   ;;  %v964_v12 = vld [vmem:[%s1234_s0 + $0x94] ss:$12 sps:$4 sm:$0xff]   ;;  %v957_v16 = vld [vmem:[%s1233_s1 + $0x78] sm:$0xff]  }
   0x6   :  { %v955_v14 = vld [vmem:[%s1233_s1 + $0x70] sm:$0xff]   ;;  %378 = vmatprep.mubr.bf16.mxu0 %v961_v11  ;;  %426 = vmatprep.mubr.bf16.mxu1 %v964_v12  ;;  %v958_v17 = vld [vmem:[%s1233_s1 + $0x38] sm:$0xff]   ;;  %v959_v18 = vld [vmem:[%s1234_s0] ss:$12 sps:$4 sm:$0xff]  }
   0x7   :  { %835 = vmatpush3.bf16.msra.mxu0 %v946_v3  ;;  %935 = vmatpush3.bf16.msra.mxu1 %v946_v3  ;;  %v956_v15 = vld [vmem:[%s1233_s1 + $0x30] sm:$0xff]   ;;  %v969_v19 = vld [vmem:[%s1233_s1 + $0x80] sm:$0xff]   ;;  %v965_v21 = vld [vmem:[%s1234_s0 + $0x1c] ss:$12 sps:$4 sm:$0xff]  }
   0x8   :  { %836 = vmatprep.subr.bf16.mxu0 %v947_v4  ;;  %928 = vmatprep.subr.bf16.mxu1 %v947_v4  ;;  %v962_v20 = vld [vmem:[%s1234_s0 + $0x90] ss:$12 sps:$4 sm:$0xff]   ;;  %v967_v22 = vld [vmem:[%s1234_s0 + $0xac] ss:$12 sps:$4 sm:$0xff]   ;;  %v971_v25 = vld [vmem:[%s1234_s0 + $0xa8] ss:$12 sps:$4 sm:$0xff]  }
   0x9   :  { %v972_v23 = vld [vmem:[%s1233_s1 + $0x88] sm:$0xff]   ;;  %v970_v24 = vld [vmem:[%s1234_s0 + $0x18] ss:$12 sps:$4 sm:$0xff]   ;;  %v973_v26 = vld [vmem:[%s1234_s0 + $0x34] ss:$12 sps:$4 sm:$0xff]  }
   0xa   :  { %v975_v27 = vld [vmem:[%s1234_s0 + $0x8] ss:$12 sps:$4 sm:$0xff]   ;;  %v976_v28 = vld [vmem:[%s1234_s0 + $0x30] ss:$12 sps:$4 sm:$0xff]   ;;  %v977_v29 = vld [vmem:[%s1234_s0 + $0x20] ss:$12 sps:$4 sm:$0xff]  }
   0xb   :  { %837 = vmatpush3.bf16.msra.mxu0 %v948_v5  ;;  %936 = vmatpush3.bf16.msra.mxu1 %v948_v5  ;;  %v978_v30 = vld [vmem:[%s1234_s0 + $0x4c] ss:$12 sps:$4 sm:$0xff]   ;;  %v981_v32 = vld [vmem:[%s1234_s0 + $0x48] ss:$12 sps:$4 sm:$0xff]   ;;  %v982_v33 = vld [vmem:[%s1234_s0 + $0x50] ss:$12 sps:$4 sm:$0xff]  }
   0xc   :  { %838 = vmatprep.subr.bf16.mxu0 %v949_v6  ;;  %929 = vmatprep.subr.bf16.mxu1 %v949_v6  ;;  %v980_v31 = vld [vmem:[%s1234_s0 + $0x38] ss:$12 sps:$4 sm:$0xff]   ;;  %v985_v35 = vld [vmem:[%s1234_s0 + $0x68] ss:$12 sps:$4 sm:$0xff]   ;;  %v986_v36 = vld [vmem:[%s1234_s0 + $0x60] ss:$12 sps:$4 sm:$0xff]  }
   0xd   :  { %v983_v34 = vld [vmem:[%s1234_s0 + $0x64] ss:$12 sps:$4 sm:$0xff]   ;;  %v987_v37 = vld [vmem:[%s1234_s0 + $0x80] ss:$12 sps:$4 sm:$0xff]   ;;  %v988_v38 = vld [vmem:[%s1234_s0 + $0x7c] ss:$12 sps:$4 sm:$0xff]  }
   0xe   :  { %v990_v39 = vld [vmem:[%s1234_s0 + $0x98] ss:$12 sps:$4 sm:$0xff]   ;;  %v992_v41 = vld [vmem:[%s1234_s0 + $0xb0] ss:$12 sps:$4 sm:$0xff]   ;;  %v1175_v3 = vld [vmem:[%s1237_s2] ss:$0 sm:$0xff] }
   0xf   :  { %839 = vmatpush3.bf16.msra.mxu0 %v950_v7  ;;  %937 = vmatpush3.bf16.msra.mxu1 %v950_v7  ;;  %v991_v40 = vld [vmem:[%s1234_s0 + $0x78] ss:$12 sps:$4 sm:$0xff]  }
  0x10   :  { %840 = vmatprep.subr.bf16.mxu0 %v951_v8  ;;  %930 = vmatprep.subr.bf16.mxu1 %v951_v8 }
  0x13   :  { %841 = vmatpush3.bf16.msra.mxu0 %v952_v9  ;;  %938 = vmatpush3.bf16.msra.mxu1 %v952_v9 }
  0x14   :  { %842 = vmatprep.subr.bf16.mxu0 %v953_v10  ;;  %931 = vmatprep.subr.bf16.mxu1 %v953_v10 }
  0x17   :  { %843 = vmatpush3.bf16.msra.mxu0 %v954_v13  ;;  %939 = vmatpush3.bf16.msra.mxu1 %v954_v13 }
  0x18   :  { %844 = vmatprep.subr.bf16.mxu0 %v955_v14  ;;  %932 = vmatprep.subr.bf16.mxu1 %v955_v14 }
  0x1b   :  { %845 = vmatpush3.bf16.msra.mxu0 %v956_v15  ;;  %940 = vmatpush3.bf16.msra.mxu1 %v956_v15 }
  0x1c   :  { %846 = vmatprep.subr.bf16.mxu0 %v957_v16  ;;  %933 = vmatprep.subr.bf16.mxu1 %v957_v16 }
  0x1f   :  { %847 = vmatpush3.bf16.msra.mxu0 %v958_v17  ;;  %941 = vmatpush3.bf16.msra.mxu1 %v958_v17 }
  0x20   :  { %906 = vmatprep.subr.bf16.mxu1 %v969_v19 }
  0x22   :  { %379 = vmatmul.mubr.bf16.vlgmr.msra.gmra.mrb[0].mxu0 %v959_v18  ;;  %427 = vmatmul.mubr.bf16.vlgmr.msra.gmra.mrb[0].mxu1 %v962_v20 }
  0x23   :  { %386 = vmatprep.mubr.bf16.mxu0 %v965_v21  ;;  %434 = vmatprep.mubr.bf16.mxu1 %v967_v22 }
  0x24   :  { %907 = vmatpush3.bf16.msra.mxu1 %v969_v19 }
  0x25   :  { %908 = vmatprep.subr.bf16.mxu1 %v972_v23 }
  0x28   :  { %909 = vmatpush3.bf16.msra.mxu1 %v972_v23 }
  0x2a   :  { %387 = vmatmul.mubr.bf16.gmra.mrb[4].mxu0 %v970_v24  ;;  %435 = vmatmul.mubr.bf16.gmra.mrb[4].mxu1 %v971_v25 }
  0x2b   :  { %394 = vmatprep.mubr.bf16.mxu0 %v973_v26  ;;  %910 = vmatprep.mubr.msk.bf16.mxu1 %vm321_vm0, %v975_v27 }
  0x32   :  { %395 = vmatmul.mubr.bf16.gmra.mrb[8].mxu0 %v976_v28  ;;  %911 = vmatmul.mubr.msk.bf16.vlgmr.msra.gmra.mrb[8].mxu1 %vm321_vm0, %v977_v29 }
  0x33   :  { %402 = vmatprep.mubr.bf16.mxu0 %v978_v30  ;;  %914 = vmatprep.mubr.msk.bf16.mxu1 %vm321_vm0, %v980_v31 }
  0x3a   :  { %403 = vmatmul.mubr.bf16.gmra.mrb[12].mxu0 %v981_v32  ;;  %915 = vmatmul.mubr.msk.bf16.gmra.mrb[12].mxu1 %vm321_vm0, %v982_v33 }
  0x3b   :  { %410 = vmatprep.mubr.bf16.mxu0 %v983_v34  ;;  %918 = vmatprep.mubr.msk.bf16.mxu1 %vm321_vm0, %v985_v35 }
  0x42   :  { %411 = vmatmul.mubr.bf16.gmra.mrb[16].mxu0 %v986_v36  ;;  %919 = vmatmul.mubr.msk.bf16.gmra.mrb[16].mxu1 %vm321_vm0, %v987_v37 }
  0x43   :  { %418 = vmatprep.mubr.bf16.mxu0 %v988_v38  ;;  %922 = vmatprep.mubr.msk.bf16.mxu1 %vm321_vm0, %v990_v39 }
  0x4a   :  { %419 = vmatmul.mubr.bf16.gmra.mrb[20].mxu0 %v991_v40  ;;  %923 = vmatmul.mubr.msk.bf16.gmra.mrb[20].mxu1 %vm321_vm0, %v992_v41 }
  0xf5   :  { %v848_v43 = vpop.f32.mrb[0].mxu0  ;;  %v884_v44 = vpop.f32.mrb[0].mxu1 }
  0xf6   :  { %v849_v45 = vpop.f32.mrb[1].mxu0  ;;  %v885_v46 = vpop.f32.mrb[1].mxu1 }
  0xf7   :  { %v850_v47 = vadd.f32 %v849_v45, %v848_v43  ;;  %v851_v48 = vpop.f32.mrb[2].mxu0  ;;  %v1164_v49 = vadd.f32 %v885_v46, %v884_v44  ;;  %v887_v50 = vpop.f32.mrb[2].mxu1 }
  0xf8   :  { %v852_v51 = vpop.f32.mrb[3].mxu0  ;;  %v888_v52 = vpop.f32.mrb[3].mxu1 }
  0xf9   :  { %v853_v53 = vadd.f32 %v852_v51, %v851_v48  ;;  %v1166_v54 = vadd.f32 %v888_v52, %v887_v50  ;;  %v381_v7 = vadd.f32 %v850_v47, %v1175_v3 }
  0xfb   :  { %v384_v16 = vadd.f32 %v853_v53, %v1175_v3 }
  0xfd   :  { %v854_v55 = vpop.f32.mrb[4].mxu0  ;;  %v890_v56 = vpop.f32.mrb[4].mxu1 }
  0xfe   :  { %v855_v57 = vpop.f32.mrb[5].mxu0  ;;  %v891_v58 = vpop.f32.mrb[5].mxu1 }
  0xff   :  { %v856_v59 = vadd.f32 %v855_v57, %v854_v55  ;;  %v857_v60 = vpop.f32.mrb[6].mxu0  ;;  %v1168_v61 = vadd.f32 %v891_v58, %v890_v56  ;;  %v893_v62 = vpop.f32.mrb[6].mxu1 }
 0x100   :  { %v858_v63 = vpop.f32.mrb[7].mxu0  ;;  %v894_v0 = vpop.f32.mrb[7].mxu1 }
 0x101   :  { %v859_v1 = vadd.f32 %v858_v63, %v857_v60  ;;  %v1170_v2 = vadd.f32 %v894_v0, %v893_v62  ;;  %v389_v4 = vadd.f32 %v856_v59, %v1175_v3 }
 0x103   :  { %v392_v11 = vadd.f32 %v859_v1, %v1175_v3 }
 0x105   :  { %v860_v5 = vpop.f32.mrb[8].mxu0  ;;  %v912_v6 = vpop.f32.mrb[8].mxu1 }
 0x106   :  { %v486_v8 = vadd.f32 %v912_v6, %v389_v4  ;;  %v861_v9 = vpop.f32.mrb[9].mxu0  ;;  %v477_v10 = vpop.f32.mrb[9].mxu1 }
 0x107   :  { %v862_v12 = vadd.f32 %v861_v9, %v860_v5  ;;  %v478_v13 = vadd.f32 %v477_v10, %v381_v7  ;;  %v863_v14 = vpop.f32.mrb[10].mxu0  ;;  %v913_v15 = vpop.f32.mrb[10].mxu1 }
 0x108   :  { %v489_v17 = vadd.f32 %v913_v15, %v392_v11  ;;  %v864_v18 = vpop.f32.mrb[11].mxu0  ;;  %v480_v19 = vpop.f32.mrb[11].mxu1  ;;  %v653_v27 = vmul.f32 %v486_v8, %v486_v8 }
 0x109   :  { %v865_v20 = vadd.f32 %v864_v18, %v863_v14  ;;  %v481_v21 = vadd.f32 %v480_v19, %v384_v16  ;;  %v651_v23 = vmul.f32 %v478_v13, %v478_v13  ;;  %v397_v32 = vadd.f32 %v862_v12, %v1175_v3 }
 0x10a   :  { %v793_v22 = vpack.c.bf16 %v489_v17, %v486_v8  ;;  %v654_v33 = vmul.f32 %v489_v17, %v489_v17 }
 0x10b   :  { %v788_v24 = vpack.c.bf16 %v481_v21, %v478_v13  ;;  %v627_v25 = vadd.f32 %v481_v21, %v478_v13  ;;  %v652_v26 = vmul.f32 %v481_v21, %v481_v21  ;;  %v400_v43 = vadd.f32 %v865_v20, %v1175_v3 }
 0x10c   :  { %825 = vst [vmem:[%s1238_s3 + $0x8] sm:$0xff] %v793_v22   ;;  %v437_v20 = vadd.f32 %v1168_v61, %v1175_v3 }
 0x10d   :  { %789 = vst [vmem:[%s1238_s3] sm:$0xff] %v788_v24   ;;  %v628_v28 = vadd.f32 %v627_v25, %v486_v8  ;;  %v667_v29 = vadd.f32 %v652_v26, %v651_v23  ;;  %v866_v30 = vpop.f32.mrb[12].mxu0  ;;  %v916_v31 = vpop.f32.mrb[12].mxu1 }
 0x10e   :  { %v867_v34 = vpop.f32.mrb[13].mxu0  ;;  %v493_v35 = vpop.f32.mrb[13].mxu1 }
 0x10f   :  { %v668_v36 = vadd.f32 %v667_v29, %v653_v27  ;;  %v868_v37 = vadd.f32 %v867_v34, %v866_v30  ;;  %v494_v38 = vadd.f32 %v493_v35, %v397_v32  ;;  %v629_v39 = vadd.f32 %v628_v28, %v489_v17  ;;  %v869_v40 = vpop.f32.mrb[14].mxu0  ;;  %v917_v41 = vpop.f32.mrb[14].mxu1 }
 0x110   :  { %v870_v42 = vpop.f32.mrb[15].mxu0  ;;  %v496_v44 = vpop.f32.mrb[15].mxu1  ;;  %v429_v28 = vadd.f32 %v1164_v49, %v1175_v3  ;;  %v440_v30 = vadd.f32 %v1170_v2, %v1175_v3 }
 0x111   :  { %v405_v45 = vadd.f32 %v868_v37, %v1175_v3  ;;  %v630_v46 = vadd.f32 %v629_v39, %v494_v38  ;;  %v655_v47 = vmul.f32 %v494_v38, %v494_v38  ;;  %v669_v48 = vadd.f32 %v668_v36, %v654_v33 }
 0x112   :  { %v871_v50 = vadd.f32 %v870_v42, %v869_v40  ;;  %v497_v51 = vadd.f32 %v496_v44, %v400_v43 }
 0x113   :  { %v502_v52 = vadd.f32 %v916_v31, %v405_v45  ;;  %v670_v53 = vadd.f32 %v669_v48, %v655_v47  ;;  %v432_v31 = vadd.f32 %v1166_v54, %v1175_v3 }
 0x114   :  { %v408_v55 = vadd.f32 %v871_v50, %v1175_v3  ;;  %v798_v56 = vpack.c.bf16 %v497_v51, %v494_v38  ;;  %v631_v57 = vadd.f32 %v630_v46, %v497_v51  ;;  %v656_v58 = vmul.f32 %v497_v51, %v497_v51 }
 0x115   :  { %v657_v59 = vmul.f32 %v502_v52, %v502_v52  ;;  %v872_v60 = vpop.f32.mrb[16].mxu0  ;;  %v920_v62 = vpop.f32.mrb[16].mxu1 }
 0x116   :  { %v505_v63 = vadd.f32 %v917_v41, %v408_v55  ;;  %826 = vst [vmem:[%s1238_s3 + $0x10] sm:$0xff] %v798_v56   ;;  %v632_v0 = vadd.f32 %v631_v57, %v502_v52  ;;  %v671_v1 = vadd.f32 %v670_v53, %v656_v58  ;;  %v873_v4 = vpop.f32.mrb[17].mxu0  ;;  %v509_v5 = vpop.f32.mrb[17].mxu1 }
 0x117   :  { %v874_v6 = vadd.f32 %v873_v4, %v872_v60  ;;  %v875_v7 = vpop.f32.mrb[18].mxu0  ;;  %v921_v8 = vpop.f32.mrb[18].mxu1 }
 0x118   :  { %v803_v9 = vpack.c.bf16 %v505_v63, %v502_v52  ;;  %v658_v10 = vmul.f32 %v505_v63, %v505_v63  ;;  %v672_v11 = vadd.f32 %v671_v1, %v657_v59  ;;  %v876_v12 = vpop.f32.mrb[19].mxu0  ;;  %v633_v13 = vadd.f32 %v632_v0, %v505_v63  ;;  %v512_v14 = vpop.f32.mrb[19].mxu1 }
 0x119   :  { %v877_v15 = vadd.f32 %v876_v12, %v875_v7  ;;  %v413_v16 = vadd.f32 %v874_v6, %v1175_v3 }
 0x11a   :  { %827 = vst [vmem:[%s1238_s3 + $0x18] sm:$0xff] %v803_v9   ;;  %v673_v17 = vadd.f32 %v672_v11, %v658_v10 }
 0x11b   :  { %v510_v18 = vadd.f32 %v509_v5, %v413_v16  ;;  %v416_v19 = vadd.f32 %v877_v15, %v1175_v3  ;;  %v626_v16 = vld [vmem:[%s1235_s4] sm:$0x1] }
 0x11d   :  { %v634_v21 = vadd.f32 %v633_v13, %v510_v18  ;;  %v659_v22 = vmul.f32 %v510_v18, %v510_v18  ;;  %v513_v23 = vadd.f32 %v512_v14, %v416_v19  ;;  %v878_v24 = vpop.f32.mrb[20].mxu0  ;;  %v924_v25 = vpop.f32.mrb[20].mxu1  ;;  %v650_v19 = vld [vmem:[%s1236_s5] sm:$0x1] }
 0x11e   :  { %v534_v26 = vadd.f32 %v924_v25, %v437_v20  ;;  %v879_v27 = vpop.f32.mrb[21].mxu0  ;;  %v525_v29 = vpop.f32.mrb[21].mxu1 }
 0x11f   :  { %v674_v32 = vadd.f32 %v673_v17, %v659_v22  ;;  %v808_v33 = vpack.c.bf16 %v513_v23, %v510_v18  ;;  %v635_v61 = vadd.f32 %v634_v21, %v513_v23  ;;  %v660_v34 = vmul.f32 %v513_v23, %v513_v23  ;;  %v881_v35 = vpop.f32.mrb[22].mxu0  ;;  %v925_v36 = vpop.f32.mrb[22].mxu1 }
 0x120   :  { %v880_v37 = vadd.f32 %v879_v27, %v878_v24  ;;  %v526_v38 = vadd.f32 %v525_v29, %v429_v28  ;;  %v537_v39 = vadd.f32 %v925_v36, %v440_v30  ;;  %v882_v40 = vpop.f32.mrb[23].mxu0  ;;  %v528_v41 = vpop.f32.mrb[23].mxu1 }
 0x121   :  { %828 = vst [vmem:[%s1238_s3 + $0x20] sm:$0xff] %v808_v33   ;;  %v675_v49 = vadd.f32 %v674_v32, %v660_v34  ;;  %v883_v2 = vadd.f32 %v882_v40, %v881_v35  ;;  %v529_v42 = vadd.f32 %v528_v41, %v432_v31 }
 0x122   :  { %v421_v54 = vadd.f32 %v880_v37, %v1175_v3  ;;  %v823_v43 = vpack.c.bf16 %v537_v39, %v534_v26  ;;  %v666_v1 = vmul.f32 %v537_v39, %v537_v39 }
 0x123   :  { %v424_v44 = vadd.f32 %v883_v2, %v1175_v3  ;;  %v818_v45 = vpack.c.bf16 %v529_v42, %v526_v38  ;;  %v663_v3 = vmul.f32 %v526_v38, %v526_v38  ;;  %v664_v59 = vmul.f32 %v529_v42, %v529_v42 }
 0x124   :  { %v518_v46 = vadd.f32 %v920_v62, %v421_v54  ;;  %831 = vst [vmem:[%s1238_s3 + $0x38] sm:$0xff] %v823_v43   ;;  %v665_v62 = vmul.f32 %v534_v26, %v534_v26 }
 0x125   :  { %v521_v47 = vadd.f32 %v921_v8, %v424_v44  ;;  %830 = vst [vmem:[%s1238_s3 + $0x30] sm:$0xff] %v818_v45  }
 0x126   :  { %v636_v48 = vadd.f32 %v635_v61, %v518_v46  ;;  %v661_v50 = vmul.f32 %v518_v46, %v518_v46 }
 0x127   :  { %v813_v51 = vpack.c.bf16 %v521_v47, %v518_v46  ;;  %v662_v52 = vmul.f32 %v521_v47, %v521_v47 }
 0x128   :  { %v676_v53 = vadd.f32 %v675_v49, %v661_v50  ;;  %v637_v55 = vadd.f32 %v636_v48, %v521_v47 }
 0x129   :  { %829 = vst [vmem:[%s1238_s3 + $0x28] sm:$0xff] %v813_v51  }
 0x12a   :  { %v638_v56 = vadd.f32 %v637_v55, %v526_v38  ;;  %v677_v57 = vadd.f32 %v676_v53, %v662_v52 }
 0x12c   :  { %v639_v58 = vadd.f32 %v638_v56, %v529_v42  ;;  %v678_v60 = vadd.f32 %v677_v57, %v663_v3 }
 0x12e   :  { %v640_v63 = vadd.f32 %v639_v58, %v534_v26  ;;  %v679_v0 = vadd.f32 %v678_v60, %v664_v59 }
 0x130   :  { %v641_v4 = vadd.f32 %v640_v63, %v537_v39  ;;  %v680_v5 = vadd.f32 %v679_v0, %v665_v62 }
 0x132   :  { %v642_v6 = vrot.slane %v641_v4, 4  ;;  %v681_v7 = vadd.f32 %v680_v5, %v666_v1 }
 0x134   :  { %v643_v8 = vadd.f32 %v642_v6, %v641_v4  ;;  %v682_v9 = vrot.slane %v681_v7, 4 }
 0x136   :  { %v644_v10 = vrot.slane %v643_v8, 2  ;;  %v683_v11 = vadd.f32 %v682_v9, %v681_v7 }
 0x138   :  { %v645_v12 = vadd.f32 %v644_v10, %v643_v8  ;;  %v684_v13 = vrot.slane %v683_v11, 2 }
 0x13a   :  { %v646_v14 = vrot.slane %v645_v12, 1  ;;  %v685_v15 = vadd.f32 %v684_v13, %v683_v11 }
 0x13c   :  { %v647_v17 = vadd.f32 %v646_v14, %v645_v12  ;;  %v686_v18 = vrot.slane %v685_v15, 1 }
 0x13e   :  { %v648_v20 = vadd.f32 %v647_v17, %v626_v16  ;;  %v687_v21 = vadd.f32 %v686_v18, %v685_v15 }
 0x140   :  { %649 = vst [vmem:[%s1235_s4] sm:$0x1] %v648_v20  ;;  %v688_v22 = vadd.f32 %v687_v21, %v650_v19 }
 0x142   :  { %689 = vst [vmem:[%s1236_s5] sm:$0x1] %v688_v22 }

// kernel: blur_generator_forward.99
= control target key start
LH: loop header
LB: loop body
LE: loop exit
PB: predicated region body
PF: predicated region fallthrough
CT: control target
= control target key end

     0   :  { %s666_s9 = smov 0   ;;  %s668_s10 = smov 0   ;;  %s798_s0 = inlined_call_operand.vmem [shape: bf16[2,256,8], index: 0, kind: input, shape index: {}]   ;;  %s799_s1 = inlined_call_operand.vmem [shape: f32[2,1,8], index: 1, kind: output, shape index: {0}]   ;;  %s800_s2 = inlined_call_operand.vmem [shape: f32[2,1,8], index: 2, kind: output, shape index: {1}]  }
   0x1   :  { %s670_s11 = smov 0  }
   0x2 LB: > { %s25_s12 = sadd.s32 1, %s644_s10  ;;  %p516_p0 = scmp.ge.s32.totalorder %s648_s11, 1  ;;  %s648_s11 = sphi %s670_s11, %s13_s11   ;;  %s644_s10 = sphi %s668_s10, %s802_s10   ;;  %s640_s9 = sphi %s666_s9, %s801_s9  }
   0x3   : > { %p27_p1 = scmp.ge.s32.totalorder %s25_s12, 2  ;;  %p134_p2 = scmp.lt.s32.totalorder %s648_s11, 3 }
   0x5   : > { %s804_s12 = smov (%p27_p1, %s25_s12), 0  ;;  %p135_p3 = pnand %p516_p0, %p134_p2 }
   0x6   : > { %p162_p4 = scmp.lt.s32.totalorder (!%p135_p3), %s640_s9, 1  ;;  %vm181_vm0 = vcmask (!%p135_p3), 57344   ;;  %v650_v0 = vmov (!%p135_p3), 0.0   ;;  %vm249_vm1 = vcmask (!%p135_p3), 64512  }
   0x7   : > { %138 = sbr.rel (%p135_p3) target bundleno = 104 (0x68), region = 24 }
   0xe   : > { %s806_s9 = smov (!%p162_p4, %s640_s9), 1 }
   0xf   : > { %s521_s13 = sshll.u32 %s806_s9, 7  ;;  %s687_s16 = scalar_lea.vmem %s799_s1, %s806_s9 }
  0x10   : > { %182 = vst.msk [vmem:[%s687_s16] sm:$0x1] %vm181_vm0, %v650_v0  ;;  %s694_s19 = scalar_lea.vmem %s800_s2, %s806_s9  ;;  %s701_s22 = scalar_lea.vmem %s798_s0, %s521_s13 }
  0x11   : > { %183 = vst.msk [vmem:[%s694_s19] sm:$0x1] %vm181_vm0, %v650_v0  ;;  %v523_v1 = vld [vmem:[%s701_s22] sm:$0xff]   ;;  %v586_v2 = vld [vmem:[%s701_s22 + $0x8] sm:$0xff]   ;;  %v587_v6 = vld [vmem:[%s701_s22 + $0x10] sm:$0xff]  }
  0x12   : > { %v524_v3 = vunpack.c.l.bf16 %v523_v1  ;;  %v525_v4 = vunpack.c.h.bf16 %v523_v1  ;;  %v528_v5 = vunpack.c.l.bf16 %v586_v2  ;;  %v529_v7 = vunpack.c.h.bf16 %v586_v2  ;;  %v588_v14 = vld [vmem:[%s701_s22 + $0x18] sm:$0xff]   ;;  %v589_v21 = vld [vmem:[%s701_s22 + $0x20] sm:$0xff]   ;;  %v590_v27 = vld [vmem:[%s701_s22 + $0x28] sm:$0xff]  }
  0x13   : > { %v532_v12 = vunpack.c.l.bf16 %v587_v6  ;;  %v533_v16 = vunpack.c.h.bf16 %v587_v6  ;;  %v536_v19 = vunpack.c.l.bf16 %v588_v14  ;;  %v537_v23 = vunpack.c.h.bf16 %v588_v14  ;;  %v591_v34 = vld [vmem:[%s701_s22 + $0x30] sm:$0xff]   ;;  %v592_v50 = vld [vmem:[%s701_s22 + $0x38] sm:$0xff]   ;;  %v593_v63 = vld [vmem:[%s701_s22 + $0x40] sm:$0xff]  }
  0x14   : > { %v250_v8 = vsel %vm249_vm1, %v524_v3, 0.0  ;;  %v251_v9 = vsel %vm249_vm1, %v525_v4, 0.0  ;;  %v253_v10 = vsel %vm249_vm1, %v528_v5, 0.0  ;;  %v255_v13 = vsel %vm249_vm1, %v529_v7, 0.0 }
  0x15   : > { %v252_v11 = vadd.f32 %v251_v9, %v250_v8  ;;  %v257_v17 = vsel %vm249_vm1, %v532_v12, 0.0  ;;  %v259_v20 = vsel %vm249_vm1, %v533_v16, 0.0  ;;  %v261_v24 = vsel %vm249_vm1, %v536_v19, 0.0 }
  0x16   : > { %v540_v26 = vunpack.c.l.bf16 %v589_v21  ;;  %v263_v28 = vsel %vm249_vm1, %v537_v23, 0.0  ;;  %v541_v30 = vunpack.c.h.bf16 %v589_v21  ;;  %v544_v32 = vunpack.c.l.bf16 %v590_v27 }
  0x17   : > { %v254_v15 = vadd.f32 %v253_v10, %v252_v11  ;;  %v323_v36 = vmul.f32 %v524_v3, %v524_v3  ;;  %v324_v37 = vmul.f32 %v525_v4, %v525_v4  ;;  %v325_v38 = vmul.f32 %v528_v5, %v528_v5 }
  0x18   : > { %v265_v31 = vsel %vm249_vm1, %v540_v26, 0.0  ;;  %v267_v35 = vsel %vm249_vm1, %v541_v30, 0.0  ;;  %v545_v39 = vunpack.c.h.bf16 %v590_v27  ;;  %v269_v41 = vsel %vm249_vm1, %v544_v32, 0.0 }
  0x19   : > { %v256_v18 = vadd.f32 %v255_v13, %v254_v15  ;;  %v326_v42 = vmul.f32 %v529_v7, %v529_v7  ;;  %v548_v43 = vunpack.c.l.bf16 %v591_v34  ;;  %v327_v46 = vmul.f32 %v532_v12, %v532_v12  ;;  %v594_v12 = vld [vmem:[%s701_s22 + $0x48] sm:$0xff]  }
  0x1a   : > { %v271_v45 = vsel %vm249_vm1, %v545_v39, 0.0  ;;  %v355_v47 = vsel %vm249_vm1, %v323_v36, 0.0  ;;  %v356_v48 = vsel %vm249_vm1, %v324_v37, 0.0  ;;  %v358_v49 = vsel %vm249_vm1, %v325_v38, 0.0  ;;  %v596_v38 = vld [vmem:[%s701_s22 + $0x58] sm:$0xff]  }
  0x1b   : > { %v258_v22 = vadd.f32 %v257_v17, %v256_v18  ;;  %v357_v52 = vadd.f32 %v356_v48, %v355_v47  ;;  %v549_v53 = vunpack.c.h.bf16 %v591_v34  ;;  %v273_v54 = vsel %vm249_vm1, %v548_v43, 0.0 }
  0x1c   : > { %v328_v55 = vmul.f32 %v533_v16, %v533_v16  ;;  %v360_v56 = vsel %vm249_vm1, %v326_v42, 0.0  ;;  %v552_v59 = vunpack.c.l.bf16 %v592_v50  ;;  %v329_v61 = vmul.f32 %v536_v19, %v536_v19 }
  0x1d   : > { %v260_v25 = vadd.f32 %v259_v20, %v258_v22  ;;  %v359_v58 = vadd.f32 %v358_v49, %v357_v52  ;;  %v275_v60 = vsel %vm249_vm1, %v549_v53, 0.0  ;;  %v362_v62 = vsel %vm249_vm1, %v327_v46, 0.0 }
  0x1e   : > { %v553_v2 = vunpack.c.h.bf16 %v592_v50  ;;  %v277_v3 = vsel %vm249_vm1, %v552_v59, 0.0  ;;  %v330_v4 = vmul.f32 %v537_v23, %v537_v23  ;;  %v364_v5 = vsel %vm249_vm1, %v328_v55, 0.0 }
  0x1f   : > { %v262_v29 = vadd.f32 %v261_v24, %v260_v25  ;;  %v361_v1 = vadd.f32 %v360_v56, %v359_v58  ;;  %v556_v8 = vunpack.c.l.bf16 %v593_v63  ;;  %v331_v10 = vmul.f32 %v540_v26, %v540_v26  ;;  %v595_v25 = vld [vmem:[%s701_s22 + $0x50] sm:$0xff]  }
  0x20   : > { %v279_v9 = vsel %vm249_vm1, %v553_v2, 0.0  ;;  %v366_v11 = vsel %vm249_vm1, %v329_v61, 0.0  ;;  %v557_v15 = vunpack.c.h.bf16 %v593_v63  ;;  %v332_v17 = vmul.f32 %v541_v30, %v541_v30 }
  0x21   : > { %v264_v33 = vadd.f32 %v263_v28, %v262_v29  ;;  %v363_v7 = vadd.f32 %v362_v62, %v361_v1  ;;  %v281_v16 = vsel %vm249_vm1, %v556_v8, 0.0  ;;  %v368_v18 = vsel %vm249_vm1, %v330_v4, 0.0 }
  0x22   : > { %v560_v21 = vunpack.c.l.bf16 %v594_v12  ;;  %v283_v22 = vsel %vm249_vm1, %v557_v15, 0.0  ;;  %v333_v23 = vmul.f32 %v544_v32, %v544_v32  ;;  %v370_v24 = vsel %vm249_vm1, %v331_v10, 0.0 }
  0x23   : > { %v266_v40 = vadd.f32 %v265_v31, %v264_v33  ;;  %v365_v14 = vadd.f32 %v364_v5, %v363_v7  ;;  %v561_v28 = vunpack.c.h.bf16 %v594_v12  ;;  %v334_v31 = vmul.f32 %v545_v39, %v545_v39 }
  0x24   : > { %v285_v29 = vsel %vm249_vm1, %v560_v21, 0.0  ;;  %v372_v30 = vsel %vm249_vm1, %v332_v17, 0.0  ;;  %v335_v37 = vmul.f32 %v548_v43, %v548_v43  ;;  %v374_v32 = vsel %vm249_vm1, %v333_v23, 0.0 }
  0x25   : > { %v268_v44 = vadd.f32 %v267_v35, %v266_v40  ;;  %v367_v20 = vadd.f32 %v366_v11, %v365_v14  ;;  %v564_v35 = vunpack.c.l.bf16 %v595_v25  ;;  %v287_v36 = vsel %vm249_vm1, %v561_v28, 0.0 }
  0x26   : > { %v565_v42 = vunpack.c.h.bf16 %v595_v25  ;;  %v376_v39 = vsel %vm249_vm1, %v334_v31, 0.0  ;;  %v568_v48 = vunpack.c.l.bf16 %v596_v38  ;;  %v337_v50 = vmul.f32 %v552_v59, %v552_v59 }
  0x27   : > { %v270_v51 = vadd.f32 %v269_v41, %v268_v44  ;;  %v369_v27 = vadd.f32 %v368_v18, %v367_v20  ;;  %v289_v44 = vsel %vm249_vm1, %v564_v35, 0.0  ;;  %v378_v43 = vsel %vm249_vm1, %v335_v37, 0.0 }
  0x28   : > { %v291_v49 = vsel %vm249_vm1, %v565_v42, 0.0  ;;  %v569_v55 = vunpack.c.h.bf16 %v596_v38  ;;  %v293_v56 = vsel %vm249_vm1, %v568_v48, 0.0  ;;  %v339_v63 = vmul.f32 %v556_v8, %v556_v8 }
  0x29   : > { %v272_v57 = vadd.f32 %v271_v45, %v270_v51  ;;  %v371_v34 = vadd.f32 %v370_v24, %v369_v27  ;;  %v336_v45 = vmul.f32 %v549_v53, %v549_v53  ;;  %v597_v51 = vld [vmem:[%s701_s22 + $0x60] sm:$0xff]   ;;  %v382_v59 = vsel %vm249_vm1, %v337_v50, 0.0 }
  0x2a   : > { %v572_v61 = vunpack.c.l.bf16 %v597_v51  ;;  %v295_v62 = vsel %vm249_vm1, %v569_v55, 0.0  ;;  %v573_v4 = vunpack.c.h.bf16 %v597_v51  ;;  %v341_v12 = vmul.f32 %v560_v21, %v560_v21  ;;  %v600_v21 = vld [vmem:[%s701_s22 + $0x78] sm:$0xff]  }
  0x2b   : > { %v274_v0 = vadd.f32 %v273_v54, %v272_v57  ;;  %v373_v41 = vadd.f32 %v372_v30, %v371_v34  ;;  %v338_v57 = vmul.f32 %v553_v2, %v553_v2  ;;  %v380_v53 = vsel %vm249_vm1, %v336_v45, 0.0 }
  0x2c   : > { %v297_v5 = vsel %vm249_vm1, %v572_v61, 0.0  ;;  %v299_v11 = vsel %vm249_vm1, %v573_v4, 0.0  ;;  %v386_v8 = vsel %vm249_vm1, %v339_v63, 0.0  ;;  %v343_v25 = vmul.f32 %v564_v35, %v564_v35 }
  0x2d   : > { %v276_v6 = vadd.f32 %v275_v60, %v274_v0  ;;  %v375_v47 = vadd.f32 %v374_v32, %v373_v41  ;;  %v598_v0 = vld [vmem:[%s701_s22 + $0x68] sm:$0xff]   ;;  %v384_v2 = vsel %vm249_vm1, %v338_v57, 0.0  ;;  %v584_v37 = vunpack.c.l.bf16 %v600_v21 }
  0x2e   : > { %v576_v10 = vunpack.c.l.bf16 %v598_v0  ;;  %v577_v17 = vunpack.c.h.bf16 %v598_v0  ;;  %v345_v38 = vmul.f32 %v568_v48, %v568_v48  ;;  %v347_v50 = vmul.f32 %v572_v61, %v572_v61 }
  0x2f   : > { %v278_v13 = vadd.f32 %v277_v3, %v276_v6  ;;  %v377_v54 = vadd.f32 %v376_v39, %v375_v47  ;;  %v340_v6 = vmul.f32 %v557_v15, %v557_v15  ;;  %v309_v45 = vsel %vm249_vm1, %v584_v37, 0.0 }
  0x30   : > { %v301_v18 = vsel %vm249_vm1, %v576_v10, 0.0  ;;  %v303_v24 = vsel %vm249_vm1, %v577_v17, 0.0  ;;  %v346_v39 = vmul.f32 %v569_v55, %v569_v55  ;;  %v348_v48 = vmul.f32 %v573_v4, %v573_v4 }
  0x31   : > { %v280_v19 = vadd.f32 %v279_v9, %v278_v13  ;;  %v379_v60 = vadd.f32 %v378_v43, %v377_v54  ;;  %v599_v13 = vld [vmem:[%s701_s22 + $0x70] sm:$0xff]   ;;  %v388_v15 = vsel %vm249_vm1, %v340_v6, 0.0  ;;  %v398_v43 = vsel %vm249_vm1, %v345_v38, 0.0 }
  0x32   : > { %v580_v23 = vunpack.c.l.bf16 %v599_v13  ;;  %v581_v31 = vunpack.c.h.bf16 %v599_v13  ;;  %v400_v54 = vsel %vm249_vm1, %v346_v39, 0.0  ;;  %v404_v63 = vsel %vm249_vm1, %v348_v48, 0.0 }
  0x33   : > { %v282_v26 = vadd.f32 %v281_v16, %v280_v19  ;;  %v381_v3 = vadd.f32 %v380_v53, %v379_v60  ;;  %v342_v19 = vmul.f32 %v561_v28, %v561_v28  ;;  %v349_v53 = vmul.f32 %v576_v10, %v576_v10 }
  0x34   : > { %v305_v30 = vsel %vm249_vm1, %v580_v23, 0.0  ;;  %v307_v32 = vsel %vm249_vm1, %v581_v31, 0.0  ;;  %v351_v0 = vmul.f32 %v580_v23, %v580_v23 }
  0x35   : > { %v284_v33 = vadd.f32 %v283_v22, %v282_v26  ;;  %v383_v9 = vadd.f32 %v382_v59, %v381_v3  ;;  %v390_v26 = vsel %vm249_vm1, %v341_v12, 0.0  ;;  %v392_v34 = vsel %vm249_vm1, %v342_v19, 0.0 }
  0x36   : > { %v410_v10 = vsel %vm249_vm1, %v351_v0, 0.0 }
  0x37   : > { %v286_v40 = vadd.f32 %v285_v29, %v284_v33  ;;  %v385_v16 = vadd.f32 %v384_v2, %v383_v9  ;;  %v344_v33 = vmul.f32 %v565_v42, %v565_v42  ;;  %v353_v9 = vmul.f32 %v584_v37, %v584_v37 }
  0x39   : > { %v288_v46 = vadd.f32 %v287_v36, %v286_v40  ;;  %v387_v22 = vadd.f32 %v386_v8, %v385_v16  ;;  %v394_v40 = vsel %vm249_vm1, %v343_v25, 0.0  ;;  %v248_v8 = vld [vmem:[%s687_s16] sm:$0x1] }
  0x3b   : > { %v290_v52 = vadd.f32 %v289_v44, %v288_v46  ;;  %v389_v29 = vadd.f32 %v388_v15, %v387_v22  ;;  %v585_v44 = vunpack.c.h.bf16 %v600_v21  ;;  %v396_v46 = vsel %vm249_vm1, %v344_v33, 0.0 }
  0x3d   : > { %v292_v58 = vadd.f32 %v291_v49, %v290_v52  ;;  %v391_v36 = vadd.f32 %v390_v26, %v389_v29  ;;  %v311_v49 = vsel %vm249_vm1, %v585_v44, 0.0  ;;  %v354_v13 = vmul.f32 %v585_v44, %v585_v44  ;;  %v322_v29 = vld [vmem:[%s694_s19] sm:$0x1] }
  0x3f   : > { %v294_v1 = vadd.f32 %v293_v56, %v292_v58  ;;  %v393_v41 = vadd.f32 %v392_v34, %v391_v36  ;;  %v402_v58 = vsel %vm249_vm1, %v347_v50, 0.0 }
  0x41   : > { %v296_v7 = vadd.f32 %v295_v62, %v294_v1  ;;  %v395_v42 = vadd.f32 %v394_v40, %v393_v41  ;;  %v350_v62 = vmul.f32 %v577_v17, %v577_v17  ;;  %v406_v1 = vsel %vm249_vm1, %v349_v53, 0.0 }
  0x43   : > { %v298_v14 = vadd.f32 %v297_v5, %v296_v7  ;;  %v397_v52 = vadd.f32 %v396_v46, %v395_v42  ;;  %v352_v5 = vmul.f32 %v581_v31, %v581_v31  ;;  %v408_v6 = vsel %vm249_vm1, %v350_v62, 0.0 }
  0x45   : > { %v300_v20 = vadd.f32 %v299_v11, %v298_v14  ;;  %v399_v57 = vadd.f32 %v398_v43, %v397_v52  ;;  %v412_v14 = vsel %vm249_vm1, %v352_v5, 0.0 }
  0x47   : > { %v302_v27 = vadd.f32 %v301_v18, %v300_v20  ;;  %v401_v60 = vadd.f32 %v400_v54, %v399_v57  ;;  %v414_v18 = vsel %vm249_vm1, %v353_v9, 0.0  ;;  %v416_v20 = vsel %vm249_vm1, %v354_v13, 0.0 }
  0x49   : > { %v304_v28 = vadd.f32 %v303_v24, %v302_v27  ;;  %v403_v61 = vadd.f32 %v402_v58, %v401_v60 }
  0x4b   : > { %v306_v35 = vadd.f32 %v305_v30, %v304_v28  ;;  %v405_v4 = vadd.f32 %v404_v63, %v403_v61 }
  0x4d   : > { %v308_v47 = vadd.f32 %v307_v32, %v306_v35  ;;  %v407_v7 = vadd.f32 %v406_v1, %v405_v4 }
  0x4f   : > { %v310_v51 = vadd.f32 %v309_v45, %v308_v47  ;;  %v409_v12 = vadd.f32 %v408_v6, %v407_v7 }
  0x51   : > { %v312_v56 = vadd.f32 %v311_v49, %v310_v51  ;;  %v411_v17 = vadd.f32 %v410_v10, %v409_v12 }
  0x53   : > { %v313_v55 = vrot.slane %v312_v56, 4  ;;  %v413_v15 = vadd.f32 %v412_v14, %v411_v17 }
  0x55   : > { %v314_v59 = vadd.f32 %v313_v55, %v312_v56  ;;  %v415_v22 = vadd.f32 %v414_v18, %v413_v15 }
  0x57   : > { %v315_v3 = vrot.slane %v314_v59, 2  ;;  %v417_v23 = vadd.f32 %v416_v20, %v415_v22 }
  0x59   : > { %v316_v2 = vadd.f32 %v315_v3, %v314_v59  ;;  %v418_v24 = vrot.slane %v417_v23, 4 }
  0x5b   : > { %v317_v11 = vrot.slane %v316_v2, 1  ;;  %v419_v25 = vadd.f32 %v418_v24, %v417_v23 }
  0x5d   : > { %v318_v16 = vadd.f32 %v317_v11, %v316_v2  ;;  %v420_v26 = vrot.slane %v419_v25, 2 }
  0x5f   : > { %v319_v19 = vadd.f32 %v318_v16, %v248_v8  ;;  %v421_v21 = vadd.f32 %v420_v26, %v419_v25 }
  0x61   : > { %321 = vst.msk [vmem:[%s687_s16] sm:$0x1] %vm181_vm0, %v319_v19  ;;  %v422_v27 = vrot.slane %v421_v21, 1 }
  0x63   : > { %v423_v31 = vadd.f32 %v422_v27, %v421_v21 }
  0x65   : > { %v424_v30 = vadd.f32 %v423_v31, %v322_v29 }
  0x67   : > { %425 = vst.msk [vmem:[%s694_s19] sm:$0x1] %vm181_vm0, %v424_v30 }
  0x68 PF: > { %s13_s11 = sadd.s32 1, %s648_s11   ;;  %s801_s9 = smov %s644_s10 }
  0x69   : > { %p10_p5 = scmp.ge.s32.totalorder %s13_s11, 4   ;;  %s802_s10 = smov %s804_s12 }
  0x6b   :  { %12 = sbr.rel (!%p10_p5) target bundleno = 2 (0x2), region = 70 }

// kernel: blur_generator_forward.100
= control target key start
LH: loop header
LB: loop body
LE: loop exit
PB: predicated region body
PF: predicated region fallthrough
CT: control target
= control target key end

     0   :  { %s872_s12 = smov 0   ;;  %s874_s13 = smov 0   ;;  %s1072_s0 = inlined_call_operand.vmem [shape: bf16[2,256,8], index: 0, kind: input, shape index: {}]   ;;  %s1073_s1 = inlined_call_operand.vmem [shape: f32[2,1,8], index: 1, kind: input, shape index: {}]   ;;  %s1074_s2 = inlined_call_operand.vmem [shape: f32[2,1,8], index: 2, kind: input, shape index: {}]   ;;  %s1075_s3 = inlined_call_operand.vmem [shape: bf16[2,256,8], index: 3, kind: output, shape index: {}]  }
   0x1   :  { %s876_s14 = smov 0  }
   0x2 LB: > { %s25_s15 = sadd.s32 1, %s846_s13  ;;  %p650_p0 = scmp.ge.s32.totalorder %s850_s14, 1  ;;  %s850_s14 = sphi %s876_s14, %s13_s14   ;;  %s846_s13 = sphi %s874_s13, %s1077_s13   ;;  %s842_s12 = sphi %s872_s12, %s1076_s12  }
   0x3   : > { %p27_p1 = scmp.ge.s32.totalorder %s25_s15, 2  ;;  %p174_p2 = scmp.lt.s32.totalorder %s850_s14, 3 }
   0x5   : > { %s1079_s15 = smov (%p27_p1, %s25_s15), 0  ;;  %p175_p3 = pnand %p650_p0, %p174_p2 }
   0x6   : > { %p213_p4 = scmp.lt.s32.totalorder (!%p175_p3), %s842_s12, 1  ;;  %vm508_vm0 = vcmask (!%p175_p3), 60416  }
   0x7   : > { %178 = sbr.rel (%p175_p3) target bundleno = 54 (0x36), region = 32 }
   0xe   : > { %s1081_s12 = smov (!%p213_p4, %s842_s12), 1 }
   0xf   : > { %s691_s16 = sshll.u32 %s1081_s12, 7  ;;  %s224_s19 = scalar_lea.vmem %s1073_s1, %s1081_s12 }
  0x10   : > { %s902_s22 = scalar_lea.vmem %s1072_s0, %s691_s16  ;;  %s227_s25 = scalar_lea.vmem %s1074_s2, %s1081_s12  ;;  %v909_v1 = vld [vmem:[%s224_s19] ss:$0 sm:$0xff] }
  0x11   : > { %v726_v0 = vld [vmem:[%s902_s22] sm:$0xff]   ;;  %v789_v2 = vld [vmem:[%s902_s22 + $0x8] sm:$0xff]   ;;  %v790_v7 = vld [vmem:[%s902_s22 + $0x10] sm:$0xff]   ;;  %s933_s28 = scalar_lea.vmem %s1075_s3, %s691_s16 }
  0x12   : > { %v727_v3 = vunpack.c.l.bf16 %v726_v0  ;;  %v728_v4 = vunpack.c.h.bf16 %v726_v0  ;;  %v731_v5 = vunpack.c.l.bf16 %v789_v2  ;;  %v732_v6 = vunpack.c.h.bf16 %v789_v2  ;;  %v791_v8 = vld [vmem:[%s902_s22 + $0x18] sm:$0xff]   ;;  %v914_v9 = vld [vmem:[%s227_s25] ss:$0 sm:$0xff]  ;;  %v793_v31 = vld [vmem:[%s902_s22 + $0x28] sm:$0xff]  }
  0x13   : > { %v735_v10 = vunpack.c.l.bf16 %v790_v7  ;;  %v736_v11 = vunpack.c.h.bf16 %v790_v7  ;;  %v739_v12 = vunpack.c.l.bf16 %v791_v8  ;;  %v740_v13 = vunpack.c.h.bf16 %v791_v8  ;;  %v792_v30 = vld [vmem:[%s902_s22 + $0x20] sm:$0xff]   ;;  %v794_v36 = vld [vmem:[%s902_s22 + $0x30] sm:$0xff]   ;;  %v795_v37 = vld [vmem:[%s902_s22 + $0x38] sm:$0xff]  }
  0x14   : > { %v309_v14 = vmul.f32 %v727_v3, %v909_v1  ;;  %v310_v15 = vmul.f32 %v728_v4, %v909_v1  ;;  %v311_v16 = vmul.f32 %v731_v5, %v909_v1  ;;  %v312_v17 = vmul.f32 %v732_v6, %v909_v1  ;;  %v796_v3 = vld [vmem:[%s902_s22 + $0x40] sm:$0xff]   ;;  %v797_v4 = vld [vmem:[%s902_s22 + $0x48] sm:$0xff]  }
  0x15   : > { %v313_v18 = vmul.f32 %v735_v10, %v909_v1  ;;  %v314_v19 = vmul.f32 %v736_v11, %v909_v1  ;;  %v315_v20 = vmul.f32 %v739_v12, %v909_v1  ;;  %v316_v21 = vmul.f32 %v740_v13, %v909_v1  ;;  %v798_v10 = vld [vmem:[%s902_s22 + $0x50] sm:$0xff]   ;;  %v799_v11 = vld [vmem:[%s902_s22 + $0x58] sm:$0xff]  }
  0x16   : > { %v348_v22 = vadd.f32 %v914_v9, %v309_v14  ;;  %v349_v23 = vadd.f32 %v914_v9, %v310_v15  ;;  %v350_v24 = vadd.f32 %v914_v9, %v311_v16  ;;  %v351_v25 = vadd.f32 %v914_v9, %v312_v17 }
  0x17   : > { %v352_v26 = vadd.f32 %v914_v9, %v313_v18  ;;  %v353_v27 = vadd.f32 %v914_v9, %v314_v19  ;;  %v354_v28 = vadd.f32 %v914_v9, %v315_v20  ;;  %v355_v29 = vadd.f32 %v914_v9, %v316_v21 }
  0x18   : > { %v693_v32 = vpack.c.bf16 %v348_v22, %v348_v22  ;;  %v694_v33 = vpack.c.bf16 %v349_v23, %v349_v23  ;;  %v695_v34 = vpack.c.bf16 %v350_v24, %v350_v24  ;;  %v696_v35 = vpack.c.bf16 %v351_v25, %v351_v25 }
  0x19   : > { %v697_v38 = vpack.c.bf16 %v352_v26, %v352_v26  ;;  %v698_v39 = vpack.c.bf16 %v353_v27, %v353_v27  ;;  %v699_v40 = vpack.c.bf16 %v354_v28, %v354_v28  ;;  %v700_v41 = vpack.c.bf16 %v355_v29, %v355_v29 }
  0x1a   : > { %509 = vst.msk [vmem:[%s933_s28] sm:$0xf] %vm508_vm0, %v693_v32  ;;  %510 = vst.msk [vmem:[%s933_s28 + $0x4] sm:$0xf] %vm508_vm0, %v694_v33  ;;  %v743_v42 = vunpack.c.l.bf16 %v792_v30  ;;  %v744_v43 = vunpack.c.h.bf16 %v792_v30  ;;  %v747_v44 = vunpack.c.l.bf16 %v793_v31  ;;  %v748_v45 = vunpack.c.h.bf16 %v793_v31 }
  0x1b   : > { %511 = vst.msk [vmem:[%s933_s28 + $0x8] sm:$0xf] %vm508_vm0, %v695_v34  ;;  %512 = vst.msk [vmem:[%s933_s28 + $0xc] sm:$0xf] %vm508_vm0, %v696_v35  ;;  %v751_v46 = vunpack.c.l.bf16 %v794_v36  ;;  %v752_v47 = vunpack.c.h.bf16 %v794_v36  ;;  %v755_v48 = vunpack.c.l.bf16 %v795_v37  ;;  %v756_v49 = vunpack.c.h.bf16 %v795_v37 }
  0x1c   : > { %513 = vst.msk [vmem:[%s933_s28 + $0x10] sm:$0xf] %vm508_vm0, %v697_v38  ;;  %514 = vst.msk [vmem:[%s933_s28 + $0x14] sm:$0xf] %vm508_vm0, %v698_v39  ;;  %v317_v50 = vmul.f32 %v743_v42, %v909_v1  ;;  %v318_v51 = vmul.f32 %v744_v43, %v909_v1  ;;  %v319_v52 = vmul.f32 %v747_v44, %v909_v1  ;;  %v759_v16 = vunpack.c.l.bf16 %v796_v3 }
  0x1d   : > { %515 = vst.msk [vmem:[%s933_s28 + $0x18] sm:$0xf] %vm508_vm0, %v699_v40  ;;  %516 = vst.msk [vmem:[%s933_s28 + $0x1c] sm:$0xf] %vm508_vm0, %v700_v41  ;;  %v320_v53 = vmul.f32 %v748_v45, %v909_v1  ;;  %v321_v54 = vmul.f32 %v751_v46, %v909_v1  ;;  %v322_v55 = vmul.f32 %v752_v47, %v909_v1  ;;  %v760_v17 = vunpack.c.h.bf16 %v796_v3  ;;  %v800_v40 = vld [vmem:[%s902_s22 + $0x60] sm:$0xff]   ;;  %v801_v41 = vld [vmem:[%s902_s22 + $0x68] sm:$0xff]  }
  0x1e   : > { %v323_v56 = vmul.f32 %v755_v48, %v909_v1  ;;  %v324_v57 = vmul.f32 %v756_v49, %v909_v1  ;;  %v356_v58 = vadd.f32 %v914_v9, %v317_v50  ;;  %v357_v59 = vadd.f32 %v914_v9, %v318_v51  ;;  %v802_v46 = vld [vmem:[%s902_s22 + $0x70] sm:$0xff]   ;;  %v803_v47 = vld [vmem:[%s902_s22 + $0x78] sm:$0xff]  }
  0x1f   : > { %v358_v60 = vadd.f32 %v914_v9, %v319_v52  ;;  %v359_v61 = vadd.f32 %v914_v9, %v320_v53  ;;  %v360_v62 = vadd.f32 %v914_v9, %v321_v54  ;;  %v361_v63 = vadd.f32 %v914_v9, %v322_v55 }
  0x20   : > { %v362_v0 = vadd.f32 %v914_v9, %v323_v56  ;;  %v363_v2 = vadd.f32 %v914_v9, %v324_v57  ;;  %v701_v5 = vpack.c.bf16 %v356_v58, %v356_v58  ;;  %v702_v6 = vpack.c.bf16 %v357_v59, %v357_v59 }
  0x21   : > { %v703_v7 = vpack.c.bf16 %v358_v60, %v358_v60  ;;  %v704_v8 = vpack.c.bf16 %v359_v61, %v359_v61  ;;  %v705_v12 = vpack.c.bf16 %v360_v62, %v360_v62  ;;  %v706_v13 = vpack.c.bf16 %v361_v63, %v361_v63 }
  0x22   : > { %v707_v14 = vpack.c.bf16 %v362_v0, %v362_v0  ;;  %v708_v15 = vpack.c.bf16 %v363_v2, %v363_v2  ;;  %517 = vst.msk [vmem:[%s933_s28 + $0x20] sm:$0xf] %vm508_vm0, %v701_v5  ;;  %518 = vst.msk [vmem:[%s933_s28 + $0x24] sm:$0xf] %vm508_vm0, %v702_v6  ;;  %v763_v18 = vunpack.c.l.bf16 %v797_v4  ;;  %v764_v19 = vunpack.c.h.bf16 %v797_v4 }
  0x23   : > { %519 = vst.msk [vmem:[%s933_s28 + $0x28] sm:$0xf] %vm508_vm0, %v703_v7  ;;  %520 = vst.msk [vmem:[%s933_s28 + $0x2c] sm:$0xf] %vm508_vm0, %v704_v8  ;;  %v767_v20 = vunpack.c.l.bf16 %v798_v10  ;;  %v768_v21 = vunpack.c.h.bf16 %v798_v10  ;;  %v771_v22 = vunpack.c.l.bf16 %v799_v11  ;;  %v772_v23 = vunpack.c.h.bf16 %v799_v11 }
  0x24   : > { %521 = vst.msk [vmem:[%s933_s28 + $0x30] sm:$0xf] %vm508_vm0, %v705_v12  ;;  %522 = vst.msk [vmem:[%s933_s28 + $0x34] sm:$0xf] %vm508_vm0, %v706_v13  ;;  %v325_v24 = vmul.f32 %v759_v16, %v909_v1  ;;  %v326_v25 = vmul.f32 %v760_v17, %v909_v1  ;;  %v327_v26 = vmul.f32 %v763_v18, %v909_v1  ;;  %v775_v52 = vunpack.c.l.bf16 %v800_v40 }
  0x25   : > { %523 = vst.msk [vmem:[%s933_s28 + $0x38] sm:$0xf] %vm508_vm0, %v707_v14  ;;  %524 = vst.msk [vmem:[%s933_s28 + $0x3c] sm:$0xf] %vm508_vm0, %v708_v15  ;;  %v328_v27 = vmul.f32 %v764_v19, %v909_v1  ;;  %v329_v28 = vmul.f32 %v767_v20, %v909_v1  ;;  %v330_v29 = vmul.f32 %v768_v21, %v909_v1  ;;  %v776_v53 = vunpack.c.h.bf16 %v800_v40 }
  0x26   : > { %v331_v30 = vmul.f32 %v771_v22, %v909_v1  ;;  %v332_v31 = vmul.f32 %v772_v23, %v909_v1  ;;  %v364_v32 = vadd.f32 %v914_v9, %v325_v24  ;;  %v365_v33 = vadd.f32 %v914_v9, %v326_v25 }
  0x27   : > { %v366_v34 = vadd.f32 %v914_v9, %v327_v26  ;;  %v367_v35 = vadd.f32 %v914_v9, %v328_v27  ;;  %v368_v36 = vadd.f32 %v914_v9, %v329_v28  ;;  %v369_v37 = vadd.f32 %v914_v9, %v330_v29 }
  0x28   : > { %v370_v38 = vadd.f32 %v914_v9, %v331_v30  ;;  %v371_v39 = vadd.f32 %v914_v9, %v332_v31  ;;  %v709_v42 = vpack.c.bf16 %v364_v32, %v364_v32  ;;  %v710_v43 = vpack.c.bf16 %v365_v33, %v365_v33 }
  0x29   : > { %v711_v44 = vpack.c.bf16 %v366_v34, %v366_v34  ;;  %v712_v45 = vpack.c.bf16 %v367_v35, %v367_v35  ;;  %v713_v48 = vpack.c.bf16 %v368_v36, %v368_v36  ;;  %v714_v49 = vpack.c.bf16 %v369_v37, %v369_v37 }
  0x2a   : > { %v715_v50 = vpack.c.bf16 %v370_v38, %v370_v38  ;;  %v716_v51 = vpack.c.bf16 %v371_v39, %v371_v39  ;;  %525 = vst.msk [vmem:[%s933_s28 + $0x40] sm:$0xf] %vm508_vm0, %v709_v42  ;;  %526 = vst.msk [vmem:[%s933_s28 + $0x44] sm:$0xf] %vm508_vm0, %v710_v43  ;;  %v779_v54 = vunpack.c.l.bf16 %v801_v41  ;;  %v780_v55 = vunpack.c.h.bf16 %v801_v41 }
  0x2b   : > { %527 = vst.msk [vmem:[%s933_s28 + $0x48] sm:$0xf] %vm508_vm0, %v711_v44  ;;  %528 = vst.msk [vmem:[%s933_s28 + $0x4c] sm:$0xf] %vm508_vm0, %v712_v45  ;;  %v783_v56 = vunpack.c.l.bf16 %v802_v46  ;;  %v784_v57 = vunpack.c.h.bf16 %v802_v46  ;;  %v787_v58 = vunpack.c.l.bf16 %v803_v47  ;;  %v788_v59 = vunpack.c.h.bf16 %v803_v47 }
  0x2c   : > { %529 = vst.msk [vmem:[%s933_s28 + $0x50] sm:$0xf] %vm508_vm0, %v713_v48  ;;  %530 = vst.msk [vmem:[%s933_s28 + $0x54] sm:$0xf] %vm508_vm0, %v714_v49  ;;  %v333_v60 = vmul.f32 %v775_v52, %v909_v1  ;;  %v334_v61 = vmul.f32 %v776_v53, %v909_v1  ;;  %v335_v62 = vmul.f32 %v779_v54, %v909_v1 }
  0x2d   : > { %531 = vst.msk [vmem:[%s933_s28 + $0x58] sm:$0xf] %vm508_vm0, %v715_v50  ;;  %532 = vst.msk [vmem:[%s933_s28 + $0x5c] sm:$0xf] %vm508_vm0, %v716_v51  ;;  %v336_v63 = vmul.f32 %v780_v55, %v909_v1  ;;  %v337_v0 = vmul.f32 %v783_v56, %v909_v1  ;;  %v338_v2 = vmul.f32 %v784_v57, %v909_v1 }
  0x2e   : > { %v339_v3 = vmul.f32 %v787_v58, %v909_v1  ;;  %v340_v4 = vmul.f32 %v788_v59, %v909_v1  ;;  %v372_v5 = vadd.f32 %v914_v9, %v333_v60  ;;  %v373_v6 = vadd.f32 %v914_v9, %v334_v61 }
  0x2f   : > { %v374_v7 = vadd.f32 %v914_v9, %v335_v62  ;;  %v375_v8 = vadd.f32 %v914_v9, %v336_v63  ;;  %v376_v10 = vadd.f32 %v914_v9, %v337_v0  ;;  %v377_v11 = vadd.f32 %v914_v9, %v338_v2 }
  0x30   : > { %v378_v1 = vadd.f32 %v914_v9, %v339_v3  ;;  %v379_v12 = vadd.f32 %v914_v9, %v340_v4  ;;  %v717_v13 = vpack.c.bf16 %v372_v5, %v372_v5  ;;  %v718_v14 = vpack.c.bf16 %v373_v6, %v373_v6 }
  0x31   : > { %v719_v15 = vpack.c.bf16 %v374_v7, %v374_v7  ;;  %v720_v16 = vpack.c.bf16 %v375_v8, %v375_v8  ;;  %v721_v17 = vpack.c.bf16 %v376_v10, %v376_v10  ;;  %v722_v18 = vpack.c.bf16 %v377_v11, %v377_v11 }
  0x32   : > { %v723_v19 = vpack.c.bf16 %v378_v1, %v378_v1  ;;  %v724_v20 = vpack.c.bf16 %v379_v12, %v379_v12  ;;  %533 = vst.msk [vmem:[%s933_s28 + $0x60] sm:$0xf] %vm508_vm0, %v717_v13  ;;  %534 = vst.msk [vmem:[%s933_s28 + $0x64] sm:$0xf] %vm508_vm0, %v718_v14 }
  0x33   : > { %535 = vst.msk [vmem:[%s933_s28 + $0x68] sm:$0xf] %vm508_vm0, %v719_v15  ;;  %536 = vst.msk [vmem:[%s933_s28 + $0x6c] sm:$0xf] %vm508_vm0, %v720_v16 }
  0x34   : > { %537 = vst.msk [vmem:[%s933_s28 + $0x70] sm:$0xf] %vm508_vm0, %v721_v17  ;;  %538 = vst.msk [vmem:[%s933_s28 + $0x74] sm:$0xf] %vm508_vm0, %v722_v18 }
  0x35   : > { %539 = vst.msk [vmem:[%s933_s28 + $0x78] sm:$0xf] %vm508_vm0, %v723_v19  ;;  %540 = vst.msk [vmem:[%s933_s28 + $0x7c] sm:$0xf] %vm508_vm0, %v724_v20 }
  0x36 PF: > { %s13_s14 = sadd.s32 1, %s850_s14   ;;  %s1076_s12 = smov %s846_s13 }
  0x37   : > { %p10_p5 = scmp.ge.s32.totalorder %s13_s14, 4   ;;  %s1077_s13 = smov %s1079_s15 }
  0x39   :  { %12 = sbr.rel (!%p10_p5) target bundleno = 2 (0x2), region = 68 }

// kernel: blur_generator_forward.105
= control target key start
LH: loop header
LB: loop body
LE: loop exit
PB: predicated region body
PF: predicated region fallthrough
CT: control target
= control target key end

     0   :  { %vm344_vm0 = vcmask 1043456   ;;  %vm247_vm1 = vcmask 64512   ;;  %s2141_s1 = inlined_call_operand.vmem [shape: bf16[8,128], index: 1, kind: input, shape index: {}]   ;;  %s2142_s0 = inlined_call_operand.vmem [shape: bf16[512,8], index: 0, kind: input, shape index: {}]   ;;  %s2143_s2 = inlined_call_operand.vmem [shape: f32[1,128], index: 2, kind: input, shape index: {}]   ;;  %s2144_s3 = inlined_call_operand.vmem [shape: f32[512,128], index: 3, kind: output, shape index: {}]  }
   0x1   :  { %v79_v0 = vld [vmem:[%s2141_s1] sm:$0xf]  ;;  %v1323_v4 = vld [vmem:[%s2142_s0 + $0x8] sm:$0xff]   ;;  %v1325_v6 = vld [vmem:[%s2142_s0 + $0x10] sm:$0xff]  }
   0x2   :  { %1319 = vmatprep.subr.msk.bf16.mxu0 %vm344_vm0, %v79_v0  ;;  %1320 = vmatprep.subr.msk.bf16.mxu1 %vm344_vm0, %v79_v0  ;;  %v346_v1 = vsel %vm344_vm0, %v79_v0, 0  ;;  %v1321_v2 = vld [vmem:[%s2142_s0] sm:$0xff]   ;;  %v1324_v5 = vld [vmem:[%s2142_s0 + $0x88] sm:$0xff]   ;;  %v1326_v7 = vld [vmem:[%s2142_s0 + $0x90] sm:$0xff]  }
   0x3   :  { %1252 = vmatpush3.bf16.msra.mxu0 %v346_v1  ;;  %1318 = vmatpush3.bf16.msra.mxu1 %v346_v1  ;;  %v1322_v3 = vld [vmem:[%s2142_s0 + $0x80] sm:$0xff]   ;;  %v1327_v8 = vld [vmem:[%s2142_s0 + $0x18] sm:$0xff]   ;;  %v1331_v12 = vld [vmem:[%s2142_s0 + $0x28] sm:$0xff]  }
   0x4   :  { %1253 = vmatprep.mubr.msk.bf16.mxu0 %vm247_vm1, %v1321_v2  ;;  %1285 = vmatprep.mubr.msk.bf16.mxu1 %vm247_vm1, %v1322_v3  ;;  %v1328_v9 = vld [vmem:[%s2142_s0 + $0x98] sm:$0xff]   ;;  %v1329_v10 = vld [vmem:[%s2142_s0 + $0x20] sm:$0xff]   ;;  %v1332_v13 = vld [vmem:[%s2142_s0 + $0xa8] sm:$0xff]  }
   0x5   :  { %v1330_v11 = vld [vmem:[%s2142_s0 + $0xa0] sm:$0xff]   ;;  %v1333_v14 = vld [vmem:[%s2142_s0 + $0x30] sm:$0xff]   ;;  %v1335_v16 = vld [vmem:[%s2142_s0 + $0x38] sm:$0xff]  }
   0x6   :  { %1254 = vmatmul.mubr.msk.bf16.vlgmr.msra.gmra.mrb[0].mxu0 %vm247_vm1, %v1323_v4  ;;  %1286 = vmatmul.mubr.msk.bf16.vlgmr.msra.gmra.mrb[0].mxu1 %vm247_vm1, %v1324_v5  ;;  %v1334_v15 = vld [vmem:[%s2142_s0 + $0xb0] sm:$0xff]   ;;  %v1336_v17 = vld [vmem:[%s2142_s0 + $0xb8] sm:$0xff]   ;;  %v1337_v18 = vld [vmem:[%s2142_s0 + $0x40] sm:$0xff]  }
   0x7   :  { %1257 = vmatprep.mubr.msk.bf16.mxu0 %vm247_vm1, %v1325_v6  ;;  %1289 = vmatprep.mubr.msk.bf16.mxu1 %vm247_vm1, %v1326_v7  ;;  %v1338_v19 = vld [vmem:[%s2142_s0 + $0xc0] sm:$0xff]   ;;  %v1339_v20 = vld [vmem:[%s2142_s0 + $0x48] sm:$0xff]   ;;  %v1341_v22 = vld [vmem:[%s2142_s0 + $0x50] sm:$0xff]  }
   0x8   :  { %v1340_v21 = vld [vmem:[%s2142_s0 + $0xc8] sm:$0xff]   ;;  %v1342_v23 = vld [vmem:[%s2142_s0 + $0xd0] sm:$0xff]   ;;  %v1343_v24 = vld [vmem:[%s2142_s0 + $0x58] sm:$0xff]  }
   0x9   :  { %v1344_v25 = vld [vmem:[%s2142_s0 + $0xd8] sm:$0xff]   ;;  %v1345_v26 = vld [vmem:[%s2142_s0 + $0x60] sm:$0xff]   ;;  %v1347_v28 = vld [vmem:[%s2142_s0 + $0x68] sm:$0xff]  }
   0xa   :  { %v1346_v27 = vld [vmem:[%s2142_s0 + $0xe0] sm:$0xff]   ;;  %v1348_v29 = vld [vmem:[%s2142_s0 + $0xe8] sm:$0xff]   ;;  %v1349_v30 = vld [vmem:[%s2142_s0 + $0x70] sm:$0xff]  }
   0xb   :  { %v1350_v31 = vld [vmem:[%s2142_s0 + $0xf0] sm:$0xff]   ;;  %v1351_v32 = vld [vmem:[%s2142_s0 + $0x78] sm:$0xff]   ;;  %v1763_v34 = vld [vmem:[%s2143_s2] ss:$0 sm:$0xff] }
   0xc   :  { %v1352_v33 = vld [vmem:[%s2142_s0 + $0xf8] sm:$0xff]  }
   0xe   :  { %1258 = vmatmul.mubr.msk.bf16.gmra.mrb[4].mxu0 %vm247_vm1, %v1327_v8  ;;  %1290 = vmatmul.mubr.msk.bf16.gmra.mrb[4].mxu1 %vm247_vm1, %v1328_v9 }
   0xf   :  { %1261 = vmatprep.mubr.msk.bf16.mxu0 %vm247_vm1, %v1329_v10  ;;  %1293 = vmatprep.mubr.msk.bf16.mxu1 %vm247_vm1, %v1330_v11 }
  0x16   :  { %1262 = vmatmul.mubr.msk.bf16.gmra.mrb[8].mxu0 %vm247_vm1, %v1331_v12  ;;  %1294 = vmatmul.mubr.msk.bf16.gmra.mrb[8].mxu1 %vm247_vm1, %v1332_v13 }
  0x17   :  { %1265 = vmatprep.mubr.msk.bf16.mxu0 %vm247_vm1, %v1333_v14  ;;  %1297 = vmatprep.mubr.msk.bf16.mxu1 %vm247_vm1, %v1334_v15 }
  0x1e   :  { %1266 = vmatmul.mubr.msk.bf16.gmra.mrb[12].mxu0 %vm247_vm1, %v1335_v16  ;;  %1298 = vmatmul.mubr.msk.bf16.gmra.mrb[12].mxu1 %vm247_vm1, %v1336_v17 }
  0x1f   :  { %1269 = vmatprep.mubr.msk.bf16.mxu0 %vm247_vm1, %v1337_v18  ;;  %1301 = vmatprep.mubr.msk.bf16.mxu1 %vm247_vm1, %v1338_v19 }
  0x26   :  { %1270 = vmatmul.mubr.msk.bf16.gmra.mrb[16].mxu0 %vm247_vm1, %v1339_v20  ;;  %1302 = vmatmul.mubr.msk.bf16.gmra.mrb[16].mxu1 %vm247_vm1, %v1340_v21 }
  0x27   :  { %1273 = vmatprep.mubr.msk.bf16.mxu0 %vm247_vm1, %v1341_v22  ;;  %1305 = vmatprep.mubr.msk.bf16.mxu1 %vm247_vm1, %v1342_v23 }
  0x2e   :  { %1274 = vmatmul.mubr.msk.bf16.gmra.mrb[20].mxu0 %vm247_vm1, %v1343_v24  ;;  %1306 = vmatmul.mubr.msk.bf16.gmra.mrb[20].mxu1 %vm247_vm1, %v1344_v25 }
  0x2f   :  { %1277 = vmatprep.mubr.msk.bf16.mxu0 %vm247_vm1, %v1345_v26  ;;  %1309 = vmatprep.mubr.msk.bf16.mxu1 %vm247_vm1, %v1346_v27 }
  0x36   :  { %1278 = vmatmul.mubr.msk.bf16.gmra.mrb[24].mxu0 %vm247_vm1, %v1347_v28  ;;  %1310 = vmatmul.mubr.msk.bf16.gmra.mrb[24].mxu1 %vm247_vm1, %v1348_v29 }
  0x37   :  { %1281 = vmatprep.mubr.msk.bf16.mxu0 %vm247_vm1, %v1349_v30  ;;  %1313 = vmatprep.mubr.msk.bf16.mxu1 %vm247_vm1, %v1350_v31 }
  0x3e   :  { %1282 = vmatmul.mubr.msk.bf16.gmra.mrb[28].mxu0 %vm247_vm1, %v1351_v32  ;;  %1314 = vmatmul.mubr.msk.bf16.gmra.mrb[28].mxu1 %vm247_vm1, %v1352_v33 }
  0xd9   :  { %v1255_v35 = vpop.f32.mrb[0].mxu0  ;;  %v1287_v37 = vpop.f32.mrb[0].mxu1 }
  0xda   :  { %v391_v36 = vadd.f32 %v1255_v35, %v1763_v34  ;;  %v382_v38 = vpop.f32.mrb[1].mxu0  ;;  %v519_v39 = vadd.f32 %v1287_v37, %v1763_v34  ;;  %v510_v41 = vpop.f32.mrb[1].mxu1 }
  0xdb   :  { %v383_v40 = vadd.f32 %v1763_v34, %v382_v38  ;;  %v1256_v42 = vpop.f32.mrb[2].mxu0  ;;  %v511_v44 = vadd.f32 %v1763_v34, %v510_v41  ;;  %v1288_v46 = vpop.f32.mrb[2].mxu1 }
  0xdc   :  { %v1156_v43 = vmul.f32 -1.442695, %v391_v36  ;;  %v394_v45 = vadd.f32 %v1256_v42, %v1763_v34  ;;  %v385_v47 = vpop.f32.mrb[3].mxu0  ;;  %v1188_v48 = vmul.f32 -1.442695, %v519_v39  ;;  %v522_v50 = vadd.f32 %v1288_v46, %v1763_v34  ;;  %v513_v52 = vpop.f32.mrb[3].mxu1 }
  0xdd   :  { %v1154_v49 = vmul.f32 -1.442695, %v383_v40  ;;  %v386_v51 = vadd.f32 %v1763_v34, %v385_v47  ;;  %v1186_v53 = vmul.f32 -1.442695, %v511_v44  ;;  %v514_v55 = vadd.f32 %v1763_v34, %v513_v52 }
  0xde   :  { %1353 = vpow2.f32 %v1156_v43  ;;  %v1157_v54 = vmul.f32 -1.442695, %v394_v45  ;;  %v1189_v56 = vmul.f32 -1.442695, %v522_v50 }
  0xdf   :  { %1355 = vpow2.f32 %v1188_v48  ;;  %v1155_v57 = vmul.f32 -1.442695, %v386_v51  ;;  %v1187_v58 = vmul.f32 -1.442695, %v514_v55 }
  0xe0   :  { %1357 = vpow2.f32 %v1154_v49 }
  0xe1   :  { %1359 = vpow2.f32 %v1186_v53  ;;  %v1259_v59 = vpop.f32.mrb[4].mxu0  ;;  %v1291_v61 = vpop.f32.mrb[4].mxu1 }
  0xe2   :  { %1361 = vpow2.f32 %v1157_v54  ;;  %v407_v60 = vadd.f32 %v1259_v59, %v1763_v34  ;;  %v398_v62 = vpop.f32.mrb[5].mxu0  ;;  %v535_v63 = vadd.f32 %v1291_v61, %v1763_v34  ;;  %v526_v1 = vpop.f32.mrb[5].mxu1 }
  0xe3   :  { %1363 = vpow2.f32 %v1189_v56  ;;  %v399_v0 = vadd.f32 %v1763_v34, %v398_v62  ;;  %v1260_v2 = vpop.f32.mrb[6].mxu0  ;;  %v527_v4 = vadd.f32 %v1763_v34, %v526_v1  ;;  %v1292_v6 = vpop.f32.mrb[6].mxu1 }
  0xe4   :  { %1365 = vpow2.f32 %v1155_v57  ;;  %v1160_v3 = vmul.f32 -1.442695, %v407_v60  ;;  %v410_v5 = vadd.f32 %v1260_v2, %v1763_v34  ;;  %v401_v7 = vpop.f32.mrb[7].mxu0  ;;  %v1192_v8 = vmul.f32 -1.442695, %v535_v63  ;;  %v529_v10 = vpop.f32.mrb[7].mxu1 }
  0xe5   :  { %1367 = vpow2.f32 %v1187_v58  ;;  %v1158_v9 = vmul.f32 -1.442695, %v399_v0  ;;  %v1190_v11 = vmul.f32 -1.442695, %v527_v4  ;;  %v538_v39 = vadd.f32 %v1292_v6, %v1763_v34 }
  0xe6   :  { %1369 = vpow2.f32 %v1160_v3  ;;  %v1161_v12 = vmul.f32 -1.442695, %v410_v5  ;;  %v402_v42 = vadd.f32 %v1763_v34, %v401_v7  ;;  %v530_v46 = vadd.f32 %v1763_v34, %v529_v10 }
  0xe7   :  { %1371 = vpow2.f32 %v1192_v8  ;;  %v1193_v56 = vmul.f32 -1.442695, %v538_v39 }
  0xe8   :  { %v1354_v13 = vpop.eup %1353  ;;  %1373 = vpow2.f32 %v1158_v9  ;;  %v1159_v62 = vmul.f32 -1.442695, %v402_v42  ;;  %v1191_v2 = vmul.f32 -1.442695, %v530_v46 }
  0xe9   :  { %v1356_v14 = vpop.eup %1355  ;;  %v831_v15 = vadd.f32 1.0, %v1354_v13  ;;  %1375 = vpow2.f32 %v1190_v11  ;;  %v1263_v16 = vpop.f32.mrb[8].mxu0 }
  0xea   :  { %v1358_v17 = vpop.eup %1357  ;;  %v863_v18 = vadd.f32 1.0, %v1356_v14  ;;  %1377 = vpow2.f32 %v1161_v12  ;;  %v1295_v19 = vpop.f32.mrb[8].mxu1  ;;  %v423_v51 = vadd.f32 %v1263_v16, %v1763_v34 }
  0xeb   :  { %v414_v20 = vpop.f32.mrb[9].mxu0  ;;  %v1360_v21 = vpop.eup %1359  ;;  %1379 = vrcp.f32 %v831_v15  ;;  %v829_v22 = vadd.f32 1.0, %v1358_v17  ;;  %v551_v57 = vadd.f32 %v1295_v19, %v1763_v34 }
  0xec   :  { %v542_v23 = vpop.f32.mrb[9].mxu1  ;;  %v1264_v24 = vpop.f32.mrb[10].mxu0  ;;  %1381 = vrcp.f32 %v863_v18  ;;  %v861_v26 = vadd.f32 1.0, %v1360_v21  ;;  %v415_v63 = vadd.f32 %v1763_v34, %v414_v20  ;;  %v1164_v5 = vmul.f32 -1.442695, %v423_v51 }
  0xed   :  { %v1362_v25 = vpop.eup %1361  ;;  %v1296_v27 = vpop.f32.mrb[10].mxu1  ;;  %1383 = vrcp.f32 %v829_v22  ;;  %v543_v3 = vadd.f32 %v1763_v34, %v542_v23  ;;  %v426_v6 = vadd.f32 %v1264_v24, %v1763_v34  ;;  %v1196_v8 = vmul.f32 -1.442695, %v551_v57 }
  0xee   :  { %v1778_v28 = vpop.f32.mrb[11].mxu0  ;;  %v1364_v29 = vpop.eup %1363  ;;  %v832_v30 = vadd.f32 1.0, %v1362_v25  ;;  %1385 = vrcp.f32 %v861_v26  ;;  %v554_v9 = vadd.f32 %v1296_v27, %v1763_v34  ;;  %v1162_v11 = vmul.f32 -1.442695, %v415_v63 }
  0xef   :  { %v1780_v31 = vpop.f32.mrb[11].mxu1  ;;  %v1366_v32 = vpop.eup %1365  ;;  %v864_v33 = vadd.f32 1.0, %v1364_v29  ;;  %v418_v12 = vadd.f32 %v1763_v34, %v1778_v28  ;;  %v1194_v15 = vmul.f32 -1.442695, %v543_v3  ;;  %v1165_v20 = vmul.f32 -1.442695, %v426_v6 }
  0xf0   :  { %v1368_v35 = vpop.eup %1367  ;;  %1387 = vrcp.f32 %v832_v30  ;;  %v830_v36 = vadd.f32 1.0, %v1366_v32  ;;  %v546_v16 = vadd.f32 %v1763_v34, %v1780_v31  ;;  %v1197_v25 = vmul.f32 -1.442695, %v554_v9 }
  0xf1   :  { %v1370_v37 = vpop.eup %1369  ;;  %1389 = vrcp.f32 %v864_v33  ;;  %v862_v38 = vadd.f32 1.0, %v1368_v35  ;;  %v1267_v43 = vpop.f32.mrb[12].mxu0  ;;  %v1163_v30 = vmul.f32 -1.442695, %v418_v12 }
  0xf2   :  { %v1372_v40 = vpop.eup %1371  ;;  %1391 = vrcp.f32 %v830_v36  ;;  %v835_v41 = vadd.f32 1.0, %v1370_v37  ;;  %v1299_v47 = vpop.f32.mrb[12].mxu1  ;;  %v439_v21 = vadd.f32 %v1267_v43, %v1763_v34  ;;  %v1195_v33 = vmul.f32 -1.442695, %v546_v16 }
  0xf3   :  { %v1374_v44 = vpop.eup %1373  ;;  %1393 = vrcp.f32 %v862_v38  ;;  %v867_v45 = vadd.f32 1.0, %v1372_v40  ;;  %v1785_v48 = vpop.f32.mrb[13].mxu0  ;;  %v567_v26 = vadd.f32 %v1299_v47, %v1763_v34 }
  0xf4   :  { %v1376_v49 = vpop.eup %1375  ;;  %1395 = vrcp.f32 %v835_v41  ;;  %v833_v50 = vadd.f32 1.0, %v1374_v44  ;;  %v1788_v52 = vpop.f32.mrb[13].mxu1  ;;  %v1168_v37 = vmul.f32 -1.442695, %v439_v21 }
  0xf5   :  { %v1790_v53 = vpop.f32.mrb[14].mxu0  ;;  %v1378_v54 = vpop.eup %1377  ;;  %1397 = vrcp.f32 %v867_v45  ;;  %v865_v55 = vadd.f32 1.0, %v1376_v49  ;;  %v1200_v40 = vmul.f32 -1.442695, %v567_v26  ;;  %v559_v3 = vadd.f32 %v1763_v34, %v1788_v52 }
  0xf6   :  { %v1793_v58 = vpop.f32.mrb[14].mxu1  ;;  %v1795_v59 = vpop.f32.mrb[15].mxu0  ;;  %1399 = vrcp.f32 %v833_v50  ;;  %v836_v61 = vadd.f32 1.0, %v1378_v54 }
  0xf7   :  { %v1380_v60 = vpop.eup %1379  ;;  %v1798_v0 = vpop.f32.mrb[15].mxu1  ;;  %1401 = vrcp.f32 %v865_v55 }
  0xf8   :  { %v1382_v1 = vpop.eup %1381  ;;  %1023 = vst [vmem:[%s2144_s3 + $0x10] sm:$0xff] %v1380_v60  ;;  %1403 = vrcp.f32 %v836_v61 }
  0xf9   :  { %v1384_v4 = vpop.eup %1383  ;;  %1055 = vst [vmem:[%s2144_s3 + $0x110] sm:$0xff] %v1382_v1  ;;  %1405 = vpow2.f32 %v1193_v56  ;;  %v1817_v13 = vpop.f32.mrb[16].mxu0 }
  0xfa   :  { %v1386_v7 = vpop.eup %1385  ;;  %1021 = vst [vmem:[%s2144_s3] sm:$0xff] %v1384_v4  ;;  %1407 = vpow2.f32 %v1159_v62  ;;  %v1824_v17 = vpop.f32.mrb[16].mxu1 }
  0xfb   :  { %v1388_v10 = vpop.eup %1387  ;;  %1053 = vst [vmem:[%s2144_s3 + $0x100] sm:$0xff] %v1386_v7  ;;  %1409 = vpow2.f32 %v1191_v2  ;;  %v1826_v18 = vpop.f32.mrb[17].mxu0  ;;  %v431_v2 = vadd.f32 %v1763_v34, %v1785_v48 }
  0xfc   :  { %v1390_v14 = vpop.eup %1389  ;;  %1024 = vst [vmem:[%s2144_s3 + $0x18] sm:$0xff] %v1388_v10  ;;  %1411 = vpow2.f32 %v1164_v5  ;;  %v1832_v22 = vpop.f32.mrb[17].mxu1 }
  0xfd   :  { %v1392_v19 = vpop.eup %1391  ;;  %1056 = vst [vmem:[%s2144_s3 + $0x118] sm:$0xff] %v1390_v14  ;;  %v1834_v23 = vpop.f32.mrb[18].mxu0  ;;  %1413 = vpow2.f32 %v1196_v8  ;;  %v1166_v16 = vmul.f32 -1.442695, %v431_v2 }
  0xfe   :  { %v1394_v24 = vpop.eup %1393  ;;  %1022 = vst [vmem:[%s2144_s3 + $0x8] sm:$0xff] %v1392_v19  ;;  %v1840_v27 = vpop.f32.mrb[18].mxu1  ;;  %1415 = vpow2.f32 %v1162_v11  ;;  %v1198_v19 = vmul.f32 -1.442695, %v559_v3 }
  0xff   :  { %v449_v28 = vpop.f32.mrb[19].mxu0  ;;  %v1396_v29 = vpop.eup %1395  ;;  %1054 = vst [vmem:[%s2144_s3 + $0x108] sm:$0xff] %v1394_v24  ;;  %1417 = vpow2.f32 %v1194_v15 }
 0x100   :  { %v577_v31 = vpop.f32.mrb[19].mxu1  ;;  %v1398_v32 = vpop.eup %1397  ;;  %1027 = vst [vmem:[%s2144_s3 + $0x30] sm:$0xff] %v1396_v29  ;;  %v1849_v35 = vadd.f32 %v1763_v34, %v449_v28  ;;  %1419 = vpow2.f32 %v1165_v20 }
 0x101   :  { %v1400_v36 = vpop.eup %1399  ;;  %1059 = vst [vmem:[%s2144_s3 + $0x130] sm:$0xff] %v1398_v32  ;;  %v1855_v38 = vadd.f32 %v1763_v34, %v577_v31  ;;  %1421 = vpow2.f32 %v1197_v25  ;;  %v1275_v42 = vpop.f32.mrb[20].mxu0  ;;  %v442_v25 = vadd.f32 %v1790_v53, %v1763_v34  ;;  %v570_v53 = vadd.f32 %v1793_v58, %v1763_v34 }
 0x102   :  { %v1402_v39 = vpop.eup %1401  ;;  %1025 = vst [vmem:[%s2144_s3 + $0x20] sm:$0xff] %v1400_v36  ;;  %1423 = vpow2.f32 %v1163_v30  ;;  %v1867_v44 = vadd.f32 %v1275_v42, %v1763_v34  ;;  %v1307_v45 = vpop.f32.mrb[20].mxu1  ;;  %v455_v58 = vadd.f32 %v1817_v13, %v1763_v34 }
 0x103   :  { %v1404_v41 = vpop.eup %1403  ;;  %1057 = vst [vmem:[%s2144_s3 + $0x120] sm:$0xff] %v1402_v39  ;;  %1425 = vpow2.f32 %v1195_v33  ;;  %v462_v46 = vpop.f32.mrb[21].mxu0  ;;  %v1870_v50 = vadd.f32 %v1307_v45, %v1763_v34  ;;  %v1201_v13 = vmul.f32 -1.442695, %v570_v53 }
 0x104   :  { %v1406_v43 = vpop.eup %1405  ;;  %1028 = vst [vmem:[%s2144_s3 + $0x38] sm:$0xff] %v1404_v41  ;;  %1427 = vpow2.f32 %v1168_v37  ;;  %v1873_v51 = vadd.f32 %v1763_v34, %v462_v46  ;;  %v590_v54 = vpop.f32.mrb[21].mxu1 }
 0x105   :  { %v1408_v47 = vpop.eup %1407  ;;  %v868_v49 = vadd.f32 1.0, %v1406_v43  ;;  %v1276_v55 = vpop.f32.mrb[22].mxu0  ;;  %1429 = vpow2.f32 %v1200_v40  ;;  %v1876_v60 = vadd.f32 %v1763_v34, %v590_v54 }
 0x106   :  { %v1410_v56 = vpop.eup %1409  ;;  %v834_v57 = vadd.f32 1.0, %v1408_v47  ;;  %v1308_v61 = vpop.f32.mrb[22].mxu1  ;;  %v1883_v7 = vadd.f32 %v1276_v55, %v1763_v34  ;;  %v434_v47 = vadd.f32 %v1763_v34, %v1795_v59 }
 0x107   :  { %v465_v62 = vpop.f32.mrb[23].mxu0  ;;  %v1412_v63 = vpop.eup %1411  ;;  %1431 = vrcp.f32 %v868_v49  ;;  %v866_v1 = vadd.f32 1.0, %v1410_v56  ;;  %v1886_v10 = vadd.f32 %v1308_v61, %v1763_v34  ;;  %v562_v49 = vadd.f32 %v1763_v34, %v1798_v0 }
 0x108   :  { %v593_v4 = vpop.f32.mrb[23].mxu1  ;;  %v1414_v5 = vpop.eup %1413  ;;  %1433 = vrcp.f32 %v834_v57  ;;  %v839_v6 = vadd.f32 1.0, %v1412_v63  ;;  %v1889_v11 = vadd.f32 %v1763_v34, %v465_v62 }
 0x109   :  { %v1416_v8 = vpop.eup %1415  ;;  %1435 = vrcp.f32 %v866_v1  ;;  %v871_v9 = vadd.f32 1.0, %v1414_v5  ;;  %v1892_v52 = vadd.f32 %v1763_v34, %v593_v4  ;;  %v1279_v20 = vpop.f32.mrb[24].mxu0  ;;  %v1169_v1 = vmul.f32 -1.442695, %v442_v25 }
 0x10a   :  { %v1418_v48 = vpop.eup %1417  ;;  %1437 = vrcp.f32 %v839_v6  ;;  %v837_v12 = vadd.f32 1.0, %v1416_v8  ;;  %v1897_v26 = vadd.f32 %v1279_v20, %v1763_v34  ;;  %v1311_v28 = vpop.f32.mrb[24].mxu1  ;;  %v1167_v4 = vmul.f32 -1.442695, %v434_v47 }
 0x10b   :  { %v1420_v14 = vpop.eup %1419  ;;  %1439 = vrcp.f32 %v871_v9  ;;  %v869_v15 = vadd.f32 1.0, %v1418_v48  ;;  %v478_v29 = vpop.f32.mrb[25].mxu0  ;;  %v1900_v32 = vadd.f32 %v1311_v28, %v1763_v34  ;;  %v1199_v5 = vmul.f32 -1.442695, %v562_v49 }
 0x10c   :  { %v1422_v21 = vpop.eup %1421  ;;  %1441 = vrcp.f32 %v837_v12  ;;  %v840_v24 = vadd.f32 1.0, %v1420_v14  ;;  %v1903_v33 = vadd.f32 %v1763_v34, %v478_v29  ;;  %v606_v36 = vpop.f32.mrb[25].mxu1  ;;  %v583_v6 = vadd.f32 %v1824_v17, %v1763_v34 }
 0x10d   :  { %v1424_v30 = vpop.eup %1423  ;;  %1443 = vrcp.f32 %v869_v15  ;;  %v872_v31 = vadd.f32 1.0, %v1422_v21  ;;  %v1280_v37 = vpop.f32.mrb[26].mxu0  ;;  %v1908_v41 = vadd.f32 %v1763_v34, %v606_v36  ;;  %v1172_v48 = vmul.f32 -1.442695, %v455_v58 }
 0x10e   :  { %v1426_v39 = vpop.eup %1425  ;;  %1445 = vrcp.f32 %v840_v24  ;;  %v838_v40 = vadd.f32 1.0, %v1424_v30  ;;  %v1312_v42 = vpop.f32.mrb[26].mxu1  ;;  %v1917_v57 = vadd.f32 %v1280_v37, %v1763_v34  ;;  %v447_v12 = vadd.f32 %v1763_v34, %v1826_v18 }
 0x10f   :  { %v481_v43 = vpop.f32.mrb[27].mxu0  ;;  %v1428_v45 = vpop.eup %1427  ;;  %1447 = vrcp.f32 %v872_v31  ;;  %v870_v46 = vadd.f32 1.0, %v1426_v39  ;;  %v1920_v63 = vadd.f32 %v1312_v42, %v1763_v34  ;;  %v575_v17 = vadd.f32 %v1763_v34, %v1832_v22 }
 0x110   :  { %v609_v54 = vpop.f32.mrb[27].mxu1  ;;  %v1430_v55 = vpop.eup %1429  ;;  %1449 = vrcp.f32 %v838_v40  ;;  %v843_v56 = vadd.f32 1.0, %v1428_v45  ;;  %v1923_v59 = vadd.f32 %v1763_v34, %v481_v43  ;;  %v1204_v37 = vmul.f32 -1.442695, %v583_v6 }
 0x111   :  { %v1432_v61 = vpop.eup %1431  ;;  %1451 = vrcp.f32 %v870_v46  ;;  %v875_v62 = vadd.f32 1.0, %v1430_v55  ;;  %v1929_v2 = vadd.f32 %v1763_v34, %v609_v54  ;;  %v1283_v8 = vpop.f32.mrb[28].mxu0  ;;  %v586_v39 = vadd.f32 %v1840_v27, %v1763_v34 }
 0x112   :  { %v1434_v0 = vpop.eup %1433  ;;  %1060 = vst [vmem:[%s2144_s3 + $0x138] sm:$0xff] %v1432_v61  ;;  %1453 = vrcp.f32 %v843_v56  ;;  %v1942_v14 = vadd.f32 %v1283_v8, %v1763_v34  ;;  %v1315_v15 = vpop.f32.mrb[28].mxu1  ;;  %v1170_v42 = vmul.f32 -1.442695, %v447_v12  ;;  %v1202_v27 = vmul.f32 -1.442695, %v575_v17 }
 0x113   :  { %v1436_v3 = vpop.eup %1435  ;;  %1026 = vst [vmem:[%s2144_s3 + $0x28] sm:$0xff] %v1434_v0  ;;  %1455 = vrcp.f32 %v875_v62  ;;  %v494_v20 = vpop.f32.mrb[29].mxu0  ;;  %v1205_v55 = vmul.f32 -1.442695, %v586_v39 }
 0x114   :  { %v1438_v9 = vpop.eup %1437  ;;  %1058 = vst [vmem:[%s2144_s3 + $0x128] sm:$0xff] %v1436_v3  ;;  %1457 = vpow2.f32 %v1166_v16  ;;  %v1950_v16 = vadd.f32 %v1315_v15, %v1763_v34  ;;  %v1953_v24 = vadd.f32 %v1763_v34, %v494_v20  ;;  %v622_v18 = vpop.f32.mrb[29].mxu1 }
 0x115   :  { %v1440_v21 = vpop.eup %1439  ;;  %1031 = vst [vmem:[%s2144_s3 + $0x50] sm:$0xff] %v1438_v9  ;;  %1459 = vpow2.f32 %v1198_v19  ;;  %v1284_v25 = vpop.f32.mrb[30].mxu0  ;;  %v458_v19 = vadd.f32 %v1834_v23, %v1763_v34  ;;  %v1961_v29 = vadd.f32 %v1763_v34, %v622_v18 }
 0x116   :  { %v1442_v28 = vpop.eup %1441  ;;  %1063 = vst [vmem:[%s2144_s3 + $0x150] sm:$0xff] %v1440_v21  ;;  %1461 = vpow2.f32 %v1169_v1  ;;  %v1964_v22 = vadd.f32 %v1284_v25, %v1763_v34  ;;  %v1316_v30 = vpop.f32.mrb[30].mxu1 }
 0x117   :  { %v497_v31 = vpop.f32.mrb[31].mxu0  ;;  %v1444_v36 = vpop.eup %1443  ;;  %1029 = vst [vmem:[%s2144_s3 + $0x40] sm:$0xff] %v1442_v28  ;;  %1463 = vpow2.f32 %v1201_v13  ;;  %v1972_v23 = vadd.f32 %v1316_v30, %v1763_v34  ;;  %v1173_v49 = vmul.f32 -1.442695, %v458_v19 }
 0x118   :  { %v625_v40 = vpop.f32.mrb[31].mxu1  ;;  %v1446_v53 = vpop.eup %1445  ;;  %1061 = vst [vmem:[%s2144_s3 + $0x140] sm:$0xff] %v1444_v36  ;;  %1465 = vpow2.f32 %v1167_v4  ;;  %v1978_v43 = vadd.f32 %v1763_v34, %v497_v31 }
 0x119   :  { %v1448_v45 = vpop.eup %1447  ;;  %1032 = vst [vmem:[%s2144_s3 + $0x58] sm:$0xff] %v1446_v53  ;;  %1467 = vpow2.f32 %v1199_v5  ;;  %v1984_v46 = vadd.f32 %v1763_v34, %v625_v40  ;;  %v1171_v34 = vmul.f32 -1.442695, %v1849_v35  ;;  %v1176_v53 = vmul.f32 -1.442695, %v1867_v44 }
 0x11a   :  { %v1450_v47 = vpop.eup %1449  ;;  %1064 = vst [vmem:[%s2144_s3 + $0x158] sm:$0xff] %v1448_v45  ;;  %1469 = vpow2.f32 %v1172_v48  ;;  %v1208_v45 = vmul.f32 -1.442695, %v1870_v50  ;;  %v1206_v44 = vmul.f32 -1.442695, %v1876_v60 }
 0x11b   :  { %v1452_v54 = vpop.eup %1451  ;;  %1030 = vst [vmem:[%s2144_s3 + $0x48] sm:$0xff] %v1450_v47  ;;  %1471 = vpow2.f32 %v1204_v37  ;;  %v1203_v37 = vmul.f32 -1.442695, %v1855_v38  ;;  %v1174_v38 = vmul.f32 -1.442695, %v1873_v51 }
 0x11c   :  { %v1454_v56 = vpop.eup %1453  ;;  %1062 = vst [vmem:[%s2144_s3 + $0x148] sm:$0xff] %v1452_v54  ;;  %1473 = vpow2.f32 %v1170_v42  ;;  %v1177_v50 = vmul.f32 -1.442695, %v1883_v7  ;;  %v1209_v51 = vmul.f32 -1.442695, %v1886_v10 }
 0x11d   :  { %v1456_v58 = vpop.eup %1455  ;;  %1035 = vst [vmem:[%s2144_s3 + $0x70] sm:$0xff] %v1454_v56  ;;  %1475 = vpow2.f32 %v1202_v27  ;;  %v1175_v60 = vmul.f32 -1.442695, %v1889_v11  ;;  %v1207_v7 = vmul.f32 -1.442695, %v1892_v52 }
 0x11e   :  { %v1458_v61 = vpop.eup %1457  ;;  %1067 = vst [vmem:[%s2144_s3 + $0x170] sm:$0xff] %v1456_v58  ;;  %1477 = vpow2.f32 %v1173_v49  ;;  %v1180_v10 = vmul.f32 -1.442695, %v1897_v26  ;;  %v1212_v11 = vmul.f32 -1.442695, %v1900_v32 }
 0x11f   :  { %v1460_v62 = vpop.eup %1459  ;;  %v841_v0 = vadd.f32 1.0, %v1458_v61  ;;  %1479 = vpow2.f32 %v1205_v55  ;;  %v1178_v52 = vmul.f32 -1.442695, %v1903_v33  ;;  %v1210_v26 = vmul.f32 -1.442695, %v1908_v41 }
 0x120   :  { %v1462_v1 = vpop.eup %1461  ;;  %v873_v13 = vadd.f32 1.0, %v1460_v62  ;;  %1481 = vpow2.f32 %v1171_v34 }
 0x121   :  { %v1464_v3 = vpop.eup %1463  ;;  %1483 = vrcp.f32 %v841_v0  ;;  %v844_v35 = vadd.f32 1.0, %v1462_v1 }
 0x122   :  { %v1466_v4 = vpop.eup %1465  ;;  %1485 = vrcp.f32 %v873_v13  ;;  %v876_v5 = vadd.f32 1.0, %v1464_v3 }
 0x123   :  { %v1468_v6 = vpop.eup %1467  ;;  %1487 = vrcp.f32 %v844_v35  ;;  %v842_v8 = vadd.f32 1.0, %v1466_v4 }
 0x124   :  { %v1470_v9 = vpop.eup %1469  ;;  %1489 = vrcp.f32 %v876_v5  ;;  %v874_v48 = vadd.f32 1.0, %v1468_v6 }
 0x125   :  { %v1472_v12 = vpop.eup %1471  ;;  %1491 = vrcp.f32 %v842_v8  ;;  %v847_v15 = vadd.f32 1.0, %v1470_v9 }
 0x126   :  { %v1474_v20 = vpop.eup %1473  ;;  %1493 = vrcp.f32 %v874_v48  ;;  %v879_v21 = vadd.f32 1.0, %v1472_v12 }
 0x127   :  { %v1476_v17 = vpop.eup %1475  ;;  %1495 = vrcp.f32 %v847_v15  ;;  %v845_v18 = vadd.f32 1.0, %v1474_v20 }
 0x128   :  { %v1478_v25 = vpop.eup %1477  ;;  %1497 = vrcp.f32 %v879_v21  ;;  %v877_v28 = vadd.f32 1.0, %v1476_v17 }
 0x129   :  { %v1480_v19 = vpop.eup %1479  ;;  %1499 = vrcp.f32 %v845_v18  ;;  %v848_v30 = vadd.f32 1.0, %v1478_v25 }
 0x12a   :  { %v1482_v31 = vpop.eup %1481  ;;  %1501 = vrcp.f32 %v877_v28  ;;  %v880_v36 = vadd.f32 1.0, %v1480_v19 }
 0x12b   :  { %v1484_v39 = vpop.eup %1483  ;;  %1503 = vrcp.f32 %v848_v30  ;;  %v846_v40 = vadd.f32 1.0, %v1482_v31 }
 0x12c   :  { %v1486_v42 = vpop.eup %1485  ;;  %1033 = vst [vmem:[%s2144_s3 + $0x60] sm:$0xff] %v1484_v39  ;;  %1505 = vrcp.f32 %v880_v36 }
 0x12d   :  { %v1488_v27 = vpop.eup %1487  ;;  %1065 = vst [vmem:[%s2144_s3 + $0x160] sm:$0xff] %v1486_v42  ;;  %1507 = vrcp.f32 %v846_v40 }
 0x12e   :  { %v1490_v47 = vpop.eup %1489  ;;  %1036 = vst [vmem:[%s2144_s3 + $0x78] sm:$0xff] %v1488_v27  ;;  %1509 = vpow2.f32 %v1203_v37  ;;  %v1181_v37 = vmul.f32 -1.442695, %v1917_v57  ;;  %v1211_v57 = vmul.f32 -1.442695, %v1929_v2 }
 0x12f   :  { %v1492_v49 = vpop.eup %1491  ;;  %1068 = vst [vmem:[%s2144_s3 + $0x178] sm:$0xff] %v1490_v47  ;;  %1511 = vpow2.f32 %v1176_v53  ;;  %v1213_v53 = vmul.f32 -1.442695, %v1920_v63  ;;  %v1184_v63 = vmul.f32 -1.442695, %v1942_v14 }
 0x130   :  { %v1494_v54 = vpop.eup %1493  ;;  %1034 = vst [vmem:[%s2144_s3 + $0x68] sm:$0xff] %v1492_v49  ;;  %1513 = vpow2.f32 %v1208_v45  ;;  %v1179_v45 = vmul.f32 -1.442695, %v1923_v59  ;;  %v1216_v59 = vmul.f32 -1.442695, %v1950_v16 }
 0x131   :  { %v1496_v55 = vpop.eup %1495  ;;  %1066 = vst [vmem:[%s2144_s3 + $0x168] sm:$0xff] %v1494_v54  ;;  %1515 = vpow2.f32 %v1174_v38  ;;  %v1182_v2 = vmul.f32 -1.442695, %v1953_v24  ;;  %v1214_v14 = vmul.f32 -1.442695, %v1961_v29 }
 0x132   :  { %v1498_v56 = vpop.eup %1497  ;;  %1039 = vst [vmem:[%s2144_s3 + $0x90] sm:$0xff] %v1496_v55  ;;  %1517 = vpow2.f32 %v1206_v44  ;;  %v1185_v16 = vmul.f32 -1.442695, %v1964_v22  ;;  %v1217_v24 = vmul.f32 -1.442695, %v1972_v23 }
 0x133   :  { %v1500_v34 = vpop.eup %1499  ;;  %1071 = vst [vmem:[%s2144_s3 + $0x190] sm:$0xff] %v1498_v56  ;;  %1519 = vpow2.f32 %v1177_v50  ;;  %v1183_v29 = vmul.f32 -1.442695, %v1978_v43  ;;  %v1215_v22 = vmul.f32 -1.442695, %v1984_v46 }
 0x134   :  { %v1502_v58 = vpop.eup %1501  ;;  %1037 = vst [vmem:[%s2144_s3 + $0x80] sm:$0xff] %v1500_v34  ;;  %1521 = vpow2.f32 %v1209_v51 }
 0x135   :  { %v1504_v61 = vpop.eup %1503  ;;  %1069 = vst [vmem:[%s2144_s3 + $0x180] sm:$0xff] %v1502_v58  ;;  %1523 = vpow2.f32 %v1175_v60 }
 0x136   :  { %v1506_v62 = vpop.eup %1505  ;;  %1040 = vst [vmem:[%s2144_s3 + $0x98] sm:$0xff] %v1504_v61  ;;  %1525 = vpow2.f32 %v1207_v7 }
 0x137   :  { %v1508_v0 = vpop.eup %1507  ;;  %1072 = vst [vmem:[%s2144_s3 + $0x198] sm:$0xff] %v1506_v62  ;;  %1527 = vpow2.f32 %v1180_v10 }
 0x138   :  { %v1510_v32 = vpop.eup %1509  ;;  %1038 = vst [vmem:[%s2144_s3 + $0x88] sm:$0xff] %v1508_v0  ;;  %1529 = vpow2.f32 %v1212_v11 }
 0x139   :  { %v1512_v33 = vpop.eup %1511  ;;  %v878_v1 = vadd.f32 1.0, %v1510_v32  ;;  %1531 = vpow2.f32 %v1178_v52 }
 0x13a   :  { %v1514_v13 = vpop.eup %1513  ;;  %v851_v3 = vadd.f32 1.0, %v1512_v33  ;;  %1533 = vpow2.f32 %v1210_v26 }
 0x13b   :  { %v1516_v35 = vpop.eup %1515  ;;  %1535 = vrcp.f32 %v878_v1  ;;  %v883_v41 = vadd.f32 1.0, %v1514_v13 }
 0x13c   :  { %v1518_v4 = vpop.eup %1517  ;;  %1537 = vrcp.f32 %v851_v3  ;;  %v849_v5 = vadd.f32 1.0, %v1516_v35 }
 0x13d   :  { %v1520_v6 = vpop.eup %1519  ;;  %1539 = vrcp.f32 %v883_v41  ;;  %v881_v8 = vadd.f32 1.0, %v1518_v4 }
 0x13e   :  { %v1522_v9 = vpop.eup %1521  ;;  %1541 = vrcp.f32 %v849_v5  ;;  %v852_v48 = vadd.f32 1.0, %v1520_v6 }
 0x13f   :  { %v1524_v12 = vpop.eup %1523  ;;  %1543 = vrcp.f32 %v881_v8  ;;  %v884_v15 = vadd.f32 1.0, %v1522_v9 }
 0x140   :  { %v1526_v20 = vpop.eup %1525  ;;  %1545 = vrcp.f32 %v852_v48  ;;  %v850_v21 = vadd.f32 1.0, %v1524_v12 }
 0x141   :  { %v1528_v17 = vpop.eup %1527  ;;  %1547 = vrcp.f32 %v884_v15  ;;  %v882_v18 = vadd.f32 1.0, %v1526_v20 }
 0x142   :  { %v1530_v25 = vpop.eup %1529  ;;  %1549 = vrcp.f32 %v850_v21  ;;  %v855_v28 = vadd.f32 1.0, %v1528_v17 }
 0x143   :  { %v1532_v19 = vpop.eup %1531  ;;  %1551 = vrcp.f32 %v882_v18  ;;  %v887_v30 = vadd.f32 1.0, %v1530_v25 }
 0x144   :  { %v1534_v31 = vpop.eup %1533  ;;  %1553 = vrcp.f32 %v855_v28  ;;  %v853_v36 = vadd.f32 1.0, %v1532_v19 }
 0x145   :  { %v1536_v39 = vpop.eup %1535  ;;  %1555 = vrcp.f32 %v887_v30  ;;  %v885_v40 = vadd.f32 1.0, %v1534_v31 }
 0x146   :  { %v1538_v42 = vpop.eup %1537  ;;  %1070 = vst [vmem:[%s2144_s3 + $0x188] sm:$0xff] %v1536_v39  ;;  %1557 = vrcp.f32 %v853_v36 }
 0x147   :  { %v1540_v27 = vpop.eup %1539  ;;  %1043 = vst [vmem:[%s2144_s3 + $0xb0] sm:$0xff] %v1538_v42  ;;  %1559 = vrcp.f32 %v885_v40 }
 0x148   :  { %v1542_v38 = vpop.eup %1541  ;;  %1075 = vst [vmem:[%s2144_s3 + $0x1b0] sm:$0xff] %v1540_v27  ;;  %1561 = vpow2.f32 %v1181_v37 }
 0x149   :  { %v1544_v47 = vpop.eup %1543  ;;  %1041 = vst [vmem:[%s2144_s3 + $0xa0] sm:$0xff] %v1542_v38  ;;  %1563 = vpow2.f32 %v1213_v53 }
 0x14a   :  { %v1546_v44 = vpop.eup %1545  ;;  %1073 = vst [vmem:[%s2144_s3 + $0x1a0] sm:$0xff] %v1544_v47  ;;  %1565 = vpow2.f32 %v1179_v45 }
 0x14b   :  { %v1548_v49 = vpop.eup %1547  ;;  %1044 = vst [vmem:[%s2144_s3 + $0xb8] sm:$0xff] %v1546_v44  ;;  %1567 = vpow2.f32 %v1211_v57 }
 0x14c   :  { %v1550_v50 = vpop.eup %1549  ;;  %1076 = vst [vmem:[%s2144_s3 + $0x1b8] sm:$0xff] %v1548_v49  ;;  %1569 = vpow2.f32 %v1184_v63 }
 0x14d   :  { %v1552_v54 = vpop.eup %1551  ;;  %1042 = vst [vmem:[%s2144_s3 + $0xa8] sm:$0xff] %v1550_v50  ;;  %1571 = vpow2.f32 %v1216_v59 }
 0x14e   :  { %v1554_v51 = vpop.eup %1553  ;;  %1074 = vst [vmem:[%s2144_s3 + $0x1a8] sm:$0xff] %v1552_v54  ;;  %1573 = vpow2.f32 %v1182_v2 }
 0x14f   :  { %v1556_v55 = vpop.eup %1555  ;;  %1047 = vst [vmem:[%s2144_s3 + $0xd0] sm:$0xff] %v1554_v51  ;;  %1575 = vpow2.f32 %v1214_v14 }
 0x150   :  { %v1558_v60 = vpop.eup %1557  ;;  %1079 = vst [vmem:[%s2144_s3 + $0x1d0] sm:$0xff] %v1556_v55  ;;  %1577 = vpow2.f32 %v1185_v16 }
 0x151   :  { %v1560_v23 = vpop.eup %1559  ;;  %1045 = vst [vmem:[%s2144_s3 + $0xc0] sm:$0xff] %v1558_v60  ;;  %1579 = vpow2.f32 %v1217_v24 }
 0x152   :  { %v1562_v43 = vpop.eup %1561  ;;  %1077 = vst [vmem:[%s2144_s3 + $0x1c0] sm:$0xff] %v1560_v23  ;;  %1581 = vpow2.f32 %v1183_v29 }
 0x153   :  { %v1564_v56 = vpop.eup %1563  ;;  %v856_v46 = vadd.f32 1.0, %v1562_v43  ;;  %1583 = vpow2.f32 %v1215_v22 }
 0x154   :  { %v1566_v7 = vpop.eup %1565  ;;  %v888_v34 = vadd.f32 1.0, %v1564_v56 }
 0x155   :  { %v1568_v10 = vpop.eup %1567  ;;  %1585 = vrcp.f32 %v856_v46  ;;  %v854_v58 = vadd.f32 1.0, %v1566_v7 }
 0x156   :  { %v1570_v11 = vpop.eup %1569  ;;  %1587 = vrcp.f32 %v888_v34  ;;  %v886_v61 = vadd.f32 1.0, %v1568_v10 }
 0x157   :  { %v1572_v52 = vpop.eup %1571  ;;  %1589 = vrcp.f32 %v854_v58  ;;  %v859_v62 = vadd.f32 1.0, %v1570_v11 }
 0x158   :  { %v1574_v26 = vpop.eup %1573  ;;  %1591 = vrcp.f32 %v886_v61  ;;  %v891_v0 = vadd.f32 1.0, %v1572_v52 }
 0x159   :  { %v1576_v32 = vpop.eup %1575  ;;  %1593 = vrcp.f32 %v859_v62  ;;  %v857_v33 = vadd.f32 1.0, %v1574_v26 }
 0x15a   :  { %v1578_v1 = vpop.eup %1577  ;;  %1595 = vrcp.f32 %v891_v0  ;;  %v889_v13 = vadd.f32 1.0, %v1576_v32 }
 0x15b   :  { %v1580_v3 = vpop.eup %1579  ;;  %1597 = vrcp.f32 %v857_v33  ;;  %v860_v35 = vadd.f32 1.0, %v1578_v1 }
 0x15c   :  { %v1582_v41 = vpop.eup %1581  ;;  %1599 = vrcp.f32 %v889_v13  ;;  %v892_v4 = vadd.f32 1.0, %v1580_v3 }
 0x15d   :  { %v1584_v5 = vpop.eup %1583  ;;  %1601 = vrcp.f32 %v860_v35  ;;  %v858_v6 = vadd.f32 1.0, %v1582_v41 }
 0x15e   :  { %1603 = vrcp.f32 %v892_v4  ;;  %v890_v8 = vadd.f32 1.0, %v1584_v5 }
 0x15f   :  { %v1586_v9 = vpop.eup %1585  ;;  %1605 = vrcp.f32 %v858_v6 }
 0x160   :  { %v1588_v48 = vpop.eup %1587  ;;  %1048 = vst [vmem:[%s2144_s3 + $0xd8] sm:$0xff] %v1586_v9  ;;  %1607 = vrcp.f32 %v890_v8 }
 0x161   :  { %v1590_v12 = vpop.eup %1589  ;;  %1080 = vst [vmem:[%s2144_s3 + $0x1d8] sm:$0xff] %v1588_v48 }
 0x162   :  { %v1592_v15 = vpop.eup %1591  ;;  %1046 = vst [vmem:[%s2144_s3 + $0xc8] sm:$0xff] %v1590_v12 }
 0x163   :  { %v1594_v20 = vpop.eup %1593  ;;  %1078 = vst [vmem:[%s2144_s3 + $0x1c8] sm:$0xff] %v1592_v15 }
 0x164   :  { %v1596_v21 = vpop.eup %1595  ;;  %1051 = vst [vmem:[%s2144_s3 + $0xf0] sm:$0xff] %v1594_v20 }
 0x165   :  { %v1598_v17 = vpop.eup %1597  ;;  %1083 = vst [vmem:[%s2144_s3 + $0x1f0] sm:$0xff] %v1596_v21 }
 0x166   :  { %v1600_v18 = vpop.eup %1599  ;;  %1049 = vst [vmem:[%s2144_s3 + $0xe0] sm:$0xff] %v1598_v17 }
 0x167   :  { %v1602_v25 = vpop.eup %1601  ;;  %1081 = vst [vmem:[%s2144_s3 + $0x1e0] sm:$0xff] %v1600_v18 }
 0x168   :  { %v1604_v28 = vpop.eup %1603  ;;  %1052 = vst [vmem:[%s2144_s3 + $0xf8] sm:$0xff] %v1602_v25 }
 0x169   :  { %v1606_v19 = vpop.eup %1605  ;;  %1084 = vst [vmem:[%s2144_s3 + $0x1f8] sm:$0xff] %v1604_v28 }
 0x16a   :  { %v1608_v30 = vpop.eup %1607  ;;  %1050 = vst [vmem:[%s2144_s3 + $0xe8] sm:$0xff] %v1606_v19 }
 0x16b   :  { %1082 = vst [vmem:[%s2144_s3 + $0x1e8] sm:$0xff] %v1608_v30 }

// kernel: blur_generator_forward.101
= control target key start
LH: loop header
LB: loop body
LE: loop exit
PB: predicated region body
PF: predicated region fallthrough
CT: control target
= control target key end

     0   :  { %v1931_v0 = vmov 0   ;;  %vm449_vm0 = vcmask 130048   ;;  %s2589_s1 = inlined_call_operand.vmem [shape: bf16[144,128], index: 1, kind: input, shape index: {}]   ;;  %s2590_s0 = inlined_call_operand.vmem [shape: bf16[512,144], index: 0, kind: input, shape index: {}]   ;;  %s2591_s2 = inlined_call_operand.vmem [shape: f32[1,128], index: 2, kind: input, shape index: {}]   ;;  %s2592_s3 = inlined_call_operand.vmem [shape: bf16[512,128], index: 3, kind: output, shape index: {0}]   ;;  %s2593_s4 = inlined_call_operand.vmem [shape: f32[1,128], index: 4, kind: output, shape index: {1}]   ;;  %s2594_s5 = inlined_call_operand.vmem [shape: f32[1,128], index: 5, kind: output, shape index: {2}]  }
   0x1   :  { %546 = vmatprep.subr.bf16.mxu0 %v1931_v0  ;;  %v1826_v1 = vld [vmem:[%s2589_s1] sm:$0xff]   ;;  %1806 = vmatprep.subr.bf16.mxu1 %v1931_v0  ;;  %v1827_v2 = vld [vmem:[%s2589_s1 + $0x8] sm:$0xff]   ;;  %v1828_v3 = vld [vmem:[%s2589_s1 + $0x10] sm:$0xff]  }
   0x2   :  { %547 = vmatpush1.bf16.msra.mxu0 %v1826_v1  ;;  %1815 = vmatpush1.bf16.msra.mxu1 %v1826_v1  ;;  %v1829_v4 = vld [vmem:[%s2589_s1 + $0x18] sm:$0xff]   ;;  %v1837_v5 = vld [vmem:[%s2590_s0 + $0x4] ss:$8 sps:$4 sm:$0xff]   ;;  %v1832_v9 = vld [vmem:[%s2589_s1 + $0x30] sm:$0xff]  }
   0x3   :  { %548 = vmatprep.subr.bf16.mxu0 %v1931_v0  ;;  %1807 = vmatprep.subr.bf16.mxu1 %v1931_v0  ;;  %v1830_v6 = vld [vmem:[%s2589_s1 + $0x20] sm:$0xff]   ;;  %v1831_v7 = vld [vmem:[%s2589_s1 + $0x28] sm:$0xff]   ;;  %v1833_v10 = vld [vmem:[%s2589_s1 + $0x38] sm:$0xff]  }
   0x4   :  { %1455 = vmatprep.mubr.msk.bf16.mxu0 %vm449_vm0, %v1837_v5  ;;  %v1861_v8 = vld [vmem:[%s2590_s0 + $0x104] ss:$8 sps:$4 sm:$0xff]   ;;  %v1835_v12 = vld [vmem:[%s2590_s0] ss:$8 sps:$4 sm:$0xff]   ;;  %v1838_v13 = vld [vmem:[%s2590_s0 + $0x14] ss:$8 sps:$4 sm:$0xff]  }
   0x5   :  { %1471 = vmatprep.mubr.msk.bf16.mxu1 %vm449_vm0, %v1861_v8  ;;  %v1834_v11 = vld [vmem:[%s2589_s1 + $0x40] sm:$0xff]   ;;  %v1865_v15 = vld [vmem:[%s2590_s0 + $0x114] ss:$8 sps:$4 sm:$0xff]   ;;  %v1840_v16 = vld [vmem:[%s2590_s0 + $0x10] ss:$8 sps:$4 sm:$0xff]  }
   0x6   :  { %549 = vmatpush1.bf16.msra.mxu0 %v1827_v2  ;;  %1816 = vmatpush1.bf16.msra.mxu1 %v1827_v2  ;;  %v1859_v14 = vld [vmem:[%s2590_s0 + $0x100] ss:$8 sps:$4 sm:$0xff]   ;;  %v1841_v17 = vld [vmem:[%s2590_s0 + $0x24] ss:$8 sps:$4 sm:$0xff]   ;;  %v1867_v18 = vld [vmem:[%s2590_s0 + $0x110] ss:$8 sps:$4 sm:$0xff]  }
   0x7   :  { %550 = vmatprep.subr.bf16.mxu0 %v1931_v0  ;;  %1808 = vmatprep.subr.bf16.mxu1 %v1931_v0  ;;  %v1871_v19 = vld [vmem:[%s2590_s0 + $0x124] ss:$8 sps:$4 sm:$0xff]   ;;  %v1843_v20 = vld [vmem:[%s2590_s0 + $0x20] ss:$8 sps:$4 sm:$0xff]   ;;  %v1844_v21 = vld [vmem:[%s2590_s0 + $0x34] ss:$8 sps:$4 sm:$0xff]  }
   0x8   :  { %v1873_v22 = vld [vmem:[%s2590_s0 + $0x120] ss:$8 sps:$4 sm:$0xff]   ;;  %v1877_v23 = vld [vmem:[%s2590_s0 + $0x134] ss:$8 sps:$4 sm:$0xff]   ;;  %v1846_v24 = vld [vmem:[%s2590_s0 + $0x30] ss:$8 sps:$4 sm:$0xff]  }
   0x9   :  { %v1879_v25 = vld [vmem:[%s2590_s0 + $0x130] ss:$8 sps:$4 sm:$0xff]   ;;  %v1847_v26 = vld [vmem:[%s2590_s0 + $0x44] ss:$8 sps:$4 sm:$0xff]   ;;  %v1849_v28 = vld [vmem:[%s2590_s0 + $0x40] ss:$8 sps:$4 sm:$0xff]  }
   0xa   :  { %551 = vmatpush1.bf16.msra.mxu0 %v1828_v3  ;;  %1817 = vmatpush1.bf16.msra.mxu1 %v1828_v3  ;;  %v1883_v27 = vld [vmem:[%s2590_s0 + $0x144] ss:$8 sps:$4 sm:$0xff]   ;;  %v1885_v29 = vld [vmem:[%s2590_s0 + $0x140] ss:$8 sps:$4 sm:$0xff]   ;;  %v1850_v30 = vld [vmem:[%s2590_s0 + $0x54] ss:$8 sps:$4 sm:$0xff]  }
   0xb   :  { %552 = vmatprep.subr.bf16.mxu0 %v1931_v0  ;;  %1809 = vmatprep.subr.bf16.mxu1 %v1931_v0  ;;  %v1889_v31 = vld [vmem:[%s2590_s0 + $0x154] ss:$8 sps:$4 sm:$0xff]   ;;  %v1852_v32 = vld [vmem:[%s2590_s0 + $0x50] ss:$8 sps:$4 sm:$0xff]   ;;  %v1853_v34 = vld [vmem:[%s2590_s0 + $0x64] ss:$8 sps:$4 sm:$0xff]  }
   0xc   :  { %v1891_v33 = vld [vmem:[%s2590_s0 + $0x150] ss:$8 sps:$4 sm:$0xff]   ;;  %v1895_v35 = vld [vmem:[%s2590_s0 + $0x164] ss:$8 sps:$4 sm:$0xff]   ;;  %v1855_v36 = vld [vmem:[%s2590_s0 + $0x60] ss:$8 sps:$4 sm:$0xff]  }
   0xd   :  { %v1897_v37 = vld [vmem:[%s2590_s0 + $0x160] ss:$8 sps:$4 sm:$0xff]   ;;  %v1856_v38 = vld [vmem:[%s2590_s0 + $0x74] ss:$8 sps:$4 sm:$0xff]   ;;  %v1858_v40 = vld [vmem:[%s2590_s0 + $0x70] ss:$8 sps:$4 sm:$0xff]  }
   0xe   :  { %553 = vmatpush1.bf16.msra.mxu0 %v1829_v4  ;;  %1818 = vmatpush1.bf16.msra.mxu1 %v1829_v4  ;;  %v1901_v39 = vld [vmem:[%s2590_s0 + $0x174] ss:$8 sps:$4 sm:$0xff]   ;;  %v1903_v41 = vld [vmem:[%s2590_s0 + $0x170] ss:$8 sps:$4 sm:$0xff]   ;;  %v1862_v42 = vld [vmem:[%s2590_s0 + $0x84] ss:$8 sps:$4 sm:$0xff]  }
   0xf   :  { %554 = vmatprep.subr.bf16.mxu0 %v1931_v0  ;;  %1810 = vmatprep.subr.bf16.mxu1 %v1931_v0  ;;  %v1907_v43 = vld [vmem:[%s2590_s0 + $0x184] ss:$8 sps:$4 sm:$0xff]   ;;  %v1864_v44 = vld [vmem:[%s2590_s0 + $0x80] ss:$8 sps:$4 sm:$0xff]   ;;  %v1868_v46 = vld [vmem:[%s2590_s0 + $0x94] ss:$8 sps:$4 sm:$0xff]  }
  0x10   :  { %v1909_v45 = vld [vmem:[%s2590_s0 + $0x180] ss:$8 sps:$4 sm:$0xff]   ;;  %v1910_v47 = vld [vmem:[%s2590_s0 + $0x194] ss:$8 sps:$4 sm:$0xff]   ;;  %v1870_v48 = vld [vmem:[%s2590_s0 + $0x90] ss:$8 sps:$4 sm:$0xff]  }
  0x11   :  { %v1912_v49 = vld [vmem:[%s2590_s0 + $0x190] ss:$8 sps:$4 sm:$0xff]   ;;  %v1874_v50 = vld [vmem:[%s2590_s0 + $0xa4] ss:$8 sps:$4 sm:$0xff]   ;;  %v1876_v52 = vld [vmem:[%s2590_s0 + $0xa0] ss:$8 sps:$4 sm:$0xff]  }
  0x12   :  { %555 = vmatpush1.bf16.msra.mxu0 %v1830_v6  ;;  %1819 = vmatpush1.bf16.msra.mxu1 %v1830_v6  ;;  %v1913_v51 = vld [vmem:[%s2590_s0 + $0x1a4] ss:$8 sps:$4 sm:$0xff]   ;;  %v1915_v53 = vld [vmem:[%s2590_s0 + $0x1a0] ss:$8 sps:$4 sm:$0xff]   ;;  %v1880_v54 = vld [vmem:[%s2590_s0 + $0xb4] ss:$8 sps:$4 sm:$0xff]  }
  0x13   :  { %556 = vmatprep.subr.bf16.mxu0 %v1931_v0  ;;  %1811 = vmatprep.subr.bf16.mxu1 %v1931_v0  ;;  %v1916_v55 = vld [vmem:[%s2590_s0 + $0x1b4] ss:$8 sps:$4 sm:$0xff]   ;;  %v1882_v56 = vld [vmem:[%s2590_s0 + $0xb0] ss:$8 sps:$4 sm:$0xff]   ;;  %v1886_v58 = vld [vmem:[%s2590_s0 + $0xc4] ss:$8 sps:$4 sm:$0xff]  }
  0x14   :  { %v1918_v57 = vld [vmem:[%s2590_s0 + $0x1b0] ss:$8 sps:$4 sm:$0xff]   ;;  %v1919_v59 = vld [vmem:[%s2590_s0 + $0x1c4] ss:$8 sps:$4 sm:$0xff]   ;;  %v1888_v60 = vld [vmem:[%s2590_s0 + $0xc0] ss:$8 sps:$4 sm:$0xff]  }
  0x15   :  { %v1921_v61 = vld [vmem:[%s2590_s0 + $0x1c0] ss:$8 sps:$4 sm:$0xff]   ;;  %v1892_v62 = vld [vmem:[%s2590_s0 + $0xd4] ss:$8 sps:$4 sm:$0xff]   ;;  %v1924_v1 = vld [vmem:[%s2590_s0 + $0x1d0] ss:$8 sps:$4 sm:$0xff]  }
  0x16   :  { %557 = vmatpush1.bf16.msra.mxu0 %v1831_v7  ;;  %1820 = vmatpush1.bf16.msra.mxu1 %v1831_v7  ;;  %v1922_v63 = vld [vmem:[%s2590_s0 + $0x1d4] ss:$8 sps:$4 sm:$0xff]   ;;  %v1898_v2 = vld [vmem:[%s2590_s0 + $0xe4] ss:$8 sps:$4 sm:$0xff]   ;;  %v1900_v4 = vld [vmem:[%s2590_s0 + $0xe0] ss:$8 sps:$4 sm:$0xff]  }
  0x17   :  { %558 = vmatprep.subr.bf16.mxu0 %v1931_v0  ;;  %1812 = vmatprep.subr.bf16.mxu1 %v1931_v0  ;;  %v1925_v3 = vld [vmem:[%s2590_s0 + $0x1e4] ss:$8 sps:$4 sm:$0xff]   ;;  %v1927_v5 = vld [vmem:[%s2590_s0 + $0x1e0] ss:$8 sps:$4 sm:$0xff]   ;;  %v1904_v6 = vld [vmem:[%s2590_s0 + $0xf4] ss:$8 sps:$4 sm:$0xff]  }
  0x18   :  { %v1928_v7 = vld [vmem:[%s2590_s0 + $0x1f4] ss:$8 sps:$4 sm:$0xff]   ;;  %v1906_v8 = vld [vmem:[%s2590_s0 + $0xf0] ss:$8 sps:$4 sm:$0xff]  }
  0x1a   :  { %559 = vmatpush1.bf16.msra.mxu0 %v1832_v9  ;;  %1821 = vmatpush1.bf16.msra.mxu1 %v1832_v9  ;;  %v1930_v9 = vld [vmem:[%s2590_s0 + $0x1f0] ss:$8 sps:$4 sm:$0xff]  }
  0x1b   :  { %560 = vmatprep.subr.bf16.mxu0 %v1931_v0  ;;  %1813 = vmatprep.subr.bf16.mxu1 %v1931_v0 }
  0x1e   :  { %561 = vmatpush1.bf16.msra.mxu0 %v1833_v10  ;;  %1822 = vmatpush1.bf16.msra.mxu1 %v1833_v10  ;;  %v2217_v10 = vld [vmem:[%s2591_s2] ss:$0 sm:$0xff] }
  0x1f   :  { %562 = vmatprep.subr.bf16.mxu0 %v1931_v0  ;;  %1814 = vmatprep.subr.bf16.mxu1 %v1931_v0  ;;  %v1894_v0 = vld [vmem:[%s2590_s0 + $0xd0] ss:$8 sps:$4 sm:$0xff]  }
  0x22   :  { %563 = vmatpush1.bf16.msra.mxu0 %v1834_v11  ;;  %1823 = vmatpush1.bf16.msra.mxu1 %v1834_v11 }
  0x25   :  { %579 = vmatmul.mubr.bf16.vlgmr.msra.gmra.mrb[0].mxu0 %v1835_v12  ;;  %707 = vmatmul.mubr.bf16.vlgmr.msra.gmra.mrb[0].mxu1 %v1859_v14 }
  0x26   :  { %1456 = vmatprep.mubr.msk.bf16.mxu0 %vm449_vm0, %v1838_v13  ;;  %1472 = vmatprep.mubr.msk.bf16.mxu1 %vm449_vm0, %v1865_v15 }
  0x2d   :  { %587 = vmatmul.mubr.bf16.gmra.mrb[4].mxu0 %v1840_v16  ;;  %715 = vmatmul.mubr.bf16.gmra.mrb[4].mxu1 %v1867_v18 }
  0x2e   :  { %1457 = vmatprep.mubr.msk.bf16.mxu0 %vm449_vm0, %v1841_v17  ;;  %1473 = vmatprep.mubr.msk.bf16.mxu1 %vm449_vm0, %v1871_v19 }
  0x35   :  { %595 = vmatmul.mubr.bf16.gmra.mrb[8].mxu0 %v1843_v20  ;;  %723 = vmatmul.mubr.bf16.gmra.mrb[8].mxu1 %v1873_v22 }
  0x36   :  { %1458 = vmatprep.mubr.msk.bf16.mxu0 %vm449_vm0, %v1844_v21  ;;  %1474 = vmatprep.mubr.msk.bf16.mxu1 %vm449_vm0, %v1877_v23 }
  0x3d   :  { %603 = vmatmul.mubr.bf16.gmra.mrb[12].mxu0 %v1846_v24  ;;  %731 = vmatmul.mubr.bf16.gmra.mrb[12].mxu1 %v1879_v25 }
  0x3e   :  { %1459 = vmatprep.mubr.msk.bf16.mxu0 %vm449_vm0, %v1847_v26  ;;  %1475 = vmatprep.mubr.msk.bf16.mxu1 %vm449_vm0, %v1883_v27 }
  0x45   :  { %611 = vmatmul.mubr.bf16.gmra.mrb[16].mxu0 %v1849_v28  ;;  %739 = vmatmul.mubr.bf16.gmra.mrb[16].mxu1 %v1885_v29 }
  0x46   :  { %1460 = vmatprep.mubr.msk.bf16.mxu0 %vm449_vm0, %v1850_v30  ;;  %1476 = vmatprep.mubr.msk.bf16.mxu1 %vm449_vm0, %v1889_v31 }
  0x4d   :  { %619 = vmatmul.mubr.bf16.gmra.mrb[20].mxu0 %v1852_v32  ;;  %747 = vmatmul.mubr.bf16.gmra.mrb[20].mxu1 %v1891_v33 }
  0x4e   :  { %1461 = vmatprep.mubr.msk.bf16.mxu0 %vm449_vm0, %v1853_v34  ;;  %1477 = vmatprep.mubr.msk.bf16.mxu1 %vm449_vm0, %v1895_v35 }
  0x55   :  { %627 = vmatmul.mubr.bf16.gmra.mrb[24].mxu0 %v1855_v36  ;;  %755 = vmatmul.mubr.bf16.gmra.mrb[24].mxu1 %v1897_v37 }
  0x56   :  { %1462 = vmatprep.mubr.msk.bf16.mxu0 %vm449_vm0, %v1856_v38  ;;  %1478 = vmatprep.mubr.msk.bf16.mxu1 %vm449_vm0, %v1901_v39 }
  0x5d   :  { %635 = vmatmul.mubr.bf16.gmra.mrb[28].mxu0 %v1858_v40  ;;  %763 = vmatmul.mubr.bf16.gmra.mrb[28].mxu1 %v1903_v41 }
  0x5e   :  { %1463 = vmatprep.mubr.msk.bf16.mxu0 %vm449_vm0, %v1862_v42  ;;  %1479 = vmatprep.mubr.msk.bf16.mxu1 %vm449_vm0, %v1907_v43 }
  0x65   :  { %643 = vmatmul.mubr.bf16.gmra.mrb[32].mxu0 %v1864_v44  ;;  %771 = vmatmul.mubr.bf16.gmra.mrb[32].mxu1 %v1909_v45 }
  0x66   :  { %1464 = vmatprep.mubr.msk.bf16.mxu0 %vm449_vm0, %v1868_v46  ;;  %1480 = vmatprep.mubr.msk.bf16.mxu1 %vm449_vm0, %v1910_v47 }
  0x6d   :  { %651 = vmatmul.mubr.bf16.gmra.mrb[36].mxu0 %v1870_v48  ;;  %779 = vmatmul.mubr.bf16.gmra.mrb[36].mxu1 %v1912_v49 }
  0x6e   :  { %1465 = vmatprep.mubr.msk.bf16.mxu0 %vm449_vm0, %v1874_v50  ;;  %1481 = vmatprep.mubr.msk.bf16.mxu1 %vm449_vm0, %v1913_v51 }
  0x75   :  { %659 = vmatmul.mubr.bf16.gmra.mrb[40].mxu0 %v1876_v52  ;;  %787 = vmatmul.mubr.bf16.gmra.mrb[40].mxu1 %v1915_v53 }
  0x76   :  { %1466 = vmatprep.mubr.msk.bf16.mxu0 %vm449_vm0, %v1880_v54  ;;  %1482 = vmatprep.mubr.msk.bf16.mxu1 %vm449_vm0, %v1916_v55 }
  0x7d   :  { %667 = vmatmul.mubr.bf16.gmra.mrb[44].mxu0 %v1882_v56  ;;  %795 = vmatmul.mubr.bf16.gmra.mrb[44].mxu1 %v1918_v57 }
  0x7e   :  { %1467 = vmatprep.mubr.msk.bf16.mxu0 %vm449_vm0, %v1886_v58  ;;  %1483 = vmatprep.mubr.msk.bf16.mxu1 %vm449_vm0, %v1919_v59 }
  0x85   :  { %675 = vmatmul.mubr.bf16.gmra.mrb[48].mxu0 %v1888_v60  ;;  %803 = vmatmul.mubr.bf16.gmra.mrb[48].mxu1 %v1921_v61 }
  0x86   :  { %1468 = vmatprep.mubr.msk.bf16.mxu0 %vm449_vm0, %v1892_v62  ;;  %1484 = vmatprep.mubr.msk.bf16.mxu1 %vm449_vm0, %v1922_v63 }
  0x8d   :  { %683 = vmatmul.mubr.bf16.gmra.mrb[52].mxu0 %v1894_v0  ;;  %811 = vmatmul.mubr.bf16.gmra.mrb[52].mxu1 %v1924_v1 }
  0x8e   :  { %1469 = vmatprep.mubr.msk.bf16.mxu0 %vm449_vm0, %v1898_v2  ;;  %1485 = vmatprep.mubr.msk.bf16.mxu1 %vm449_vm0, %v1925_v3 }
  0x95   :  { %691 = vmatmul.mubr.bf16.gmra.mrb[56].mxu0 %v1900_v4  ;;  %819 = vmatmul.mubr.bf16.gmra.mrb[56].mxu1 %v1927_v5 }
  0x96   :  { %1470 = vmatprep.mubr.msk.bf16.mxu0 %vm449_vm0, %v1904_v6  ;;  %1486 = vmatprep.mubr.msk.bf16.mxu1 %vm449_vm0, %v1928_v7 }
  0x9d   :  { %699 = vmatmul.mubr.bf16.gmra.mrb[60].mxu0 %v1906_v8  ;;  %827 = vmatmul.mubr.bf16.gmra.mrb[60].mxu1 %v1930_v9 }
  0xf8   :  { %v580_v11 = vpop.f32.mrb[0].mxu0  ;;  %v708_v12 = vpop.f32.mrb[0].mxu1 }
  0xf9   :  { %v581_v13 = vadd.f32 %v2217_v10, %v580_v11  ;;  %v582_v14 = vpop.f32.mrb[1].mxu0  ;;  %v2221_v15 = vadd.f32 %v2217_v10, %v708_v12  ;;  %v710_v16 = vpop.f32.mrb[1].mxu1 }
  0xfa   :  { %v583_v17 = vpop.f32.mrb[2].mxu0  ;;  %v711_v18 = vpop.f32.mrb[2].mxu1 }
  0xfb   :  { %v584_v19 = vadd.f32 %v2217_v10, %v583_v17  ;;  %v585_v20 = vpop.f32.mrb[3].mxu0  ;;  %v2225_v21 = vadd.f32 %v2217_v10, %v711_v18  ;;  %v713_v22 = vpop.f32.mrb[3].mxu1  ;;  %v1234_v23 = vmul.f32 %v581_v13, %v581_v13 }
  0xfd   :  { %v1618_v24 = vpack.c.bf16 %v584_v19, %v581_v13  ;;  %v1162_v25 = vadd.f32 %v584_v19, %v581_v13  ;;  %v1235_v26 = vmul.f32 %v584_v19, %v584_v19  ;;  %v1698_v27 = vpack.c.bf16 %v2225_v21, %v2221_v15 }
  0xff   :  { %1619 = vst [vmem:[%s2592_s3] sm:$0xff] %v1618_v24   ;;  %v1298_v28 = vadd.f32 %v1235_v26, %v1234_v23  ;;  %1790 = vst [vmem:[%s2592_s3 + $0x80] sm:$0xff] %v1698_v27  }
 0x100   :  { %v588_v29 = vpop.f32.mrb[4].mxu0  ;;  %v716_v30 = vpop.f32.mrb[4].mxu1 }
 0x101   :  { %v589_v31 = vadd.f32 %v2217_v10, %v588_v29  ;;  %v590_v32 = vpop.f32.mrb[5].mxu0  ;;  %v718_v33 = vpop.f32.mrb[5].mxu1  ;;  %v2237_v35 = vadd.f32 %v2217_v10, %v716_v30 }
 0x102   :  { %v591_v34 = vpop.f32.mrb[6].mxu0  ;;  %v719_v36 = vpop.f32.mrb[6].mxu1 }
 0x103   :  { %v1163_v37 = vadd.f32 %v1162_v25, %v589_v31  ;;  %v1236_v38 = vmul.f32 %v589_v31, %v589_v31  ;;  %v592_v39 = vadd.f32 %v2217_v10, %v591_v34  ;;  %v593_v40 = vpop.f32.mrb[7].mxu0  ;;  %v721_v41 = vpop.f32.mrb[7].mxu1  ;;  %v2241_v42 = vadd.f32 %v2217_v10, %v719_v36 }
 0x105   :  { %v1299_v43 = vadd.f32 %v1298_v28, %v1236_v38  ;;  %v1623_v44 = vpack.c.bf16 %v592_v39, %v589_v31  ;;  %v1164_v45 = vadd.f32 %v1163_v37, %v592_v39  ;;  %v1237_v46 = vmul.f32 %v592_v39, %v592_v39 }
 0x106   :  { %v1703_v47 = vpack.c.bf16 %v2241_v42, %v2237_v35 }
 0x107   :  { %1775 = vst [vmem:[%s2592_s3 + $0x8] sm:$0xff] %v1623_v44   ;;  %v1300_v48 = vadd.f32 %v1299_v43, %v1237_v46 }
 0x108   :  { %v596_v49 = vpop.f32.mrb[8].mxu0  ;;  %1791 = vst [vmem:[%s2592_s3 + $0x88] sm:$0xff] %v1703_v47   ;;  %v724_v50 = vpop.f32.mrb[8].mxu1 }
 0x109   :  { %v597_v51 = vadd.f32 %v2217_v10, %v596_v49  ;;  %v598_v52 = vpop.f32.mrb[9].mxu0  ;;  %v726_v53 = vpop.f32.mrb[9].mxu1  ;;  %v2253_v55 = vadd.f32 %v2217_v10, %v724_v50 }
 0x10a   :  { %v599_v54 = vpop.f32.mrb[10].mxu0  ;;  %v727_v56 = vpop.f32.mrb[10].mxu1 }
 0x10b   :  { %v1165_v57 = vadd.f32 %v1164_v45, %v597_v51  ;;  %v1238_v58 = vmul.f32 %v597_v51, %v597_v51  ;;  %v600_v59 = vadd.f32 %v2217_v10, %v599_v54  ;;  %v601_v60 = vpop.f32.mrb[11].mxu0  ;;  %v729_v61 = vpop.f32.mrb[11].mxu1  ;;  %v2257_v62 = vadd.f32 %v2217_v10, %v727_v56 }
 0x10d   :  { %v1301_v63 = vadd.f32 %v1300_v48, %v1238_v58  ;;  %v1628_v0 = vpack.c.bf16 %v600_v59, %v597_v51  ;;  %v1166_v1 = vadd.f32 %v1165_v57, %v600_v59  ;;  %v1239_v2 = vmul.f32 %v600_v59, %v600_v59 }
 0x10e   :  { %v1708_v3 = vpack.c.bf16 %v2257_v62, %v2253_v55 }
 0x10f   :  { %1776 = vst [vmem:[%s2592_s3 + $0x10] sm:$0xff] %v1628_v0   ;;  %v1302_v4 = vadd.f32 %v1301_v63, %v1239_v2 }
 0x110   :  { %v604_v5 = vpop.f32.mrb[12].mxu0  ;;  %1792 = vst [vmem:[%s2592_s3 + $0x90] sm:$0xff] %v1708_v3   ;;  %v732_v6 = vpop.f32.mrb[12].mxu1 }
 0x111   :  { %v605_v7 = vadd.f32 %v2217_v10, %v604_v5  ;;  %v606_v8 = vpop.f32.mrb[13].mxu0  ;;  %v734_v9 = vpop.f32.mrb[13].mxu1  ;;  %v2269_v12 = vadd.f32 %v2217_v10, %v732_v6 }
 0x112   :  { %v607_v11 = vpop.f32.mrb[14].mxu0  ;;  %v735_v13 = vpop.f32.mrb[14].mxu1 }
 0x113   :  { %v1167_v14 = vadd.f32 %v1166_v1, %v605_v7  ;;  %v1240_v16 = vmul.f32 %v605_v7, %v605_v7  ;;  %v608_v17 = vadd.f32 %v2217_v10, %v607_v11  ;;  %v609_v18 = vpop.f32.mrb[15].mxu0  ;;  %v737_v19 = vpop.f32.mrb[15].mxu1  ;;  %v2273_v20 = vadd.f32 %v2217_v10, %v735_v13 }
 0x115   :  { %v1303_v22 = vadd.f32 %v1302_v4, %v1240_v16  ;;  %v1633_v23 = vpack.c.bf16 %v608_v17, %v605_v7  ;;  %v1168_v24 = vadd.f32 %v1167_v14, %v608_v17  ;;  %v1241_v25 = vmul.f32 %v608_v17, %v608_v17 }
 0x116   :  { %v1713_v26 = vpack.c.bf16 %v2273_v20, %v2269_v12 }
 0x117   :  { %1777 = vst [vmem:[%s2592_s3 + $0x18] sm:$0xff] %v1633_v23   ;;  %v1304_v27 = vadd.f32 %v1303_v22, %v1241_v25 }
 0x118   :  { %v612_v28 = vpop.f32.mrb[16].mxu0  ;;  %1793 = vst [vmem:[%s2592_s3 + $0x98] sm:$0xff] %v1713_v26   ;;  %v740_v29 = vpop.f32.mrb[16].mxu1 }
 0x119   :  { %v613_v30 = vadd.f32 %v2217_v10, %v612_v28  ;;  %v614_v31 = vpop.f32.mrb[17].mxu0  ;;  %v742_v32 = vpop.f32.mrb[17].mxu1  ;;  %v2285_v34 = vadd.f32 %v2217_v10, %v740_v29 }
 0x11a   :  { %v615_v33 = vpop.f32.mrb[18].mxu0  ;;  %v743_v36 = vpop.f32.mrb[18].mxu1 }
 0x11b   :  { %v1169_v37 = vadd.f32 %v1168_v24, %v613_v30  ;;  %v1242_v38 = vmul.f32 %v613_v30, %v613_v30  ;;  %v616_v39 = vadd.f32 %v2217_v10, %v615_v33  ;;  %v617_v40 = vpop.f32.mrb[19].mxu0  ;;  %v745_v41 = vpop.f32.mrb[19].mxu1  ;;  %v2289_v43 = vadd.f32 %v2217_v10, %v743_v36 }
 0x11d   :  { %v1305_v44 = vadd.f32 %v1304_v27, %v1242_v38  ;;  %v1638_v45 = vpack.c.bf16 %v616_v39, %v613_v30  ;;  %v1170_v46 = vadd.f32 %v1169_v37, %v616_v39  ;;  %v1243_v47 = vmul.f32 %v616_v39, %v616_v39 }
 0x11e   :  { %v1718_v48 = vpack.c.bf16 %v2289_v43, %v2285_v34 }
 0x11f   :  { %1778 = vst [vmem:[%s2592_s3 + $0x20] sm:$0xff] %v1638_v45   ;;  %v1306_v49 = vadd.f32 %v1305_v44, %v1243_v47 }
 0x120   :  { %v620_v50 = vpop.f32.mrb[20].mxu0  ;;  %1794 = vst [vmem:[%s2592_s3 + $0xa0] sm:$0xff] %v1718_v48   ;;  %v748_v51 = vpop.f32.mrb[20].mxu1 }
 0x121   :  { %v621_v52 = vadd.f32 %v2217_v10, %v620_v50  ;;  %v622_v53 = vpop.f32.mrb[21].mxu0  ;;  %v750_v54 = vpop.f32.mrb[21].mxu1  ;;  %v2301_v57 = vadd.f32 %v2217_v10, %v748_v51 }
 0x122   :  { %v623_v56 = vpop.f32.mrb[22].mxu0  ;;  %v751_v58 = vpop.f32.mrb[22].mxu1 }
 0x123   :  { %v1171_v59 = vadd.f32 %v1170_v46, %v621_v52  ;;  %v1244_v60 = vmul.f32 %v621_v52, %v621_v52  ;;  %v624_v61 = vadd.f32 %v2217_v10, %v623_v56  ;;  %v625_v63 = vpop.f32.mrb[23].mxu0  ;;  %v753_v0 = vpop.f32.mrb[23].mxu1  ;;  %v2305_v1 = vadd.f32 %v2217_v10, %v751_v58 }
 0x125   :  { %v1307_v2 = vadd.f32 %v1306_v49, %v1244_v60  ;;  %v1643_v3 = vpack.c.bf16 %v624_v61, %v621_v52  ;;  %v1172_v4 = vadd.f32 %v1171_v59, %v624_v61  ;;  %v1245_v5 = vmul.f32 %v624_v61, %v624_v61 }
 0x126   :  { %v1723_v6 = vpack.c.bf16 %v2305_v1, %v2301_v57  ;;  %v1932_v59 = vmov 0.0  }
 0x127   :  { %1779 = vst [vmem:[%s2592_s3 + $0x28] sm:$0xff] %v1643_v3   ;;  %v1308_v7 = vadd.f32 %v1307_v2, %v1245_v5  ;;  %1159 = vst [vmem:[%s2593_s4] sm:$0x1] %v1932_v59 }
 0x128   :  { %v628_v8 = vpop.f32.mrb[24].mxu0  ;;  %1795 = vst [vmem:[%s2592_s3 + $0xa8] sm:$0xff] %v1723_v6   ;;  %v756_v9 = vpop.f32.mrb[24].mxu1  ;;  %1160 = vst [vmem:[%s2594_s5] sm:$0x1] %v1932_v59 }
 0x129   :  { %v629_v11 = vadd.f32 %v2217_v10, %v628_v8  ;;  %v630_v13 = vpop.f32.mrb[25].mxu0  ;;  %v758_v14 = vpop.f32.mrb[25].mxu1  ;;  %v2317_v17 = vadd.f32 %v2217_v10, %v756_v9 }
 0x12a   :  { %v631_v16 = vpop.f32.mrb[26].mxu0  ;;  %v759_v18 = vpop.f32.mrb[26].mxu1 }
 0x12b   :  { %v1173_v19 = vadd.f32 %v1172_v4, %v629_v11  ;;  %v1246_v22 = vmul.f32 %v629_v11, %v629_v11  ;;  %v632_v23 = vadd.f32 %v2217_v10, %v631_v16  ;;  %v633_v24 = vpop.f32.mrb[27].mxu0  ;;  %v761_v25 = vpop.f32.mrb[27].mxu1  ;;  %v2321_v26 = vadd.f32 %v2217_v10, %v759_v18 }
 0x12d   :  { %v1309_v27 = vadd.f32 %v1308_v7, %v1246_v22  ;;  %v1648_v28 = vpack.c.bf16 %v632_v23, %v629_v11  ;;  %v1174_v29 = vadd.f32 %v1173_v19, %v632_v23  ;;  %v1247_v30 = vmul.f32 %v632_v23, %v632_v23 }
 0x12e   :  { %v1728_v31 = vpack.c.bf16 %v2321_v26, %v2317_v17 }
 0x12f   :  { %1780 = vst [vmem:[%s2592_s3 + $0x30] sm:$0xff] %v1648_v28   ;;  %v1310_v32 = vadd.f32 %v1309_v27, %v1247_v30 }
 0x130   :  { %v636_v33 = vpop.f32.mrb[28].mxu0  ;;  %1796 = vst [vmem:[%s2592_s3 + $0xb0] sm:$0xff] %v1728_v31   ;;  %v764_v36 = vpop.f32.mrb[28].mxu1 }
 0x131   :  { %v637_v37 = vadd.f32 %v2217_v10, %v636_v33  ;;  %v638_v38 = vpop.f32.mrb[29].mxu0  ;;  %v766_v39 = vpop.f32.mrb[29].mxu1  ;;  %v2333_v41 = vadd.f32 %v2217_v10, %v764_v36 }
 0x132   :  { %v639_v40 = vpop.f32.mrb[30].mxu0  ;;  %v767_v44 = vpop.f32.mrb[30].mxu1 }
 0x133   :  { %v1175_v45 = vadd.f32 %v1174_v29, %v637_v37  ;;  %v1248_v46 = vmul.f32 %v637_v37, %v637_v37  ;;  %v640_v47 = vadd.f32 %v2217_v10, %v639_v40  ;;  %v641_v48 = vpop.f32.mrb[31].mxu0  ;;  %v769_v49 = vpop.f32.mrb[31].mxu1  ;;  %v2337_v50 = vadd.f32 %v2217_v10, %v767_v44 }
 0x135   :  { %v1311_v51 = vadd.f32 %v1310_v32, %v1248_v46  ;;  %v1653_v52 = vpack.c.bf16 %v640_v47, %v637_v37  ;;  %v1176_v53 = vadd.f32 %v1175_v45, %v640_v47  ;;  %v1249_v54 = vmul.f32 %v640_v47, %v640_v47 }
 0x136   :  { %v1733_v56 = vpack.c.bf16 %v2337_v50, %v2333_v41 }
 0x137   :  { %1781 = vst [vmem:[%s2592_s3 + $0x38] sm:$0xff] %v1653_v52   ;;  %v1312_v58 = vadd.f32 %v1311_v51, %v1249_v54 }
 0x138   :  { %v644_v60 = vpop.f32.mrb[32].mxu0  ;;  %1797 = vst [vmem:[%s2592_s3 + $0xb8] sm:$0xff] %v1733_v56   ;;  %v772_v61 = vpop.f32.mrb[32].mxu1 }
 0x139   :  { %v645_v63 = vadd.f32 %v2217_v10, %v644_v60  ;;  %v646_v0 = vpop.f32.mrb[33].mxu0  ;;  %v774_v2 = vpop.f32.mrb[33].mxu1  ;;  %v2355_v4 = vadd.f32 %v2217_v10, %v772_v61 }
 0x13a   :  { %v647_v3 = vpop.f32.mrb[34].mxu0  ;;  %v775_v5 = vpop.f32.mrb[34].mxu1 }
 0x13b   :  { %v1177_v6 = vadd.f32 %v1176_v53, %v645_v63  ;;  %v1250_v7 = vmul.f32 %v645_v63, %v645_v63  ;;  %v648_v8 = vadd.f32 %v2217_v10, %v647_v3  ;;  %v649_v9 = vpop.f32.mrb[35].mxu0  ;;  %v777_v11 = vpop.f32.mrb[35].mxu1  ;;  %v2359_v13 = vadd.f32 %v2217_v10, %v775_v5 }
 0x13d   :  { %v1313_v14 = vadd.f32 %v1312_v58, %v1250_v7  ;;  %v1658_v16 = vpack.c.bf16 %v648_v8, %v645_v63  ;;  %v1178_v18 = vadd.f32 %v1177_v6, %v648_v8  ;;  %v1251_v19 = vmul.f32 %v648_v8, %v648_v8 }
 0x13e   :  { %v1738_v22 = vpack.c.bf16 %v2359_v13, %v2355_v4 }
 0x13f   :  { %1782 = vst [vmem:[%s2592_s3 + $0x40] sm:$0xff] %v1658_v16   ;;  %v1314_v23 = vadd.f32 %v1313_v14, %v1251_v19 }
 0x140   :  { %v652_v24 = vpop.f32.mrb[36].mxu0  ;;  %1798 = vst [vmem:[%s2592_s3 + $0xc0] sm:$0xff] %v1738_v22   ;;  %v780_v25 = vpop.f32.mrb[36].mxu1 }
 0x141   :  { %v653_v27 = vadd.f32 %v2217_v10, %v652_v24  ;;  %v654_v28 = vpop.f32.mrb[37].mxu0  ;;  %v782_v29 = vpop.f32.mrb[37].mxu1  ;;  %v2371_v31 = vadd.f32 %v2217_v10, %v780_v25 }
 0x142   :  { %v655_v30 = vpop.f32.mrb[38].mxu0  ;;  %v783_v32 = vpop.f32.mrb[38].mxu1 }
 0x143   :  { %v1179_v33 = vadd.f32 %v1178_v18, %v653_v27  ;;  %v1252_v36 = vmul.f32 %v653_v27, %v653_v27  ;;  %v656_v37 = vadd.f32 %v2217_v10, %v655_v30  ;;  %v657_v38 = vpop.f32.mrb[39].mxu0  ;;  %v785_v39 = vpop.f32.mrb[39].mxu1  ;;  %v2375_v40 = vadd.f32 %v2217_v10, %v783_v32 }
 0x145   :  { %v1315_v44 = vadd.f32 %v1314_v23, %v1252_v36  ;;  %v1663_v45 = vpack.c.bf16 %v656_v37, %v653_v27  ;;  %v1180_v46 = vadd.f32 %v1179_v33, %v656_v37  ;;  %v1253_v47 = vmul.f32 %v656_v37, %v656_v37 }
 0x146   :  { %v1743_v48 = vpack.c.bf16 %v2375_v40, %v2371_v31 }
 0x147   :  { %1783 = vst [vmem:[%s2592_s3 + $0x48] sm:$0xff] %v1663_v45   ;;  %v1316_v49 = vadd.f32 %v1315_v44, %v1253_v47 }
 0x148   :  { %v660_v51 = vpop.f32.mrb[40].mxu0  ;;  %1799 = vst [vmem:[%s2592_s3 + $0xc8] sm:$0xff] %v1743_v48   ;;  %v788_v52 = vpop.f32.mrb[40].mxu1 }
 0x149   :  { %v661_v53 = vadd.f32 %v2217_v10, %v660_v51  ;;  %v662_v54 = vpop.f32.mrb[41].mxu0  ;;  %v790_v56 = vpop.f32.mrb[41].mxu1  ;;  %v2387_v59 = vadd.f32 %v2217_v10, %v788_v52 }
 0x14a   :  { %v663_v58 = vpop.f32.mrb[42].mxu0  ;;  %v791_v60 = vpop.f32.mrb[42].mxu1 }
 0x14b   :  { %v1181_v61 = vadd.f32 %v1180_v46, %v661_v53  ;;  %v1254_v63 = vmul.f32 %v661_v53, %v661_v53  ;;  %v664_v0 = vadd.f32 %v2217_v10, %v663_v58  ;;  %v665_v2 = vpop.f32.mrb[43].mxu0  ;;  %v793_v3 = vpop.f32.mrb[43].mxu1  ;;  %v2391_v5 = vadd.f32 %v2217_v10, %v791_v60 }
 0x14d   :  { %v1317_v6 = vadd.f32 %v1316_v49, %v1254_v63  ;;  %v1668_v7 = vpack.c.bf16 %v664_v0, %v661_v53  ;;  %v1182_v8 = vadd.f32 %v1181_v61, %v664_v0  ;;  %v1255_v9 = vmul.f32 %v664_v0, %v664_v0 }
 0x14e   :  { %v1748_v11 = vpack.c.bf16 %v2391_v5, %v2387_v59 }
 0x14f   :  { %1784 = vst [vmem:[%s2592_s3 + $0x50] sm:$0xff] %v1668_v7   ;;  %v1318_v14 = vadd.f32 %v1317_v6, %v1255_v9 }
 0x150   :  { %v668_v16 = vpop.f32.mrb[44].mxu0  ;;  %1800 = vst [vmem:[%s2592_s3 + $0xd0] sm:$0xff] %v1748_v11   ;;  %v796_v18 = vpop.f32.mrb[44].mxu1 }
 0x151   :  { %v669_v19 = vadd.f32 %v2217_v10, %v668_v16  ;;  %v670_v22 = vpop.f32.mrb[45].mxu0  ;;  %v798_v23 = vpop.f32.mrb[45].mxu1  ;;  %v2403_v25 = vadd.f32 %v2217_v10, %v796_v18 }
 0x152   :  { %v671_v24 = vpop.f32.mrb[46].mxu0  ;;  %v799_v27 = vpop.f32.mrb[46].mxu1 }
 0x153   :  { %v1183_v28 = vadd.f32 %v1182_v8, %v669_v19  ;;  %v1256_v29 = vmul.f32 %v669_v19, %v669_v19  ;;  %v672_v30 = vadd.f32 %v2217_v10, %v671_v24  ;;  %v673_v32 = vpop.f32.mrb[47].mxu0  ;;  %v801_v33 = vpop.f32.mrb[47].mxu1  ;;  %v2407_v36 = vadd.f32 %v2217_v10, %v799_v27 }
 0x155   :  { %v1319_v37 = vadd.f32 %v1318_v14, %v1256_v29  ;;  %v1673_v38 = vpack.c.bf16 %v672_v30, %v669_v19  ;;  %v1184_v39 = vadd.f32 %v1183_v28, %v672_v30  ;;  %v1257_v44 = vmul.f32 %v672_v30, %v672_v30 }
 0x156   :  { %v1753_v45 = vpack.c.bf16 %v2407_v36, %v2403_v25 }
 0x157   :  { %1785 = vst [vmem:[%s2592_s3 + $0x58] sm:$0xff] %v1673_v38   ;;  %v1320_v46 = vadd.f32 %v1319_v37, %v1257_v44 }
 0x158   :  { %v676_v47 = vpop.f32.mrb[48].mxu0  ;;  %1801 = vst [vmem:[%s2592_s3 + $0xd8] sm:$0xff] %v1753_v45   ;;  %v804_v48 = vpop.f32.mrb[48].mxu1 }
 0x159   :  { %v677_v49 = vadd.f32 %v2217_v10, %v676_v47  ;;  %v678_v51 = vpop.f32.mrb[49].mxu0  ;;  %v806_v52 = vpop.f32.mrb[49].mxu1  ;;  %v2419_v54 = vadd.f32 %v2217_v10, %v804_v48 }
 0x15a   :  { %v679_v53 = vpop.f32.mrb[50].mxu0  ;;  %v807_v56 = vpop.f32.mrb[50].mxu1 }
 0x15b   :  { %v1185_v58 = vadd.f32 %v1184_v39, %v677_v49  ;;  %v1258_v60 = vmul.f32 %v677_v49, %v677_v49  ;;  %v680_v61 = vadd.f32 %v2217_v10, %v679_v53  ;;  %v681_v63 = vpop.f32.mrb[51].mxu0  ;;  %v809_v0 = vpop.f32.mrb[51].mxu1  ;;  %v2423_v2 = vadd.f32 %v2217_v10, %v807_v56 }
 0x15d   :  { %v1321_v3 = vadd.f32 %v1320_v46, %v1258_v60  ;;  %v1678_v6 = vpack.c.bf16 %v680_v61, %v677_v49  ;;  %v1186_v7 = vadd.f32 %v1185_v58, %v680_v61  ;;  %v1259_v8 = vmul.f32 %v680_v61, %v680_v61 }
 0x15e   :  { %v1758_v9 = vpack.c.bf16 %v2423_v2, %v2419_v54 }
 0x15f   :  { %1786 = vst [vmem:[%s2592_s3 + $0x60] sm:$0xff] %v1678_v6   ;;  %v1322_v11 = vadd.f32 %v1321_v3, %v1259_v8 }
 0x160   :  { %v684_v14 = vpop.f32.mrb[52].mxu0  ;;  %1802 = vst [vmem:[%s2592_s3 + $0xe0] sm:$0xff] %v1758_v9   ;;  %v812_v16 = vpop.f32.mrb[52].mxu1 }
 0x161   :  { %v685_v18 = vadd.f32 %v2217_v10, %v684_v14  ;;  %v686_v19 = vpop.f32.mrb[53].mxu0  ;;  %v814_v22 = vpop.f32.mrb[53].mxu1  ;;  %v2435_v24 = vadd.f32 %v2217_v10, %v812_v16 }
 0x162   :  { %v687_v23 = vpop.f32.mrb[54].mxu0  ;;  %v815_v27 = vpop.f32.mrb[54].mxu1 }
 0x163   :  { %v1187_v28 = vadd.f32 %v1186_v7, %v685_v18  ;;  %v1260_v29 = vmul.f32 %v685_v18, %v685_v18  ;;  %v688_v30 = vadd.f32 %v2217_v10, %v687_v23  ;;  %v689_v32 = vpop.f32.mrb[55].mxu0  ;;  %v817_v33 = vpop.f32.mrb[55].mxu1  ;;  %v2439_v37 = vadd.f32 %v2217_v10, %v815_v27 }
 0x165   :  { %v1323_v38 = vadd.f32 %v1322_v11, %v1260_v29  ;;  %v1683_v39 = vpack.c.bf16 %v688_v30, %v685_v18  ;;  %v1188_v44 = vadd.f32 %v1187_v28, %v688_v30  ;;  %v1261_v45 = vmul.f32 %v688_v30, %v688_v30 }
 0x166   :  { %v1763_v46 = vpack.c.bf16 %v2439_v37, %v2435_v24 }
 0x167   :  { %1787 = vst [vmem:[%s2592_s3 + $0x68] sm:$0xff] %v1683_v39   ;;  %v1324_v47 = vadd.f32 %v1323_v38, %v1261_v45 }
 0x168   :  { %v692_v48 = vpop.f32.mrb[56].mxu0  ;;  %1803 = vst [vmem:[%s2592_s3 + $0xe8] sm:$0xff] %v1763_v46   ;;  %v820_v49 = vpop.f32.mrb[56].mxu1 }
 0x169   :  { %v693_v51 = vadd.f32 %v2217_v10, %v692_v48  ;;  %v694_v52 = vpop.f32.mrb[57].mxu0  ;;  %v822_v53 = vpop.f32.mrb[57].mxu1  ;;  %v2451_v58 = vadd.f32 %v2217_v10, %v820_v49 }
 0x16a   :  { %v695_v56 = vpop.f32.mrb[58].mxu0  ;;  %v823_v60 = vpop.f32.mrb[58].mxu1  ;;  %v1266_v53 = vmul.f32 %v2221_v15, %v2221_v15 }
 0x16b   :  { %v1189_v61 = vadd.f32 %v1188_v44, %v693_v51  ;;  %v1262_v63 = vmul.f32 %v693_v51, %v693_v51  ;;  %v696_v0 = vadd.f32 %v2217_v10, %v695_v56  ;;  %v697_v3 = vpop.f32.mrb[59].mxu0  ;;  %v825_v6 = vpop.f32.mrb[59].mxu1  ;;  %v2455_v7 = vadd.f32 %v2217_v10, %v823_v60 }
 0x16d   :  { %v1325_v8 = vadd.f32 %v1324_v47, %v1262_v63  ;;  %v1688_v9 = vpack.c.bf16 %v696_v0, %v693_v51  ;;  %v1190_v11 = vadd.f32 %v1189_v61, %v696_v0  ;;  %v1263_v14 = vmul.f32 %v696_v0, %v696_v0 }
 0x16e   :  { %v1768_v16 = vpack.c.bf16 %v2455_v7, %v2451_v58  ;;  %v1268_v0 = vmul.f32 %v2237_v35, %v2237_v35 }
 0x16f   :  { %1788 = vst [vmem:[%s2592_s3 + $0x70] sm:$0xff] %v1688_v9   ;;  %v1326_v18 = vadd.f32 %v1325_v8, %v1263_v14 }
 0x170   :  { %v700_v19 = vpop.f32.mrb[60].mxu0  ;;  %1804 = vst [vmem:[%s2592_s3 + $0xf0] sm:$0xff] %v1768_v16   ;;  %v828_v22 = vpop.f32.mrb[60].mxu1 }
 0x171   :  { %v701_v23 = vadd.f32 %v2217_v10, %v700_v19  ;;  %v702_v27 = vpop.f32.mrb[61].mxu0  ;;  %v830_v28 = vpop.f32.mrb[61].mxu1  ;;  %v2467_v30 = vadd.f32 %v2217_v10, %v828_v22 }
 0x172   :  { %v703_v29 = vpop.f32.mrb[62].mxu0  ;;  %v831_v32 = vpop.f32.mrb[62].mxu1 }
 0x173   :  { %v1191_v33 = vadd.f32 %v1190_v11, %v701_v23  ;;  %v1264_v38 = vmul.f32 %v701_v23, %v701_v23  ;;  %v704_v39 = vadd.f32 %v2217_v10, %v703_v29  ;;  %v705_v44 = vpop.f32.mrb[63].mxu0  ;;  %v833_v45 = vpop.f32.mrb[63].mxu1  ;;  %v2471_v46 = vadd.f32 %v2217_v10, %v831_v32 }
 0x174   :  { %v1267_v10 = vmul.f32 %v2225_v21, %v2225_v21  ;;  %v1270_v11 = vmul.f32 %v2253_v55, %v2253_v55 }
 0x175   :  { %v1327_v47 = vadd.f32 %v1326_v18, %v1264_v38  ;;  %v1693_v48 = vpack.c.bf16 %v704_v39, %v701_v23  ;;  %v1192_v49 = vadd.f32 %v1191_v33, %v704_v39  ;;  %v1265_v51 = vmul.f32 %v704_v39, %v704_v39 }
 0x176   :  { %v1773_v52 = vpack.c.bf16 %v2471_v46, %v2467_v30 }
 0x177   :  { %1789 = vst [vmem:[%s2592_s3 + $0x78] sm:$0xff] %v1693_v48   ;;  %v1193_v56 = vadd.f32 %v1192_v49, %v2221_v15  ;;  %v1328_v60 = vadd.f32 %v1327_v47, %v1265_v51  ;;  %v1269_v15 = vmul.f32 %v2241_v42, %v2241_v42 }
 0x178   :  { %1805 = vst [vmem:[%s2592_s3 + $0xf8] sm:$0xff] %v1773_v52  }
 0x179   :  { %v1194_v61 = vadd.f32 %v1193_v56, %v2225_v21  ;;  %v1329_v63 = vadd.f32 %v1328_v60, %v1266_v53  ;;  %v1271_v21 = vmul.f32 %v2257_v62, %v2257_v62 }
 0x17b   :  { %v1195_v3 = vadd.f32 %v1194_v61, %v2237_v35  ;;  %v1330_v6 = vadd.f32 %v1329_v63, %v1267_v10  ;;  %v1272_v35 = vmul.f32 %v2269_v12, %v2269_v12  ;;  %v1282_v61 = vmul.f32 %v2355_v4, %v2355_v4 }
 0x17d   :  { %v1196_v8 = vadd.f32 %v1195_v3, %v2241_v42  ;;  %v1331_v9 = vadd.f32 %v1330_v6, %v1268_v0  ;;  %v1273_v42 = vmul.f32 %v2273_v20, %v2273_v20  ;;  %v1283_v3 = vmul.f32 %v2359_v13, %v2359_v13 }
 0x17f   :  { %v1197_v14 = vadd.f32 %v1196_v8, %v2253_v55  ;;  %v1332_v16 = vadd.f32 %v1331_v9, %v1269_v15  ;;  %v1274_v55 = vmul.f32 %v2285_v34, %v2285_v34  ;;  %v1284_v15 = vmul.f32 %v2371_v31, %v2371_v31 }
 0x180   :  { %v1285_v9 = vmul.f32 %v2375_v40, %v2375_v40 }
 0x181   :  { %v1198_v18 = vadd.f32 %v1197_v14, %v2257_v62  ;;  %v1333_v19 = vadd.f32 %v1332_v16, %v1270_v11  ;;  %v1275_v62 = vmul.f32 %v2289_v43, %v2289_v43  ;;  %v1286_v14 = vmul.f32 %v2387_v59, %v2387_v59 }
 0x183   :  { %v1199_v22 = vadd.f32 %v1198_v18, %v2269_v12  ;;  %v1334_v23 = vadd.f32 %v1333_v19, %v1271_v21  ;;  %v1276_v12 = vmul.f32 %v2301_v57, %v2301_v57  ;;  %v1287_v21 = vmul.f32 %v2391_v5, %v2391_v5 }
 0x184   :  { %v1288_v19 = vmul.f32 %v2403_v25, %v2403_v25 }
 0x185   :  { %v1200_v27 = vadd.f32 %v1199_v22, %v2273_v20  ;;  %v1335_v28 = vadd.f32 %v1334_v23, %v1272_v35  ;;  %v1277_v20 = vmul.f32 %v2305_v1, %v2305_v1  ;;  %v1289_v22 = vmul.f32 %v2407_v36, %v2407_v36 }
 0x187   :  { %v1336_v29 = vadd.f32 %v1335_v28, %v1273_v42  ;;  %v1201_v32 = vadd.f32 %v1200_v27, %v2285_v34  ;;  %v1278_v34 = vmul.f32 %v2317_v17, %v2317_v17  ;;  %v1290_v42 = vmul.f32 %v2419_v54, %v2419_v54 }
 0x188   :  { %v1291_v28 = vmul.f32 %v2423_v2, %v2423_v2 }
 0x189   :  { %v1202_v33 = vadd.f32 %v1201_v32, %v2289_v43  ;;  %v1337_v38 = vadd.f32 %v1336_v29, %v1274_v55  ;;  %v1279_v43 = vmul.f32 %v2321_v26, %v2321_v26  ;;  %v1292_v29 = vmul.f32 %v2435_v24, %v2435_v24 }
 0x18b   :  { %v1203_v39 = vadd.f32 %v1202_v33, %v2301_v57  ;;  %v1338_v44 = vadd.f32 %v1337_v38, %v1275_v62  ;;  %v1280_v57 = vmul.f32 %v2333_v41, %v2333_v41  ;;  %v1293_v62 = vmul.f32 %v2439_v37, %v2439_v37 }
 0x18c   :  { %v1294_v38 = vmul.f32 %v2451_v58, %v2451_v58 }
 0x18d   :  { %v1204_v45 = vadd.f32 %v1203_v39, %v2305_v1  ;;  %v1339_v47 = vadd.f32 %v1338_v44, %v1276_v12  ;;  %v1281_v1 = vmul.f32 %v2337_v50, %v2337_v50  ;;  %v1295_v39 = vmul.f32 %v2455_v7, %v2455_v7 }
 0x18f   :  { %v1205_v48 = vadd.f32 %v1204_v45, %v2317_v17  ;;  %v1340_v49 = vadd.f32 %v1339_v47, %v1277_v20  ;;  %v1297_v47 = vmul.f32 %v2471_v46, %v2471_v46 }
 0x191   :  { %v1206_v51 = vadd.f32 %v1205_v48, %v2321_v26  ;;  %v1341_v52 = vadd.f32 %v1340_v49, %v1278_v34 }
 0x193   :  { %v1207_v53 = vadd.f32 %v1206_v51, %v2333_v41  ;;  %v1342_v56 = vadd.f32 %v1341_v52, %v1279_v43 }
 0x195   :  { %v1208_v60 = vadd.f32 %v1207_v53, %v2337_v50  ;;  %v1343_v10 = vadd.f32 %v1342_v56, %v1280_v57 }
 0x197   :  { %v1209_v17 = vadd.f32 %v1208_v60, %v2355_v4  ;;  %v1344_v63 = vadd.f32 %v1343_v10, %v1281_v1 }
 0x199   :  { %v1345_v26 = vadd.f32 %v1344_v63, %v1282_v61  ;;  %v1210_v0 = vadd.f32 %v1209_v17, %v2359_v13 }
 0x19b   :  { %v1346_v41 = vadd.f32 %v1345_v26, %v1283_v3  ;;  %v1211_v6 = vadd.f32 %v1210_v0, %v2371_v31 }
 0x19d   :  { %v1347_v50 = vadd.f32 %v1346_v41, %v1284_v15  ;;  %v1212_v8 = vadd.f32 %v1211_v6, %v2375_v40 }
 0x19f   :  { %v1348_v4 = vadd.f32 %v1347_v50, %v1285_v9  ;;  %v1213_v11 = vadd.f32 %v1212_v8, %v2387_v59 }
 0x1a1   :  { %v1349_v16 = vadd.f32 %v1348_v4, %v1286_v14  ;;  %v1214_v13 = vadd.f32 %v1213_v11, %v2391_v5 }
 0x1a3   :  { %v1350_v18 = vadd.f32 %v1349_v16, %v1287_v21  ;;  %v1215_v31 = vadd.f32 %v1214_v13, %v2403_v25 }
 0x1a5   :  { %v1351_v35 = vadd.f32 %v1350_v18, %v1288_v19  ;;  %v1216_v40 = vadd.f32 %v1215_v31, %v2407_v36 }
 0x1a7   :  { %v1352_v23 = vadd.f32 %v1351_v35, %v1289_v22  ;;  %v1217_v59 = vadd.f32 %v1216_v40, %v2419_v54 }
 0x1a9   :  { %v1353_v27 = vadd.f32 %v1352_v23, %v1290_v42  ;;  %v1218_v5 = vadd.f32 %v1217_v59, %v2423_v2 }
 0x1ab   :  { %v1354_v55 = vadd.f32 %v1353_v27, %v1291_v28  ;;  %v1219_v25 = vadd.f32 %v1218_v5, %v2435_v24  ;;  %v1296_v24 = vmul.f32 %v2467_v30, %v2467_v30 }
 0x1ad   :  { %v1355_v32 = vadd.f32 %v1354_v55, %v1292_v29  ;;  %v1220_v36 = vadd.f32 %v1219_v25, %v2439_v37 }
 0x1af   :  { %v1356_v33 = vadd.f32 %v1355_v32, %v1293_v62  ;;  %v1221_v54 = vadd.f32 %v1220_v36, %v2451_v58 }
 0x1b1   :  { %v1357_v12 = vadd.f32 %v1356_v33, %v1294_v38  ;;  %v1222_v2 = vadd.f32 %v1221_v54, %v2455_v7 }
 0x1b3   :  { %v1358_v44 = vadd.f32 %v1357_v12, %v1295_v39  ;;  %v1223_v20 = vadd.f32 %v1222_v2, %v2467_v30  ;;  %v1161_v30 = vld [vmem:[%s2593_s4] sm:$0x1] }
 0x1b5   :  { %v1359_v45 = vadd.f32 %v1358_v44, %v1296_v24  ;;  %v1224_v37 = vadd.f32 %v1223_v20, %v2471_v46  ;;  %v1233_v46 = vld [vmem:[%s2594_s5] sm:$0x1] }
 0x1b7   :  { %v1225_v34 = vrot.slane %v1224_v37, 4  ;;  %v1360_v58 = vadd.f32 %v1359_v45, %v1297_v47 }
 0x1b9   :  { %v1226_v48 = vadd.f32 %v1225_v34, %v1224_v37  ;;  %v1361_v49 = vrot.slane %v1360_v58, 4 }
 0x1bb   :  { %v1227_v43 = vrot.slane %v1226_v48, 2  ;;  %v1362_v51 = vadd.f32 %v1361_v49, %v1360_v58 }
 0x1bd   :  { %v1228_v52 = vadd.f32 %v1227_v43, %v1226_v48  ;;  %v1363_v7 = vrot.slane %v1362_v51, 2 }
 0x1bf   :  { %v1229_v57 = vrot.slane %v1228_v52, 1  ;;  %v1364_v53 = vadd.f32 %v1363_v7, %v1362_v51 }
 0x1c1   :  { %v1230_v56 = vadd.f32 %v1229_v57, %v1228_v52  ;;  %v1365_v1 = vrot.slane %v1364_v53, 1 }
 0x1c3   :  { %v1231_v60 = vadd.f32 %v1230_v56, %v1161_v30  ;;  %v1366_v10 = vadd.f32 %v1365_v1, %v1364_v53 }
 0x1c5   :  { %1232 = vst [vmem:[%s2593_s4] sm:$0x1] %v1231_v60  ;;  %v1367_v17 = vadd.f32 %v1366_v10, %v1233_v46 }
 0x1c7   :  { %1368 = vst [vmem:[%s2594_s5] sm:$0x1] %v1367_v17 }

</bundles_post_ra>
